<compile_context>
chip_gen: v5e
topology: v5e:2x2
jax: 0.10.0
libtpu: 0.0.40
codegen_flags: <defaults>
</compile_context>

<pallas_src>
import functools

import jax
import jax.numpy as jnp
from jax.experimental import pallas as pl
from jax.experimental.pallas import tpu as pltpu

_LANES = 128
_SUBLANES = 8


def _round_up(v, m):
    return (v + m - 1) // m * m


def _cdiv(a, b):
    return (a + b - 1) // b


_VMEM_CFG = None


def _vmem_config():
    """(working-set budget, scoped vmem limit, min grid tiles) -- generation aware."""
    global _VMEM_CFG
    if _VMEM_CFG is not None:
        return _VMEM_CFG
    vmem_bytes = None
    try:
        info_fn = getattr(pltpu, "get_tpu_info", None)
        if info_fn is not None:
            vmem_bytes = getattr(info_fn(), "vmem_capacity_bytes", None)
    except Exception:
        vmem_bytes = None
    if vmem_bytes is None:
        vmem_bytes = 64 * 1024 * 1024                  # conservative (v7x-sized)
    if vmem_bytes >= 100 * 1024 * 1024:                # v5e / v6e: 128 MiB VMEM
        _VMEM_CFG = (32 * 1024 * 1024, 100 * 1024 * 1024, 2)
    else:                                              # v7x: 64 MiB VMEM, 2 TCs/chip
        _VMEM_CFG = (16 * 1024 * 1024, 48 * 1024 * 1024, 4)
    return _VMEM_CFG


def _choose_rows(per_row_bytes, fixed_bytes, m, *, cap):
    """Row-tile size (multiple of 8) under the VMEM budget; expose >= min_tiles."""
    budget, _, min_tiles = _vmem_config()
    avail = max(budget - fixed_bytes, _SUBLANES * max(per_row_bytes, 1))
    tm = avail // max(per_row_bytes, 1)
    tm = max(_SUBLANES, min(cap, tm))
    tm = (tm // _SUBLANES) * _SUBLANES
    if m >= min_tiles * _SUBLANES:                     # pipelining / megacore
        tm = min(tm, _round_up(_cdiv(m, min_tiles), _SUBLANES))
    tm = min(tm, _round_up(m, _SUBLANES))
    return max(_SUBLANES, tm)


# ----------------------------------------------------------------------------
# Pallas kernels
# ----------------------------------------------------------------------------
def _conv3x3_acc(x_ref, w_ref, b_ref, out_w):
    """9-tap im2col conv on one row tile.

    x_ref: (tm, W+2, k3p) bf16 -- the 3 vertical taps pre-stacked on channels,
                                  lane-padded to k3p (multiple of 128).
    w_ref: (3*k3p, Coutp)  bf16 -- rows ordered (kj, ki, ci).
    b_ref: (1, Coutp)      f32
    returns fp32 accumulator of shape (tm*W, Coutp).
    """
    tm = x_ref.shape[0]
    k3p = x_ref.shape[2]
    xs = jnp.concatenate([x_ref[:, j:j + out_w, :] for j in range(3)], axis=-1)
    xs = xs.reshape(tm * out_w, 3 * k3p)
    acc = jnp.dot(xs, w_ref[...], preferred_element_type=jnp.float32)
    return acc + b_ref[...]


def _conv3x3_kernel(x_ref, w_ref, b_ref, o_ref, *, out_w, slope):
    acc = _conv3x3_acc(x_ref, w_ref, b_ref, out_w)
    if slope != 0.0:
        acc = jnp.where(acc >= 0.0, acc, slope * acc)
    o_ref[...] = acc.astype(o_ref.dtype)


def _conv3x3_res_kernel(x_ref, w_ref, b_ref, r_ref, o_ref, *, out_w, slope):
    acc = _conv3x3_acc(x_ref, w_ref, b_ref, out_w)
    if slope != 0.0:
        acc = jnp.where(acc >= 0.0, acc, slope * acc)
    acc = acc + r_ref[...].astype(jnp.float32)   # fused residual (free VPU add)
    o_ref[...] = acc.astype(o_ref.dtype)


def _mm_bias_kernel(x_ref, w_ref, b_ref, o_ref):
    acc = jnp.dot(x_ref[...], w_ref[...], preferred_element_type=jnp.float32)
    o_ref[...] = (acc + b_ref[...]).astype(o_ref.dtype)


# ----------------------------------------------------------------------------
# Weight packing (done once per forward, outside the per-frame loops)
# ----------------------------------------------------------------------------
def prep_conv3x3(weight, bias):
    """torch (Cout, Cin, 3, 3) -> im2col matrix (3*k3p, Coutp) bf16 + (1, Coutp) f32."""
    cout, cin = weight.shape[0], weight.shape[1]
    coutp = _round_up(cout, _LANES)
    k3 = 3 * cin
    k3p = _round_up(k3, _LANES)
    # rows ordered (kj, ki, ci) to match the kernel's horizontal-tap concat of
    # vertically pre-stacked channels.
    w = jnp.transpose(weight, (3, 2, 1, 0)).reshape(3, k3, cout)
    w = jnp.pad(w, ((0, 0), (0, k3p - k3), (0, coutp - cout)))
    w = w.reshape(3 * k3p, coutp)
    b = jnp.pad(bias, (0, coutp - cout))
    return {"w": w.astype(jnp.bfloat16),
            "b": b.reshape(1, coutp).astype(jnp.float32),
            "cout": cout, "cin": cin, "k3p": k3p}


def prep_dense9(weight, bias):
    """torch (Cout, Cin, 3, 3) -> (9*Cin, Coutp) bf16 for the deformable conv."""
    cout, cin = weight.shape[0], weight.shape[1]
    coutp = _round_up(cout, _LANES)
    w = jnp.transpose(weight, (2, 3, 1, 0)).reshape(9 * cin, cout)
    w = jnp.pad(w, ((0, 0), (0, coutp - cout)))
    b = jnp.pad(bias, (0, coutp - cout))
    return {"w": w.astype(jnp.bfloat16),
            "b": b.reshape(1, coutp).astype(jnp.float32),
            "cout": cout}


def prepare_params(params):
    pp = {}
    for name in ("backward_1", "forward_1"):
        da = params["deform_align_" + name]
        pp["deform_align_" + name] = {
            "off0": prep_conv3x3(*da["off0"]),
            "off1": prep_conv3x3(*da["off1"]),
            "off2": prep_conv3x3(*da["off2"]),
            "off3": prep_conv3x3(*da["off3"]),
            "dcn": prep_dense9(da["weight"], da["bias"]),
        }
        bb = params["backbone_" + name]
        pp["backbone_" + name] = {"c0": prep_conv3x3(*bb["c0"]),
                                  "c1": prep_conv3x3(*bb["c1"])}
    pp["fuse_c0"] = prep_conv3x3(*params["fuse_c0"])
    pp["fuse_c1"] = prep_conv3x3(*params["fuse_c1"])
    return pp


# ----------------------------------------------------------------------------
# Conv wrappers around the Pallas kernels
# ----------------------------------------------------------------------------
def conv3x3(x, wp, slope=0.0, residual=None):
    """Conv2d(k=3, s=1, p=1) [+ LeakyReLU(slope)] [+ residual]. NHWC -> NHWC bf16."""
    n, h, w, cin = x.shape
    wk, bias, cout, k3p = wp["w"], wp["b"], wp["cout"], wp["k3p"]
    assert cin == wp["cin"]
    coutp = wk.shape[1]

    xb = x.astype(jnp.bfloat16)
    xp = jnp.pad(xb, ((0, 0), (1, 1), (1, 1), (0, 0)))
    # Pre-stack the 3 vertical taps on the channel axis and lane-pad to k3p in
    # a single concatenate (halo'd row blocks are not expressible with Blocked
    # BlockSpec indexing).
    # TODO(synk): replace with an in-kernel halo DMA (memory_space=pl.ANY +
    # make_async_copy of (tm+2)-row slabs) to cut conv input HBM traffic ~3x.
    pieces = [xp[:, 0:h], xp[:, 1:h + 1], xp[:, 2:h + 2]]
    if k3p != 3 * cin:
        pieces.append(jnp.zeros((n, h, w + 2, k3p - 3 * cin), jnp.bfloat16))
    xv = jnp.concatenate(pieces, axis=-1)
    m = n * h
    xv = xv.reshape(m, w + 2, k3p)

    per_row = ((w + 2) * k3p * 2 * 2        # input block, double-buffered bf16
               + w * 3 * k3p * 2            # in-kernel im2col concat (bf16)
               + w * coutp * 4              # fp32 accumulator
               + w * coutp * 2 * 2)         # output block, double-buffered bf16
    if residual is not None:
        per_row += w * coutp * 2 * 2        # residual block, double-buffered bf16
    fixed = 3 * k3p * coutp * 2 * 2 + coutp * 4 * 2
    tm = _choose_rows(per_row, fixed, m, cap=512)
    mp = _round_up(m, tm)
    if mp != m:
        xv = jnp.pad(xv, ((0, mp - m), (0, 0), (0, 0)))

    _, vmem_limit, _ = _vmem_config()
    in_specs = [
        pl.BlockSpec((tm, w + 2, k3p), lambda i: (i, 0, 0)),
        pl.BlockSpec((3 * k3p, coutp), lambda i: (0, 0)),
        pl.BlockSpec((1, coutp), lambda i: (0, 0)),
    ]
    args = [xv, wk, bias]
    if residual is None:
        kern = functools.partial(_conv3x3_kernel, out_w=w, slope=float(slope))
    else:
        r = residual.astype(jnp.bfloat16).reshape(m, w, cout)
        r = jnp.pad(r, ((0, mp - m), (0, 0), (0, coutp - cout)))
        args.append(r.reshape(mp * w, coutp))
        in_specs.append(pl.BlockSpec((tm * w, coutp), lambda i: (i, 0)))
        kern = functools.partial(_conv3x3_res_kernel, out_w=w, slope=float(slope))

    out = pl.pallas_call(
        kern,
        out_shape=jax.ShapeDtypeStruct((mp * w, coutp), jnp.bfloat16),
        grid=(mp // tm,),
        in_specs=in_specs,
        out_specs=pl.BlockSpec((tm * w, coutp), lambda i: (i, 0)),
        compiler_params=pltpu.CompilerParams(
            dimension_semantics=("parallel",),
            vmem_limit_bytes=vmem_limit),
    )(*args)

    out = out.reshape(mp, w, coutp)[:m].reshape(n, h, w, coutp)
    if cout != coutp:
        out = out[..., :cout]
    return out


def matmul_bias(x, wp):
    """out = x @ w + b with lane-padded Cout; x: (M, K)."""
    m, k = x.shape
    wk, bias, cout = wp["w"], wp["b"], wp["cout"]
    coutp = wk.shape[1]

    per_row = k * 2 * 2 + coutp * 4 + coutp * 2 * 2
    fixed = k * coutp * 2 * 2 + coutp * 4 * 2
    tm = _choose_rows(per_row, fixed, m, cap=2048)
    mp = _round_up(m, tm)
    xb = x.astype(jnp.bfloat16)
    if mp != m:
        xb = jnp.pad(xb, ((0, mp - m), (0, 0)))

    _, vmem_limit, _ = _vmem_config()
    out = pl.pallas_call(
        _mm_bias_kernel,
        out_shape=jax.ShapeDtypeStruct((mp, coutp), jnp.bfloat16),
        grid=(mp // tm,),
        in_specs=[pl.BlockSpec((tm, k), lambda i: (i, 0)),
                  pl.BlockSpec((k, coutp), lambda i: (0, 0)),
                  pl.BlockSpec((1, coutp), lambda i: (0, 0))],
        out_specs=pl.BlockSpec((tm, coutp), lambda i: (i, 0)),
        compiler_params=pltpu.CompilerParams(
            dimension_semantics=("parallel",),
            vmem_limit_bytes=vmem_limit),
    )(xb, wk, bias)

    out = out[:m]
    if cout != coutp:
        out = out[:, :cout]
    return out


# ----------------------------------------------------------------------------
# JAX glue: bilinear sampling (data-dependent gather)
# ----------------------------------------------------------------------------
# TODO(synk): this gather dominates wall-clock; a Pallas manual-DMA gather with
# lane-dense channel tiles (memory_space=pl.ANY + make_async_copy) is the next step.
def bilinear_gather(img, px, py, h, w):
    """img: (B, H*W, C); px/py: (B, S) f32 coords; zero padding outside. Returns f32."""
    bsz, _, c = img.shape
    s = px.shape[1]
    x0 = jnp.floor(px)
    y0 = jnp.floor(py)
    wx1 = px - x0
    wx0 = 1.0 - wx1
    wy1 = py - y0
    wy0 = 1.0 - wy1

    def corner(xi, yi):
        inb = ((xi >= 0) & (xi <= w - 1) & (yi >= 0) & (yi <= h - 1))
        xc = jnp.clip(xi, 0, w - 1).astype(jnp.int32)
        yc = jnp.clip(yi, 0, h - 1).astype(jnp.int32)
        flat = jnp.broadcast_to((yc * w + xc)[:, :, None], (bsz, s, c))
        v = jnp.take_along_axis(img, flat, axis=1).astype(jnp.float32)
        return v * inb[:, :, None].astype(jnp.float32)

    return (corner(x0, y0) * (wx0 * wy0)[:, :, None]
            + corner(x0 + 1.0, y0) * (wx1 * wy0)[:, :, None]
            + corner(x0, y0 + 1.0) * (wx0 * wy1)[:, :, None]
            + corner(x0 + 1.0, y0 + 1.0) * (wx1 * wy1)[:, :, None])


def flow_warp(x, flow):
    """x: (N, H, W, C); flow: (N, H, W, 2) with [...,0]=dx, [...,1]=dy.
    Matches grid_sample(bilinear, zeros padding, align_corners=True). Returns f32."""
    n, h, w, c = x.shape
    gy, gx = jnp.meshgrid(jnp.arange(h, dtype=jnp.float32),
                          jnp.arange(w, dtype=jnp.float32), indexing="ij")
    px = gx[None] + flow[..., 0].astype(jnp.float32)
    py = gy[None] + flow[..., 1].astype(jnp.float32)
    samp = bilinear_gather(x.reshape(n, h * w, c),
                           px.reshape(n, h * w), py.reshape(n, h * w), h, w)
    return samp.reshape(n, h, w, c)


def fb_consistency_check(flow_fw, flow_bw, alpha1=0.01, alpha2=0.5):
    """fbConsistencyCheck on NHWC flows; plain fused jnp (no HBM round trip)."""
    flow_bw_warped = flow_warp(flow_bw, flow_fw)                 # f32
    flow_fw = flow_fw.astype(jnp.float32)
    flow_diff = flow_fw + flow_bw_warped
    mag_sq = (jnp.sum(flow_fw * flow_fw, axis=-1, keepdims=True)
              + jnp.sum(flow_bw_warped * flow_bw_warped, axis=-1, keepdims=True))
    occ_thresh = alpha1 * mag_sq + alpha2
    diff_sq = jnp.sum(flow_diff * flow_diff, axis=-1, keepdims=True)
    return (diff_sq < occ_thresh).astype(jnp.float32)


# ----------------------------------------------------------------------------
# DeformableAlignment / BidirectionalPropagation (learnable=True), NHWC
# ----------------------------------------------------------------------------
def deform_conv2d(x, offset, mask, flow, wp, deform_groups):
    """Modulated deformable conv (torchvision semantics), k=3, s=1, p=1, NHWC.
    `offset` is the raw tanh-scaled residual; `flow` (dx, dy) is added by
    broadcast instead of materializing its 9*g-fold tile."""
    n, h, w, c = x.shape
    g = deform_groups
    cg = c // g
    off = offset.reshape(n, h, w, g, 9, 2)
    # torchvision layout: per (group, tap) -> (dy, dx); flow channels are (dx, dy)
    off_y = off[..., 0] + flow[..., 1].astype(jnp.float32)[..., None, None]
    off_x = off[..., 1] + flow[..., 0].astype(jnp.float32)[..., None, None]
    mm = mask.reshape(n, h, w, g, 9)

    ys = jnp.arange(h, dtype=jnp.float32)
    xs = jnp.arange(w, dtype=jnp.float32)
    ki = jnp.arange(3, dtype=jnp.float32)
    tap_y = jnp.repeat(ki, 3) - 1.0       # [-1,-1,-1, 0,0,0, 1,1,1]
    tap_x = jnp.tile(ki, 3) - 1.0         # [-1, 0, 1,-1,0,1,-1,0,1]
    py = ys[None, :, None, None, None] + tap_y[None, None, None, None, :] + off_y
    px = xs[None, None, :, None, None] + tap_x[None, None, None, None, :] + off_x

    img = x.reshape(n, h * w, g, cg).transpose(0, 2, 1, 3).reshape(n * g, h * w, cg)
    px_r = px.transpose(0, 3, 4, 1, 2).reshape(n * g, 9 * h * w)
    py_r = py.transpose(0, 3, 4, 1, 2).reshape(n * g, 9 * h * w)
    samp = bilinear_gather(img, px_r, py_r, h, w)          # (n*g, 9*h*w, cg) f32
    samp = samp.reshape(n, g, 9, h, w, cg)
    samp = samp * mm.transpose(0, 3, 4, 1, 2)[..., None]   # fp32 modulation
    # col[m, k*C + (g*cg + ci)] matches w2[k*Cin + ci, co]
    col = samp.transpose(0, 3, 4, 2, 1, 5).reshape(n * h * w, 9 * c)

    out = matmul_bias(col.astype(jnp.bfloat16), wp)
    return out.reshape(n, h, w, wp["cout"])


def deformable_alignment(da, x, cond, flow, deform_groups=16,
                         max_residue_magnitude=3.0):
    out = conv3x3(cond, da["off0"], slope=0.1)
    out = conv3x3(out, da["off1"], slope=0.1)
    out = conv3x3(out, da["off2"], slope=0.1)
    out = conv3x3(out, da["off3"], slope=0.0)
    o1, o2, m = jnp.split(out, 3, axis=-1)
    offset = max_residue_magnitude * jnp.tanh(
        jnp.concatenate([o1, o2], axis=-1).astype(jnp.float32))
    m = jax.nn.sigmoid(m.astype(jnp.float32))
    return deform_conv2d(x, offset, m, flow, da["dcn"], deform_groups)


def bidirectional_propagation(params, x, flows_forward, flows_backward, mask):
    b, t, c, h, w = x.shape
    pp = prepare_params(params)                    # weight packing: done once

    # channels-last working layout, bf16 activations (fp32 flows / accumulation)
    x_nhwc = jnp.transpose(x, (0, 1, 3, 4, 2)).astype(jnp.bfloat16)
    mask_nhwc = jnp.transpose(mask, (0, 1, 3, 4, 2)).astype(jnp.bfloat16)
    ffw = jnp.transpose(flows_forward, (0, 1, 3, 4, 2)).astype(jnp.float32)
    fbw = jnp.transpose(flows_backward, (0, 1, 3, 4, 2)).astype(jnp.float32)

    feats = {"input": [x_nhwc[:, i] for i in range(t)]}
    masks = {"input": [mask_nhwc[:, i] for i in range(t)]}
    prop_list = ["backward_1", "forward_1"]
    cache_list = ["input"] + prop_list

    for p_i, module_name in enumerate(prop_list):
        feats[module_name] = []
        masks[module_name] = []
        if "backward" in module_name:
            frame_idx = list(range(t))[::-1]
            flow_idx = frame_idx
            flows_for_prop = ffw
            flows_for_check = fbw
        else:
            frame_idx = list(range(t))
            flow_idx = list(range(-1, t - 1))
            flows_for_prop = fbw
            flows_for_check = ffw

        for i, idx in enumerate(frame_idx):
            feat_current = feats[cache_list[p_i]][idx]
            mask_current = masks[cache_list[p_i]][idx]
            if i == 0:
                feat_prop = feat_current
            else:
                flow_prop = flows_for_prop[:, flow_idx[i]]
                flow_check = flows_for_check[:, flow_idx[i]]
                flow_valid_mask = fb_consistency_check(flow_prop, flow_check)
                feat_warped = flow_warp(feat_prop, flow_prop)
                cond = jnp.concatenate(
                    [feat_current, feat_warped.astype(jnp.bfloat16),
                     flow_prop.astype(jnp.bfloat16),
                     flow_valid_mask.astype(jnp.bfloat16),
                     mask_current], axis=-1)
                feat_prop = deformable_alignment(
                    pp["deform_align_" + module_name], feat_prop, cond, flow_prop)
            # learnable backbone refinement; residual fused into the c1 conv
            feat = jnp.concatenate([feat_current, feat_prop, mask_current], axis=-1)
            bb = pp["backbone_" + module_name]
            r = conv3x3(feat, bb["c0"], slope=0.2)
            feat_prop = conv3x3(r, bb["c1"], slope=0.0, residual=feat_prop)

            feats[module_name].append(feat_prop)
            masks[module_name].append(mask_current)

        if "backward" in module_name:
            feats[module_name] = feats[module_name][::-1]
            masks[module_name] = masks[module_name][::-1]

    outputs_b = jnp.stack(feats["backward_1"], axis=1).reshape(b * t, h, w, c)
    outputs_f = jnp.stack(feats["forward_1"], axis=1).reshape(b * t, h, w, c)
    mask_in = mask_nhwc.reshape(b * t, h, w, 2)
    fuse_in = jnp.concatenate([outputs_b, outputs_f, mask_in], axis=-1)
    fo = conv3x3(fuse_in, pp["fuse_c0"], slope=0.2)
    outputs = conv3x3(fo, pp["fuse_c1"], slope=0.0,
                      residual=x_nhwc.reshape(b * t, h, w, c))

    def to_nchw(a):
        return jnp.transpose(a.reshape(b, t, h, w, c),
                             (0, 1, 4, 2, 3)).astype(jnp.float32)

    return (to_nchw(outputs_b), to_nchw(outputs_f), to_nchw(outputs),
            None)   # masks_f is None when learnable=True


# ----------------------------------------------------------------------------
# Deterministic parameter init (shapes per the module's __init__, torch layout)
# ----------------------------------------------------------------------------
def conv_params(key, cin, cout, k=3, scale=0.05, zero=False):
    if zero:
        return (jnp.zeros((cout, cin, k, k), jnp.float32),
                jnp.zeros((cout,), jnp.float32))
    kw, kb = jax.random.split(key)
    w = jax.random.normal(kw, (cout, cin, k, k), jnp.float32) * scale
    b = jax.random.normal(kb, (cout,), jnp.float32) * scale
    return w, b


def init_params(key, channel, deform_groups=16):
    keys = list(jax.random.split(key, 32))
    it = iter(keys)
    params = {}
    for name in ("backward_1", "forward_1"):
        da = {}
        da["weight"], da["bias"] = conv_params(next(it), channel, channel)
        cin0 = 2 * channel + 2 + 1 + 2
        da["off0"] = conv_params(next(it), cin0, channel)
        da["off1"] = conv_params(next(it), channel, channel)
        da["off2"] = conv_params(next(it), channel, channel)
        # init_offset(): last conv_offset layer zero-initialised
        da["off3"] = conv_params(next(it), channel, 27 * deform_groups, zero=True)
        params["deform_align_" + name] = da
        bb = {"c0": conv_params(next(it), 2 * channel + 2, channel),
              "c1": conv_params(next(it), channel, channel)}
        params["backbone_" + name] = bb
    params["fuse_c0"] = conv_params(next(it), 2 * channel + 2, channel)
    params["fuse_c1"] = conv_params(next(it), channel, channel)
    return params


# ----------------------------------------------------------------------------
if __name__ == "__main__":
    b, t, c, h, w = 2, 4, 16, 16, 16  # channel must be divisible by deform_groups=16

    key = jax.random.PRNGKey(0)
    k_p, k_x, k_ff, k_fb, k_m = jax.random.split(key, 5)
    params = init_params(k_p, c)

    x = jax.random.normal(k_x, (b, t, c, h, w), jnp.float32)
    flows_forward = jax.random.normal(k_ff, (b, t - 1, 2, h, w), jnp.float32) * 1.5
    flows_backward = jax.random.normal(k_fb, (b, t - 1, 2, h, w), jnp.float32) * 1.5
    mask = (jax.random.uniform(k_m, (b, t, 2, h, w)) > 0.5).astype(jnp.float32)

    fwd = jax.jit(bidirectional_propagation)
    outputs_b, outputs_f, outputs, masks_f = fwd(params, x, flows_forward,
                                                 flows_backward, mask)
    jax.block_until_ready((outputs_b, outputs_f, outputs))

    assert outputs_b.shape == (b, t, c, h, w)
    assert outputs_f.shape == (b, t, c, h, w)
    assert outputs.shape == (b, t, c, h, w)
    assert masks_f is None
    print("KERNEL_OK")
</pallas_src>

<mosaic_0001>
module attributes {stable_mosaic.version = 11 : i64} {
  func.func @_conv3x3_kernel(%arg0: i32, %arg1: memref<8x18x128xbf16, #tpu.memory_space<vmem>>, %arg2: memref<384x128xbf16, #tpu.memory_space<vmem>>, %arg3: memref<1x128xf32, #tpu.memory_space<vmem>>, %arg4: memref<128x128xbf16, #tpu.memory_space<vmem>>) attributes {dimension_semantics = [#tpu.dimension_semantics<parallel>], iteration_bounds = array<i64: 4>, scalar_prefetch = 0 : i64, scratch_operands = 0 : i64, tpu.core_type = #tpu.core_type<tc>, window_params = [{transform_indices = @transform_0, window_bounds = array<i64: 8, 18, 128>}, {pipeline_mode = #tpu.pipeline_mode<synchronous>, transform_indices = @transform_1, window_bounds = array<i64: 384, 128>}, {pipeline_mode = #tpu.pipeline_mode<synchronous>, transform_indices = @transform_2, window_bounds = array<i64: 1, 128>}, {transform_indices = @transform_3, window_bounds = array<i64: 128, 128>}]} {
    %c0 = arith.constant 0 : index
    %c0_0 = arith.constant 0 : index
    %c0_1 = arith.constant 0 : index
    %0 = vector.load %arg1[%c0, %c0_0, %c0_1] : memref<8x18x128xbf16, #tpu.memory_space<vmem>>, vector<8x16x128xbf16>
    %c0_2 = arith.constant 0 : index
    %c1 = arith.constant 1 : index
    %c0_3 = arith.constant 0 : index
    %1 = vector.load %arg1[%c0_2, %c1, %c0_3] : memref<8x18x128xbf16, #tpu.memory_space<vmem>>, vector<8x16x128xbf16>
    %c0_4 = arith.constant 0 : index
    %c2 = arith.constant 2 : index
    %c0_5 = arith.constant 0 : index
    %2 = vector.load %arg1[%c0_4, %c2, %c0_5] : memref<8x18x128xbf16, #tpu.memory_space<vmem>>, vector<8x16x128xbf16>
    %3 = tpu.concatenate %0, %1, %2 in 2 : vector<8x16x128xbf16>, vector<8x16x128xbf16>, vector<8x16x128xbf16> -> vector<8x16x384xbf16>
    %4 = vector.shape_cast %3 : vector<8x16x384xbf16> to vector<128x384xbf16>
    %c0_6 = arith.constant 0 : index
    %c0_7 = arith.constant 0 : index
    %5 = vector.load %arg2[%c0_6, %c0_7] : memref<384x128xbf16, #tpu.memory_space<vmem>>, vector<384x128xbf16>
    %cst = arith.constant dense<0.000000e+00> : vector<128x128xf32>
    %6 = tpu.matmul %4, %5, %cst {dimension_numbers = #tpu.dot_dimension_numbers<[1], [0], [0], [1], [0, 0, 1, 1], [], []>} : vector<128x384xbf16>, vector<384x128xbf16>, vector<128x128xf32> -> vector<128x128xf32>
    %c0_8 = arith.constant 0 : index
    %c0_9 = arith.constant 0 : index
    %7 = vector.load %arg3[%c0_8, %c0_9] : memref<1x128xf32, #tpu.memory_space<vmem>>, vector<1x128xf32>
    %8 = vector.broadcast %7 : vector<1x128xf32> to vector<128x128xf32>
    %9 = arith.addf %6, %8 : vector<128x128xf32>
    %cst_10 = arith.constant 0.000000e+00 : f32
    %10 = vector.broadcast %cst_10 : f32 to vector<128x128xf32>
    %11 = arith.cmpf oge, %9, %10 : vector<128x128xf32>
    %cst_11 = arith.constant 2.000000e-01 : f32
    %12 = vector.broadcast %cst_11 : f32 to vector<128x128xf32>
    %13 = arith.mulf %12, %9 : vector<128x128xf32>
    %14 = arith.select %11, %9, %13 : vector<128x128xi1>, vector<128x128xf32>
    %15 = arith.truncf %14 : vector<128x128xf32> to vector<128x128xbf16>
    %c0_12 = arith.constant 0 : index
    %c0_13 = arith.constant 0 : index
    %16 = vector.load %arg4[%c0_12, %c0_13] : memref<128x128xbf16, #tpu.memory_space<vmem>>, vector<128x128xbf16>
    tpu.vector_store %arg4[%c0_12, %c0_13], %15 {strides = array<i32>} : memref<128x128xbf16, #tpu.memory_space<vmem>>, vector<128x128xbf16>,
    return
  }
  func.func @transform_0(%arg0: i32) -> (i32, i32, i32) {
    %c0_i32 = arith.constant 0 : i32
    %c0_i32_0 = arith.constant 0 : i32
    %c0_i32_1 = arith.constant 0 : i32
    return %arg0, %c0_i32, %c0_i32_0 : i32, i32, i32
  }
  func.func @transform_1(%arg0: i32) -> (i32, i32) {
    %c0_i32 = arith.constant 0 : i32
    %c0_i32_0 = arith.constant 0 : i32
    %c0_i32_1 = arith.constant 0 : i32
    return %c0_i32, %c0_i32_0 : i32, i32
  }
  func.func @transform_2(%arg0: i32) -> (i32, i32) {
    %c0_i32 = arith.constant 0 : i32
    %c0_i32_0 = arith.constant 0 : i32
    %c0_i32_1 = arith.constant 0 : i32
    return %c0_i32, %c0_i32_0 : i32, i32
  }
  func.func @transform_3(%arg0: i32) -> (i32, i32) {
    %c0_i32 = arith.constant 0 : i32
    %c0_i32_0 = arith.constant 0 : i32
    return %arg0, %c0_i32 : i32, i32
  }
}

module attributes {stable_mosaic.version = 11 : i64} {
  func.func @_conv3x3_res_kernel(%arg0: i32, %arg1: memref<8x18x128xbf16, #tpu.memory_space<vmem>>, %arg2: memref<384x128xbf16, #tpu.memory_space<vmem>>, %arg3: memref<1x128xf32, #tpu.memory_space<vmem>>, %arg4: memref<128x128xbf16, #tpu.memory_space<vmem>>, %arg5: memref<128x128xbf16, #tpu.memory_space<vmem>>) attributes {dimension_semantics = [#tpu.dimension_semantics<parallel>], iteration_bounds = array<i64: 4>, scalar_prefetch = 0 : i64, scratch_operands = 0 : i64, tpu.core_type = #tpu.core_type<tc>, window_params = [{transform_indices = @transform_0, window_bounds = array<i64: 8, 18, 128>}, {pipeline_mode = #tpu.pipeline_mode<synchronous>, transform_indices = @transform_1, window_bounds = array<i64: 384, 128>}, {pipeline_mode = #tpu.pipeline_mode<synchronous>, transform_indices = @transform_2, window_bounds = array<i64: 1, 128>}, {transform_indices = @transform_3, window_bounds = array<i64: 128, 128>}, {transform_indices = @transform_4, window_bounds = array<i64: 128, 128>}]} {
    %c0 = arith.constant 0 : index
    %c0_0 = arith.constant 0 : index
    %c0_1 = arith.constant 0 : index
    %0 = vector.load %arg1[%c0, %c0_0, %c0_1] : memref<8x18x128xbf16, #tpu.memory_space<vmem>>, vector<8x16x128xbf16>
    %c0_2 = arith.constant 0 : index
    %c1 = arith.constant 1 : index
    %c0_3 = arith.constant 0 : index
    %1 = vector.load %arg1[%c0_2, %c1, %c0_3] : memref<8x18x128xbf16, #tpu.memory_space<vmem>>, vector<8x16x128xbf16>
    %c0_4 = arith.constant 0 : index
    %c2 = arith.constant 2 : index
    %c0_5 = arith.constant 0 : index
    %2 = vector.load %arg1[%c0_4, %c2, %c0_5] : memref<8x18x128xbf16, #tpu.memory_space<vmem>>, vector<8x16x128xbf16>
    %3 = tpu.concatenate %0, %1, %2 in 2 : vector<8x16x128xbf16>, vector<8x16x128xbf16>, vector<8x16x128xbf16> -> vector<8x16x384xbf16>
    %4 = vector.shape_cast %3 : vector<8x16x384xbf16> to vector<128x384xbf16>
    %c0_6 = arith.constant 0 : index
    %c0_7 = arith.constant 0 : index
    %5 = vector.load %arg2[%c0_6, %c0_7] : memref<384x128xbf16, #tpu.memory_space<vmem>>, vector<384x128xbf16>
    %cst = arith.constant dense<0.000000e+00> : vector<128x128xf32>
    %6 = tpu.matmul %4, %5, %cst {dimension_numbers = #tpu.dot_dimension_numbers<[1], [0], [0], [1], [0, 0, 1, 1], [], []>} : vector<128x384xbf16>, vector<384x128xbf16>, vector<128x128xf32> -> vector<128x128xf32>
    %c0_8 = arith.constant 0 : index
    %c0_9 = arith.constant 0 : index
    %7 = vector.load %arg3[%c0_8, %c0_9] : memref<1x128xf32, #tpu.memory_space<vmem>>, vector<1x128xf32>
    %8 = vector.broadcast %7 : vector<1x128xf32> to vector<128x128xf32>
    %9 = arith.addf %6, %8 : vector<128x128xf32>
    %c0_10 = arith.constant 0 : index
    %c0_11 = arith.constant 0 : index
    %10 = vector.load %arg4[%c0_10, %c0_11] : memref<128x128xbf16, #tpu.memory_space<vmem>>, vector<128x128xbf16>
    %11 = arith.extf %10 : vector<128x128xbf16> to vector<128x128xf32>
    %12 = arith.addf %9, %11 : vector<128x128xf32>
    %13 = arith.truncf %12 : vector<128x128xf32> to vector<128x128xbf16>
    %c0_12 = arith.constant 0 : index
    %c0_13 = arith.constant 0 : index
    %14 = vector.load %arg5[%c0_12, %c0_13] : memref<128x128xbf16, #tpu.memory_space<vmem>>, vector<128x128xbf16>
    tpu.vector_store %arg5[%c0_12, %c0_13], %13 {strides = array<i32>} : memref<128x128xbf16, #tpu.memory_space<vmem>>, vector<128x128xbf16>,
    return
  }
  func.func @transform_0(%arg0: i32) -> (i32, i32, i32) {
    %c0_i32 = arith.constant 0 : i32
    %c0_i32_0 = arith.constant 0 : i32
    %c0_i32_1 = arith.constant 0 : i32
    return %arg0, %c0_i32, %c0_i32_0 : i32, i32, i32
  }
  func.func @transform_1(%arg0: i32) -> (i32, i32) {
    %c0_i32 = arith.constant 0 : i32
    %c0_i32_0 = arith.constant 0 : i32
    %c0_i32_1 = arith.constant 0 : i32
    return %c0_i32, %c0_i32_0 : i32, i32
  }
  func.func @transform_2(%arg0: i32) -> (i32, i32) {
    %c0_i32 = arith.constant 0 : i32
    %c0_i32_0 = arith.constant 0 : i32
    %c0_i32_1 = arith.constant 0 : i32
    return %c0_i32, %c0_i32_0 : i32, i32
  }
  func.func @transform_3(%arg0: i32) -> (i32, i32) {
    %c0_i32 = arith.constant 0 : i32
    %c0_i32_0 = arith.constant 0 : i32
    return %arg0, %c0_i32 : i32, i32
  }
  func.func @transform_4(%arg0: i32) -> (i32, i32) {
    %c0_i32 = arith.constant 0 : i32
    %c0_i32_0 = arith.constant 0 : i32
    return %arg0, %c0_i32 : i32, i32
  }
}

module attributes {stable_mosaic.version = 11 : i64} {
  func.func @_conv3x3_kernel(%arg0: i32, %arg1: memref<8x18x128xbf16, #tpu.memory_space<vmem>>, %arg2: memref<384x128xbf16, #tpu.memory_space<vmem>>, %arg3: memref<1x128xf32, #tpu.memory_space<vmem>>, %arg4: memref<128x128xbf16, #tpu.memory_space<vmem>>) attributes {dimension_semantics = [#tpu.dimension_semantics<parallel>], iteration_bounds = array<i64: 4>, scalar_prefetch = 0 : i64, scratch_operands = 0 : i64, tpu.core_type = #tpu.core_type<tc>, window_params = [{transform_indices = @transform_0, window_bounds = array<i64: 8, 18, 128>}, {pipeline_mode = #tpu.pipeline_mode<synchronous>, transform_indices = @transform_1, window_bounds = array<i64: 384, 128>}, {pipeline_mode = #tpu.pipeline_mode<synchronous>, transform_indices = @transform_2, window_bounds = array<i64: 1, 128>}, {transform_indices = @transform_3, window_bounds = array<i64: 128, 128>}]} {
    %c0 = arith.constant 0 : index
    %c0_0 = arith.constant 0 : index
    %c0_1 = arith.constant 0 : index
    %0 = vector.load %arg1[%c0, %c0_0, %c0_1] : memref<8x18x128xbf16, #tpu.memory_space<vmem>>, vector<8x16x128xbf16>
    %c0_2 = arith.constant 0 : index
    %c1 = arith.constant 1 : index
    %c0_3 = arith.constant 0 : index
    %1 = vector.load %arg1[%c0_2, %c1, %c0_3] : memref<8x18x128xbf16, #tpu.memory_space<vmem>>, vector<8x16x128xbf16>
    %c0_4 = arith.constant 0 : index
    %c2 = arith.constant 2 : index
    %c0_5 = arith.constant 0 : index
    %2 = vector.load %arg1[%c0_4, %c2, %c0_5] : memref<8x18x128xbf16, #tpu.memory_space<vmem>>, vector<8x16x128xbf16>
    %3 = tpu.concatenate %0, %1, %2 in 2 : vector<8x16x128xbf16>, vector<8x16x128xbf16>, vector<8x16x128xbf16> -> vector<8x16x384xbf16>
    %4 = vector.shape_cast %3 : vector<8x16x384xbf16> to vector<128x384xbf16>
    %c0_6 = arith.constant 0 : index
    %c0_7 = arith.constant 0 : index
    %5 = vector.load %arg2[%c0_6, %c0_7] : memref<384x128xbf16, #tpu.memory_space<vmem>>, vector<384x128xbf16>
    %cst = arith.constant dense<0.000000e+00> : vector<128x128xf32>
    %6 = tpu.matmul %4, %5, %cst {dimension_numbers = #tpu.dot_dimension_numbers<[1], [0], [0], [1], [0, 0, 1, 1], [], []>} : vector<128x384xbf16>, vector<384x128xbf16>, vector<128x128xf32> -> vector<128x128xf32>
    %c0_8 = arith.constant 0 : index
    %c0_9 = arith.constant 0 : index
    %7 = vector.load %arg3[%c0_8, %c0_9] : memref<1x128xf32, #tpu.memory_space<vmem>>, vector<1x128xf32>
    %8 = vector.broadcast %7 : vector<1x128xf32> to vector<128x128xf32>
    %9 = arith.addf %6, %8 : vector<128x128xf32>
    %cst_10 = arith.constant 0.000000e+00 : f32
    %10 = vector.broadcast %cst_10 : f32 to vector<128x128xf32>
    %11 = arith.cmpf oge, %9, %10 : vector<128x128xf32>
    %cst_11 = arith.constant 1.000000e-01 : f32
    %12 = vector.broadcast %cst_11 : f32 to vector<128x128xf32>
    %13 = arith.mulf %12, %9 : vector<128x128xf32>
    %14 = arith.select %11, %9, %13 : vector<128x128xi1>, vector<128x128xf32>
    %15 = arith.truncf %14 : vector<128x128xf32> to vector<128x128xbf16>
    %c0_12 = arith.constant 0 : index
    %c0_13 = arith.constant 0 : index
    %16 = vector.load %arg4[%c0_12, %c0_13] : memref<128x128xbf16, #tpu.memory_space<vmem>>, vector<128x128xbf16>
    tpu.vector_store %arg4[%c0_12, %c0_13], %15 {strides = array<i32>} : memref<128x128xbf16, #tpu.memory_space<vmem>>, vector<128x128xbf16>,
    return
  }
  func.func @transform_0(%arg0: i32) -> (i32, i32, i32) {
    %c0_i32 = arith.constant 0 : i32
    %c0_i32_0 = arith.constant 0 : i32
    %c0_i32_1 = arith.constant 0 : i32
    return %arg0, %c0_i32, %c0_i32_0 : i32, i32, i32
  }
  func.func @transform_1(%arg0: i32) -> (i32, i32) {
    %c0_i32 = arith.constant 0 : i32
    %c0_i32_0 = arith.constant 0 : i32
    %c0_i32_1 = arith.constant 0 : i32
    return %c0_i32, %c0_i32_0 : i32, i32
  }
  func.func @transform_2(%arg0: i32) -> (i32, i32) {
    %c0_i32 = arith.constant 0 : i32
    %c0_i32_0 = arith.constant 0 : i32
    %c0_i32_1 = arith.constant 0 : i32
    return %c0_i32, %c0_i32_0 : i32, i32
  }
  func.func @transform_3(%arg0: i32) -> (i32, i32) {
    %c0_i32 = arith.constant 0 : i32
    %c0_i32_0 = arith.constant 0 : i32
    return %arg0, %c0_i32 : i32, i32
  }
}

module attributes {stable_mosaic.version = 11 : i64} {
  func.func @_conv3x3_kernel(%arg0: i32, %arg1: memref<8x18x128xbf16, #tpu.memory_space<vmem>>, %arg2: memref<384x512xbf16, #tpu.memory_space<vmem>>, %arg3: memref<1x512xf32, #tpu.memory_space<vmem>>, %arg4: memref<128x512xbf16, #tpu.memory_space<vmem>>) attributes {dimension_semantics = [#tpu.dimension_semantics<parallel>], iteration_bounds = array<i64: 4>, scalar_prefetch = 0 : i64, scratch_operands = 0 : i64, tpu.core_type = #tpu.core_type<tc>, window_params = [{transform_indices = @transform_0, window_bounds = array<i64: 8, 18, 128>}, {pipeline_mode = #tpu.pipeline_mode<synchronous>, transform_indices = @transform_1, window_bounds = array<i64: 384, 512>}, {pipeline_mode = #tpu.pipeline_mode<synchronous>, transform_indices = @transform_2, window_bounds = array<i64: 1, 512>}, {transform_indices = @transform_3, window_bounds = array<i64: 128, 512>}]} {
    %c0 = arith.constant 0 : index
    %c0_0 = arith.constant 0 : index
    %c0_1 = arith.constant 0 : index
    %0 = vector.load %arg1[%c0, %c0_0, %c0_1] : memref<8x18x128xbf16, #tpu.memory_space<vmem>>, vector<8x16x128xbf16>
    %c0_2 = arith.constant 0 : index
    %c1 = arith.constant 1 : index
    %c0_3 = arith.constant 0 : index
    %1 = vector.load %arg1[%c0_2, %c1, %c0_3] : memref<8x18x128xbf16, #tpu.memory_space<vmem>>, vector<8x16x128xbf16>
    %c0_4 = arith.constant 0 : index
    %c2 = arith.constant 2 : index
    %c0_5 = arith.constant 0 : index
    %2 = vector.load %arg1[%c0_4, %c2, %c0_5] : memref<8x18x128xbf16, #tpu.memory_space<vmem>>, vector<8x16x128xbf16>
    %3 = tpu.concatenate %0, %1, %2 in 2 : vector<8x16x128xbf16>, vector<8x16x128xbf16>, vector<8x16x128xbf16> -> vector<8x16x384xbf16>
    %4 = vector.shape_cast %3 : vector<8x16x384xbf16> to vector<128x384xbf16>
    %c0_6 = arith.constant 0 : index
    %c0_7 = arith.constant 0 : index
    %5 = vector.load %arg2[%c0_6, %c0_7] : memref<384x512xbf16, #tpu.memory_space<vmem>>, vector<384x512xbf16>
    %cst = arith.constant dense<0.000000e+00> : vector<128x512xf32>
    %6 = tpu.matmul %4, %5, %cst {dimension_numbers = #tpu.dot_dimension_numbers<[1], [0], [0], [1], [0, 0, 1, 1], [], []>} : vector<128x384xbf16>, vector<384x512xbf16>, vector<128x512xf32> -> vector<128x512xf32>
    %c0_8 = arith.constant 0 : index
    %c0_9 = arith.constant 0 : index
    %7 = vector.load %arg3[%c0_8, %c0_9] : memref<1x512xf32, #tpu.memory_space<vmem>>, vector<1x512xf32>
    %8 = vector.broadcast %7 : vector<1x512xf32> to vector<128x512xf32>
    %9 = arith.addf %6, %8 : vector<128x512xf32>
    %10 = arith.truncf %9 : vector<128x512xf32> to vector<128x512xbf16>
    %c0_10 = arith.constant 0 : index
    %c0_11 = arith.constant 0 : index
    %11 = vector.load %arg4[%c0_10, %c0_11] : memref<128x512xbf16, #tpu.memory_space<vmem>>, vector<128x512xbf16>
    tpu.vector_store %arg4[%c0_10, %c0_11], %10 {strides = array<i32>} : memref<128x512xbf16, #tpu.memory_space<vmem>>, vector<128x512xbf16>,
    return
  }
  func.func @transform_0(%arg0: i32) -> (i32, i32, i32) {
    %c0_i32 = arith.constant 0 : i32
    %c0_i32_0 = arith.constant 0 : i32
    %c0_i32_1 = arith.constant 0 : i32
    return %arg0, %c0_i32, %c0_i32_0 : i32, i32, i32
  }
  func.func @transform_1(%arg0: i32) -> (i32, i32) {
    %c0_i32 = arith.constant 0 : i32
    %c0_i32_0 = arith.constant 0 : i32
    %c0_i32_1 = arith.constant 0 : i32
    return %c0_i32, %c0_i32_0 : i32, i32
  }
  func.func @transform_2(%arg0: i32) -> (i32, i32) {
    %c0_i32 = arith.constant 0 : i32
    %c0_i32_0 = arith.constant 0 : i32
    %c0_i32_1 = arith.constant 0 : i32
    return %c0_i32, %c0_i32_0 : i32, i32
  }
  func.func @transform_3(%arg0: i32) -> (i32, i32) {
    %c0_i32 = arith.constant 0 : i32
    %c0_i32_0 = arith.constant 0 : i32
    return %arg0, %c0_i32 : i32, i32
  }
}

module attributes {stable_mosaic.version = 11 : i64} {
  func.func @_mm_bias_kernel(%arg0: i32, %arg1: memref<128x144xbf16, #tpu.memory_space<vmem>>, %arg2: memref<144x128xbf16, #tpu.memory_space<vmem>>, %arg3: memref<1x128xf32, #tpu.memory_space<vmem>>, %arg4: memref<128x128xbf16, #tpu.memory_space<vmem>>) attributes {dimension_semantics = [#tpu.dimension_semantics<parallel>], iteration_bounds = array<i64: 4>, scalar_prefetch = 0 : i64, scratch_operands = 0 : i64, tpu.core_type = #tpu.core_type<tc>, window_params = [{transform_indices = @transform_0, window_bounds = array<i64: 128, 144>}, {pipeline_mode = #tpu.pipeline_mode<synchronous>, transform_indices = @transform_1, window_bounds = array<i64: 144, 128>}, {pipeline_mode = #tpu.pipeline_mode<synchronous>, transform_indices = @transform_2, window_bounds = array<i64: 1, 128>}, {transform_indices = @transform_3, window_bounds = array<i64: 128, 128>}]} {
    %c0 = arith.constant 0 : index
    %c0_0 = arith.constant 0 : index
    %0 = vector.load %arg1[%c0, %c0_0] : memref<128x144xbf16, #tpu.memory_space<vmem>>, vector<128x144xbf16>
    %c0_1 = arith.constant 0 : index
    %c0_2 = arith.constant 0 : index
    %1 = vector.load %arg2[%c0_1, %c0_2] : memref<144x128xbf16, #tpu.memory_space<vmem>>, vector<144x128xbf16>
    %cst = arith.constant dense<0.000000e+00> : vector<128x128xf32>
    %2 = tpu.matmul %0, %1, %cst {dimension_numbers = #tpu.dot_dimension_numbers<[1], [0], [0], [1], [0, 0, 1, 1], [], []>} : vector<128x144xbf16>, vector<144x128xbf16>, vector<128x128xf32> -> vector<128x128xf32>
    %c0_3 = arith.constant 0 : index
    %c0_4 = arith.constant 0 : index
    %3 = vector.load %arg3[%c0_3, %c0_4] : memref<1x128xf32, #tpu.memory_space<vmem>>, vector<1x128xf32>
    %4 = vector.broadcast %3 : vector<1x128xf32> to vector<128x128xf32>
    %5 = arith.addf %2, %4 : vector<128x128xf32>
    %6 = arith.truncf %5 : vector<128x128xf32> to vector<128x128xbf16>
    %c0_5 = arith.constant 0 : index
    %c0_6 = arith.constant 0 : index
    %7 = vector.load %arg4[%c0_5, %c0_6] : memref<128x128xbf16, #tpu.memory_space<vmem>>, vector<128x128xbf16>
    tpu.vector_store %arg4[%c0_5, %c0_6], %6 {strides = array<i32>} : memref<128x128xbf16, #tpu.memory_space<vmem>>, vector<128x128xbf16>,
    return
  }
  func.func @transform_0(%arg0: i32) -> (i32, i32) {
    %c0_i32 = arith.constant 0 : i32
    %c0_i32_0 = arith.constant 0 : i32
    return %arg0, %c0_i32 : i32, i32
  }
  func.func @transform_1(%arg0: i32) -> (i32, i32) {
    %c0_i32 = arith.constant 0 : i32
    %c0_i32_0 = arith.constant 0 : i32
    %c0_i32_1 = arith.constant 0 : i32
    return %c0_i32, %c0_i32_0 : i32, i32
  }
  func.func @transform_2(%arg0: i32) -> (i32, i32) {
    %c0_i32 = arith.constant 0 : i32
    %c0_i32_0 = arith.constant 0 : i32
    %c0_i32_1 = arith.constant 0 : i32
    return %c0_i32, %c0_i32_0 : i32, i32
  }
  func.func @transform_3(%arg0: i32) -> (i32, i32) {
    %c0_i32 = arith.constant 0 : i32
    %c0_i32_0 = arith.constant 0 : i32
    return %arg0, %c0_i32 : i32, i32
  }
}

module attributes {stable_mosaic.version = 11 : i64} {
  func.func @_conv3x3_kernel(%arg0: i32, %arg1: memref<32x18x128xbf16, #tpu.memory_space<vmem>>, %arg2: memref<384x128xbf16, #tpu.memory_space<vmem>>, %arg3: memref<1x128xf32, #tpu.memory_space<vmem>>, %arg4: memref<512x128xbf16, #tpu.memory_space<vmem>>) attributes {dimension_semantics = [#tpu.dimension_semantics<parallel>], iteration_bounds = array<i64: 4>, scalar_prefetch = 0 : i64, scratch_operands = 0 : i64, tpu.core_type = #tpu.core_type<tc>, window_params = [{transform_indices = @transform_0, window_bounds = array<i64: 32, 18, 128>}, {pipeline_mode = #tpu.pipeline_mode<synchronous>, transform_indices = @transform_1, window_bounds = array<i64: 384, 128>}, {pipeline_mode = #tpu.pipeline_mode<synchronous>, transform_indices = @transform_2, window_bounds = array<i64: 1, 128>}, {transform_indices = @transform_3, window_bounds = array<i64: 512, 128>}]} {
    %c0 = arith.constant 0 : index
    %c0_0 = arith.constant 0 : index
    %c0_1 = arith.constant 0 : index
    %0 = vector.load %arg1[%c0, %c0_0, %c0_1] : memref<32x18x128xbf16, #tpu.memory_space<vmem>>, vector<32x16x128xbf16>
    %c0_2 = arith.constant 0 : index
    %c1 = arith.constant 1 : index
    %c0_3 = arith.constant 0 : index
    %1 = vector.load %arg1[%c0_2, %c1, %c0_3] : memref<32x18x128xbf16, #tpu.memory_space<vmem>>, vector<32x16x128xbf16>
    %c0_4 = arith.constant 0 : index
    %c2 = arith.constant 2 : index
    %c0_5 = arith.constant 0 : index
    %2 = vector.load %arg1[%c0_4, %c2, %c0_5] : memref<32x18x128xbf16, #tpu.memory_space<vmem>>, vector<32x16x128xbf16>
    %3 = tpu.concatenate %0, %1, %2 in 2 : vector<32x16x128xbf16>, vector<32x16x128xbf16>, vector<32x16x128xbf16> -> vector<32x16x384xbf16>
    %4 = vector.shape_cast %3 : vector<32x16x384xbf16> to vector<512x384xbf16>
    %c0_6 = arith.constant 0 : index
    %c0_7 = arith.constant 0 : index
    %5 = vector.load %arg2[%c0_6, %c0_7] : memref<384x128xbf16, #tpu.memory_space<vmem>>, vector<384x128xbf16>
    %cst = arith.constant dense<0.000000e+00> : vector<512x128xf32>
    %6 = tpu.matmul %4, %5, %cst {dimension_numbers = #tpu.dot_dimension_numbers<[1], [0], [0], [1], [0, 0, 1, 1], [], []>} : vector<512x384xbf16>, vector<384x128xbf16>, vector<512x128xf32> -> vector<512x128xf32>
    %c0_8 = arith.constant 0 : index
    %c0_9 = arith.constant 0 : index
    %7 = vector.load %arg3[%c0_8, %c0_9] : memref<1x128xf32, #tpu.memory_space<vmem>>, vector<1x128xf32>
    %8 = vector.broadcast %7 : vector<1x128xf32> to vector<512x128xf32>
    %9 = arith.addf %6, %8 : vector<512x128xf32>
    %cst_10 = arith.constant 0.000000e+00 : f32
    %10 = vector.broadcast %cst_10 : f32 to vector<512x128xf32>
    %11 = arith.cmpf oge, %9, %10 : vector<512x128xf32>
    %cst_11 = arith.constant 2.000000e-01 : f32
    %12 = vector.broadcast %cst_11 : f32 to vector<512x128xf32>
    %13 = arith.mulf %12, %9 : vector<512x128xf32>
    %14 = arith.select %11, %9, %13 : vector<512x128xi1>, vector<512x128xf32>
    %15 = arith.truncf %14 : vector<512x128xf32> to vector<512x128xbf16>
    %c0_12 = arith.constant 0 : index
    %c0_13 = arith.constant 0 : index
    %16 = vector.load %arg4[%c0_12, %c0_13] : memref<512x128xbf16, #tpu.memory_space<vmem>>, vector<512x128xbf16>
    tpu.vector_store %arg4[%c0_12, %c0_13], %15 {strides = array<i32>} : memref<512x128xbf16, #tpu.memory_space<vmem>>, vector<512x128xbf16>,
    return
  }
  func.func @transform_0(%arg0: i32) -> (i32, i32, i32) {
    %c0_i32 = arith.constant 0 : i32
    %c0_i32_0 = arith.constant 0 : i32
    %c0_i32_1 = arith.constant 0 : i32
    return %arg0, %c0_i32, %c0_i32_0 : i32, i32, i32
  }
  func.func @transform_1(%arg0: i32) -> (i32, i32) {
    %c0_i32 = arith.constant 0 : i32
    %c0_i32_0 = arith.constant 0 : i32
    %c0_i32_1 = arith.constant 0 : i32
    return %c0_i32, %c0_i32_0 : i32, i32
  }
  func.func @transform_2(%arg0: i32) -> (i32, i32) {
    %c0_i32 = arith.constant 0 : i32
    %c0_i32_0 = arith.constant 0 : i32
    %c0_i32_1 = arith.constant 0 : i32
    return %c0_i32, %c0_i32_0 : i32, i32
  }
  func.func @transform_3(%arg0: i32) -> (i32, i32) {
    %c0_i32 = arith.constant 0 : i32
    %c0_i32_0 = arith.constant 0 : i32
    return %arg0, %c0_i32 : i32, i32
  }
}

module attributes {stable_mosaic.version = 11 : i64} {
  func.func @_conv3x3_res_kernel(%arg0: i32, %arg1: memref<32x18x128xbf16, #tpu.memory_space<vmem>>, %arg2: memref<384x128xbf16, #tpu.memory_space<vmem>>, %arg3: memref<1x128xf32, #tpu.memory_space<vmem>>, %arg4: memref<512x128xbf16, #tpu.memory_space<vmem>>, %arg5: memref<512x128xbf16, #tpu.memory_space<vmem>>) attributes {dimension_semantics = [#tpu.dimension_semantics<parallel>], iteration_bounds = array<i64: 4>, scalar_prefetch = 0 : i64, scratch_operands = 0 : i64, tpu.core_type = #tpu.core_type<tc>, window_params = [{transform_indices = @transform_0, window_bounds = array<i64: 32, 18, 128>}, {pipeline_mode = #tpu.pipeline_mode<synchronous>, transform_indices = @transform_1, window_bounds = array<i64: 384, 128>}, {pipeline_mode = #tpu.pipeline_mode<synchronous>, transform_indices = @transform_2, window_bounds = array<i64: 1, 128>}, {transform_indices = @transform_3, window_bounds = array<i64: 512, 128>}, {transform_indices = @transform_4, window_bounds = array<i64: 512, 128>}]} {
    %c0 = arith.constant 0 : index
    %c0_0 = arith.constant 0 : index
    %c0_1 = arith.constant 0 : index
    %0 = vector.load %arg1[%c0, %c0_0, %c0_1] : memref<32x18x128xbf16, #tpu.memory_space<vmem>>, vector<32x16x128xbf16>
    %c0_2 = arith.constant 0 : index
    %c1 = arith.constant 1 : index
    %c0_3 = arith.constant 0 : index
    %1 = vector.load %arg1[%c0_2, %c1, %c0_3] : memref<32x18x128xbf16, #tpu.memory_space<vmem>>, vector<32x16x128xbf16>
    %c0_4 = arith.constant 0 : index
    %c2 = arith.constant 2 : index
    %c0_5 = arith.constant 0 : index
    %2 = vector.load %arg1[%c0_4, %c2, %c0_5] : memref<32x18x128xbf16, #tpu.memory_space<vmem>>, vector<32x16x128xbf16>
    %3 = tpu.concatenate %0, %1, %2 in 2 : vector<32x16x128xbf16>, vector<32x16x128xbf16>, vector<32x16x128xbf16> -> vector<32x16x384xbf16>
    %4 = vector.shape_cast %3 : vector<32x16x384xbf16> to vector<512x384xbf16>
    %c0_6 = arith.constant 0 : index
    %c0_7 = arith.constant 0 : index
    %5 = vector.load %arg2[%c0_6, %c0_7] : memref<384x128xbf16, #tpu.memory_space<vmem>>, vector<384x128xbf16>
    %cst = arith.constant dense<0.000000e+00> : vector<512x128xf32>
    %6 = tpu.matmul %4, %5, %cst {dimension_numbers = #tpu.dot_dimension_numbers<[1], [0], [0], [1], [0, 0, 1, 1], [], []>} : vector<512x384xbf16>, vector<384x128xbf16>, vector<512x128xf32> -> vector<512x128xf32>
    %c0_8 = arith.constant 0 : index
    %c0_9 = arith.constant 0 : index
    %7 = vector.load %arg3[%c0_8, %c0_9] : memref<1x128xf32, #tpu.memory_space<vmem>>, vector<1x128xf32>
    %8 = vector.broadcast %7 : vector<1x128xf32> to vector<512x128xf32>
    %9 = arith.addf %6, %8 : vector<512x128xf32>
    %c0_10 = arith.constant 0 : index
    %c0_11 = arith.constant 0 : index
    %10 = vector.load %arg4[%c0_10, %c0_11] : memref<512x128xbf16, #tpu.memory_space<vmem>>, vector<512x128xbf16>
    %11 = arith.extf %10 : vector<512x128xbf16> to vector<512x128xf32>
    %12 = arith.addf %9, %11 : vector<512x128xf32>
    %13 = arith.truncf %12 : vector<512x128xf32> to vector<512x128xbf16>
    %c0_12 = arith.constant 0 : index
    %c0_13 = arith.constant 0 : index
    %14 = vector.load %arg5[%c0_12, %c0_13] : memref<512x128xbf16, #tpu.memory_space<vmem>>, vector<512x128xbf16>
    tpu.vector_store %arg5[%c0_12, %c0_13], %13 {strides = array<i32>} : memref<512x128xbf16, #tpu.memory_space<vmem>>, vector<512x128xbf16>,
    return
  }
  func.func @transform_0(%arg0: i32) -> (i32, i32, i32) {
    %c0_i32 = arith.constant 0 : i32
    %c0_i32_0 = arith.constant 0 : i32
    %c0_i32_1 = arith.constant 0 : i32
    return %arg0, %c0_i32, %c0_i32_0 : i32, i32, i32
  }
  func.func @transform_1(%arg0: i32) -> (i32, i32) {
    %c0_i32 = arith.constant 0 : i32
    %c0_i32_0 = arith.constant 0 : i32
    %c0_i32_1 = arith.constant 0 : i32
    return %c0_i32, %c0_i32_0 : i32, i32
  }
  func.func @transform_2(%arg0: i32) -> (i32, i32) {
    %c0_i32 = arith.constant 0 : i32
    %c0_i32_0 = arith.constant 0 : i32
    %c0_i32_1 = arith.constant 0 : i32
    return %c0_i32, %c0_i32_0 : i32, i32
  }
  func.func @transform_3(%arg0: i32) -> (i32, i32) {
    %c0_i32 = arith.constant 0 : i32
    %c0_i32_0 = arith.constant 0 : i32
    return %arg0, %c0_i32 : i32, i32
  }
  func.func @transform_4(%arg0: i32) -> (i32, i32) {
    %c0_i32 = arith.constant 0 : i32
    %c0_i32_0 = arith.constant 0 : i32
    return %arg0, %c0_i32 : i32, i32
  }
}

</mosaic_0001>

<bundles_post_ra>
// kernel: bidirectional_propagation.48
= control target key start
LH: loop header
LB: loop body
LE: loop exit
PB: predicated region body
PF: predicated region fallthrough
CT: control target
= control target key end

     0   :  { %s1205_s12 = smov 0   ;;  %s1474_s0 = inlined_call_operand.vmem [shape: bf16[32,18,128], index: 0, kind: input, shape index: {}]   ;;  %s1475_s1 = inlined_call_operand.vmem [shape: bf16[384,128], index: 1, kind: input, shape index: {}]   ;;  %s1476_s2 = inlined_call_operand.vmem [shape: f32[1,128], index: 2, kind: input, shape index: {}]   ;;  %s1477_s3 = inlined_call_operand.vmem [shape: bf16[512,128], index: 3, kind: output, shape index: {}]  }
   0x1 LB: > { %s922_s13 = sadd.s32 4294967295, %s1183_s12   ;;  %p926_p0 = scmp.ge.s32.totalorder %s1183_s12, 1  ;;  %s1183_s12 = sphi %s1205_s12, %s13_s12  }
   0x2   : > { %p139_p1 = scmp.lt.s32.totalorder %s1183_s12, 5 }
   0x4   : > { %p140_p2 = pnand %p926_p0, %p139_p1 }
   0x5   : > { %s927_s20 = sshll.u32 (!%p140_p2), %s922_s13, 3  ;;  %s929_s19 = sshll.u32 (!%p140_p2), %s922_s13, 4 }
   0x6   : > { %143 = sbr.rel (%p140_p2) target bundleno = 273 (0x111), region = 32  ;;  %p165_p3 = scmp.lt.s32.totalorder (!%p140_p2), %s927_s20, 31 }
   0x7   : > { %p172_p4 = scmp.lt.s32.totalorder (!%p140_p2), %s929_s19, 63 }
   0xb   : > { %v1036_v0 = vld [vmem:[%s1475_s1 + $0x38] sm:$0xff]  ;;  %v1035_v3 = vld [vmem:[%s1475_s1 + $0x30] sm:$0xff]  ;;  %s1479_s20 = smov (!%p165_p3, %s927_s20), 31  ;;  %v1034_v6 = vld [vmem:[%s1475_s1 + $0x28] sm:$0xff]  ;;  %vm281_vm0 = vsmask.f32 7424 }
   0xc   : > { %v1219_v1 = vld [vmem:[%s1475_s1 + $0x78] sm:$0xff]  ;;  %639 = vmatpush.bf16.msra.mxu0 %v1036_v0  ;;  %1131 = vmatpush.bf16.msra.mxu3 %v1036_v0  ;;  %v1236_v4 = vld [vmem:[%s1475_s1 + $0x70] sm:$0xff]  ;;  %s1155_s27 = smul.u32 12, %s1479_s20  ;;  %v1251_v7 = vld [vmem:[%s1475_s1 + $0x68] sm:$0xff]  ;;  %vm410_vm1 = vcmask 1046528   ;;  %s1481_s19 = smov (!%p172_p4, %s929_s19), 63 }
   0xd   : > { %v1224_v2 = vld [vmem:[%s1475_s1 + $0xb8] sm:$0xff]  ;;  %688 = vmatpush.bf16.msra.mxu1 %v1219_v1  ;;  %v1241_v5 = vld [vmem:[%s1475_s1 + $0xb0] sm:$0xff]  ;;  %v1256_v8 = vld [vmem:[%s1475_s1 + $0xa8] sm:$0xff]  ;;  %s930_s20 = sshll.u32 %s1481_s19, 2 }
   0xe   : > { %737 = vmatpush.bf16.msra.mxu2 %v1224_v2  ;;  %s1261_s9 = scalar_lea.vmem %s1474_s0, %s1155_s27  ;;  %v1033_v9 = vld [vmem:[%s1475_s1 + $0x20] sm:$0xff]  ;;  %v1032_v13 = vld [vmem:[%s1475_s1 + $0x18] sm:$0xff]  ;;  %v1031_v18 = vld [vmem:[%s1475_s1 + $0x10] sm:$0xff]  ;;  %s1436_s22 = scalar_lea.vmem %s1477_s3, %s930_s20 }
   0xf   : > { %v1271_v10 = vld [vmem:[%s1475_s1 + $0x60] sm:$0xff]  ;;  %v193_v12 = vld [vmem:[%s1261_s9 + $0x8] sm:$0x1]  ;;  %v1287_v14 = vld [vmem:[%s1475_s1 + $0x58] sm:$0xff] }
  0x10   : > { %640 = vmatpush.bf16.msra.mxu0 %v1035_v3  ;;  %1132 = vmatpush.bf16.msra.mxu3 %v1035_v3  ;;  %v1276_v11 = vld [vmem:[%s1475_s1 + $0xa0] sm:$0xff]  ;;  %v1292_v15 = vld [vmem:[%s1475_s1 + $0x98] sm:$0xff]  ;;  %v265_v16 = vunpack.c.l.b16 %v193_v12  ;;  %v1303_v19 = vld [vmem:[%s1475_s1 + $0x50] sm:$0xff] }
  0x11   : > { %689 = vmatpush.bf16.msra.mxu1 %v1236_v4  ;;  %v1054_v17 = vld [vmem:[%s1261_s9] sm:$0xff]   ;;  %v1308_v20 = vld [vmem:[%s1475_s1 + $0x90] sm:$0xff]  ;;  %v1030_v25 = vld [vmem:[%s1475_s1 + $0x8] sm:$0xff] }
  0x12   : > { %738 = vmatpush.bf16.msra.mxu2 %v1241_v5  ;;  %v285_v21 = vshll.u32 %v1054_v17, 16  ;;  %v273_v22 = vpack.c.b16 %v265_v16, %v265_v16  ;;  %v1112_v23 = vld [vmem:[%s1261_s9] sm:$0xf0]  ;;  %v1113_v24 = vld [vmem:[%s1261_s9] sm:$0xe]  ;;  %v1320_v26 = vld [vmem:[%s1475_s1 + $0x48] sm:$0xff] }
  0x13   : > { %v1325_v27 = vld [vmem:[%s1475_s1 + $0x88] sm:$0xff]  ;;  %v283_v28 = vshrl.u32 %v1054_v17, 16  ;;  %v1114_v31 = vor.u32 %v1113_v24, %v1112_v23  ;;  %v1165_v33 = vld [vmem:[%s1261_s9 + $0xc] sm:$0xf0]  ;;  %v1029_v34 = vld [vmem:[%s1475_s1] sm:$0xff] }
  0x14   : > { %641 = vmatpush.bf16.msra.mxu0 %v1034_v6  ;;  %1133 = vmatpush.bf16.msra.mxu3 %v1034_v6  ;;  %v287_v29 = vrot.slane %v285_v21, 1  ;;  %v290_v30 = vshll.u32 %v273_v22, 16  ;;  %v179_v32 = vld [vmem:[%s1261_s9 + $0xc] sm:$0xff]   ;;  %v1337_v35 = vld [vmem:[%s1475_s1 + $0x40] sm:$0xff]  ;;  %v412_v40 = vrot.slane %v273_v22, 1  ;;  %v1354_v49 = vld [vmem:[%s1261_s9 + $0x54] sm:$0xff]  }
  0x15   : > { %690 = vmatpush.bf16.msra.mxu1 %v1251_v7  ;;  %v1342_v36 = vld [vmem:[%s1475_s1 + $0x80] sm:$0xff]  ;;  %v411_v39 = vrot.slane %v1114_v31, 1  ;;  %v194_v41 = vld [vmem:[%s1261_s9 + $0x14] sm:$0x1]  ;;  %v1111_v42 = vld [vmem:[%s1261_s9 + $0x48] sm:$0xff]   ;;  %v297_v48 = vshll.u32 %v179_v32, 16 }
  0x16   : > { %739 = vmatpush.bf16.msra.mxu2 %v1256_v8  ;;  %v288_v37 = vor.u32 %v287_v29, %v283_v28  ;;  %v292_v38 = vrot.slane %v290_v30, 1  ;;  %v266_v45 = vunpack.c.l.b16 %v194_v41  ;;  %v1166_v46 = vld [vmem:[%s1261_s9 + $0xc] sm:$0xe]  ;;  %v1357_v50 = vld [vmem:[%s1261_s9 + $0x54] sm:$0xf0]  ;;  %v295_v52 = vshrl.u32 %v179_v32, 16 }
  0x17   : > { %v413_v44 = vsel %vm410_vm1, %v411_v39, %v412_v40  ;;  %v1167_v51 = vor.u32 %v1166_v46, %v1165_v33  ;;  %v299_v53 = vrot.slane %v297_v48, 1  ;;  %v195_v59 = vld [vmem:[%s1261_s9 + $0x20] sm:$0x1]  ;;  %v199_v60 = vld [vmem:[%s1261_s9 + $0x50] sm:$0x1]  ;;  %v357_v3 = vshll.u32 %v1111_v42, 16 }
  0x18   : > { %642 = vmatpush.bf16.msra.mxu0 %v1033_v9  ;;  %1134 = vmatpush.bf16.msra.mxu3 %v1033_v9  ;;  %v293_v43 = vsel %vm281_vm0, %v288_v37, %v292_v38  ;;  %v274_v47 = vpack.c.b16 %v266_v45, %v266_v45  ;;  %v267_v61 = vunpack.c.l.b16 %v195_v59  ;;  %v271_v62 = vunpack.c.l.b16 %v199_v60  ;;  %v1115_v9 = vld [vmem:[%s1261_s9 + $0x18] sm:$0xf0]  ;;  %v183_v22 = vld [vmem:[%s1261_s9 + $0x24] sm:$0xff]   ;;  %v1110_v59 = vld [vmem:[%s1261_s9 + $0x30] sm:$0xff]  }
  0x19   : > { %691 = vmatpush.bf16.msra.mxu1 %v1271_v10  ;;  %v414_v55 = vrot.slane %v1167_v51, 1  ;;  %v300_v56 = vor.u32 %v299_v53, %v295_v52  ;;  %v355_v12 = vshrl.u32 %v1111_v42, 16  ;;  %v1168_v23 = vld [vmem:[%s1261_s9 + $0x24] sm:$0xf0]  ;;  %v200_v31 = vld [vmem:[%s1261_s9 + $0x5c] sm:$0x1] }
  0x1a   : > { %740 = vmatpush.bf16.msra.mxu2 %v1276_v11  ;;  %v302_v54 = vshll.u32 %v274_v47, 16  ;;  %v415_v58 = vrot.slane %v274_v47, 1  ;;  %v275_v6 = vpack.c.b16 %v267_v61, %v267_v61  ;;  %v1169_v39 = vld [vmem:[%s1261_s9 + $0x24] sm:$0xe]  ;;  %v321_v41 = vshll.u32 %v183_v22, 16 }
  0x1b   : > { %v319_v45 = vshrl.u32 %v183_v22, 16  ;;  %v1170_v48 = vor.u32 %v1169_v39, %v1168_v23  ;;  %v1121_v61 = vld [vmem:[%s1261_s9 + $0x48] sm:$0xf0] }
  0x1c   : > { %643 = vmatpush.bf16.msra.mxu0 %v1032_v13  ;;  %1135 = vmatpush.bf16.msra.mxu3 %v1032_v13  ;;  %v304_v57 = vrot.slane %v302_v54, 1  ;;  %v416_v0 = vsel %vm410_vm1, %v414_v55, %v415_v58  ;;  %v359_v13 = vrot.slane %v357_v3, 1  ;;  %v418_v30 = vrot.slane %v275_v6, 1 }
  0x1d   : > { %692 = vmatpush.bf16.msra.mxu1 %v1287_v14  ;;  %v323_v46 = vrot.slane %v321_v41, 1  ;;  %v420_v54 = vrot.slane %v1170_v48, 1 }
  0x1e   : > { %741 = vmatpush.bf16.msra.mxu2 %v1292_v15  ;;  %v305_v63 = vsel %vm281_vm0, %v300_v56, %v304_v57  ;;  %v360_v24 = vor.u32 %v359_v13, %v355_v12 }
  0x20   : > { %644 = vmatpush.bf16.msra.mxu0 %v1031_v18  ;;  %1136 = vmatpush.bf16.msra.mxu3 %v1031_v18 }
  0x21   : > { %693 = vmatpush.bf16.msra.mxu1 %v1303_v19 }
  0x22   : > { %742 = vmatpush.bf16.msra.mxu2 %v1308_v20 }
  0x24   : > { %645 = vmatpush.bf16.msra.mxu0 %v1030_v25  ;;  %1137 = vmatpush.bf16.msra.mxu3 %v1030_v25 }
  0x25   : > { %694 = vmatpush.bf16.msra.mxu1 %v1320_v26 }
  0x26   : > { %743 = vmatpush.bf16.msra.mxu2 %v1325_v27 }
  0x28   : > { %646 = vmatpush.bf16.msra.mxu0 %v1029_v34  ;;  %1138 = vmatpush.bf16.msra.mxu3 %v1029_v34  ;;  %v272_v34 = vunpack.c.l.b16 %v200_v31 }
  0x29   : > { %695 = vmatpush.bf16.msra.mxu1 %v1337_v35 }
  0x2a   : > { %744 = vmatpush.bf16.msra.mxu2 %v1342_v36  ;;  %v1385_v40 = vpack.c.b16 %v272_v34, %v272_v34 }
  0x2b   : > { %647 = vmatmul.bf16.vlgmr.msra.gmra.mxu0 %v1054_v17  ;;  %677 = vmatmul.bf16.vlgmr.msra.gmra.mxu3 %v1111_v42  ;;  %v314_v17 = vshll.u32 %v275_v6, 16  ;;  %v367_v42 = vshrl.u32 %v1354_v49, 16 }
  0x2c   : > { %1139 = vmatpush.bf16.msrb.mxu3 %v1219_v1  ;;  %696 = vmatmul.bf16.vlgmr.msra.gmra.mxu1 %v293_v43  ;;  %v1109_v1 = vld [vmem:[%s1261_s9 + $0x18] sm:$0xff]  }
  0x2d   : > { %745 = vmatmul.bf16.vlgmr.msra.gmra.mxu2 %v413_v44  ;;  %v374_v44 = vshll.u32 %v1385_v40, 16 }
  0x2f   : > { %v376_v52 = vrot.slane %v374_v44, 1 }
  0x30   : > { %1140 = vmatpush.bf16.msrb.mxu3 %v1236_v4  ;;  %v309_v4 = vshll.u32 %v1109_v1, 16 }
  0x32   : > { %v311_v16 = vrot.slane %v309_v4, 1 }
  0x34   : > { %1141 = vmatpush.bf16.msrb.mxu3 %v1251_v7  ;;  %v1368_v7 = vpack.c.b16 %v271_v62, %v271_v62  ;;  %v1122_v62 = vld [vmem:[%s1261_s9 + $0x48] sm:$0xe] }
  0x35   : > { %v1123_v4 = vor.u32 %v1122_v62, %v1121_v61 }
  0x36   : > { %v362_v18 = vshll.u32 %v1368_v7, 16 }
  0x38   : > { %1142 = vmatpush.bf16.msrb.mxu3 %v1271_v10  ;;  %v1116_v10 = vld [vmem:[%s1261_s9 + $0x18] sm:$0xe]  ;;  %v364_v28 = vrot.slane %v362_v18, 1  ;;  %v198_v18 = vld [vmem:[%s1261_s9 + $0x44] sm:$0x1] }
  0x39   : > { %v1117_v21 = vor.u32 %v1116_v10, %v1115_v9  ;;  %v187_v9 = vld [vmem:[%s1261_s9 + $0x3c] sm:$0xff]   ;;  %v270_v23 = vunpack.c.l.b16 %v198_v18 }
  0x3a   : > { %v365_v33 = vsel %vm281_vm0, %v360_v24, %v364_v28  ;;  %v1174_v10 = vld [vmem:[%s1261_s9 + $0x3c] sm:$0xf0]  ;;  %v1172_v24 = vld [vmem:[%s1261_s9 + $0x54] sm:$0xe]  ;;  %v343_v28 = vshrl.u32 %v187_v9, 16 }
  0x3b   : > { %652 = vmatmul.bf16.gmra.mxu0 %v179_v32  ;;  %682 = vmatmul.bf16.gmra.mxu3 %v1354_v49  ;;  %v417_v29 = vrot.slane %v1117_v21, 1  ;;  %v196_v32 = vld [vmem:[%s1261_s9 + $0x2c] sm:$0x1] }
  0x3c   : > { %1143 = vmatpush.bf16.msrb.mxu3 %v1287_v14  ;;  %701 = vmatmul.bf16.gmra.mxu1 %v305_v63  ;;  %v307_v14 = vshrl.u32 %v1109_v1, 16  ;;  %v268_v38 = vunpack.c.l.b16 %v196_v32  ;;  %v1118_v63 = vld [vmem:[%s1261_s9 + $0x30] sm:$0xf0] }
  0x3d   : > { %750 = vmatmul.bf16.gmra.mxu2 %v416_v0  ;;  %v419_v37 = vsel %vm410_vm1, %v417_v29, %v418_v30  ;;  %v1119_v0 = vld [vmem:[%s1261_s9 + $0x30] sm:$0xe] }
  0x3e   : > { %v312_v25 = vor.u32 %v311_v16, %v307_v14  ;;  %v1120_v6 = vor.u32 %v1119_v0, %v1118_v63  ;;  %v429_v14 = vrot.slane %v1123_v4, 1 }
  0x40   : > { %1144 = vmatpush.bf16.msrb.mxu3 %v1303_v19  ;;  %v316_v19 = vrot.slane %v314_v17, 1  ;;  %v423_v16 = vrot.slane %v1120_v6, 1 }
  0x44   : > { %1145 = vmatpush.bf16.msrb.mxu3 %v1320_v26  ;;  %v317_v26 = vsel %vm281_vm0, %v312_v25, %v316_v19  ;;  %v1175_v25 = vld [vmem:[%s1261_s9 + $0x3c] sm:$0xe]  ;;  %v278_v19 = vpack.c.b16 %v270_v23, %v270_v23 }
  0x45   : > { %v1176_v31 = vor.u32 %v1175_v25, %v1174_v10 }
  0x46   : > { %v350_v30 = vshll.u32 %v278_v19, 16 }
  0x48   : > { %1146 = vmatpush.bf16.msrb.mxu3 %v1337_v35  ;;  %v369_v35 = vshll.u32 %v1354_v49, 16  ;;  %v197_v49 = vld [vmem:[%s1261_s9 + $0x38] sm:$0x1] }
  0x4a   : > { %v371_v43 = vrot.slane %v369_v35, 1 }
  0x4b   : > { %657 = vmatmul.bf16.gmra.mxu0 %v1109_v1  ;;  %726 = vmatmul.bf16.vlgmr.msrb.gmra.mxu3 %v365_v33  ;;  %v331_v1 = vshrl.u32 %v1110_v59, 16  ;;  %v433_v33 = vrot.slane %v1385_v40, 1 }
  0x4c   : > { %1147 = vmatpush.bf16.msra.mxu3 %v1224_v2  ;;  %706 = vmatmul.bf16.gmra.mxu1 %v317_v26  ;;  %v276_v2 = vpack.c.b16 %v268_v38, %v268_v38  ;;  %v372_v51 = vor.u32 %v371_v43, %v367_v42  ;;  %v352_v26 = vrot.slane %v350_v30, 1  ;;  %v427_v38 = vrot.slane %v278_v19, 1 }
  0x4d   : > { %755 = vmatmul.bf16.gmra.mxu2 %v419_v37  ;;  %v426_v37 = vrot.slane %v1176_v31, 1 }
  0x4e   : > { %v326_v47 = vshll.u32 %v276_v2, 16  ;;  %v421_v55 = vrot.slane %v276_v2, 1  ;;  %v377_v56 = vsel %vm281_vm0, %v372_v51, %v376_v52 }
  0x4f   : > { %v428_v2 = vsel %vm410_vm1, %v426_v37, %v427_v38 }
  0x50   : > { %1148 = vmatpush.bf16.msra.mxu3 %v1241_v5  ;;  %v324_v5 = vor.u32 %v323_v46, %v319_v45  ;;  %v328_v53 = vrot.slane %v326_v47, 1  ;;  %v422_v58 = vsel %vm410_vm1, %v420_v54, %v421_v55 }
  0x52   : > { %v329_v57 = vsel %vm281_vm0, %v324_v5, %v328_v53 }
  0x54   : > { %1149 = vmatpush.bf16.msra.mxu3 %v1256_v8  ;;  %v269_v8 = vunpack.c.l.b16 %v197_v49 }
  0x56   : > { %v277_v60 = vpack.c.b16 %v269_v8, %v269_v8 }
  0x58   : > { %1150 = vmatpush.bf16.msra.mxu3 %v1276_v11  ;;  %v333_v11 = vshll.u32 %v1110_v59, 16  ;;  %v338_v3 = vshll.u32 %v277_v60, 16  ;;  %v424_v17 = vrot.slane %v277_v60, 1 }
  0x5a   : > { %v340_v13 = vrot.slane %v338_v3, 1 }
  0x5b   : > { %662 = vmatmul.bf16.gmra.mxu0 %v183_v22  ;;  %731 = vmatmul.bf16.gmra.mxu3 %v377_v56 }
  0x5c   : > { %1151 = vmatpush.bf16.msra.mxu3 %v1292_v15  ;;  %711 = vmatmul.bf16.gmra.mxu1 %v329_v57  ;;  %v335_v15 = vrot.slane %v333_v11, 1 }
  0x5d   : > { %760 = vmatmul.bf16.gmra.mxu2 %v422_v58 }
  0x5e   : > { %v336_v12 = vor.u32 %v335_v15, %v331_v1 }
  0x60   : > { %1152 = vmatpush.bf16.msra.mxu3 %v1308_v20  ;;  %v430_v20 = vrot.slane %v1368_v7, 1  ;;  %v341_v22 = vsel %vm281_vm0, %v336_v12, %v340_v13  ;;  %v345_v7 = vshll.u32 %v187_v9, 16 }
  0x62   : > { %v431_v21 = vsel %vm410_vm1, %v429_v14, %v430_v20  ;;  %v347_v29 = vrot.slane %v345_v7, 1 }
  0x64   : > { %1153 = vmatpush.bf16.msra.mxu3 %v1325_v27  ;;  %v425_v27 = vsel %vm410_vm1, %v423_v16, %v424_v17  ;;  %v348_v34 = vor.u32 %v347_v29, %v343_v28 }
  0x66   : > { %v353_v35 = vsel %vm281_vm0, %v348_v34, %v352_v26 }
  0x68   : > { %1154 = vmatpush.bf16.msra.mxu3 %v1342_v36  ;;  %v1173_v36 = vor.u32 %v1172_v24, %v1357_v50  ;;  %v1423_v50 = vld [vmem:[%s1476_s2] ss:$0 sm:$0xff] }
  0x6a   : > { %v432_v32 = vrot.slane %v1173_v36, 1 }
  0x6b   : > { %667 = vmatmul.bf16.gmra.mxu0 %v1110_v59  ;;  %775 = vmatmul.bf16.vlgmr.msra.gmra.mxu3 %v431_v21 }
  0x6c   : > { %716 = vmatmul.bf16.gmra.mxu1 %v341_v22  ;;  %v434_v39 = vsel %vm410_vm1, %v432_v32, %v433_v33 }
  0x6d   : > { %765 = vmatmul.bf16.gmra.mxu2 %v425_v27 }
  0x7b   : > { %672 = vmatmul.bf16.gmra.mxu0 %v187_v9  ;;  %780 = vmatmul.bf16.gmra.mxu3 %v434_v39 }
  0x7c   : > { %721 = vmatmul.bf16.gmra.mxu1 %v353_v35 }
  0x7d   : > { %770 = vmatmul.bf16.gmra.mxu2 %v428_v2 }
  0xa8   : > { %v648_v40 = vpop.f32.mrf.mxu0 }
  0xa9   : > { %v697_v41 = vpop.f32.mrf.mxu1  ;;  %v649_v42 = vadd.f32 %v1423_v50, %v648_v40 }
  0xab   : > { %v698_v45 = vadd.f32 %v697_v41, %v649_v42 }
  0xae   : > { %v1426_v43 = vpop.f32.mrf.mxu3 }
  0xb0   : > { %v746_v44 = vpop.f32.mrf.mxu2  ;;  %v650_v46 = vpop.f32.mrf.mxu0 }
  0xb1   : > { %v699_v47 = vpop.f32.mrf.mxu1  ;;  %v651_v48 = vadd.f32 %v1423_v50, %v650_v46  ;;  %v747_v51 = vadd.f32 %v746_v44, %v698_v45 }
  0xb3   : > { %v700_v52 = vadd.f32 %v699_v47, %v651_v48  ;;  %v802_v54 = vmul.f32 0.2, %v747_v51  ;;  %vm786_vm2 = vcmp.ge.f32.partialorder %v747_v51, 0.0 }
  0xb5   : > { %v818_v57 = vsel %vm786_vm2, %v747_v51, %v802_v54 }
  0xb6   : > { %v1431_v5 = vpop.f32.mrf.mxu3 }
  0xb8   : > { %v748_v53 = vpop.f32.mrf.mxu2  ;;  %v653_v49 = vpop.f32.mrf.mxu0 }
  0xb9   : > { %v749_v55 = vadd.f32 %v748_v53, %v700_v52  ;;  %v702_v56 = vpop.f32.mrf.mxu1  ;;  %v654_v59 = vadd.f32 %v1423_v50, %v653_v49 }
  0xbb   : > { %vm787_vm3 = vcmp.ge.f32.partialorder %v749_v55, 0.0  ;;  %v803_v8 = vmul.f32 0.2, %v749_v55  ;;  %v703_v62 = vadd.f32 %v702_v56, %v654_v59 }
  0xbd   : > { %v819_v58 = vsel %vm787_vm3, %v749_v55, %v803_v8 }
  0xbe   : > { %v1072_v11 = vpack.c.bf16 %v819_v58, %v818_v57  ;;  %v1439_v60 = vpop.f32.mrf.mxu3  ;;  %v679_v58 = vadd.f32 %v1423_v50, %v1426_v43 }
  0xc0   : > { %1073 = vst [vmem:[%s1436_s22] sm:$0xff] %v1072_v11   ;;  %v751_v61 = vpop.f32.mrf.mxu2  ;;  %v655_v63 = vpop.f32.mrf.mxu0 }
  0xc1   : > { %v704_v0 = vpop.f32.mrf.mxu1  ;;  %v656_v1 = vadd.f32 %v1423_v50, %v655_v63  ;;  %v752_v15 = vadd.f32 %v751_v61, %v703_v62 }
  0xc3   : > { %v705_v3 = vadd.f32 %v704_v0, %v656_v1  ;;  %v804_v9 = vmul.f32 0.2, %v752_v15  ;;  %vm788_vm4 = vcmp.ge.f32.partialorder %v752_v15, 0.0  ;;  %v681_v1 = vadd.f32 %v1423_v50, %v1431_v5 }
  0xc5   : > { %v820_v20 = vsel %vm788_vm4, %v752_v15, %v804_v9 }
  0xc6   : > { %v1443_v4 = vpop.f32.mrf.mxu3 }
  0xc8   : > { %v753_v6 = vpop.f32.mrf.mxu2  ;;  %v658_v12 = vpop.f32.mrf.mxu0 }
  0xc9   : > { %v754_v10 = vadd.f32 %v753_v6, %v705_v3  ;;  %v707_v13 = vpop.f32.mrf.mxu1  ;;  %v659_v17 = vadd.f32 %v1423_v50, %v658_v12 }
  0xcb   : > { %vm789_vm5 = vcmp.ge.f32.partialorder %v754_v10, 0.0  ;;  %v805_v14 = vmul.f32 0.2, %v754_v10  ;;  %v708_v27 = vadd.f32 %v707_v13, %v659_v17 }
  0xcd   : > { %v821_v16 = vsel %vm789_vm5, %v754_v10, %v805_v14 }
  0xce   : > { %v1077_v18 = vpack.c.bf16 %v821_v16, %v820_v20  ;;  %v727_v21 = vpop.f32.mrf.mxu3 }
  0xcf   : > { %v728_v62 = vadd.f32 %v727_v21, %v679_v58 }
  0xd0   : > { %1124 = vst [vmem:[%s1436_s22 + $0x8] sm:$0xff] %v1077_v18   ;;  %v756_v22 = vpop.f32.mrf.mxu2  ;;  %v660_v23 = vpop.f32.mrf.mxu0 }
  0xd1   : > { %v709_v24 = vpop.f32.mrf.mxu1  ;;  %v661_v25 = vadd.f32 %v1423_v50, %v660_v23  ;;  %v757_v19 = vadd.f32 %v756_v22, %v708_v27 }
  0xd3   : > { %v710_v7 = vadd.f32 %v709_v24, %v661_v25  ;;  %v806_v29 = vmul.f32 0.2, %v757_v19  ;;  %vm790_vm6 = vcmp.ge.f32.partialorder %v757_v19, 0.0 }
  0xd5   : > { %v822_v34 = vsel %vm790_vm6, %v757_v19, %v806_v29 }
  0xd6   : > { %v729_v36 = vpop.f32.mrf.mxu3 }
  0xd7   : > { %v730_v6 = vadd.f32 %v729_v36, %v681_v1  ;;  %v684_v36 = vadd.f32 %v1423_v50, %v1439_v60 }
  0xd8   : > { %v758_v28 = vpop.f32.mrf.mxu2  ;;  %v663_v31 = vpop.f32.mrf.mxu0 }
  0xd9   : > { %v759_v30 = vadd.f32 %v758_v28, %v710_v7  ;;  %v712_v32 = vpop.f32.mrf.mxu1  ;;  %v664_v37 = vadd.f32 %v1423_v50, %v663_v31 }
  0xdb   : > { %vm791_vm7 = vcmp.ge.f32.partialorder %v759_v30, 0.0  ;;  %v807_v33 = vmul.f32 0.2, %v759_v30  ;;  %v713_v2 = vadd.f32 %v712_v32, %v664_v37 }
  0xdd   : > { %v823_v26 = vsel %vm791_vm7, %v759_v30, %v807_v33  ;;  %v686_v33 = vadd.f32 %v1423_v50, %v1443_v4 }
  0xde   : > { %v1082_v38 = vpack.c.bf16 %v823_v26, %v822_v34  ;;  %v1449_v39 = vpop.f32.mrf.mxu3 }
  0xdf   : > { %v733_v31 = vadd.f32 %v1449_v39, %v684_v36 }
  0xe0   : > { %1125 = vst [vmem:[%s1436_s22 + $0x10] sm:$0xff] %v1082_v38   ;;  %v761_v35 = vpop.f32.mrf.mxu2  ;;  %v665_v40 = vpop.f32.mrf.mxu0 }
  0xe1   : > { %v714_v41 = vpop.f32.mrf.mxu1  ;;  %v666_v42 = vadd.f32 %v1423_v50, %v665_v40  ;;  %v762_v44 = vadd.f32 %v761_v35, %v713_v2 }
  0xe3   : > { %v715_v45 = vadd.f32 %v714_v41, %v666_v42  ;;  %v808_v48 = vmul.f32 0.2, %v762_v44  ;;  %vm792_vm8 = vcmp.ge.f32.partialorder %v762_v44, 0.0 }
  0xe5   : > { %v824_v55 = vsel %vm792_vm8, %v762_v44, %v808_v48 }
  0xe6   : > { %v734_v46 = vpop.f32.mrf.mxu3 }
  0xe7   : > { %v735_v37 = vadd.f32 %v734_v46, %v686_v33 }
  0xe8   : > { %v763_v47 = vpop.f32.mrf.mxu2  ;;  %v668_v52 = vpop.f32.mrf.mxu0 }
  0xe9   : > { %v764_v51 = vadd.f32 %v763_v47, %v715_v45  ;;  %v717_v53 = vpop.f32.mrf.mxu1  ;;  %v669_v56 = vadd.f32 %v1423_v50, %v668_v52 }
  0xeb   : > { %vm793_vm9 = vcmp.ge.f32.partialorder %v764_v51, 0.0  ;;  %v809_v54 = vmul.f32 0.2, %v764_v51  ;;  %v718_v11 = vadd.f32 %v717_v53, %v669_v56 }
  0xed   : > { %v825_v49 = vsel %vm793_vm9, %v764_v51, %v809_v54 }
  0xee   : > { %v1087_v8 = vpack.c.bf16 %v825_v49, %v824_v55  ;;  %v776_v57 = vpop.f32.mrf.mxu3 }
  0xef   : > { %v777_v15 = vadd.f32 %v776_v57, %v728_v62 }
  0xf0   : > { %1126 = vst [vmem:[%s1436_s22 + $0x18] sm:$0xff] %v1087_v8   ;;  %v766_v59 = vpop.f32.mrf.mxu2  ;;  %v670_v61 = vpop.f32.mrf.mxu0 }
  0xf1   : > { %v719_v63 = vpop.f32.mrf.mxu1  ;;  %v671_v0 = vadd.f32 %v1423_v50, %v670_v61  ;;  %v767_v3 = vadd.f32 %v766_v59, %v718_v11  ;;  %v814_v12 = vmul.f32 0.2, %v777_v15  ;;  %vm798_vm10 = vcmp.ge.f32.partialorder %v777_v15, 0.0 }
  0xf3   : > { %v720_v9 = vadd.f32 %v719_v63, %v671_v0  ;;  %v810_v43 = vmul.f32 0.2, %v767_v3  ;;  %vm794_vm11 = vcmp.ge.f32.partialorder %v767_v3, 0.0  ;;  %v830_v5 = vsel %vm798_vm10, %v777_v15, %v814_v12 }
  0xf5   : > { %v826_v27 = vsel %vm794_vm11, %v767_v3, %v810_v43 }
  0xf6   : > { %v778_v10 = vpop.f32.mrf.mxu3 }
  0xf7   : > { %v779_v14 = vadd.f32 %v778_v10, %v730_v6 }
  0xf8   : > { %v768_v13 = vpop.f32.mrf.mxu2  ;;  %v673_v16 = vpop.f32.mrf.mxu0 }
  0xf9   : > { %v769_v20 = vadd.f32 %v768_v13, %v720_v9  ;;  %vm799_vm12 = vcmp.ge.f32.partialorder %v779_v14, 0.0  ;;  %v815_v17 = vmul.f32 0.2, %v779_v14  ;;  %v722_v22 = vpop.f32.mrf.mxu1  ;;  %v674_v25 = vadd.f32 %v1423_v50, %v673_v16 }
  0xfb   : > { %vm795_vm13 = vcmp.ge.f32.partialorder %v769_v20, 0.0  ;;  %v811_v18 = vmul.f32 0.2, %v769_v20  ;;  %v831_v21 = vsel %vm799_vm12, %v779_v14, %v815_v17  ;;  %v723_v29 = vadd.f32 %v722_v22, %v674_v25 }
  0xfc   : > { %v1102_v24 = vpack.c.bf16 %v831_v21, %v830_v5 }
  0xfd   : > { %v827_v23 = vsel %vm795_vm13, %v769_v20, %v811_v18 }
  0xfe   : > { %v1092_v19 = vpack.c.bf16 %v827_v23, %v826_v27  ;;  %1129 = vst [vmem:[%s1436_s22 + $0x30] sm:$0xff] %v1102_v24   ;;  %v781_v7 = vpop.f32.mrf.mxu3 }
  0xff   : > { %v782_v34 = vadd.f32 %v781_v7, %v733_v31 }
 0x100   : > { %1127 = vst [vmem:[%s1436_s22 + $0x20] sm:$0xff] %v1092_v19   ;;  %v771_v28 = vpop.f32.mrf.mxu2  ;;  %v675_v30 = vpop.f32.mrf.mxu0 }
 0x101   : > { %v676_v32 = vadd.f32 %v1423_v50, %v675_v30  ;;  %v772_v26 = vadd.f32 %v771_v28, %v723_v29  ;;  %v724_v38 = vpop.f32.mrf.mxu1  ;;  %v816_v40 = vmul.f32 0.2, %v782_v34  ;;  %vm800_vm14 = vcmp.ge.f32.partialorder %v782_v34, 0.0 }
 0x103   : > { %v725_v35 = vadd.f32 %v724_v38, %v676_v32  ;;  %v812_v42 = vmul.f32 0.2, %v772_v26  ;;  %vm796_vm15 = vcmp.ge.f32.partialorder %v772_v26, 0.0  ;;  %v832_v50 = vsel %vm800_vm14, %v782_v34, %v816_v40 }
 0x105   : > { %v828_v47 = vsel %vm796_vm15, %v772_v26, %v812_v42 }
 0x106   : > { %v783_v2 = vpop.f32.mrf.mxu3 }
 0x107   : > { %v784_v60 = vadd.f32 %v783_v2, %v735_v37 }
 0x108   : > { %v773_v41 = vpop.f32.mrf.mxu2 }
 0x109   : > { %v774_v44 = vadd.f32 %v773_v41, %v725_v35  ;;  %vm801_vm0 = vcmp.ge.f32.partialorder %v784_v60, 0.0  ;;  %v817_v39 = vmul.f32 0.2, %v784_v60 }
 0x10b   : > { %vm797_vm1 = vcmp.ge.f32.partialorder %v774_v44, 0.0  ;;  %v813_v45 = vmul.f32 0.2, %v774_v44  ;;  %v833_v4 = vsel %vm801_vm0, %v784_v60, %v817_v39 }
 0x10c   : > { %v1107_v48 = vpack.c.bf16 %v833_v4, %v832_v50 }
 0x10d   : > { %v829_v46 = vsel %vm797_vm1, %v774_v44, %v813_v45 }
 0x10e   : > { %v1097_v51 = vpack.c.bf16 %v829_v46, %v828_v47  ;;  %1130 = vst [vmem:[%s1436_s22 + $0x38] sm:$0xff] %v1107_v48  }
 0x110   : > { %1128 = vst [vmem:[%s1436_s22 + $0x28] sm:$0xff] %v1097_v51  }
 0x111 PF: > { %s13_s12 = sadd.s32 1, %s1183_s12  }
 0x112   : > { %p10_p5 = scmp.ge.s32.totalorder %s13_s12, 6  }
 0x114   :  { %12 = sbr.rel (!%p10_p5) target bundleno = 1 (0x1), region = 62 }

// kernel: bidirectional_propagation.49
= control target key start
LH: loop header
LB: loop body
LE: loop exit
PB: predicated region body
PF: predicated region fallthrough
CT: control target
= control target key end

     0   :  { %s1312_s15 = smov 0   ;;  %s1594_s0 = inlined_call_operand.vmem [shape: bf16[32,18,128], index: 0, kind: input, shape index: {}]   ;;  %s1595_s1 = inlined_call_operand.vmem [shape: bf16[384,128], index: 1, kind: input, shape index: {}]   ;;  %s1596_s2 = inlined_call_operand.vmem [shape: f32[1,128], index: 2, kind: input, shape index: {}]   ;;  %s1597_s3 = inlined_call_operand.vmem [shape: bf16[512,128], index: 3, kind: input, shape index: {}]   ;;  %s1598_s4 = inlined_call_operand.vmem [shape: bf16[512,128], index: 4, kind: output, shape index: {}]  }
   0x1 LB: > { %s983_s16 = sadd.s32 4294967295, %s1285_s15   ;;  %p987_p0 = scmp.ge.s32.totalorder %s1285_s15, 1  ;;  %s1285_s15 = sphi %s1312_s15, %s14_s15  }
   0x2   : > { %p175_p1 = scmp.lt.s32.totalorder %s1285_s15, 5 }
   0x4   : > { %p176_p2 = pnand %p987_p0, %p175_p1 }
   0x5   : > { %s988_s23 = sshll.u32 (!%p176_p2), %s983_s16, 3 }
   0x6   : > { %179 = sbr.rel (%p176_p2) target bundleno = 272 (0x110), region = 36  ;;  %p208_p3 = scmp.lt.s32.totalorder (!%p176_p2), %s988_s23, 31 }
   0xb   : > { %v1099_v0 = vld [vmem:[%s1595_s1 + $0x38] sm:$0xff]  ;;  %v1098_v3 = vld [vmem:[%s1595_s1 + $0x30] sm:$0xff]  ;;  %s1600_s23 = smov (!%p208_p3, %s988_s23), 31  ;;  %v1097_v6 = vld [vmem:[%s1595_s1 + $0x28] sm:$0xff]  ;;  %vm330_vm0 = vsmask.f32 7424 }
   0xc   : > { %v1326_v1 = vld [vmem:[%s1595_s1 + $0x78] sm:$0xff]  ;;  %688 = vmatpush.bf16.msra.mxu0 %v1099_v0  ;;  %1233 = vmatpush.bf16.msra.mxu3 %v1099_v0  ;;  %v1343_v4 = vld [vmem:[%s1595_s1 + $0x70] sm:$0xff]  ;;  %s1257_s30 = smul.u32 12, %s1600_s23  ;;  %v1358_v7 = vld [vmem:[%s1595_s1 + $0x68] sm:$0xff]  ;;  %vm459_vm1 = vcmask 1046528  }
   0xd   : > { %v1331_v2 = vld [vmem:[%s1595_s1 + $0xb8] sm:$0xff]  ;;  %737 = vmatpush.bf16.msra.mxu1 %v1326_v1  ;;  %v1348_v5 = vld [vmem:[%s1595_s1 + $0xb0] sm:$0xff]  ;;  %v1363_v8 = vld [vmem:[%s1595_s1 + $0xa8] sm:$0xff] }
   0xe   : > { %786 = vmatpush.bf16.msra.mxu2 %v1331_v2  ;;  %s1368_s13 = scalar_lea.vmem %s1594_s0, %s1257_s30  ;;  %v1096_v9 = vld [vmem:[%s1595_s1 + $0x20] sm:$0xff]  ;;  %v1095_v13 = vld [vmem:[%s1595_s1 + $0x18] sm:$0xff]  ;;  %v1094_v18 = vld [vmem:[%s1595_s1 + $0x10] sm:$0xff] }
   0xf   : > { %v1378_v10 = vld [vmem:[%s1595_s1 + $0x60] sm:$0xff]  ;;  %v242_v12 = vld [vmem:[%s1368_s13 + $0x8] sm:$0x1]  ;;  %v1394_v14 = vld [vmem:[%s1595_s1 + $0x58] sm:$0xff] }
  0x10   : > { %689 = vmatpush.bf16.msra.mxu0 %v1098_v3  ;;  %1234 = vmatpush.bf16.msra.mxu3 %v1098_v3  ;;  %v1383_v11 = vld [vmem:[%s1595_s1 + $0xa0] sm:$0xff]  ;;  %v1399_v15 = vld [vmem:[%s1595_s1 + $0x98] sm:$0xff]  ;;  %v314_v16 = vunpack.c.l.b16 %v242_v12  ;;  %v1410_v19 = vld [vmem:[%s1595_s1 + $0x50] sm:$0xff] }
  0x11   : > { %738 = vmatpush.bf16.msra.mxu1 %v1343_v4  ;;  %v1117_v17 = vld [vmem:[%s1368_s13] sm:$0xff]   ;;  %v1415_v20 = vld [vmem:[%s1595_s1 + $0x90] sm:$0xff]  ;;  %v1093_v25 = vld [vmem:[%s1595_s1 + $0x8] sm:$0xff] }
  0x12   : > { %787 = vmatpush.bf16.msra.mxu2 %v1348_v5  ;;  %v334_v21 = vshll.u32 %v1117_v17, 16  ;;  %v322_v22 = vpack.c.b16 %v314_v16, %v314_v16  ;;  %v1207_v23 = vld [vmem:[%s1368_s13] sm:$0xf0]  ;;  %v1208_v24 = vld [vmem:[%s1368_s13] sm:$0xe]  ;;  %v1427_v26 = vld [vmem:[%s1595_s1 + $0x48] sm:$0xff] }
  0x13   : > { %v1432_v27 = vld [vmem:[%s1595_s1 + $0x88] sm:$0xff]  ;;  %v332_v28 = vshrl.u32 %v1117_v17, 16  ;;  %v1209_v31 = vor.u32 %v1208_v24, %v1207_v23  ;;  %v1267_v33 = vld [vmem:[%s1368_s13 + $0xc] sm:$0xf0]  ;;  %v1092_v34 = vld [vmem:[%s1595_s1] sm:$0xff] }
  0x14   : > { %690 = vmatpush.bf16.msra.mxu0 %v1097_v6  ;;  %1235 = vmatpush.bf16.msra.mxu3 %v1097_v6  ;;  %v336_v29 = vrot.slane %v334_v21, 1  ;;  %v339_v30 = vshll.u32 %v322_v22, 16  ;;  %v228_v32 = vld [vmem:[%s1368_s13 + $0xc] sm:$0xff]   ;;  %v1444_v35 = vld [vmem:[%s1595_s1 + $0x40] sm:$0xff]  ;;  %v461_v40 = vrot.slane %v322_v22, 1  ;;  %v1461_v49 = vld [vmem:[%s1368_s13 + $0x54] sm:$0xff]  }
  0x15   : > { %739 = vmatpush.bf16.msra.mxu1 %v1358_v7  ;;  %v1449_v36 = vld [vmem:[%s1595_s1 + $0x80] sm:$0xff]  ;;  %v460_v39 = vrot.slane %v1209_v31, 1  ;;  %v243_v41 = vld [vmem:[%s1368_s13 + $0x14] sm:$0x1]  ;;  %v1206_v42 = vld [vmem:[%s1368_s13 + $0x48] sm:$0xff]   ;;  %v346_v48 = vshll.u32 %v228_v32, 16 }
  0x16   : > { %788 = vmatpush.bf16.msra.mxu2 %v1363_v8  ;;  %v337_v37 = vor.u32 %v336_v29, %v332_v28  ;;  %v341_v38 = vrot.slane %v339_v30, 1  ;;  %v315_v45 = vunpack.c.l.b16 %v243_v41  ;;  %v1268_v46 = vld [vmem:[%s1368_s13 + $0xc] sm:$0xe]  ;;  %v1464_v50 = vld [vmem:[%s1368_s13 + $0x54] sm:$0xf0]  ;;  %v344_v52 = vshrl.u32 %v228_v32, 16 }
  0x17   : > { %v462_v44 = vsel %vm459_vm1, %v460_v39, %v461_v40  ;;  %v1269_v51 = vor.u32 %v1268_v46, %v1267_v33  ;;  %v348_v53 = vrot.slane %v346_v48, 1  ;;  %v244_v59 = vld [vmem:[%s1368_s13 + $0x20] sm:$0x1]  ;;  %v248_v60 = vld [vmem:[%s1368_s13 + $0x50] sm:$0x1]  ;;  %v406_v3 = vshll.u32 %v1206_v42, 16 }
  0x18   : > { %691 = vmatpush.bf16.msra.mxu0 %v1096_v9  ;;  %1236 = vmatpush.bf16.msra.mxu3 %v1096_v9  ;;  %v342_v43 = vsel %vm330_vm0, %v337_v37, %v341_v38  ;;  %v323_v47 = vpack.c.b16 %v315_v45, %v315_v45  ;;  %v316_v61 = vunpack.c.l.b16 %v244_v59  ;;  %v320_v62 = vunpack.c.l.b16 %v248_v60  ;;  %v1210_v9 = vld [vmem:[%s1368_s13 + $0x18] sm:$0xf0]  ;;  %v232_v22 = vld [vmem:[%s1368_s13 + $0x24] sm:$0xff]   ;;  %v1205_v59 = vld [vmem:[%s1368_s13 + $0x30] sm:$0xff]  }
  0x19   : > { %740 = vmatpush.bf16.msra.mxu1 %v1378_v10  ;;  %v463_v55 = vrot.slane %v1269_v51, 1  ;;  %v349_v56 = vor.u32 %v348_v53, %v344_v52  ;;  %v404_v12 = vshrl.u32 %v1206_v42, 16  ;;  %v1270_v23 = vld [vmem:[%s1368_s13 + $0x24] sm:$0xf0]  ;;  %v249_v31 = vld [vmem:[%s1368_s13 + $0x5c] sm:$0x1] }
  0x1a   : > { %789 = vmatpush.bf16.msra.mxu2 %v1383_v11  ;;  %v351_v54 = vshll.u32 %v323_v47, 16  ;;  %v464_v58 = vrot.slane %v323_v47, 1  ;;  %v324_v6 = vpack.c.b16 %v316_v61, %v316_v61  ;;  %v1271_v39 = vld [vmem:[%s1368_s13 + $0x24] sm:$0xe]  ;;  %v370_v41 = vshll.u32 %v232_v22, 16 }
  0x1b   : > { %v368_v45 = vshrl.u32 %v232_v22, 16  ;;  %v1272_v48 = vor.u32 %v1271_v39, %v1270_v23  ;;  %v1216_v61 = vld [vmem:[%s1368_s13 + $0x48] sm:$0xf0] }
  0x1c   : > { %692 = vmatpush.bf16.msra.mxu0 %v1095_v13  ;;  %1237 = vmatpush.bf16.msra.mxu3 %v1095_v13  ;;  %v353_v57 = vrot.slane %v351_v54, 1  ;;  %v465_v0 = vsel %vm459_vm1, %v463_v55, %v464_v58  ;;  %v408_v13 = vrot.slane %v406_v3, 1  ;;  %v467_v30 = vrot.slane %v324_v6, 1 }
  0x1d   : > { %741 = vmatpush.bf16.msra.mxu1 %v1394_v14  ;;  %v372_v46 = vrot.slane %v370_v41, 1  ;;  %v469_v54 = vrot.slane %v1272_v48, 1 }
  0x1e   : > { %790 = vmatpush.bf16.msra.mxu2 %v1399_v15  ;;  %v354_v63 = vsel %vm330_vm0, %v349_v56, %v353_v57  ;;  %v409_v24 = vor.u32 %v408_v13, %v404_v12 }
  0x20   : > { %693 = vmatpush.bf16.msra.mxu0 %v1094_v18  ;;  %1238 = vmatpush.bf16.msra.mxu3 %v1094_v18 }
  0x21   : > { %742 = vmatpush.bf16.msra.mxu1 %v1410_v19 }
  0x22   : > { %791 = vmatpush.bf16.msra.mxu2 %v1415_v20 }
  0x24   : > { %694 = vmatpush.bf16.msra.mxu0 %v1093_v25  ;;  %1239 = vmatpush.bf16.msra.mxu3 %v1093_v25 }
  0x25   : > { %743 = vmatpush.bf16.msra.mxu1 %v1427_v26 }
  0x26   : > { %792 = vmatpush.bf16.msra.mxu2 %v1432_v27 }
  0x28   : > { %695 = vmatpush.bf16.msra.mxu0 %v1092_v34  ;;  %1240 = vmatpush.bf16.msra.mxu3 %v1092_v34  ;;  %v321_v34 = vunpack.c.l.b16 %v249_v31 }
  0x29   : > { %744 = vmatpush.bf16.msra.mxu1 %v1444_v35 }
  0x2a   : > { %793 = vmatpush.bf16.msra.mxu2 %v1449_v36  ;;  %v1492_v40 = vpack.c.b16 %v321_v34, %v321_v34 }
  0x2b   : > { %696 = vmatmul.bf16.vlgmr.msra.gmra.mxu0 %v1117_v17  ;;  %726 = vmatmul.bf16.vlgmr.msra.gmra.mxu3 %v1206_v42  ;;  %v363_v17 = vshll.u32 %v324_v6, 16  ;;  %v416_v42 = vshrl.u32 %v1461_v49, 16 }
  0x2c   : > { %1241 = vmatpush.bf16.msrb.mxu3 %v1326_v1  ;;  %745 = vmatmul.bf16.vlgmr.msra.gmra.mxu1 %v342_v43  ;;  %v1204_v1 = vld [vmem:[%s1368_s13 + $0x18] sm:$0xff]  }
  0x2d   : > { %794 = vmatmul.bf16.vlgmr.msra.gmra.mxu2 %v462_v44  ;;  %v423_v44 = vshll.u32 %v1492_v40, 16 }
  0x2f   : > { %v425_v52 = vrot.slane %v423_v44, 1 }
  0x30   : > { %1242 = vmatpush.bf16.msrb.mxu3 %v1343_v4  ;;  %v358_v4 = vshll.u32 %v1204_v1, 16 }
  0x32   : > { %v360_v16 = vrot.slane %v358_v4, 1 }
  0x34   : > { %1243 = vmatpush.bf16.msrb.mxu3 %v1358_v7  ;;  %v1475_v7 = vpack.c.b16 %v320_v62, %v320_v62  ;;  %v1217_v62 = vld [vmem:[%s1368_s13 + $0x48] sm:$0xe] }
  0x35   : > { %v1218_v4 = vor.u32 %v1217_v62, %v1216_v61 }
  0x36   : > { %v411_v18 = vshll.u32 %v1475_v7, 16 }
  0x38   : > { %1244 = vmatpush.bf16.msrb.mxu3 %v1378_v10  ;;  %v1211_v10 = vld [vmem:[%s1368_s13 + $0x18] sm:$0xe]  ;;  %v413_v28 = vrot.slane %v411_v18, 1  ;;  %v247_v18 = vld [vmem:[%s1368_s13 + $0x44] sm:$0x1] }
  0x39   : > { %v1212_v21 = vor.u32 %v1211_v10, %v1210_v9  ;;  %v236_v9 = vld [vmem:[%s1368_s13 + $0x3c] sm:$0xff]   ;;  %v319_v23 = vunpack.c.l.b16 %v247_v18 }
  0x3a   : > { %v414_v33 = vsel %vm330_vm0, %v409_v24, %v413_v28  ;;  %v1276_v10 = vld [vmem:[%s1368_s13 + $0x3c] sm:$0xf0]  ;;  %v1274_v24 = vld [vmem:[%s1368_s13 + $0x54] sm:$0xe]  ;;  %v392_v28 = vshrl.u32 %v236_v9, 16 }
  0x3b   : > { %701 = vmatmul.bf16.gmra.mxu0 %v228_v32  ;;  %731 = vmatmul.bf16.gmra.mxu3 %v1461_v49  ;;  %v466_v29 = vrot.slane %v1212_v21, 1  ;;  %v245_v32 = vld [vmem:[%s1368_s13 + $0x2c] sm:$0x1] }
  0x3c   : > { %1245 = vmatpush.bf16.msrb.mxu3 %v1394_v14  ;;  %750 = vmatmul.bf16.gmra.mxu1 %v354_v63  ;;  %v356_v14 = vshrl.u32 %v1204_v1, 16  ;;  %v317_v38 = vunpack.c.l.b16 %v245_v32  ;;  %v1213_v63 = vld [vmem:[%s1368_s13 + $0x30] sm:$0xf0] }
  0x3d   : > { %799 = vmatmul.bf16.gmra.mxu2 %v465_v0  ;;  %v468_v37 = vsel %vm459_vm1, %v466_v29, %v467_v30  ;;  %v1214_v0 = vld [vmem:[%s1368_s13 + $0x30] sm:$0xe] }
  0x3e   : > { %v361_v25 = vor.u32 %v360_v16, %v356_v14  ;;  %v1215_v6 = vor.u32 %v1214_v0, %v1213_v63  ;;  %v478_v14 = vrot.slane %v1218_v4, 1 }
  0x40   : > { %1246 = vmatpush.bf16.msrb.mxu3 %v1410_v19  ;;  %v365_v19 = vrot.slane %v363_v17, 1  ;;  %v472_v16 = vrot.slane %v1215_v6, 1 }
  0x44   : > { %1247 = vmatpush.bf16.msrb.mxu3 %v1427_v26  ;;  %v366_v26 = vsel %vm330_vm0, %v361_v25, %v365_v19  ;;  %v1277_v25 = vld [vmem:[%s1368_s13 + $0x3c] sm:$0xe]  ;;  %v327_v19 = vpack.c.b16 %v319_v23, %v319_v23 }
  0x45   : > { %v1278_v31 = vor.u32 %v1277_v25, %v1276_v10 }
  0x46   : > { %v399_v30 = vshll.u32 %v327_v19, 16 }
  0x48   : > { %1248 = vmatpush.bf16.msrb.mxu3 %v1444_v35  ;;  %v418_v35 = vshll.u32 %v1461_v49, 16  ;;  %v246_v49 = vld [vmem:[%s1368_s13 + $0x38] sm:$0x1]  ;;  %s990_s13 = sshll.u32 %s983_s16, 4 }
  0x49   : > { %p215_p4 = scmp.lt.s32.totalorder %s990_s13, 63 }
  0x4a   : > { %v420_v43 = vrot.slane %v418_v35, 1 }
  0x4b   : > { %706 = vmatmul.bf16.gmra.mxu0 %v1204_v1  ;;  %775 = vmatmul.bf16.vlgmr.msrb.gmra.mxu3 %v414_v33  ;;  %v380_v1 = vshrl.u32 %v1205_v59, 16  ;;  %v482_v33 = vrot.slane %v1492_v40, 1  ;;  %s1602_s13 = smov (!%p215_p4, %s990_s13), 63  ;;  %v1532_v40 = vld [vmem:[%s1596_s2] ss:$0 sm:$0xff] }
  0x4c   : > { %1249 = vmatpush.bf16.msra.mxu3 %v1331_v2  ;;  %755 = vmatmul.bf16.gmra.mxu1 %v366_v26  ;;  %v325_v2 = vpack.c.b16 %v317_v38, %v317_v38  ;;  %v421_v51 = vor.u32 %v420_v43, %v416_v42  ;;  %v401_v26 = vrot.slane %v399_v30, 1  ;;  %v476_v38 = vrot.slane %v327_v19, 1  ;;  %s991_s25 = sshll.u32 %s1602_s13, 2 }
  0x4d   : > { %804 = vmatmul.bf16.gmra.mxu2 %v468_v37  ;;  %v475_v37 = vrot.slane %v1278_v31, 1  ;;  %s1540_s28 = scalar_lea.vmem %s1597_s3, %s991_s25  ;;  %s1549_s30 = scalar_lea.vmem %s1598_s4, %s991_s25 }
  0x4e   : > { %v375_v47 = vshll.u32 %v325_v2, 16  ;;  %v470_v55 = vrot.slane %v325_v2, 1  ;;  %v426_v56 = vsel %vm330_vm0, %v421_v51, %v425_v52  ;;  %v1133_v51 = vld [vmem:[%s1540_s28] sm:$0xff]  }
  0x4f   : > { %v477_v2 = vsel %vm459_vm1, %v475_v37, %v476_v38 }
  0x50   : > { %1250 = vmatpush.bf16.msra.mxu3 %v1348_v5  ;;  %v373_v5 = vor.u32 %v372_v46, %v368_v45  ;;  %v377_v53 = vrot.slane %v375_v47, 1  ;;  %v471_v58 = vsel %vm459_vm1, %v469_v54, %v470_v55  ;;  %v1135_v55 = vunpack.c.h.bf16 %v1133_v51 }
  0x52   : > { %v378_v57 = vsel %vm330_vm0, %v373_v5, %v377_v53  ;;  %v1134_v5 = vunpack.c.l.bf16 %v1133_v51 }
  0x54   : > { %1251 = vmatpush.bf16.msra.mxu3 %v1363_v8  ;;  %v318_v8 = vunpack.c.l.b16 %v246_v49 }
  0x56   : > { %v326_v60 = vpack.c.b16 %v318_v8, %v318_v8 }
  0x58   : > { %1252 = vmatpush.bf16.msra.mxu3 %v1383_v11  ;;  %v382_v11 = vshll.u32 %v1205_v59, 16  ;;  %v387_v3 = vshll.u32 %v326_v60, 16  ;;  %v473_v17 = vrot.slane %v326_v60, 1 }
  0x5a   : > { %v389_v13 = vrot.slane %v387_v3, 1  ;;  %v1219_v3 = vld [vmem:[%s1540_s28 + $0x8] sm:$0xff]  }
  0x5b   : > { %711 = vmatmul.bf16.gmra.mxu0 %v232_v22  ;;  %780 = vmatmul.bf16.gmra.mxu3 %v426_v56  ;;  %v1138_v6 = vunpack.c.l.bf16 %v1219_v3 }
  0x5c   : > { %1253 = vmatpush.bf16.msra.mxu3 %v1399_v15  ;;  %760 = vmatmul.bf16.gmra.mxu1 %v378_v57  ;;  %v384_v15 = vrot.slane %v382_v11, 1 }
  0x5d   : > { %809 = vmatmul.bf16.gmra.mxu2 %v471_v58 }
  0x5e   : > { %v385_v12 = vor.u32 %v384_v15, %v380_v1 }
  0x60   : > { %1254 = vmatpush.bf16.msra.mxu3 %v1415_v20  ;;  %v479_v20 = vrot.slane %v1475_v7, 1  ;;  %v390_v22 = vsel %vm330_vm0, %v385_v12, %v389_v13  ;;  %v394_v7 = vshll.u32 %v236_v9, 16  ;;  %v1139_v12 = vunpack.c.h.bf16 %v1219_v3  ;;  %v1224_v3 = vld [vmem:[%s1540_s28 + $0x30] sm:$0xff]  }
  0x62   : > { %v480_v21 = vsel %vm459_vm1, %v478_v14, %v479_v20  ;;  %v396_v29 = vrot.slane %v394_v7, 1 }
  0x64   : > { %1255 = vmatpush.bf16.msra.mxu3 %v1432_v27  ;;  %v474_v27 = vsel %vm459_vm1, %v472_v16, %v473_v17  ;;  %v397_v34 = vor.u32 %v396_v29, %v392_v28 }
  0x66   : > { %v402_v35 = vsel %vm330_vm0, %v397_v34, %v401_v26 }
  0x68   : > { %1256 = vmatpush.bf16.msra.mxu3 %v1449_v36  ;;  %v1275_v36 = vor.u32 %v1274_v24, %v1464_v50 }
  0x6a   : > { %v481_v32 = vrot.slane %v1275_v36, 1  ;;  %v1220_v36 = vld [vmem:[%s1540_s28 + $0x10] sm:$0xff]  }
  0x6b   : > { %716 = vmatmul.bf16.gmra.mxu0 %v1205_v59  ;;  %824 = vmatmul.bf16.vlgmr.msra.gmra.mxu3 %v480_v21  ;;  %v1142_v29 = vunpack.c.l.bf16 %v1220_v36 }
  0x6c   : > { %765 = vmatmul.bf16.gmra.mxu1 %v390_v22  ;;  %v483_v39 = vsel %vm459_vm1, %v481_v32, %v482_v33  ;;  %v1143_v32 = vunpack.c.h.bf16 %v1220_v36 }
  0x6d   : > { %814 = vmatmul.bf16.gmra.mxu2 %v474_v27 }
  0x7b   : > { %721 = vmatmul.bf16.gmra.mxu0 %v236_v9  ;;  %829 = vmatmul.bf16.gmra.mxu3 %v483_v39 }
  0x7c   : > { %770 = vmatmul.bf16.gmra.mxu1 %v402_v35 }
  0x7d   : > { %819 = vmatmul.bf16.gmra.mxu2 %v477_v2 }
  0xa8   : > { %v697_v50 = vpop.f32.mrf.mxu0 }
  0xa9   : > { %v746_v41 = vpop.f32.mrf.mxu1  ;;  %v698_v42 = vadd.f32 %v1532_v40, %v697_v50 }
  0xab   : > { %v747_v47 = vadd.f32 %v746_v41, %v698_v42 }
  0xae   : > { %v1535_v43 = vpop.f32.mrf.mxu3 }
  0xb0   : > { %v795_v44 = vpop.f32.mrf.mxu2  ;;  %v699_v45 = vpop.f32.mrf.mxu0 }
  0xb1   : > { %v748_v46 = vpop.f32.mrf.mxu1  ;;  %v700_v48 = vadd.f32 %v1532_v40, %v699_v45  ;;  %v796_v52 = vadd.f32 %v795_v44, %v747_v47  ;;  %v1221_v47 = vld [vmem:[%s1540_s28 + $0x18] sm:$0xff]  }
  0xb2   : > { %v1146_v51 = vunpack.c.l.bf16 %v1221_v47 }
  0xb3   : > { %v749_v53 = vadd.f32 %v748_v46, %v700_v48  ;;  %v867_v58 = vadd.f32 %v1134_v5, %v796_v52 }
  0xb6   : > { %v1544_v54 = vpop.f32.mrf.mxu3 }
  0xb8   : > { %v797_v49 = vpop.f32.mrf.mxu2  ;;  %v702_v8 = vpop.f32.mrf.mxu0 }
  0xb9   : > { %v798_v56 = vadd.f32 %v797_v49, %v749_v53  ;;  %v751_v57 = vpop.f32.mrf.mxu1  ;;  %v703_v60 = vadd.f32 %v1532_v40, %v702_v8  ;;  %v1147_v53 = vunpack.c.h.bf16 %v1221_v47 }
  0xbb   : > { %v868_v59 = vadd.f32 %v1135_v55, %v798_v56  ;;  %v752_v1 = vadd.f32 %v751_v57, %v703_v60 }
  0xbd   : > { %v1167_v11 = vpack.c.bf16 %v868_v59, %v867_v58 }
  0xbe   : > { %v1553_v61 = vpop.f32.mrf.mxu3 }
  0xbf   : > { %1168 = vst [vmem:[%s1549_s30] sm:$0xff] %v1167_v11  }
  0xc0   : > { %v800_v62 = vpop.f32.mrf.mxu2  ;;  %v704_v63 = vpop.f32.mrf.mxu0 }
  0xc1   : > { %v753_v0 = vpop.f32.mrf.mxu1  ;;  %v705_v15 = vadd.f32 %v1532_v40, %v704_v63  ;;  %v801_v4 = vadd.f32 %v800_v62, %v752_v1 }
  0xc3   : > { %v754_v9 = vadd.f32 %v753_v0, %v705_v15  ;;  %v869_v17 = vadd.f32 %v1138_v6, %v801_v4  ;;  %v728_v0 = vadd.f32 %v1532_v40, %v1535_v43  ;;  %v730_v6 = vadd.f32 %v1532_v40, %v1544_v54 }
  0xc6   : > { %v1557_v10 = vpop.f32.mrf.mxu3 }
  0xc8   : > { %v802_v13 = vpop.f32.mrf.mxu2  ;;  %v707_v20 = vpop.f32.mrf.mxu0 }
  0xc9   : > { %v803_v14 = vadd.f32 %v802_v13, %v754_v9  ;;  %v756_v16 = vpop.f32.mrf.mxu1  ;;  %v708_v22 = vadd.f32 %v1532_v40, %v707_v20  ;;  %v1158_v20 = vunpack.c.l.bf16 %v1224_v3 }
  0xcb   : > { %v870_v18 = vadd.f32 %v1139_v12, %v803_v14  ;;  %v757_v19 = vadd.f32 %v756_v16, %v708_v22  ;;  %v1222_v12 = vld [vmem:[%s1540_s28 + $0x20] sm:$0xff]   ;;  %v1159_v16 = vunpack.c.h.bf16 %v1224_v3 }
  0xcc   : > { %v1151_v43 = vunpack.c.h.bf16 %v1222_v12 }
  0xcd   : > { %v1172_v21 = vpack.c.bf16 %v870_v18, %v869_v17  ;;  %v1150_v18 = vunpack.c.l.bf16 %v1222_v12 }
  0xce   : > { %v776_v27 = vpop.f32.mrf.mxu3 }
  0xcf   : > { %1226 = vst [vmem:[%s1549_s30 + $0x8] sm:$0xff] %v1172_v21   ;;  %v777_v9 = vadd.f32 %v776_v27, %v728_v0 }
  0xd0   : > { %v805_v23 = vpop.f32.mrf.mxu2  ;;  %v709_v24 = vpop.f32.mrf.mxu0 }
  0xd1   : > { %v758_v25 = vpop.f32.mrf.mxu1  ;;  %v710_v7 = vadd.f32 %v1532_v40, %v709_v24  ;;  %v806_v28 = vadd.f32 %v805_v23, %v757_v19 }
  0xd3   : > { %v759_v30 = vadd.f32 %v758_v25, %v710_v7  ;;  %v871_v38 = vadd.f32 %v1142_v29, %v806_v28 }
  0xd6   : > { %v778_v31 = vpop.f32.mrf.mxu3 }
  0xd7   : > { %v779_v13 = vadd.f32 %v778_v31, %v730_v6 }
  0xd8   : > { %v807_v33 = vpop.f32.mrf.mxu2  ;;  %v712_v26 = vpop.f32.mrf.mxu0 }
  0xd9   : > { %v808_v34 = vadd.f32 %v807_v33, %v759_v30  ;;  %v761_v37 = vpop.f32.mrf.mxu1  ;;  %v713_v2 = vadd.f32 %v1532_v40, %v712_v26  ;;  %v733_v26 = vadd.f32 %v1532_v40, %v1553_v61 }
  0xdb   : > { %v872_v39 = vadd.f32 %v1143_v32, %v808_v34  ;;  %v762_v45 = vadd.f32 %v761_v37, %v713_v2 }
  0xdd   : > { %v1177_v35 = vpack.c.bf16 %v872_v39, %v871_v38  ;;  %v1225_v38 = vld [vmem:[%s1540_s28 + $0x38] sm:$0xff]  }
  0xde   : > { %v1565_v50 = vpop.f32.mrf.mxu3  ;;  %v1163_v47 = vunpack.c.h.bf16 %v1225_v38 }
  0xdf   : > { %1227 = vst [vmem:[%s1549_s30 + $0x10] sm:$0xff] %v1177_v35   ;;  %v735_v35 = vadd.f32 %v1532_v40, %v1557_v10  ;;  %v782_v2 = vadd.f32 %v1565_v50, %v733_v26 }
  0xe0   : > { %v810_v41 = vpop.f32.mrf.mxu2  ;;  %v714_v42 = vpop.f32.mrf.mxu0 }
  0xe1   : > { %v763_v44 = vpop.f32.mrf.mxu1  ;;  %v715_v46 = vadd.f32 %v1532_v40, %v714_v42  ;;  %v811_v48 = vadd.f32 %v810_v41, %v762_v45  ;;  %v1223_v41 = vld [vmem:[%s1540_s28 + $0x28] sm:$0xff]   ;;  %v1162_v45 = vunpack.c.l.bf16 %v1225_v38 }
  0xe3   : > { %v764_v52 = vadd.f32 %v763_v44, %v715_v46  ;;  %v873_v57 = vadd.f32 %v1146_v51, %v811_v48  ;;  %v1154_v51 = vunpack.c.l.bf16 %v1223_v41 }
  0xe6   : > { %v783_v5 = vpop.f32.mrf.mxu3 }
  0xe7   : > { %v784_v42 = vadd.f32 %v783_v5, %v735_v35 }
  0xe8   : > { %v812_v55 = vpop.f32.mrf.mxu2  ;;  %v717_v56 = vpop.f32.mrf.mxu0 }
  0xe9   : > { %v813_v49 = vadd.f32 %v812_v55, %v764_v52  ;;  %v766_v8 = vpop.f32.mrf.mxu1  ;;  %v718_v11 = vadd.f32 %v1532_v40, %v717_v56  ;;  %v1155_v52 = vunpack.c.h.bf16 %v1223_v41 }
  0xeb   : > { %v874_v58 = vadd.f32 %v1147_v53, %v813_v49  ;;  %v767_v15 = vadd.f32 %v766_v8, %v718_v11 }
  0xed   : > { %v1182_v59 = vpack.c.bf16 %v874_v58, %v873_v57 }
  0xee   : > { %v825_v60 = vpop.f32.mrf.mxu3 }
  0xef   : > { %1228 = vst [vmem:[%s1549_s30 + $0x18] sm:$0xff] %v1182_v59   ;;  %v826_v14 = vadd.f32 %v825_v60, %v777_v9 }
  0xf0   : > { %v815_v62 = vpop.f32.mrf.mxu2  ;;  %v719_v63 = vpop.f32.mrf.mxu0 }
  0xf1   : > { %v768_v1 = vpop.f32.mrf.mxu1  ;;  %v720_v4 = vadd.f32 %v1532_v40, %v719_v63  ;;  %v816_v17 = vadd.f32 %v815_v62, %v767_v15  ;;  %v879_v7 = vadd.f32 %v1158_v20, %v826_v14 }
  0xf3   : > { %v769_v21 = vadd.f32 %v768_v1, %v720_v4  ;;  %v875_v27 = vadd.f32 %v1150_v18, %v816_v17 }
  0xf6   : > { %v827_v22 = vpop.f32.mrf.mxu3 }
  0xf7   : > { %v828_v24 = vadd.f32 %v827_v22, %v779_v13 }
  0xf8   : > { %v817_v23 = vpop.f32.mrf.mxu2  ;;  %v722_v19 = vpop.f32.mrf.mxu0 }
  0xf9   : > { %v818_v25 = vadd.f32 %v817_v23, %v769_v21  ;;  %v880_v54 = vadd.f32 %v1159_v16, %v828_v24  ;;  %v771_v29 = vpop.f32.mrf.mxu1  ;;  %v723_v31 = vadd.f32 %v1532_v40, %v722_v19 }
  0xfb   : > { %v876_v36 = vadd.f32 %v1151_v43, %v818_v25  ;;  %v1197_v28 = vpack.c.bf16 %v880_v54, %v879_v7  ;;  %v772_v37 = vadd.f32 %v771_v29, %v723_v31 }
  0xfd   : > { %v1187_v30 = vpack.c.bf16 %v876_v36, %v875_v27  ;;  %1231 = vst [vmem:[%s1549_s30 + $0x30] sm:$0xff] %v1197_v28  }
  0xfe   : > { %v830_v32 = vpop.f32.mrf.mxu3 }
  0xff   : > { %1229 = vst [vmem:[%s1549_s30 + $0x20] sm:$0xff] %v1187_v30   ;;  %v831_v44 = vadd.f32 %v830_v32, %v782_v2 }
 0x100   : > { %v820_v33 = vpop.f32.mrf.mxu2  ;;  %v724_v34 = vpop.f32.mrf.mxu0 }
 0x101   : > { %v725_v39 = vadd.f32 %v1532_v40, %v724_v34  ;;  %v773_v46 = vpop.f32.mrf.mxu1  ;;  %v821_v48 = vadd.f32 %v820_v33, %v772_v37  ;;  %v881_v8 = vadd.f32 %v1162_v45, %v831_v44 }
 0x103   : > { %v774_v61 = vadd.f32 %v773_v46, %v725_v39  ;;  %v877_v10 = vadd.f32 %v1154_v51, %v821_v48 }
 0x106   : > { %v832_v53 = vpop.f32.mrf.mxu3 }
 0x107   : > { %v833_v49 = vadd.f32 %v832_v53, %v784_v42 }
 0x108   : > { %v822_v55 = vpop.f32.mrf.mxu2 }
 0x109   : > { %v823_v56 = vadd.f32 %v822_v55, %v774_v61  ;;  %v882_v40 = vadd.f32 %v1163_v47, %v833_v49 }
 0x10b   : > { %v878_v50 = vadd.f32 %v1155_v52, %v823_v56  ;;  %v1202_v57 = vpack.c.bf16 %v882_v40, %v881_v8 }
 0x10d   : > { %v1192_v5 = vpack.c.bf16 %v878_v50, %v877_v10  ;;  %1232 = vst [vmem:[%s1549_s30 + $0x38] sm:$0xff] %v1202_v57  }
 0x10f   : > { %1230 = vst [vmem:[%s1549_s30 + $0x28] sm:$0xff] %v1192_v5  }
 0x110 PF: > { %s14_s15 = sadd.s32 1, %s1285_s15  }
 0x111   : > { %p11_p5 = scmp.ge.s32.totalorder %s14_s15, 6  }
 0x113   :  { %13 = sbr.rel (!%p11_p5) target bundleno = 1 (0x1), region = 69 }

// kernel: bidirectional_propagation.50
= control target key start
LH: loop header
LB: loop body
LE: loop exit
PB: predicated region body
PF: predicated region fallthrough
CT: control target
= control target key end

     0   :  { %s1205_s12 = smov 0   ;;  %s1474_s0 = inlined_call_operand.vmem [shape: bf16[32,18,128], index: 0, kind: input, shape index: {}]   ;;  %s1475_s1 = inlined_call_operand.vmem [shape: bf16[384,128], index: 1, kind: input, shape index: {}]   ;;  %s1476_s2 = inlined_call_operand.vmem [shape: f32[1,128], index: 2, kind: input, shape index: {}]   ;;  %s1477_s3 = inlined_call_operand.vmem [shape: bf16[512,128], index: 3, kind: output, shape index: {}]  }
   0x1 LB: > { %s922_s13 = sadd.s32 4294967295, %s1183_s12   ;;  %p926_p0 = scmp.ge.s32.totalorder %s1183_s12, 1  ;;  %s1183_s12 = sphi %s1205_s12, %s13_s12  }
   0x2   : > { %p139_p1 = scmp.lt.s32.totalorder %s1183_s12, 5 }
   0x4   : > { %p140_p2 = pnand %p926_p0, %p139_p1 }
   0x5   : > { %s927_s20 = sshll.u32 (!%p140_p2), %s922_s13, 3  ;;  %s929_s19 = sshll.u32 (!%p140_p2), %s922_s13, 4 }
   0x6   : > { %143 = sbr.rel (%p140_p2) target bundleno = 273 (0x111), region = 32  ;;  %p165_p3 = scmp.lt.s32.totalorder (!%p140_p2), %s927_s20, 31 }
   0x7   : > { %p172_p4 = scmp.lt.s32.totalorder (!%p140_p2), %s929_s19, 63 }
   0xb   : > { %v1036_v0 = vld [vmem:[%s1475_s1 + $0x38] sm:$0xff]  ;;  %v1035_v3 = vld [vmem:[%s1475_s1 + $0x30] sm:$0xff]  ;;  %s1479_s20 = smov (!%p165_p3, %s927_s20), 31  ;;  %v1034_v6 = vld [vmem:[%s1475_s1 + $0x28] sm:$0xff]  ;;  %vm281_vm0 = vsmask.f32 7424 }
   0xc   : > { %v1219_v1 = vld [vmem:[%s1475_s1 + $0x78] sm:$0xff]  ;;  %639 = vmatpush.bf16.msra.mxu0 %v1036_v0  ;;  %1131 = vmatpush.bf16.msra.mxu3 %v1036_v0  ;;  %v1236_v4 = vld [vmem:[%s1475_s1 + $0x70] sm:$0xff]  ;;  %s1155_s27 = smul.u32 12, %s1479_s20  ;;  %v1251_v7 = vld [vmem:[%s1475_s1 + $0x68] sm:$0xff]  ;;  %vm410_vm1 = vcmask 1046528   ;;  %s1481_s19 = smov (!%p172_p4, %s929_s19), 63 }
   0xd   : > { %v1224_v2 = vld [vmem:[%s1475_s1 + $0xb8] sm:$0xff]  ;;  %688 = vmatpush.bf16.msra.mxu1 %v1219_v1  ;;  %v1241_v5 = vld [vmem:[%s1475_s1 + $0xb0] sm:$0xff]  ;;  %v1256_v8 = vld [vmem:[%s1475_s1 + $0xa8] sm:$0xff]  ;;  %s930_s20 = sshll.u32 %s1481_s19, 2 }
   0xe   : > { %737 = vmatpush.bf16.msra.mxu2 %v1224_v2  ;;  %s1261_s9 = scalar_lea.vmem %s1474_s0, %s1155_s27  ;;  %v1033_v9 = vld [vmem:[%s1475_s1 + $0x20] sm:$0xff]  ;;  %v1032_v13 = vld [vmem:[%s1475_s1 + $0x18] sm:$0xff]  ;;  %v1031_v18 = vld [vmem:[%s1475_s1 + $0x10] sm:$0xff]  ;;  %s1436_s22 = scalar_lea.vmem %s1477_s3, %s930_s20 }
   0xf   : > { %v1271_v10 = vld [vmem:[%s1475_s1 + $0x60] sm:$0xff]  ;;  %v193_v12 = vld [vmem:[%s1261_s9 + $0x8] sm:$0x1]  ;;  %v1287_v14 = vld [vmem:[%s1475_s1 + $0x58] sm:$0xff] }
  0x10   : > { %640 = vmatpush.bf16.msra.mxu0 %v1035_v3  ;;  %1132 = vmatpush.bf16.msra.mxu3 %v1035_v3  ;;  %v1276_v11 = vld [vmem:[%s1475_s1 + $0xa0] sm:$0xff]  ;;  %v1292_v15 = vld [vmem:[%s1475_s1 + $0x98] sm:$0xff]  ;;  %v265_v16 = vunpack.c.l.b16 %v193_v12  ;;  %v1303_v19 = vld [vmem:[%s1475_s1 + $0x50] sm:$0xff] }
  0x11   : > { %689 = vmatpush.bf16.msra.mxu1 %v1236_v4  ;;  %v1054_v17 = vld [vmem:[%s1261_s9] sm:$0xff]   ;;  %v1308_v20 = vld [vmem:[%s1475_s1 + $0x90] sm:$0xff]  ;;  %v1030_v25 = vld [vmem:[%s1475_s1 + $0x8] sm:$0xff] }
  0x12   : > { %738 = vmatpush.bf16.msra.mxu2 %v1241_v5  ;;  %v285_v21 = vshll.u32 %v1054_v17, 16  ;;  %v273_v22 = vpack.c.b16 %v265_v16, %v265_v16  ;;  %v1112_v23 = vld [vmem:[%s1261_s9] sm:$0xf0]  ;;  %v1113_v24 = vld [vmem:[%s1261_s9] sm:$0xe]  ;;  %v1320_v26 = vld [vmem:[%s1475_s1 + $0x48] sm:$0xff] }
  0x13   : > { %v1325_v27 = vld [vmem:[%s1475_s1 + $0x88] sm:$0xff]  ;;  %v283_v28 = vshrl.u32 %v1054_v17, 16  ;;  %v1114_v31 = vor.u32 %v1113_v24, %v1112_v23  ;;  %v1165_v33 = vld [vmem:[%s1261_s9 + $0xc] sm:$0xf0]  ;;  %v1029_v34 = vld [vmem:[%s1475_s1] sm:$0xff] }
  0x14   : > { %641 = vmatpush.bf16.msra.mxu0 %v1034_v6  ;;  %1133 = vmatpush.bf16.msra.mxu3 %v1034_v6  ;;  %v287_v29 = vrot.slane %v285_v21, 1  ;;  %v290_v30 = vshll.u32 %v273_v22, 16  ;;  %v179_v32 = vld [vmem:[%s1261_s9 + $0xc] sm:$0xff]   ;;  %v1337_v35 = vld [vmem:[%s1475_s1 + $0x40] sm:$0xff]  ;;  %v412_v40 = vrot.slane %v273_v22, 1  ;;  %v1354_v49 = vld [vmem:[%s1261_s9 + $0x54] sm:$0xff]  }
  0x15   : > { %690 = vmatpush.bf16.msra.mxu1 %v1251_v7  ;;  %v1342_v36 = vld [vmem:[%s1475_s1 + $0x80] sm:$0xff]  ;;  %v411_v39 = vrot.slane %v1114_v31, 1  ;;  %v194_v41 = vld [vmem:[%s1261_s9 + $0x14] sm:$0x1]  ;;  %v1111_v42 = vld [vmem:[%s1261_s9 + $0x48] sm:$0xff]   ;;  %v297_v48 = vshll.u32 %v179_v32, 16 }
  0x16   : > { %739 = vmatpush.bf16.msra.mxu2 %v1256_v8  ;;  %v288_v37 = vor.u32 %v287_v29, %v283_v28  ;;  %v292_v38 = vrot.slane %v290_v30, 1  ;;  %v266_v45 = vunpack.c.l.b16 %v194_v41  ;;  %v1166_v46 = vld [vmem:[%s1261_s9 + $0xc] sm:$0xe]  ;;  %v1357_v50 = vld [vmem:[%s1261_s9 + $0x54] sm:$0xf0]  ;;  %v295_v52 = vshrl.u32 %v179_v32, 16 }
  0x17   : > { %v413_v44 = vsel %vm410_vm1, %v411_v39, %v412_v40  ;;  %v1167_v51 = vor.u32 %v1166_v46, %v1165_v33  ;;  %v299_v53 = vrot.slane %v297_v48, 1  ;;  %v195_v59 = vld [vmem:[%s1261_s9 + $0x20] sm:$0x1]  ;;  %v199_v60 = vld [vmem:[%s1261_s9 + $0x50] sm:$0x1]  ;;  %v357_v3 = vshll.u32 %v1111_v42, 16 }
  0x18   : > { %642 = vmatpush.bf16.msra.mxu0 %v1033_v9  ;;  %1134 = vmatpush.bf16.msra.mxu3 %v1033_v9  ;;  %v293_v43 = vsel %vm281_vm0, %v288_v37, %v292_v38  ;;  %v274_v47 = vpack.c.b16 %v266_v45, %v266_v45  ;;  %v267_v61 = vunpack.c.l.b16 %v195_v59  ;;  %v271_v62 = vunpack.c.l.b16 %v199_v60  ;;  %v1115_v9 = vld [vmem:[%s1261_s9 + $0x18] sm:$0xf0]  ;;  %v183_v22 = vld [vmem:[%s1261_s9 + $0x24] sm:$0xff]   ;;  %v1110_v59 = vld [vmem:[%s1261_s9 + $0x30] sm:$0xff]  }
  0x19   : > { %691 = vmatpush.bf16.msra.mxu1 %v1271_v10  ;;  %v414_v55 = vrot.slane %v1167_v51, 1  ;;  %v300_v56 = vor.u32 %v299_v53, %v295_v52  ;;  %v355_v12 = vshrl.u32 %v1111_v42, 16  ;;  %v1168_v23 = vld [vmem:[%s1261_s9 + $0x24] sm:$0xf0]  ;;  %v200_v31 = vld [vmem:[%s1261_s9 + $0x5c] sm:$0x1] }
  0x1a   : > { %740 = vmatpush.bf16.msra.mxu2 %v1276_v11  ;;  %v302_v54 = vshll.u32 %v274_v47, 16  ;;  %v415_v58 = vrot.slane %v274_v47, 1  ;;  %v275_v6 = vpack.c.b16 %v267_v61, %v267_v61  ;;  %v1169_v39 = vld [vmem:[%s1261_s9 + $0x24] sm:$0xe]  ;;  %v321_v41 = vshll.u32 %v183_v22, 16 }
  0x1b   : > { %v319_v45 = vshrl.u32 %v183_v22, 16  ;;  %v1170_v48 = vor.u32 %v1169_v39, %v1168_v23  ;;  %v1121_v61 = vld [vmem:[%s1261_s9 + $0x48] sm:$0xf0] }
  0x1c   : > { %643 = vmatpush.bf16.msra.mxu0 %v1032_v13  ;;  %1135 = vmatpush.bf16.msra.mxu3 %v1032_v13  ;;  %v304_v57 = vrot.slane %v302_v54, 1  ;;  %v416_v0 = vsel %vm410_vm1, %v414_v55, %v415_v58  ;;  %v359_v13 = vrot.slane %v357_v3, 1  ;;  %v418_v30 = vrot.slane %v275_v6, 1 }
  0x1d   : > { %692 = vmatpush.bf16.msra.mxu1 %v1287_v14  ;;  %v323_v46 = vrot.slane %v321_v41, 1  ;;  %v420_v54 = vrot.slane %v1170_v48, 1 }
  0x1e   : > { %741 = vmatpush.bf16.msra.mxu2 %v1292_v15  ;;  %v305_v63 = vsel %vm281_vm0, %v300_v56, %v304_v57  ;;  %v360_v24 = vor.u32 %v359_v13, %v355_v12 }
  0x20   : > { %644 = vmatpush.bf16.msra.mxu0 %v1031_v18  ;;  %1136 = vmatpush.bf16.msra.mxu3 %v1031_v18 }
  0x21   : > { %693 = vmatpush.bf16.msra.mxu1 %v1303_v19 }
  0x22   : > { %742 = vmatpush.bf16.msra.mxu2 %v1308_v20 }
  0x24   : > { %645 = vmatpush.bf16.msra.mxu0 %v1030_v25  ;;  %1137 = vmatpush.bf16.msra.mxu3 %v1030_v25 }
  0x25   : > { %694 = vmatpush.bf16.msra.mxu1 %v1320_v26 }
  0x26   : > { %743 = vmatpush.bf16.msra.mxu2 %v1325_v27 }
  0x28   : > { %646 = vmatpush.bf16.msra.mxu0 %v1029_v34  ;;  %1138 = vmatpush.bf16.msra.mxu3 %v1029_v34  ;;  %v272_v34 = vunpack.c.l.b16 %v200_v31 }
  0x29   : > { %695 = vmatpush.bf16.msra.mxu1 %v1337_v35 }
  0x2a   : > { %744 = vmatpush.bf16.msra.mxu2 %v1342_v36  ;;  %v1385_v40 = vpack.c.b16 %v272_v34, %v272_v34 }
  0x2b   : > { %647 = vmatmul.bf16.vlgmr.msra.gmra.mxu0 %v1054_v17  ;;  %677 = vmatmul.bf16.vlgmr.msra.gmra.mxu3 %v1111_v42  ;;  %v314_v17 = vshll.u32 %v275_v6, 16  ;;  %v367_v42 = vshrl.u32 %v1354_v49, 16 }
  0x2c   : > { %1139 = vmatpush.bf16.msrb.mxu3 %v1219_v1  ;;  %696 = vmatmul.bf16.vlgmr.msra.gmra.mxu1 %v293_v43  ;;  %v1109_v1 = vld [vmem:[%s1261_s9 + $0x18] sm:$0xff]  }
  0x2d   : > { %745 = vmatmul.bf16.vlgmr.msra.gmra.mxu2 %v413_v44  ;;  %v374_v44 = vshll.u32 %v1385_v40, 16 }
  0x2f   : > { %v376_v52 = vrot.slane %v374_v44, 1 }
  0x30   : > { %1140 = vmatpush.bf16.msrb.mxu3 %v1236_v4  ;;  %v309_v4 = vshll.u32 %v1109_v1, 16 }
  0x32   : > { %v311_v16 = vrot.slane %v309_v4, 1 }
  0x34   : > { %1141 = vmatpush.bf16.msrb.mxu3 %v1251_v7  ;;  %v1368_v7 = vpack.c.b16 %v271_v62, %v271_v62  ;;  %v1122_v62 = vld [vmem:[%s1261_s9 + $0x48] sm:$0xe] }
  0x35   : > { %v1123_v4 = vor.u32 %v1122_v62, %v1121_v61 }
  0x36   : > { %v362_v18 = vshll.u32 %v1368_v7, 16 }
  0x38   : > { %1142 = vmatpush.bf16.msrb.mxu3 %v1271_v10  ;;  %v1116_v10 = vld [vmem:[%s1261_s9 + $0x18] sm:$0xe]  ;;  %v364_v28 = vrot.slane %v362_v18, 1  ;;  %v198_v18 = vld [vmem:[%s1261_s9 + $0x44] sm:$0x1] }
  0x39   : > { %v1117_v21 = vor.u32 %v1116_v10, %v1115_v9  ;;  %v187_v9 = vld [vmem:[%s1261_s9 + $0x3c] sm:$0xff]   ;;  %v270_v23 = vunpack.c.l.b16 %v198_v18 }
  0x3a   : > { %v365_v33 = vsel %vm281_vm0, %v360_v24, %v364_v28  ;;  %v1174_v10 = vld [vmem:[%s1261_s9 + $0x3c] sm:$0xf0]  ;;  %v1172_v24 = vld [vmem:[%s1261_s9 + $0x54] sm:$0xe]  ;;  %v343_v28 = vshrl.u32 %v187_v9, 16 }
  0x3b   : > { %652 = vmatmul.bf16.gmra.mxu0 %v179_v32  ;;  %682 = vmatmul.bf16.gmra.mxu3 %v1354_v49  ;;  %v417_v29 = vrot.slane %v1117_v21, 1  ;;  %v196_v32 = vld [vmem:[%s1261_s9 + $0x2c] sm:$0x1] }
  0x3c   : > { %1143 = vmatpush.bf16.msrb.mxu3 %v1287_v14  ;;  %701 = vmatmul.bf16.gmra.mxu1 %v305_v63  ;;  %v307_v14 = vshrl.u32 %v1109_v1, 16  ;;  %v268_v38 = vunpack.c.l.b16 %v196_v32  ;;  %v1118_v63 = vld [vmem:[%s1261_s9 + $0x30] sm:$0xf0] }
  0x3d   : > { %750 = vmatmul.bf16.gmra.mxu2 %v416_v0  ;;  %v419_v37 = vsel %vm410_vm1, %v417_v29, %v418_v30  ;;  %v1119_v0 = vld [vmem:[%s1261_s9 + $0x30] sm:$0xe] }
  0x3e   : > { %v312_v25 = vor.u32 %v311_v16, %v307_v14  ;;  %v1120_v6 = vor.u32 %v1119_v0, %v1118_v63  ;;  %v429_v14 = vrot.slane %v1123_v4, 1 }
  0x40   : > { %1144 = vmatpush.bf16.msrb.mxu3 %v1303_v19  ;;  %v316_v19 = vrot.slane %v314_v17, 1  ;;  %v423_v16 = vrot.slane %v1120_v6, 1 }
  0x44   : > { %1145 = vmatpush.bf16.msrb.mxu3 %v1320_v26  ;;  %v317_v26 = vsel %vm281_vm0, %v312_v25, %v316_v19  ;;  %v1175_v25 = vld [vmem:[%s1261_s9 + $0x3c] sm:$0xe]  ;;  %v278_v19 = vpack.c.b16 %v270_v23, %v270_v23 }
  0x45   : > { %v1176_v31 = vor.u32 %v1175_v25, %v1174_v10 }
  0x46   : > { %v350_v30 = vshll.u32 %v278_v19, 16 }
  0x48   : > { %1146 = vmatpush.bf16.msrb.mxu3 %v1337_v35  ;;  %v369_v35 = vshll.u32 %v1354_v49, 16  ;;  %v197_v49 = vld [vmem:[%s1261_s9 + $0x38] sm:$0x1] }
  0x4a   : > { %v371_v43 = vrot.slane %v369_v35, 1 }
  0x4b   : > { %657 = vmatmul.bf16.gmra.mxu0 %v1109_v1  ;;  %726 = vmatmul.bf16.vlgmr.msrb.gmra.mxu3 %v365_v33  ;;  %v331_v1 = vshrl.u32 %v1110_v59, 16  ;;  %v433_v33 = vrot.slane %v1385_v40, 1 }
  0x4c   : > { %1147 = vmatpush.bf16.msra.mxu3 %v1224_v2  ;;  %706 = vmatmul.bf16.gmra.mxu1 %v317_v26  ;;  %v276_v2 = vpack.c.b16 %v268_v38, %v268_v38  ;;  %v372_v51 = vor.u32 %v371_v43, %v367_v42  ;;  %v352_v26 = vrot.slane %v350_v30, 1  ;;  %v427_v38 = vrot.slane %v278_v19, 1 }
  0x4d   : > { %755 = vmatmul.bf16.gmra.mxu2 %v419_v37  ;;  %v426_v37 = vrot.slane %v1176_v31, 1 }
  0x4e   : > { %v326_v47 = vshll.u32 %v276_v2, 16  ;;  %v421_v55 = vrot.slane %v276_v2, 1  ;;  %v377_v56 = vsel %vm281_vm0, %v372_v51, %v376_v52 }
  0x4f   : > { %v428_v2 = vsel %vm410_vm1, %v426_v37, %v427_v38 }
  0x50   : > { %1148 = vmatpush.bf16.msra.mxu3 %v1241_v5  ;;  %v324_v5 = vor.u32 %v323_v46, %v319_v45  ;;  %v328_v53 = vrot.slane %v326_v47, 1  ;;  %v422_v58 = vsel %vm410_vm1, %v420_v54, %v421_v55 }
  0x52   : > { %v329_v57 = vsel %vm281_vm0, %v324_v5, %v328_v53 }
  0x54   : > { %1149 = vmatpush.bf16.msra.mxu3 %v1256_v8  ;;  %v269_v8 = vunpack.c.l.b16 %v197_v49 }
  0x56   : > { %v277_v60 = vpack.c.b16 %v269_v8, %v269_v8 }
  0x58   : > { %1150 = vmatpush.bf16.msra.mxu3 %v1276_v11  ;;  %v333_v11 = vshll.u32 %v1110_v59, 16  ;;  %v338_v3 = vshll.u32 %v277_v60, 16  ;;  %v424_v17 = vrot.slane %v277_v60, 1 }
  0x5a   : > { %v340_v13 = vrot.slane %v338_v3, 1 }
  0x5b   : > { %662 = vmatmul.bf16.gmra.mxu0 %v183_v22  ;;  %731 = vmatmul.bf16.gmra.mxu3 %v377_v56 }
  0x5c   : > { %1151 = vmatpush.bf16.msra.mxu3 %v1292_v15  ;;  %711 = vmatmul.bf16.gmra.mxu1 %v329_v57  ;;  %v335_v15 = vrot.slane %v333_v11, 1 }
  0x5d   : > { %760 = vmatmul.bf16.gmra.mxu2 %v422_v58 }
  0x5e   : > { %v336_v12 = vor.u32 %v335_v15, %v331_v1 }
  0x60   : > { %1152 = vmatpush.bf16.msra.mxu3 %v1308_v20  ;;  %v430_v20 = vrot.slane %v1368_v7, 1  ;;  %v341_v22 = vsel %vm281_vm0, %v336_v12, %v340_v13  ;;  %v345_v7 = vshll.u32 %v187_v9, 16 }
  0x62   : > { %v431_v21 = vsel %vm410_vm1, %v429_v14, %v430_v20  ;;  %v347_v29 = vrot.slane %v345_v7, 1 }
  0x64   : > { %1153 = vmatpush.bf16.msra.mxu3 %v1325_v27  ;;  %v425_v27 = vsel %vm410_vm1, %v423_v16, %v424_v17  ;;  %v348_v34 = vor.u32 %v347_v29, %v343_v28 }
  0x66   : > { %v353_v35 = vsel %vm281_vm0, %v348_v34, %v352_v26 }
  0x68   : > { %1154 = vmatpush.bf16.msra.mxu3 %v1342_v36  ;;  %v1173_v36 = vor.u32 %v1172_v24, %v1357_v50  ;;  %v1423_v50 = vld [vmem:[%s1476_s2] ss:$0 sm:$0xff] }
  0x6a   : > { %v432_v32 = vrot.slane %v1173_v36, 1 }
  0x6b   : > { %667 = vmatmul.bf16.gmra.mxu0 %v1110_v59  ;;  %775 = vmatmul.bf16.vlgmr.msra.gmra.mxu3 %v431_v21 }
  0x6c   : > { %716 = vmatmul.bf16.gmra.mxu1 %v341_v22  ;;  %v434_v39 = vsel %vm410_vm1, %v432_v32, %v433_v33 }
  0x6d   : > { %765 = vmatmul.bf16.gmra.mxu2 %v425_v27 }
  0x7b   : > { %672 = vmatmul.bf16.gmra.mxu0 %v187_v9  ;;  %780 = vmatmul.bf16.gmra.mxu3 %v434_v39 }
  0x7c   : > { %721 = vmatmul.bf16.gmra.mxu1 %v353_v35 }
  0x7d   : > { %770 = vmatmul.bf16.gmra.mxu2 %v428_v2 }
  0xa8   : > { %v648_v40 = vpop.f32.mrf.mxu0 }
  0xa9   : > { %v697_v41 = vpop.f32.mrf.mxu1  ;;  %v649_v42 = vadd.f32 %v1423_v50, %v648_v40 }
  0xab   : > { %v698_v45 = vadd.f32 %v697_v41, %v649_v42 }
  0xae   : > { %v1426_v43 = vpop.f32.mrf.mxu3 }
  0xb0   : > { %v746_v44 = vpop.f32.mrf.mxu2  ;;  %v650_v46 = vpop.f32.mrf.mxu0 }
  0xb1   : > { %v699_v47 = vpop.f32.mrf.mxu1  ;;  %v651_v48 = vadd.f32 %v1423_v50, %v650_v46  ;;  %v747_v51 = vadd.f32 %v746_v44, %v698_v45 }
  0xb3   : > { %v700_v52 = vadd.f32 %v699_v47, %v651_v48  ;;  %v802_v54 = vmul.f32 0.1, %v747_v51  ;;  %vm786_vm2 = vcmp.ge.f32.partialorder %v747_v51, 0.0 }
  0xb5   : > { %v818_v57 = vsel %vm786_vm2, %v747_v51, %v802_v54 }
  0xb6   : > { %v1431_v5 = vpop.f32.mrf.mxu3 }
  0xb8   : > { %v748_v53 = vpop.f32.mrf.mxu2  ;;  %v653_v49 = vpop.f32.mrf.mxu0 }
  0xb9   : > { %v749_v55 = vadd.f32 %v748_v53, %v700_v52  ;;  %v702_v56 = vpop.f32.mrf.mxu1  ;;  %v654_v59 = vadd.f32 %v1423_v50, %v653_v49 }
  0xbb   : > { %vm787_vm3 = vcmp.ge.f32.partialorder %v749_v55, 0.0  ;;  %v803_v8 = vmul.f32 0.1, %v749_v55  ;;  %v703_v62 = vadd.f32 %v702_v56, %v654_v59 }
  0xbd   : > { %v819_v58 = vsel %vm787_vm3, %v749_v55, %v803_v8 }
  0xbe   : > { %v1072_v11 = vpack.c.bf16 %v819_v58, %v818_v57  ;;  %v1439_v60 = vpop.f32.mrf.mxu3  ;;  %v679_v58 = vadd.f32 %v1423_v50, %v1426_v43 }
  0xc0   : > { %1073 = vst [vmem:[%s1436_s22] sm:$0xff] %v1072_v11   ;;  %v751_v61 = vpop.f32.mrf.mxu2  ;;  %v655_v63 = vpop.f32.mrf.mxu0 }
  0xc1   : > { %v704_v0 = vpop.f32.mrf.mxu1  ;;  %v656_v1 = vadd.f32 %v1423_v50, %v655_v63  ;;  %v752_v15 = vadd.f32 %v751_v61, %v703_v62 }
  0xc3   : > { %v705_v3 = vadd.f32 %v704_v0, %v656_v1  ;;  %v804_v9 = vmul.f32 0.1, %v752_v15  ;;  %vm788_vm4 = vcmp.ge.f32.partialorder %v752_v15, 0.0  ;;  %v681_v1 = vadd.f32 %v1423_v50, %v1431_v5 }
  0xc5   : > { %v820_v20 = vsel %vm788_vm4, %v752_v15, %v804_v9 }
  0xc6   : > { %v1443_v4 = vpop.f32.mrf.mxu3 }
  0xc8   : > { %v753_v6 = vpop.f32.mrf.mxu2  ;;  %v658_v12 = vpop.f32.mrf.mxu0 }
  0xc9   : > { %v754_v10 = vadd.f32 %v753_v6, %v705_v3  ;;  %v707_v13 = vpop.f32.mrf.mxu1  ;;  %v659_v17 = vadd.f32 %v1423_v50, %v658_v12 }
  0xcb   : > { %vm789_vm5 = vcmp.ge.f32.partialorder %v754_v10, 0.0  ;;  %v805_v14 = vmul.f32 0.1, %v754_v10  ;;  %v708_v27 = vadd.f32 %v707_v13, %v659_v17 }
  0xcd   : > { %v821_v16 = vsel %vm789_vm5, %v754_v10, %v805_v14 }
  0xce   : > { %v1077_v18 = vpack.c.bf16 %v821_v16, %v820_v20  ;;  %v727_v21 = vpop.f32.mrf.mxu3 }
  0xcf   : > { %v728_v62 = vadd.f32 %v727_v21, %v679_v58 }
  0xd0   : > { %1124 = vst [vmem:[%s1436_s22 + $0x8] sm:$0xff] %v1077_v18   ;;  %v756_v22 = vpop.f32.mrf.mxu2  ;;  %v660_v23 = vpop.f32.mrf.mxu0 }
  0xd1   : > { %v709_v24 = vpop.f32.mrf.mxu1  ;;  %v661_v25 = vadd.f32 %v1423_v50, %v660_v23  ;;  %v757_v19 = vadd.f32 %v756_v22, %v708_v27 }
  0xd3   : > { %v710_v7 = vadd.f32 %v709_v24, %v661_v25  ;;  %v806_v29 = vmul.f32 0.1, %v757_v19  ;;  %vm790_vm6 = vcmp.ge.f32.partialorder %v757_v19, 0.0 }
  0xd5   : > { %v822_v34 = vsel %vm790_vm6, %v757_v19, %v806_v29 }
  0xd6   : > { %v729_v36 = vpop.f32.mrf.mxu3 }
  0xd7   : > { %v730_v6 = vadd.f32 %v729_v36, %v681_v1  ;;  %v684_v36 = vadd.f32 %v1423_v50, %v1439_v60 }
  0xd8   : > { %v758_v28 = vpop.f32.mrf.mxu2  ;;  %v663_v31 = vpop.f32.mrf.mxu0 }
  0xd9   : > { %v759_v30 = vadd.f32 %v758_v28, %v710_v7  ;;  %v712_v32 = vpop.f32.mrf.mxu1  ;;  %v664_v37 = vadd.f32 %v1423_v50, %v663_v31 }
  0xdb   : > { %vm791_vm7 = vcmp.ge.f32.partialorder %v759_v30, 0.0  ;;  %v807_v33 = vmul.f32 0.1, %v759_v30  ;;  %v713_v2 = vadd.f32 %v712_v32, %v664_v37 }
  0xdd   : > { %v823_v26 = vsel %vm791_vm7, %v759_v30, %v807_v33  ;;  %v686_v33 = vadd.f32 %v1423_v50, %v1443_v4 }
  0xde   : > { %v1082_v38 = vpack.c.bf16 %v823_v26, %v822_v34  ;;  %v1449_v39 = vpop.f32.mrf.mxu3 }
  0xdf   : > { %v733_v31 = vadd.f32 %v1449_v39, %v684_v36 }
  0xe0   : > { %1125 = vst [vmem:[%s1436_s22 + $0x10] sm:$0xff] %v1082_v38   ;;  %v761_v35 = vpop.f32.mrf.mxu2  ;;  %v665_v40 = vpop.f32.mrf.mxu0 }
  0xe1   : > { %v714_v41 = vpop.f32.mrf.mxu1  ;;  %v666_v42 = vadd.f32 %v1423_v50, %v665_v40  ;;  %v762_v44 = vadd.f32 %v761_v35, %v713_v2 }
  0xe3   : > { %v715_v45 = vadd.f32 %v714_v41, %v666_v42  ;;  %v808_v48 = vmul.f32 0.1, %v762_v44  ;;  %vm792_vm8 = vcmp.ge.f32.partialorder %v762_v44, 0.0 }
  0xe5   : > { %v824_v55 = vsel %vm792_vm8, %v762_v44, %v808_v48 }
  0xe6   : > { %v734_v46 = vpop.f32.mrf.mxu3 }
  0xe7   : > { %v735_v37 = vadd.f32 %v734_v46, %v686_v33 }
  0xe8   : > { %v763_v47 = vpop.f32.mrf.mxu2  ;;  %v668_v52 = vpop.f32.mrf.mxu0 }
  0xe9   : > { %v764_v51 = vadd.f32 %v763_v47, %v715_v45  ;;  %v717_v53 = vpop.f32.mrf.mxu1  ;;  %v669_v56 = vadd.f32 %v1423_v50, %v668_v52 }
  0xeb   : > { %vm793_vm9 = vcmp.ge.f32.partialorder %v764_v51, 0.0  ;;  %v809_v54 = vmul.f32 0.1, %v764_v51  ;;  %v718_v11 = vadd.f32 %v717_v53, %v669_v56 }
  0xed   : > { %v825_v49 = vsel %vm793_vm9, %v764_v51, %v809_v54 }
  0xee   : > { %v1087_v8 = vpack.c.bf16 %v825_v49, %v824_v55  ;;  %v776_v57 = vpop.f32.mrf.mxu3 }
  0xef   : > { %v777_v15 = vadd.f32 %v776_v57, %v728_v62 }
  0xf0   : > { %1126 = vst [vmem:[%s1436_s22 + $0x18] sm:$0xff] %v1087_v8   ;;  %v766_v59 = vpop.f32.mrf.mxu2  ;;  %v670_v61 = vpop.f32.mrf.mxu0 }
  0xf1   : > { %v719_v63 = vpop.f32.mrf.mxu1  ;;  %v671_v0 = vadd.f32 %v1423_v50, %v670_v61  ;;  %v767_v3 = vadd.f32 %v766_v59, %v718_v11  ;;  %v814_v12 = vmul.f32 0.1, %v777_v15  ;;  %vm798_vm10 = vcmp.ge.f32.partialorder %v777_v15, 0.0 }
  0xf3   : > { %v720_v9 = vadd.f32 %v719_v63, %v671_v0  ;;  %v810_v43 = vmul.f32 0.1, %v767_v3  ;;  %vm794_vm11 = vcmp.ge.f32.partialorder %v767_v3, 0.0  ;;  %v830_v5 = vsel %vm798_vm10, %v777_v15, %v814_v12 }
  0xf5   : > { %v826_v27 = vsel %vm794_vm11, %v767_v3, %v810_v43 }
  0xf6   : > { %v778_v10 = vpop.f32.mrf.mxu3 }
  0xf7   : > { %v779_v14 = vadd.f32 %v778_v10, %v730_v6 }
  0xf8   : > { %v768_v13 = vpop.f32.mrf.mxu2  ;;  %v673_v16 = vpop.f32.mrf.mxu0 }
  0xf9   : > { %v769_v20 = vadd.f32 %v768_v13, %v720_v9  ;;  %vm799_vm12 = vcmp.ge.f32.partialorder %v779_v14, 0.0  ;;  %v815_v17 = vmul.f32 0.1, %v779_v14  ;;  %v722_v22 = vpop.f32.mrf.mxu1  ;;  %v674_v25 = vadd.f32 %v1423_v50, %v673_v16 }
  0xfb   : > { %vm795_vm13 = vcmp.ge.f32.partialorder %v769_v20, 0.0  ;;  %v811_v18 = vmul.f32 0.1, %v769_v20  ;;  %v831_v21 = vsel %vm799_vm12, %v779_v14, %v815_v17  ;;  %v723_v29 = vadd.f32 %v722_v22, %v674_v25 }
  0xfc   : > { %v1102_v24 = vpack.c.bf16 %v831_v21, %v830_v5 }
  0xfd   : > { %v827_v23 = vsel %vm795_vm13, %v769_v20, %v811_v18 }
  0xfe   : > { %v1092_v19 = vpack.c.bf16 %v827_v23, %v826_v27  ;;  %1129 = vst [vmem:[%s1436_s22 + $0x30] sm:$0xff] %v1102_v24   ;;  %v781_v7 = vpop.f32.mrf.mxu3 }
  0xff   : > { %v782_v34 = vadd.f32 %v781_v7, %v733_v31 }
 0x100   : > { %1127 = vst [vmem:[%s1436_s22 + $0x20] sm:$0xff] %v1092_v19   ;;  %v771_v28 = vpop.f32.mrf.mxu2  ;;  %v675_v30 = vpop.f32.mrf.mxu0 }
 0x101   : > { %v676_v32 = vadd.f32 %v1423_v50, %v675_v30  ;;  %v772_v26 = vadd.f32 %v771_v28, %v723_v29  ;;  %v724_v38 = vpop.f32.mrf.mxu1  ;;  %v816_v40 = vmul.f32 0.1, %v782_v34  ;;  %vm800_vm14 = vcmp.ge.f32.partialorder %v782_v34, 0.0 }
 0x103   : > { %v725_v35 = vadd.f32 %v724_v38, %v676_v32  ;;  %v812_v42 = vmul.f32 0.1, %v772_v26  ;;  %vm796_vm15 = vcmp.ge.f32.partialorder %v772_v26, 0.0  ;;  %v832_v50 = vsel %vm800_vm14, %v782_v34, %v816_v40 }
 0x105   : > { %v828_v47 = vsel %vm796_vm15, %v772_v26, %v812_v42 }
 0x106   : > { %v783_v2 = vpop.f32.mrf.mxu3 }
 0x107   : > { %v784_v60 = vadd.f32 %v783_v2, %v735_v37 }
 0x108   : > { %v773_v41 = vpop.f32.mrf.mxu2 }
 0x109   : > { %v774_v44 = vadd.f32 %v773_v41, %v725_v35  ;;  %vm801_vm0 = vcmp.ge.f32.partialorder %v784_v60, 0.0  ;;  %v817_v39 = vmul.f32 0.1, %v784_v60 }
 0x10b   : > { %vm797_vm1 = vcmp.ge.f32.partialorder %v774_v44, 0.0  ;;  %v813_v45 = vmul.f32 0.1, %v774_v44  ;;  %v833_v4 = vsel %vm801_vm0, %v784_v60, %v817_v39 }
 0x10c   : > { %v1107_v48 = vpack.c.bf16 %v833_v4, %v832_v50 }
 0x10d   : > { %v829_v46 = vsel %vm797_vm1, %v774_v44, %v813_v45 }
 0x10e   : > { %v1097_v51 = vpack.c.bf16 %v829_v46, %v828_v47  ;;  %1130 = vst [vmem:[%s1436_s22 + $0x38] sm:$0xff] %v1107_v48  }
 0x110   : > { %1128 = vst [vmem:[%s1436_s22 + $0x28] sm:$0xff] %v1097_v51  }
 0x111 PF: > { %s13_s12 = sadd.s32 1, %s1183_s12  }
 0x112   : > { %p10_p5 = scmp.ge.s32.totalorder %s13_s12, 6  }
 0x114   :  { %12 = sbr.rel (!%p10_p5) target bundleno = 1 (0x1), region = 62 }

// kernel: bidirectional_propagation.53
= control target key start
LH: loop header
LB: loop body
LE: loop exit
PB: predicated region body
PF: predicated region fallthrough
CT: control target
= control target key end

     0   :  { %s2317_s12 = smov 0   ;;  %s3386_s0 = inlined_call_operand.vmem [shape: bf16[32,18,128], index: 0, kind: input, shape index: {}]   ;;  %s3387_s1 = inlined_call_operand.vmem [shape: bf16[384,512], index: 1, kind: input, shape index: {}]   ;;  %s3388_s2 = inlined_call_operand.vmem [shape: f32[1,512], index: 2, kind: input, shape index: {}]   ;;  %s3389_s3 = inlined_call_operand.vmem [shape: bf16[512,512], index: 3, kind: output, shape index: {}]  }
   0x1 LB: > { %s1741_s13 = sadd.s32 4294967295, %s2295_s12   ;;  %p1745_p0 = scmp.ge.s32.totalorder %s2295_s12, 1  ;;  %s2295_s12 = sphi %s2317_s12, %s13_s12  }
   0x2   : > { %p139_p1 = scmp.lt.s32.totalorder %s2295_s12, 5 }
   0x4   : > { %p140_p2 = pnand %p1745_p0, %p139_p1 }
   0x6   : > { %143 = sbr.rel (%p140_p2) target bundleno = 564 (0x234), region = 32 }
   0xb   : > { %v1865_v0 = vld [vmem:[%s3387_s1 + $0xe0] sm:$0xf]  ;;  %v2168_v1 = vld [vmem:[%s3387_s1 + $0xec] sm:$0xf0]  ;;  %v2166_v9 = vld [vmem:[%s3387_s1 + $0xe4] sm:$0xf] }
   0xc   : > { %v1993_v2 = vld [vmem:[%s3387_s1 + $0x1e0] sm:$0xf]  ;;  %v1866_v3 = vor.u32 %v2168_v1, %v1865_v0  ;;  %v2200_v4 = vld [vmem:[%s3387_s1 + $0x1ec] sm:$0xf0]  ;;  %v1867_v10 = vld [vmem:[%s3387_s1 + $0xf0] sm:$0xf0] }
   0xd   : > { %v2121_v5 = vld [vmem:[%s3387_s1 + $0x2e0] sm:$0xf]  ;;  %v2232_v6 = vld [vmem:[%s3387_s1 + $0x2ec] sm:$0xf0]  ;;  %v1994_v7 = vor.u32 %v2200_v4, %v1993_v2  ;;  %v1870_v12 = vor.u32 %v2166_v9, %v1867_v10  ;;  %v2162_v20 = vld [vmem:[%s3387_s1 + $0xc4] sm:$0xf] }
   0xe   : > { %v2122_v8 = vor.u32 %v2232_v6, %v2121_v5  ;;  %v1849_v11 = vld [vmem:[%s3387_s1 + $0xc0] sm:$0xf]  ;;  %1031 = vmatpush.bf16.msra.mxu0 %v1866_v3  ;;  %v2164_v13 = vld [vmem:[%s3387_s1 + $0xcc] sm:$0xf0]  ;;  %v1851_v22 = vld [vmem:[%s3387_s1 + $0xd0] sm:$0xf0] }
   0xf   : > { %v1977_v14 = vld [vmem:[%s3387_s1 + $0x1c0] sm:$0xf]  ;;  %v2196_v15 = vld [vmem:[%s3387_s1 + $0x1cc] sm:$0xf0]  ;;  %1080 = vmatpush.bf16.msra.mxu1 %v1994_v7  ;;  %v1850_v16 = vor.u32 %v2164_v13, %v1849_v11  ;;  %1178 = vmatpush.bf16.msra.mxu3 %v1870_v12  ;;  %v1854_v25 = vor.u32 %v2162_v20, %v1851_v22  ;;  %v2158_v31 = vld [vmem:[%s3387_s1 + $0xa4] sm:$0xf] }
  0x10   : > { %1129 = vmatpush.bf16.msra.mxu2 %v2122_v8  ;;  %v1978_v17 = vor.u32 %v2196_v15, %v1977_v14  ;;  %v2105_v18 = vld [vmem:[%s3387_s1 + $0x2c0] sm:$0xf]  ;;  %v2228_v19 = vld [vmem:[%s3387_s1 + $0x2cc] sm:$0xf0]  ;;  %v1835_v32 = vld [vmem:[%s3387_s1 + $0xb0] sm:$0xf0] }
  0x11   : > { %v2106_v21 = vor.u32 %v2228_v19, %v2105_v18  ;;  %v1833_v23 = vld [vmem:[%s3387_s1 + $0xa0] sm:$0xf]  ;;  %v2160_v24 = vld [vmem:[%s3387_s1 + $0xac] sm:$0xf0]  ;;  %v1838_v38 = vor.u32 %v2158_v31, %v1835_v32  ;;  %v2154_v42 = vld [vmem:[%s3387_s1 + $0x84] sm:$0xf] }
  0x12   : > { %v1961_v26 = vld [vmem:[%s3387_s1 + $0x1a0] sm:$0xf]  ;;  %v2192_v27 = vld [vmem:[%s3387_s1 + $0x1ac] sm:$0xf0]  ;;  %1032 = vmatpush.bf16.msra.mxu0 %v1850_v16  ;;  %v1834_v29 = vor.u32 %v2160_v24, %v1833_v23  ;;  %v1819_v43 = vld [vmem:[%s3387_s1 + $0x90] sm:$0xf0] }
  0x13   : > { %v2089_v28 = vld [vmem:[%s3387_s1 + $0x2a0] sm:$0xf]  ;;  %v2224_v30 = vld [vmem:[%s3387_s1 + $0x2ac] sm:$0xf0]  ;;  %1081 = vmatpush.bf16.msra.mxu1 %v1978_v17  ;;  %v1962_v33 = vor.u32 %v2192_v27, %v1961_v26  ;;  %1179 = vmatpush.bf16.msra.mxu3 %v1854_v25  ;;  %v1822_v50 = vor.u32 %v2154_v42, %v1819_v43  ;;  %v2150_v54 = vld [vmem:[%s3387_s1 + $0x64] sm:$0xf] }
  0x14   : > { %1130 = vmatpush.bf16.msra.mxu2 %v2106_v21  ;;  %v2090_v34 = vor.u32 %v2224_v30, %v2089_v28  ;;  %v1817_v35 = vld [vmem:[%s3387_s1 + $0x80] sm:$0xf]  ;;  %v2156_v36 = vld [vmem:[%s3387_s1 + $0x8c] sm:$0xf0]  ;;  %v1803_v55 = vld [vmem:[%s3387_s1 + $0x70] sm:$0xf0] }
  0x15   : > { %v1945_v37 = vld [vmem:[%s3387_s1 + $0x180] sm:$0xf]  ;;  %v2188_v39 = vld [vmem:[%s3387_s1 + $0x18c] sm:$0xf0]  ;;  %v1818_v44 = vor.u32 %v2156_v36, %v1817_v35  ;;  %v1806_v62 = vor.u32 %v2150_v54, %v1803_v55  ;;  %v2146_v2 = vld [vmem:[%s3387_s1 + $0x44] sm:$0xf] }
  0x16   : > { %v2073_v40 = vld [vmem:[%s3387_s1 + $0x280] sm:$0xf]  ;;  %v2220_v41 = vld [vmem:[%s3387_s1 + $0x28c] sm:$0xf0]  ;;  %1033 = vmatpush.bf16.msra.mxu0 %v1834_v29  ;;  %v1946_v45 = vor.u32 %v2188_v39, %v1945_v37  ;;  %v1787_v3 = vld [vmem:[%s3387_s1 + $0x50] sm:$0xf0] }
  0x17   : > { %1082 = vmatpush.bf16.msra.mxu1 %v1962_v33  ;;  %v2074_v46 = vor.u32 %v2220_v41, %v2073_v40  ;;  %v1801_v47 = vld [vmem:[%s3387_s1 + $0x60] sm:$0xf]  ;;  %v2152_v48 = vld [vmem:[%s3387_s1 + $0x6c] sm:$0xf0]  ;;  %1180 = vmatpush.bf16.msra.mxu3 %v1838_v38  ;;  %v1790_v13 = vor.u32 %v2146_v2, %v1787_v3  ;;  %v2142_v14 = vld [vmem:[%s3387_s1 + $0x24] sm:$0xf] }
  0x18   : > { %1131 = vmatpush.bf16.msra.mxu2 %v2090_v34  ;;  %v1929_v49 = vld [vmem:[%s3387_s1 + $0x160] sm:$0xf]  ;;  %v2184_v51 = vld [vmem:[%s3387_s1 + $0x16c] sm:$0xf0]  ;;  %v1802_v56 = vor.u32 %v2152_v48, %v1801_v47  ;;  %v1771_v15 = vld [vmem:[%s3387_s1 + $0x30] sm:$0xf0] }
  0x19   : > { %v2057_v52 = vld [vmem:[%s3387_s1 + $0x260] sm:$0xf]  ;;  %v2216_v53 = vld [vmem:[%s3387_s1 + $0x26c] sm:$0xf0]  ;;  %v1930_v57 = vor.u32 %v2184_v51, %v1929_v49  ;;  %s1746_s26 = sshll.u32 %s1741_s13, 3  ;;  %v1774_v26 = vor.u32 %v2142_v14, %v1771_v15  ;;  %vm412_vm0 = vcmask 1046528  }
  0x1a   : > { %1034 = vmatpush.bf16.msra.mxu0 %v1818_v44  ;;  %v2058_v58 = vor.u32 %v2216_v53, %v2057_v52  ;;  %v1785_v59 = vld [vmem:[%s3387_s1 + $0x40] sm:$0xf]  ;;  %v2148_v60 = vld [vmem:[%s3387_s1 + $0x4c] sm:$0xf0]  ;;  %p166_p3 = scmp.lt.s32.totalorder %s1746_s26, 31  ;;  %s1748_s15 = sshll.u32 %s1741_s13, 4 }
  0x1b   : > { %1083 = vmatpush.bf16.msra.mxu1 %v1946_v45  ;;  %v1913_v61 = vld [vmem:[%s3387_s1 + $0x140] sm:$0xf]  ;;  %1181 = vmatpush.bf16.msra.mxu3 %v1822_v50  ;;  %v2180_v63 = vld [vmem:[%s3387_s1 + $0x14c] sm:$0xf0]  ;;  %v1786_v4 = vor.u32 %v2148_v60, %v1785_v59  ;;  %v2138_v25 = vld [vmem:[%s3387_s1 + $0x4] sm:$0xf] }
  0x1c   : > { %1132 = vmatpush.bf16.msra.mxu2 %v2074_v46  ;;  %v2041_v0 = vld [vmem:[%s3387_s1 + $0x240] sm:$0xf]  ;;  %v2212_v1 = vld [vmem:[%s3387_s1 + $0x24c] sm:$0xf0]  ;;  %v1914_v8 = vor.u32 %v2180_v63, %v1913_v61  ;;  %s3399_s26 = smov (!%p166_p3, %s1746_s26), 31  ;;  %p173_p4 = scmp.lt.s32.totalorder %s1748_s15, 63 }
  0x1d   : > { %v1769_v5 = vld [vmem:[%s3387_s1 + $0x20] sm:$0xf]  ;;  %v2144_v6 = vld [vmem:[%s3387_s1 + $0x2c] sm:$0xf0]  ;;  %v2042_v9 = vor.u32 %v2212_v1, %v2041_v0  ;;  %v1755_v27 = vld [vmem:[%s3387_s1 + $0x10] sm:$0xf0] }
  0x1e   : > { %1035 = vmatpush.bf16.msra.mxu0 %v1802_v56  ;;  %v1897_v7 = vld [vmem:[%s3387_s1 + $0x120] sm:$0xf]  ;;  %v2176_v10 = vld [vmem:[%s3387_s1 + $0x12c] sm:$0xf0]  ;;  %v1770_v18 = vor.u32 %v2144_v6, %v1769_v5  ;;  %v1873_v28 = vld [vmem:[%s3387_s1 + $0xe8] sm:$0xf]  ;;  %v1758_v41 = vor.u32 %v2138_v25, %v1755_v27 }
  0x1f   : > { %1084 = vmatpush.bf16.msra.mxu1 %v1930_v57  ;;  %v2025_v11 = vld [vmem:[%s3387_s1 + $0x220] sm:$0xf]  ;;  %v2208_v12 = vld [vmem:[%s3387_s1 + $0x22c] sm:$0xf0]  ;;  %1182 = vmatpush.bf16.msra.mxu3 %v1806_v62  ;;  %v1898_v22 = vor.u32 %v2176_v10, %v1897_v7  ;;  %v2169_v29 = vld [vmem:[%s3387_s1 + $0xf4] sm:$0xf0] }
  0x20   : > { %1133 = vmatpush.bf16.msra.mxu2 %v2058_v58  ;;  %v1753_v16 = vld [vmem:[%s3387_s1] sm:$0xf]  ;;  %v2140_v17 = vld [vmem:[%s3387_s1 + $0xc] sm:$0xf0]  ;;  %v2026_v23 = vor.u32 %v2208_v12, %v2025_v11  ;;  %s2265_s22 = smul.u32 12, %s3399_s26  ;;  %v1874_v45 = vor.u32 %v2169_v29, %v1873_v28  ;;  %s3401_s15 = smov (!%p173_p4, %s1748_s15), 63 }
  0x21   : > { %v1881_v19 = vld [vmem:[%s3387_s1 + $0x100] sm:$0xf]  ;;  %v2172_v20 = vld [vmem:[%s3387_s1 + $0x10c] sm:$0xf0]  ;;  %v2001_v30 = vld [vmem:[%s3387_s1 + $0x1e8] sm:$0xf]  ;;  %v1754_v32 = vor.u32 %v2140_v17, %v1753_v16 }
  0x22   : > { %1036 = vmatpush.bf16.msra.mxu0 %v1786_v4  ;;  %v2009_v21 = vld [vmem:[%s3387_s1 + $0x200] sm:$0xf]  ;;  %v2204_v24 = vld [vmem:[%s3387_s1 + $0x20c] sm:$0xf0]  ;;  %v2201_v31 = vld [vmem:[%s3387_s1 + $0x1f4] sm:$0xf0]  ;;  %v1882_v36 = vor.u32 %v2172_v20, %v1881_v19  ;;  %s2543_s8 = scalar_lea.vmem %s3386_s0, %s2265_s22 }
  0x23   : > { %1085 = vmatpush.bf16.msra.mxu1 %v1914_v8  ;;  %1183 = vmatpush.bf16.msra.mxu3 %v1790_v13  ;;  %v2230_v33 = vld [vmem:[%s3387_s1 + $0x2e4] sm:$0xf]  ;;  %v2123_v34 = vld [vmem:[%s3387_s1 + $0x2f0] sm:$0xf0]  ;;  %v2010_v37 = vor.u32 %v2204_v24, %v2009_v21  ;;  %v1857_v39 = vld [vmem:[%s3387_s1 + $0xc8] sm:$0xf]  ;;  %v2002_v51 = vor.u32 %v2201_v31, %v2001_v30 }
  0x24   : > { %1134 = vmatpush.bf16.msra.mxu2 %v2042_v9  ;;  %v2198_v35 = vld [vmem:[%s3387_s1 + $0x1e4] sm:$0xf]  ;;  %v1995_v38 = vld [vmem:[%s3387_s1 + $0x1f0] sm:$0xf0]  ;;  %v2165_v40 = vld [vmem:[%s3387_s1 + $0xd4] sm:$0xf0]  ;;  %v2126_v55 = vor.u32 %v2230_v33, %v2123_v34 }
  0x25   : > { %v2555_v42 = vld [vmem:[%s2543_s8] sm:$0xff]   ;;  %v195_v43 = vld [vmem:[%s2543_s8 + $0x8] sm:$0x1]  ;;  %v2566_v52 = vld [vmem:[%s2543_s8 + $0xc] sm:$0xff]   ;;  %v1998_v56 = vor.u32 %v2198_v35, %v1995_v38  ;;  %v1858_v2 = vor.u32 %v2165_v40, %v1857_v39  ;;  %vm283_vm1 = vsmask.f32 7424 }
  0x26   : > { %1037 = vmatpush.bf16.msra.mxu0 %v1770_v18  ;;  %v2253_v44 = vld [vmem:[%s2543_s8] sm:$0xf0]  ;;  %v1985_v46 = vld [vmem:[%s3387_s1 + $0x1c8] sm:$0xf]  ;;  %v267_v47 = vunpack.c.l.b16 %v195_v43  ;;  %v285_v48 = vshrl.u32 %v2555_v42, 16  ;;  %v287_v49 = vshll.u32 %v2555_v42, 16 }
  0x27   : > { %1086 = vmatpush.bf16.msra.mxu1 %v1898_v22  ;;  %1184 = vmatpush.bf16.msra.mxu3 %v1774_v26  ;;  %v2254_v50 = vld [vmem:[%s2543_s8] sm:$0xe]  ;;  %v2569_v53 = vld [vmem:[%s2543_s8 + $0xc] sm:$0xf0]  ;;  %v2197_v57 = vld [vmem:[%s3387_s1 + $0x1d4] sm:$0xf0] }
  0x28   : > { %1135 = vmatpush.bf16.msra.mxu2 %v2026_v23  ;;  %v2255_v54 = vor.u32 %v2254_v50, %v2253_v44  ;;  %v2226_v58 = vld [vmem:[%s3387_s1 + $0x2c4] sm:$0xf]  ;;  %v2107_v59 = vld [vmem:[%s3387_s1 + $0x2d0] sm:$0xf0]  ;;  %v275_v60 = vpack.c.b16 %v267_v47, %v267_v47  ;;  %v289_v61 = vrot.slane %v287_v49, 1  ;;  %v1986_v6 = vor.u32 %v2197_v57, %v1985_v46  ;;  %v2631_v38 = vld [vmem:[%s2543_s8 + $0x18] sm:$0xff]  }
  0x29   : > { %v2194_v62 = vld [vmem:[%s3387_s1 + $0x1c4] sm:$0xf]  ;;  %v1979_v63 = vld [vmem:[%s3387_s1 + $0x1d0] sm:$0xf0]  ;;  %v2278_v7 = vld [vmem:[%s2543_s8 + $0xc] sm:$0xe]  ;;  %v2110_v8 = vor.u32 %v2226_v58, %v2107_v59 }
  0x2a   : > { %1038 = vmatpush.bf16.msra.mxu0 %v1754_v32  ;;  %v413_v0 = vrot.slane %v2255_v54, 1  ;;  %v196_v1 = vld [vmem:[%s2543_s8 + $0x14] sm:$0x1]  ;;  %v290_v3 = vor.u32 %v289_v61, %v285_v48  ;;  %v292_v4 = vshll.u32 %v275_v60, 16  ;;  %v414_v5 = vrot.slane %v275_v60, 1  ;;  %v2667_v60 = vld [vmem:[%s2543_s8 + $0x24] sm:$0xff]  }
  0x2b   : > { %1087 = vmatpush.bf16.msra.mxu1 %v1882_v36  ;;  %1185 = vmatpush.bf16.msra.mxu3 %v1758_v41  ;;  %v1982_v9 = vor.u32 %v2194_v62, %v1979_v63  ;;  %v268_v12 = vunpack.c.l.b16 %v196_v1  ;;  %v1841_v14 = vld [vmem:[%s3387_s1 + $0xa8] sm:$0xf]  ;;  %v2161_v15 = vld [vmem:[%s3387_s1 + $0xb4] sm:$0xf0]  ;;  %v299_v17 = vshll.u32 %v2566_v52, 16  ;;  %v2279_v25 = vor.u32 %v2278_v7, %v2569_v53  ;;  %s2137_s13 = sshll.u32 %s3401_s15, 4 }
  0x2c   : > { %1136 = vmatpush.bf16.msra.mxu2 %v2010_v37  ;;  %v294_v10 = vrot.slane %v292_v4, 1  ;;  %v2590_v11 = vsel %vm412_vm0, %v413_v0, %v414_v5  ;;  %v1842_v18 = vor.u32 %v2161_v15, %v1841_v14  ;;  %v1969_v19 = vld [vmem:[%s3387_s1 + $0x1a8] sm:$0xf]  ;;  %v2193_v20 = vld [vmem:[%s3387_s1 + $0x1b4] sm:$0xf0]  ;;  %v297_v29 = vshrl.u32 %v2566_v52, 16  ;;  %s3191_s18 = scalar_lea.vmem %s3389_s3, %s2137_s13 }
  0x2d   : > { %1039 = vmatmul.bf16.vlgmr.msra.gmra.mxu0 %v2555_v42  ;;  %v276_v16 = vpack.c.b16 %v268_v12, %v268_v12  ;;  %v1970_v21 = vor.u32 %v2193_v20, %v1969_v19  ;;  %v2222_v22 = vld [vmem:[%s3387_s1 + $0x2a4] sm:$0xf]  ;;  %v2091_v23 = vld [vmem:[%s3387_s1 + $0x2b0] sm:$0xf0]  ;;  %v301_v30 = vrot.slane %v299_v17, 1  ;;  %v416_v32 = vrot.slane %v2279_v25, 1 }
  0x2e   : > { %1227 = vmatpush.bf16.msrb.mxu0 %v1998_v56  ;;  %1186 = vmatmul.bf16.vlgmr.msra.gmra.mxu3 %v2555_v42  ;;  %v2595_v13 = vsel %vm283_vm1, %v290_v3, %v294_v10  ;;  %v2190_v24 = vld [vmem:[%s3387_s1 + $0x1a4] sm:$0xf]  ;;  %v2094_v26 = vor.u32 %v2222_v22, %v2091_v23  ;;  %v1963_v27 = vld [vmem:[%s3387_s1 + $0x1b0] sm:$0xf0]  ;;  %v197_v36 = vld [vmem:[%s2543_s8 + $0x20] sm:$0x1] }
  0x2f   : > { %1374 = vmatpush.bf16.msrb.mxu3 %v2002_v51  ;;  %1276 = vmatpush.bf16.msrb.mxu1 %v2126_v55  ;;  %v1966_v28 = vor.u32 %v2190_v24, %v1963_v27  ;;  %v304_v31 = vshll.u32 %v276_v16, 16  ;;  %v417_v33 = vrot.slane %v276_v16, 1  ;;  %v302_v34 = vor.u32 %v301_v30, %v297_v29  ;;  %v2256_v43 = vld [vmem:[%s2543_s8 + $0x18] sm:$0xf0]  ;;  %v2257_v44 = vld [vmem:[%s2543_s8 + $0x18] sm:$0xe] }
  0x30   : > { %1325 = vmatpush.bf16.msrb.mxu2 %v1874_v45  ;;  %1088 = vmatmul.bf16.vlgmr.msra.gmra.mxu1 %v2595_v13  ;;  %v269_v40 = vunpack.c.l.b16 %v197_v36  ;;  %v311_v41 = vshll.u32 %v2631_v38, 16  ;;  %v1825_v45 = vld [vmem:[%s3387_s1 + $0x88] sm:$0xf]  ;;  %v2157_v46 = vld [vmem:[%s3387_s1 + $0x94] sm:$0xf0]  ;;  %v2258_v58 = vor.u32 %v2257_v44, %v2256_v43  ;;  %v309_v62 = vshrl.u32 %v2631_v38, 16 }
  0x31   : > { %1137 = vmatmul.bf16.vlgmr.msra.gmra.mxu2 %v2590_v11  ;;  %v306_v35 = vrot.slane %v304_v31, 1  ;;  %v2628_v37 = vsel %vm412_vm0, %v416_v32, %v417_v33  ;;  %v1953_v47 = vld [vmem:[%s3387_s1 + $0x188] sm:$0xf]  ;;  %v1826_v49 = vor.u32 %v2157_v46, %v1825_v45  ;;  %v2189_v50 = vld [vmem:[%s3387_s1 + $0x194] sm:$0xf0]  ;;  %v323_v10 = vshll.u32 %v2667_v60, 16 }
  0x32   : > { %1228 = vmatpush.bf16.msrb.mxu0 %v1982_v9  ;;  %v277_v48 = vpack.c.b16 %v269_v40, %v269_v40  ;;  %v2218_v51 = vld [vmem:[%s3387_s1 + $0x284] sm:$0xf]  ;;  %v2075_v53 = vld [vmem:[%s3387_s1 + $0x290] sm:$0xf0]  ;;  %v1954_v54 = vor.u32 %v2189_v50, %v1953_v47  ;;  %v2280_v61 = vld [vmem:[%s2543_s8 + $0x24] sm:$0xf0] }
  0x33   : > { %1375 = vmatpush.bf16.msrb.mxu3 %v1986_v6  ;;  %1277 = vmatpush.bf16.msrb.mxu1 %v2110_v8  ;;  %v2634_v39 = vsel %vm283_vm1, %v302_v34, %v306_v35  ;;  %v2078_v55 = vor.u32 %v2218_v51, %v2075_v53  ;;  %v2186_v56 = vld [vmem:[%s3387_s1 + $0x184] sm:$0xf]  ;;  %v1947_v57 = vld [vmem:[%s3387_s1 + $0x190] sm:$0xf0]  ;;  %v313_v63 = vrot.slane %v311_v41, 1  ;;  %v419_v1 = vrot.slane %v2258_v58, 1 }
  0x34   : > { %1326 = vmatpush.bf16.msrb.mxu2 %v1858_v2  ;;  %v1950_v59 = vor.u32 %v2186_v56, %v1947_v57  ;;  %v316_v0 = vshll.u32 %v277_v48, 16  ;;  %v420_v2 = vrot.slane %v277_v48, 1  ;;  %v198_v5 = vld [vmem:[%s2543_s8 + $0x2c] sm:$0x1]  ;;  %v2281_v7 = vld [vmem:[%s2543_s8 + $0x24] sm:$0xe] }
  0x35   : > { %v314_v3 = vor.u32 %v313_v63, %v309_v62  ;;  %v270_v9 = vunpack.c.l.b16 %v198_v5  ;;  %v1809_v12 = vld [vmem:[%s3387_s1 + $0x68] sm:$0xf]  ;;  %v2153_v14 = vld [vmem:[%s3387_s1 + $0x74] sm:$0xf0]  ;;  %v2214_v19 = vld [vmem:[%s3387_s1 + $0x264] sm:$0xf]  ;;  %v2282_v25 = vor.u32 %v2281_v7, %v2280_v61 }
  0x36   : > { %1229 = vmatpush.bf16.msrb.mxu0 %v1966_v28  ;;  %v318_v4 = vrot.slane %v316_v0, 1  ;;  %v2674_v6 = vsel %vm412_vm0, %v419_v1, %v420_v2  ;;  %v1937_v15 = vld [vmem:[%s3387_s1 + $0x168] sm:$0xf]  ;;  %v1810_v17 = vor.u32 %v2153_v14, %v1809_v12  ;;  %v2059_v20 = vld [vmem:[%s3387_s1 + $0x270] sm:$0xf0]  ;;  %v321_v27 = vshrl.u32 %v2667_v60, 16 }
  0x37   : > { %1376 = vmatpush.bf16.msrb.mxu3 %v1970_v21  ;;  %1278 = vmatpush.bf16.msrb.mxu1 %v2094_v26  ;;  %v278_v16 = vpack.c.b16 %v270_v9, %v270_v9  ;;  %v2062_v22 = vor.u32 %v2214_v19, %v2059_v20  ;;  %v2182_v23 = vld [vmem:[%s3387_s1 + $0x164] sm:$0xf]  ;;  %v1931_v24 = vld [vmem:[%s3387_s1 + $0x170] sm:$0xf0]  ;;  %v325_v28 = vrot.slane %v323_v10, 1  ;;  %v422_v30 = vrot.slane %v2282_v25, 1 }
  0x38   : > { %1327 = vmatpush.bf16.msrb.mxu2 %v1842_v18  ;;  %v2678_v8 = vsel %vm283_vm1, %v314_v3, %v318_v4  ;;  %v2185_v18 = vld [vmem:[%s3387_s1 + $0x174] sm:$0xf0]  ;;  %v1934_v26 = vor.u32 %v2182_v23, %v1931_v24  ;;  %v2715_v36 = vld [vmem:[%s2543_s8 + $0x30] sm:$0xff]   ;;  %v1793_v46 = vld [vmem:[%s3387_s1 + $0x48] sm:$0xf] }
  0x39   : > { %v1938_v21 = vor.u32 %v2185_v18, %v1937_v15  ;;  %v328_v29 = vshll.u32 %v278_v16, 16  ;;  %v423_v31 = vrot.slane %v278_v16, 1  ;;  %v326_v32 = vor.u32 %v325_v28, %v321_v27  ;;  %v199_v34 = vld [vmem:[%s2543_s8 + $0x38] sm:$0x1]  ;;  %v2259_v44 = vld [vmem:[%s2543_s8 + $0x30] sm:$0xf0] }
  0x3a   : > { %1230 = vmatpush.bf16.msrb.mxu0 %v1950_v59  ;;  %v271_v41 = vunpack.c.l.b16 %v199_v34  ;;  %v335_v43 = vshll.u32 %v2715_v36, 16  ;;  %v2260_v45 = vld [vmem:[%s2543_s8 + $0x30] sm:$0xe]  ;;  %v2149_v47 = vld [vmem:[%s3387_s1 + $0x54] sm:$0xf0]  ;;  %v2751_v62 = vld [vmem:[%s2543_s8 + $0x3c] sm:$0xff]  }
  0x3b   : > { %1377 = vmatpush.bf16.msrb.mxu3 %v1954_v54  ;;  %1279 = vmatpush.bf16.msrb.mxu1 %v2078_v55  ;;  %v330_v33 = vrot.slane %v328_v29, 1  ;;  %v2712_v35 = vsel %vm412_vm0, %v422_v30, %v423_v31  ;;  %v1921_v48 = vld [vmem:[%s3387_s1 + $0x148] sm:$0xf]  ;;  %v1794_v50 = vor.u32 %v2149_v47, %v1793_v46  ;;  %v2181_v51 = vld [vmem:[%s3387_s1 + $0x154] sm:$0xf0]  ;;  %v2261_v59 = vor.u32 %v2260_v45, %v2259_v44 }
  0x3c   : > { %1328 = vmatpush.bf16.msrb.mxu2 %v1826_v49  ;;  %v279_v49 = vpack.c.b16 %v271_v41, %v271_v41  ;;  %v2210_v53 = vld [vmem:[%s3387_s1 + $0x244] sm:$0xf]  ;;  %v2043_v54 = vld [vmem:[%s3387_s1 + $0x250] sm:$0xf0]  ;;  %v1922_v55 = vor.u32 %v2181_v51, %v1921_v48  ;;  %v2283_v63 = vld [vmem:[%s2543_s8 + $0x3c] sm:$0xf0] }
  0x3d   : > { %1044 = vmatmul.bf16.gmra.mxu0 %v2566_v52  ;;  %v2718_v40 = vsel %vm283_vm1, %v326_v32, %v330_v33  ;;  %v2046_v56 = vor.u32 %v2210_v53, %v2043_v54  ;;  %v2178_v57 = vld [vmem:[%s3387_s1 + $0x144] sm:$0xf]  ;;  %v1915_v58 = vld [vmem:[%s3387_s1 + $0x150] sm:$0xf0]  ;;  %v333_v0 = vshrl.u32 %v2715_v36, 16  ;;  %v337_v1 = vrot.slane %v335_v43, 1 }
  0x3e   : > { %1191 = vmatmul.bf16.gmra.mxu3 %v2566_v52  ;;  %1231 = vmatpush.bf16.msrb.mxu0 %v1934_v26  ;;  %v1918_v61 = vor.u32 %v2178_v57, %v1915_v58  ;;  %v340_v2 = vshll.u32 %v279_v49, 16  ;;  %v425_v3 = vrot.slane %v2261_v59, 1  ;;  %v426_v4 = vrot.slane %v279_v49, 1  ;;  %v200_v9 = vld [vmem:[%s2543_s8 + $0x44] sm:$0x1]  ;;  %v2799_v47 = vld [vmem:[%s2543_s8 + $0x48] sm:$0xff]  }
  0x3f   : > { %1378 = vmatpush.bf16.msrb.mxu3 %v1938_v21  ;;  %1280 = vmatpush.bf16.msrb.mxu1 %v2062_v22  ;;  %v338_v5 = vor.u32 %v337_v1, %v333_v0  ;;  %v2284_v12 = vld [vmem:[%s2543_s8 + $0x3c] sm:$0xe]  ;;  %v272_v15 = vunpack.c.l.b16 %v200_v9  ;;  %v347_v16 = vshll.u32 %v2751_v62, 16  ;;  %v2145_v18 = vld [vmem:[%s3387_s1 + $0x34] sm:$0xf0]  ;;  %v345_v31 = vshrl.u32 %v2751_v62, 16 }
  0x40   : > { %1093 = vmatmul.bf16.gmra.mxu1 %v2634_v39  ;;  %1329 = vmatpush.bf16.msrb.mxu2 %v1810_v17  ;;  %v342_v7 = vrot.slane %v340_v2, 1  ;;  %v2758_v10 = vsel %vm412_vm0, %v425_v3, %v426_v4  ;;  %v1777_v17 = vld [vmem:[%s3387_s1 + $0x28] sm:$0xf]  ;;  %v2177_v22 = vld [vmem:[%s3387_s1 + $0x134] sm:$0xf0]  ;;  %v2285_v29 = vor.u32 %v2284_v12, %v2283_v63 }
  0x41   : > { %1142 = vmatmul.bf16.gmra.mxu2 %v2628_v37  ;;  %v1905_v19 = vld [vmem:[%s3387_s1 + $0x128] sm:$0xf]  ;;  %v280_v20 = vpack.c.b16 %v272_v15, %v272_v15  ;;  %v1778_v21 = vor.u32 %v2145_v18, %v1777_v17  ;;  %v2206_v23 = vld [vmem:[%s3387_s1 + $0x224] sm:$0xf]  ;;  %v2027_v24 = vld [vmem:[%s3387_s1 + $0x230] sm:$0xf0] }
  0x42   : > { %1232 = vmatpush.bf16.msrb.mxu0 %v1918_v61  ;;  %v2762_v14 = vsel %vm283_vm1, %v338_v5, %v342_v7  ;;  %v1906_v25 = vor.u32 %v2177_v22, %v1905_v19  ;;  %v2030_v26 = vor.u32 %v2206_v23, %v2027_v24  ;;  %v2174_v27 = vld [vmem:[%s3387_s1 + $0x124] sm:$0xf]  ;;  %v1899_v28 = vld [vmem:[%s3387_s1 + $0x130] sm:$0xf0]  ;;  %v349_v32 = vrot.slane %v347_v16, 1 }
  0x43   : > { %1379 = vmatpush.bf16.msrb.mxu3 %v1922_v55  ;;  %1281 = vmatpush.bf16.msrb.mxu1 %v2046_v56  ;;  %v1902_v30 = vor.u32 %v2174_v27, %v1899_v28  ;;  %v352_v33 = vshll.u32 %v280_v20, 16  ;;  %v428_v34 = vrot.slane %v2285_v29, 1  ;;  %v429_v41 = vrot.slane %v280_v20, 1  ;;  %v201_v45 = vld [vmem:[%s2543_s8 + $0x50] sm:$0x1]  ;;  %v2836_v15 = vld [vmem:[%s2543_s8 + $0x54] sm:$0xff]  }
  0x44   : > { %1330 = vmatpush.bf16.msrb.mxu2 %v1794_v50  ;;  %v350_v43 = vor.u32 %v349_v32, %v345_v31  ;;  %v273_v49 = vunpack.c.l.b16 %v201_v45  ;;  %v359_v50 = vshll.u32 %v2799_v47, 16  ;;  %v2262_v51 = vld [vmem:[%s2543_s8 + $0x48] sm:$0xf0]  ;;  %v2263_v53 = vld [vmem:[%s2543_s8 + $0x48] sm:$0xe]  ;;  %v357_v7 = vshrl.u32 %v2799_v47, 16 }
  0x45   : > { %v354_v44 = vrot.slane %v352_v33, 1  ;;  %v2796_v46 = vsel %vm412_vm0, %v428_v34, %v429_v41  ;;  %v1761_v54 = vld [vmem:[%s3387_s1 + $0x8] sm:$0xf]  ;;  %v2141_v55 = vld [vmem:[%s3387_s1 + $0x14] sm:$0xf0]  ;;  %v2264_v4 = vor.u32 %v2263_v53, %v2262_v51  ;;  %3392 = vst [vmem:[#allocation2_spill] sm:$0xff] %v2836_v15 }
  0x46   : > { %1233 = vmatpush.bf16.msrb.mxu0 %v1902_v30  ;;  %v1889_v56 = vld [vmem:[%s3387_s1 + $0x108] sm:$0xf]  ;;  %v281_v57 = vpack.c.b16 %v273_v49, %v273_v49  ;;  %v1762_v58 = vor.u32 %v2141_v55, %v1761_v54  ;;  %v2173_v59 = vld [vmem:[%s3387_s1 + $0x114] sm:$0xf0]  ;;  %v2202_v61 = vld [vmem:[%s3387_s1 + $0x204] sm:$0xf] }
  0x47   : > { %1380 = vmatpush.bf16.msrb.mxu3 %v1906_v25  ;;  %1282 = vmatpush.bf16.msrb.mxu1 %v2030_v26  ;;  %v2802_v48 = vsel %vm283_vm1, %v350_v43, %v354_v44  ;;  %v2011_v63 = vld [vmem:[%s3387_s1 + $0x210] sm:$0xf0]  ;;  %v1890_v0 = vor.u32 %v2173_v59, %v1889_v56  ;;  %v2170_v2 = vld [vmem:[%s3387_s1 + $0x104] sm:$0xf]  ;;  %v361_v9 = vrot.slane %v359_v50, 1  ;;  %v431_v17 = vrot.slane %v2264_v4, 1 }
  0x48   : > { %1331 = vmatpush.bf16.msrb.mxu2 %v1778_v21  ;;  %v2014_v1 = vor.u32 %v2202_v61, %v2011_v63  ;;  %v1883_v3 = vld [vmem:[%s3387_s1 + $0x110] sm:$0xf0]  ;;  %v364_v12 = vshll.u32 %v281_v57, 16  ;;  %v2286_v16 = vld [vmem:[%s2543_s8 + $0x54] sm:$0xf0]  ;;  %v432_v18 = vrot.slane %v281_v57, 1 }
  0x49   : > { %v1886_v5 = vor.u32 %v2170_v2, %v1883_v3  ;;  %v362_v19 = vor.u32 %v361_v9, %v357_v7  ;;  %v202_v21 = vld [vmem:[%s2543_s8 + $0x5c] sm:$0x1]  ;;  %v2287_v23 = vld [vmem:[%s2543_s8 + $0x54] sm:$0xe]  ;;  %v2199_v26 = vld [vmem:[%s3387_s1 + $0x1ec] sm:$0xf] }
  0x4a   : > { %v366_v20 = vrot.slane %v364_v12, 1  ;;  %v2842_v22 = vsel %vm412_vm0, %v431_v17, %v432_v18  ;;  %v274_v25 = vunpack.c.l.b16 %v202_v21  ;;  %v2003_v27 = vld [vmem:[%s3387_s1 + $0x1f8] sm:$0xf0]  ;;  %v2231_v28 = vld [vmem:[%s3387_s1 + $0x2ec] sm:$0xf]  ;;  %v371_v30 = vshll.u32 %v2836_v15, 16 }
  0x4b   : > { %1381 = vmatpush.bf16.msrb.mxu3 %v1890_v0  ;;  %1283 = vmatpush.bf16.msrb.mxu1 %v2014_v1  ;;  %v2006_v31 = vor.u32 %v2199_v26, %v2003_v27  ;;  %v2131_v32 = vld [vmem:[%s3387_s1 + $0x2f8] sm:$0xf0]  ;;  %v2167_v34 = vld [vmem:[%s3387_s1 + $0xec] sm:$0xf]  ;;  %v2288_v43 = vor.u32 %v2287_v23, %v2286_v16  ;;  %v369_v45 = vshrl.u32 %v2836_v15, 16 }
  0x4c   : > { %1332 = vmatpush.bf16.msrb.mxu2 %v1762_v58  ;;  %1234 = vmatpush.bf16.msrb.mxu0 %v1886_v5  ;;  %v2846_v24 = vsel %vm283_vm1, %v362_v19, %v366_v20  ;;  %v282_v29 = vpack.c.b16 %v274_v25, %v274_v25  ;;  %v2134_v33 = vor.u32 %v2231_v28, %v2131_v32  ;;  %v1875_v41 = vld [vmem:[%s3387_s1 + $0xf8] sm:$0xf0]  ;;  %v373_v49 = vrot.slane %v371_v30, 1  ;;  %v2129_v51 = vld [vmem:[%s3387_s1 + $0x2e8] sm:$0xf] }
  0x4d   : > { %1049 = vmatmul.bf16.gmra.mxu0 %v2631_v38  ;;  %v1878_v44 = vor.u32 %v2167_v34, %v1875_v41  ;;  %v2233_v53 = vld [vmem:[%s3387_s1 + $0x2f4] sm:$0xf0]  ;;  %v434_v54 = vrot.slane %v2288_v43, 1  ;;  %v2195_v63 = vld [vmem:[%s3387_s1 + $0x1cc] sm:$0xf] }
  0x4e   : > { %1196 = vmatmul.bf16.gmra.mxu3 %v2631_v38  ;;  %v376_v50 = vshll.u32 %v282_v29, 16  ;;  %v435_v55 = vrot.slane %v282_v29, 1  ;;  %v2130_v56 = vor.u32 %v2233_v53, %v2129_v51  ;;  %v374_v57 = vor.u32 %v373_v49, %v369_v45  ;;  %v1987_v0 = vld [vmem:[%s3387_s1 + $0x1d8] sm:$0xf0]  ;;  %v2227_v1 = vld [vmem:[%s3387_s1 + $0x2cc] sm:$0xf] }
  0x4f   : > { %1570 = vmatpush.bf16.msra.mxu3 %v2134_v33  ;;  %1472 = vmatpush.bf16.msra.mxu1 %v1878_v44  ;;  %v1990_v2 = vor.u32 %v2195_v63, %v1987_v0  ;;  %v2115_v3 = vld [vmem:[%s3387_s1 + $0x2d8] sm:$0xf0]  ;;  %v2163_v5 = vld [vmem:[%s3387_s1 + $0xcc] sm:$0xf]  ;;  %v2908_v9 = vld [vmem:[%s3388_s2] sm:$0xf] }
  0x50   : > { %1098 = vmatmul.bf16.gmra.mxu1 %v2678_v8  ;;  %1521 = vmatpush.bf16.msra.mxu2 %v2006_v31  ;;  %v378_v58 = vrot.slane %v376_v50, 1  ;;  %v2879_v59 = vsel %vm412_vm0, %v434_v54, %v435_v55  ;;  %v2118_v4 = vor.u32 %v2227_v1, %v2115_v3  ;;  %v1859_v7 = vld [vmem:[%s3387_s1 + $0xd8] sm:$0xf0]  ;;  %3393 = vst [vmem:[#allocation3_spill] sm:$0xff] %v2908_v9  ;;  %v2911_v16 = vperm.slane %v2908_v9, 0 }
  0x51   : > { %1147 = vmatmul.bf16.gmra.mxu2 %v2674_v6  ;;  %1423 = vmatpush.bf16.msra.mxu0 %v2130_v56  ;;  %v1862_v12 = vor.u32 %v2163_v5, %v1859_v7  ;;  %v2113_v17 = vld [vmem:[%s3387_s1 + $0x2c8] sm:$0xf]  ;;  %v2229_v18 = vld [vmem:[%s3387_s1 + $0x2d4] sm:$0xf0]  ;;  %v2191_v28 = vld [vmem:[%s3387_s1 + $0x1ac] sm:$0xf] }
  0x52   : > { %v2882_v61 = vsel %vm283_vm1, %v374_v57, %v378_v58  ;;  %v2114_v19 = vor.u32 %v2229_v18, %v2113_v17  ;;  %v1971_v29 = vld [vmem:[%s3387_s1 + $0x1b8] sm:$0xf0]  ;;  %v2223_v30 = vld [vmem:[%s3387_s1 + $0x2ac] sm:$0xf]  ;;  %v2097_v51 = vld [vmem:[%s3387_s1 + $0x2a8] sm:$0xf] }
  0x53   : > { %1571 = vmatpush.bf16.msra.mxu3 %v2118_v4  ;;  %1473 = vmatpush.bf16.msra.mxu1 %v1862_v12  ;;  %v1974_v32 = vor.u32 %v2191_v28, %v1971_v29  ;;  %v2159_v43 = vld [vmem:[%s3387_s1 + $0xac] sm:$0xf]  ;;  %v1843_v44 = vld [vmem:[%s3387_s1 + $0xb8] sm:$0xf0]  ;;  %v2225_v53 = vld [vmem:[%s3387_s1 + $0x2b4] sm:$0xf0] }
  0x54   : > { %1522 = vmatpush.bf16.msra.mxu2 %v1990_v2  ;;  %v1846_v45 = vor.u32 %v2159_v43, %v1843_v44  ;;  %v2098_v54 = vor.u32 %v2225_v53, %v2097_v51  ;;  %v2187_v4 = vld [vmem:[%s3387_s1 + $0x18c] sm:$0xf]  ;;  %v1955_v5 = vld [vmem:[%s3387_s1 + $0x198] sm:$0xf0] }
  0x55   : > { %1424 = vmatpush.bf16.msra.mxu0 %v2114_v19  ;;  %v2219_v7 = vld [vmem:[%s3387_s1 + $0x28c] sm:$0xf]  ;;  %v1958_v17 = vor.u32 %v2187_v4, %v1955_v5  ;;  %v2083_v18 = vld [vmem:[%s3387_s1 + $0x298] sm:$0xf0] }
  0x56   : > { %v2183_v53 = vld [vmem:[%s3387_s1 + $0x16c] sm:$0xf]  ;;  %v1811_v5 = vld [vmem:[%s3387_s1 + $0x78] sm:$0xf0] }
  0x57   : > { %1474 = vmatpush.bf16.msra.mxu1 %v1846_v45  ;;  %v2151_v4 = vld [vmem:[%s3387_s1 + $0x6c] sm:$0xf] }
  0x58   : > { %1523 = vmatpush.bf16.msra.mxu2 %v1974_v32 }
  0x59   : > { %1425 = vmatpush.bf16.msra.mxu0 %v2098_v54  ;;  %v1939_v54 = vld [vmem:[%s3387_s1 + $0x178] sm:$0xf0] }
  0x5c   : > { %1524 = vmatpush.bf16.msra.mxu2 %v1958_v17 }
  0x5d   : > { %1054 = vmatmul.bf16.gmra.mxu0 %v2667_v60 }
  0x5e   : > { %1201 = vmatmul.bf16.gmra.mxu3 %v2667_v60 }
  0x60   : > { %1103 = vmatmul.bf16.gmra.mxu1 %v2718_v40 }
  0x61   : > { %1152 = vmatmul.bf16.gmra.mxu2 %v2712_v35 }
  0x6d   : > { %1059 = vmatmul.bf16.gmra.mxu0 %v2715_v36 }
  0x6e   : > { %1206 = vmatmul.bf16.gmra.mxu3 %v2715_v36 }
  0x70   : > { %1108 = vmatmul.bf16.gmra.mxu1 %v2762_v14 }
  0x71   : > { %1157 = vmatmul.bf16.gmra.mxu2 %v2758_v10 }
  0x7d   : > { %1064 = vmatmul.bf16.gmra.mxu0 %v2751_v62 }
  0x7e   : > { %1211 = vmatmul.bf16.gmra.mxu3 %v2751_v62 }
  0x80   : > { %1113 = vmatmul.bf16.gmra.mxu1 %v2802_v48 }
  0x81   : > { %1162 = vmatmul.bf16.gmra.mxu2 %v2796_v46 }
  0x8d   : > { %1069 = vmatmul.bf16.gmra.mxu0 %v2799_v47 }
  0x8e   : > { %1216 = vmatmul.bf16.gmra.mxu3 %v2799_v47 }
  0x90   : > { %1118 = vmatmul.bf16.gmra.mxu1 %v2846_v24 }
  0x91   : > { %1167 = vmatmul.bf16.gmra.mxu2 %v2842_v22 }
  0x9d   : > { %1074 = vmatmul.bf16.gmra.mxu0 %v2836_v15 }
  0x9e   : > { %1221 = vmatmul.bf16.gmra.mxu3 %v2836_v15 }
  0xa0   : > { %1123 = vmatmul.bf16.gmra.mxu1 %v2882_v61 }
  0xa1   : > { %1172 = vmatmul.bf16.gmra.mxu2 %v2879_v59 }
  0xaa   : > { %v1040_v20 = vpop.f32.mrf.mxu0 }
  0xab   : > { %v1041_v21 = vadd.f32 %v1040_v20, %v2911_v16 }
  0xad   : > { %1235 = vmatmul.bf16.vlgmr.msrb.gmra.mxu0 %v2595_v13  ;;  %v1089_v23 = vpop.f32.mrf.mxu1 }
  0xae   : > { %1382 = vmatmul.bf16.vlgmr.msrb.gmra.mxu3 %v2595_v13  ;;  %v1090_v25 = vadd.f32 %v1089_v23, %v1041_v21  ;;  %v2086_v21 = vor.u32 %v2219_v7, %v2083_v18  ;;  %v2155_v23 = vld [vmem:[%s3387_s1 + $0x8c] sm:$0xf]  ;;  %v1814_v7 = vor.u32 %v2151_v4, %v1811_v5  ;;  %v2065_v18 = vld [vmem:[%s3387_s1 + $0x268] sm:$0xf] }
  0xaf   : > { %v2049_v5 = vld [vmem:[%s3387_s1 + $0x248] sm:$0xf] }
  0xb0   : > { %1284 = vmatmul.bf16.vlgmr.msrb.gmra.mxu1 %v2590_v11 }
  0xb1   : > { %1333 = vmatmul.bf16.vlgmr.msrb.gmra.mxu2 %v2555_v42  ;;  %v2924_v26 = vpop.f32.mrf.mxu3  ;;  %v2099_v42 = vld [vmem:[%s3387_s1 + $0x2b8] sm:$0xf0] }
  0xb2   : > { %v1042_v27 = vpop.f32.mrf.mxu0  ;;  %v2102_v41 = vor.u32 %v2223_v30, %v2099_v42  ;;  %v2081_v30 = vld [vmem:[%s3387_s1 + $0x288] sm:$0xf] }
  0xb3   : > { %v1043_v34 = vadd.f32 %v1042_v27, %v2911_v16 }
  0xb4   : > { %v1138_v31 = vpop.f32.mrf.mxu2  ;;  %1572 = vmatpush.bf16.msra.mxu3 %v2102_v41 }
  0xb5   : > { %v2938_v33 = vadd.f32 %v1138_v31, %v1090_v25  ;;  %v1091_v49 = vpop.f32.mrf.mxu1  ;;  %v1827_v25 = vld [vmem:[%s3387_s1 + $0x98] sm:$0xf0]  ;;  %v2221_v31 = vld [vmem:[%s3387_s1 + $0x294] sm:$0xf0] }
  0xb6   : > { %v1092_v50 = vadd.f32 %v1091_v49, %v1043_v34  ;;  %v1830_v27 = vor.u32 %v2155_v23, %v1827_v25  ;;  %v2082_v32 = vor.u32 %v2221_v31, %v2081_v30 }
  0xb8   : > { %1573 = vmatpush.bf16.msra.mxu3 %v2086_v21  ;;  %1475 = vmatpush.bf16.msra.mxu1 %v1830_v27 }
  0xb9   : > { %v2953_v55 = vpop.f32.mrf.mxu3  ;;  %1426 = vmatpush.bf16.msra.mxu0 %v2082_v32 }
  0xba   : > { %v1045_v56 = vpop.f32.mrf.mxu0 }
  0xbb   : > { %v1046_v63 = vadd.f32 %v1045_v56, %v2911_v16  ;;  %v2215_v56 = vld [vmem:[%s3387_s1 + $0x26c] sm:$0xf] }
  0xbc   : > { %v1140_v57 = vpop.f32.mrf.mxu2  ;;  %1476 = vmatpush.bf16.msra.mxu1 %v1814_v7  ;;  %v2213_v7 = vld [vmem:[%s3387_s1 + $0x254] sm:$0xf0] }
  0xbd   : > { %v2955_v58 = vadd.f32 %v1140_v57, %v1092_v50  ;;  %1240 = vmatmul.bf16.gmra.mxu0 %v2634_v39  ;;  %v1094_v0 = vpop.f32.mrf.mxu1 }
  0xbe   : > { %1387 = vmatmul.bf16.gmra.mxu3 %v2634_v39  ;;  %v1095_v1 = vadd.f32 %v1094_v0, %v1046_v63  ;;  %v1942_v63 = vor.u32 %v2183_v53, %v1939_v54  ;;  %v2051_v53 = vld [vmem:[%s3387_s1 + $0x258] sm:$0xf0] }
  0xc0   : > { %1289 = vmatmul.bf16.gmra.mxu1 %v2628_v37  ;;  %1525 = vmatpush.bf16.msra.mxu2 %v1942_v63  ;;  %v2147_v63 = vld [vmem:[%s3387_s1 + $0x4c] sm:$0xf] }
  0xc1   : > { %1338 = vmatmul.bf16.gmra.mxu2 %v2566_v52  ;;  %v2962_v2 = vpop.f32.mrf.mxu3 }
  0xc2   : > { %v1047_v3 = vpop.f32.mrf.mxu0 }
  0xc3   : > { %v1048_v20 = vadd.f32 %v1047_v3, %v2911_v16 }
  0xc4   : > { %v1143_v12 = vpop.f32.mrf.mxu2 }
  0xc5   : > { %v2976_v19 = vadd.f32 %v1143_v12, %v1095_v1  ;;  %v1096_v28 = vpop.f32.mrf.mxu1 }
  0xc6   : > { %v1097_v29 = vadd.f32 %v1096_v28, %v1048_v20  ;;  %v2217_v20 = vld [vmem:[%s3387_s1 + $0x274] sm:$0xf0] }
  0xc7   : > { %v2066_v21 = vor.u32 %v2217_v20, %v2065_v18 }
  0xc9   : > { %v2991_v42 = vpop.f32.mrf.mxu3  ;;  %1427 = vmatpush.bf16.msra.mxu0 %v2066_v21 }
  0xca   : > { %v1050_v34 = vpop.f32.mrf.mxu0 }
  0xcb   : > { %v1051_v44 = vadd.f32 %v1050_v34, %v2911_v16 }
  0xcc   : > { %v1145_v41 = vpop.f32.mrf.mxu2 }
  0xcd   : > { %v2993_v43 = vadd.f32 %v1145_v41, %v1097_v29  ;;  %1245 = vmatmul.bf16.gmra.mxu0 %v2678_v8  ;;  %v1099_v45 = vpop.f32.mrf.mxu1  ;;  %v2179_v41 = vld [vmem:[%s3387_s1 + $0x14c] sm:$0xf] }
  0xce   : > { %1392 = vmatmul.bf16.gmra.mxu3 %v2678_v8  ;;  %v1100_v49 = vadd.f32 %v1099_v45, %v1051_v44  ;;  %v1923_v44 = vld [vmem:[%s3387_s1 + $0x158] sm:$0xf0]  ;;  %v2211_v45 = vld [vmem:[%s3387_s1 + $0x24c] sm:$0xf] }
  0xd0   : > { %1294 = vmatmul.bf16.gmra.mxu1 %v2674_v6 }
  0xd1   : > { %1343 = vmatmul.bf16.gmra.mxu2 %v2631_v38  ;;  %v3000_v50 = vpop.f32.mrf.mxu3  ;;  %v2067_v38 = vld [vmem:[%s3387_s1 + $0x278] sm:$0xf0] }
  0xd2   : > { %v1052_v51 = vpop.f32.mrf.mxu0  ;;  %v2070_v3 = vor.u32 %v2215_v56, %v2067_v38  ;;  %v1795_v38 = vld [vmem:[%s3387_s1 + $0x58] sm:$0xf0] }
  0xd3   : > { %v1053_v1 = vadd.f32 %v1052_v51, %v2911_v16  ;;  %v1926_v51 = vor.u32 %v2179_v41, %v1923_v44  ;;  %v1907_v41 = vld [vmem:[%s3387_s1 + $0x138] sm:$0xf0]  ;;  %v2207_v44 = vld [vmem:[%s3387_s1 + $0x22c] sm:$0xf] }
  0xd4   : > { %v1148_v57 = vpop.f32.mrf.mxu2  ;;  %1574 = vmatpush.bf16.msra.mxu3 %v2070_v3 }
  0xd5   : > { %v3014_v0 = vadd.f32 %v1148_v57, %v1100_v49  ;;  %v1101_v12 = vpop.f32.mrf.mxu1  ;;  %v2054_v57 = vor.u32 %v2211_v45, %v2051_v53  ;;  %1526 = vmatpush.bf16.msra.mxu2 %v1926_v51 }
  0xd6   : > { %v1102_v17 = vadd.f32 %v1101_v12, %v1053_v1  ;;  %v1798_v1 = vor.u32 %v2147_v63, %v1795_v38  ;;  %v2050_v12 = vor.u32 %v2213_v7, %v2049_v5  ;;  %v1779_v63 = vld [vmem:[%s3387_s1 + $0x38] sm:$0xf0]  ;;  %v2209_v5 = vld [vmem:[%s3387_s1 + $0x234] sm:$0xf0] }
  0xd8   : > { %1575 = vmatpush.bf16.msra.mxu3 %v2054_v57  ;;  %1477 = vmatpush.bf16.msra.mxu1 %v1798_v1  ;;  %v2143_v57 = vld [vmem:[%s3387_s1 + $0x2c] sm:$0xf] }
  0xd9   : > { %v3029_v23 = vpop.f32.mrf.mxu3  ;;  %1428 = vmatpush.bf16.msra.mxu0 %v2050_v12  ;;  %v1782_v38 = vor.u32 %v2143_v57, %v1779_v63 }
  0xda   : > { %v1055_v25 = vpop.f32.mrf.mxu0 }
  0xdb   : > { %v1056_v29 = vadd.f32 %v1055_v25, %v2911_v16 }
  0xdc   : > { %v1150_v27 = vpop.f32.mrf.mxu2  ;;  %1478 = vmatpush.bf16.msra.mxu1 %v1782_v38 }
  0xdd   : > { %v3031_v28 = vadd.f32 %v1150_v27, %v1102_v17  ;;  %1250 = vmatmul.bf16.gmra.mxu0 %v2718_v40  ;;  %v1104_v30 = vpop.f32.mrf.mxu1 }
  0xde   : > { %1397 = vmatmul.bf16.gmra.mxu3 %v2718_v40  ;;  %v1105_v31 = vadd.f32 %v1104_v30, %v1056_v29 }
  0xe0   : > { %1299 = vmatmul.bf16.gmra.mxu1 %v2712_v35 }
  0xe1   : > { %1348 = vmatmul.bf16.gmra.mxu2 %v2667_v60  ;;  %v3038_v32 = vpop.f32.mrf.mxu3 }
  0xe2   : > { %v1057_v34 = vpop.f32.mrf.mxu0 }
  0xe3   : > { %v1058_v56 = vadd.f32 %v1057_v34, %v2911_v16  ;;  %v2175_v34 = vld [vmem:[%s3387_s1 + $0x12c] sm:$0xf] }
  0xe4   : > { %v1153_v49 = vpop.f32.mrf.mxu2 }
  0xe5   : > { %v3052_v54 = vadd.f32 %v1153_v49, %v1105_v31  ;;  %v1106_v3 = vpop.f32.mrf.mxu1  ;;  %v1910_v49 = vor.u32 %v2175_v34, %v1907_v41 }
  0xe6   : > { %v1107_v4 = vadd.f32 %v1106_v3, %v1058_v56 }
  0xe7   : > { %1527 = vmatpush.bf16.msra.mxu2 %v1910_v49  ;;  %v2203_v49 = vld [vmem:[%s3387_s1 + $0x20c] sm:$0xf] }
  0xe9   : > { %v3067_v17 = vpop.f32.mrf.mxu3 }
  0xea   : > { %v1060_v18 = vpop.f32.mrf.mxu0 }
  0xeb   : > { %v1061_v25 = vadd.f32 %v1060_v18, %v2911_v16 }
  0xec   : > { %v1155_v20 = vpop.f32.mrf.mxu2 }
  0xed   : > { %v3069_v21 = vadd.f32 %v1155_v20, %v1107_v4  ;;  %1255 = vmatmul.bf16.gmra.mxu0 %v2762_v14  ;;  %v1109_v27 = vpop.f32.mrf.mxu1  ;;  %v2033_v4 = vld [vmem:[%s3387_s1 + $0x228] sm:$0xf] }
  0xee   : > { %1402 = vmatmul.bf16.gmra.mxu3 %v2762_v14  ;;  %v1110_v29 = vadd.f32 %v1109_v27, %v1061_v25  ;;  %v2034_v7 = vor.u32 %v2209_v5, %v2033_v4 }
  0xf0   : > { %1304 = vmatmul.bf16.gmra.mxu1 %v2758_v10  ;;  %1429 = vmatpush.bf16.msra.mxu0 %v2034_v7 }
  0xf1   : > { %1353 = vmatmul.bf16.gmra.mxu2 %v2715_v36  ;;  %v3076_v30 = vpop.f32.mrf.mxu3  ;;  %v2035_v36 = vld [vmem:[%s3387_s1 + $0x238] sm:$0xf0] }
  0xf2   : > { %v1062_v31 = vpop.f32.mrf.mxu0  ;;  %v2038_v56 = vor.u32 %v2207_v44, %v2035_v36  ;;  %v2171_v44 = vld [vmem:[%s3387_s1 + $0x10c] sm:$0xf] }
  0xf3   : > { %v1063_v53 = vadd.f32 %v1062_v31, %v2911_v16 }
  0xf4   : > { %v1158_v45 = vpop.f32.mrf.mxu2  ;;  %1576 = vmatpush.bf16.msra.mxu3 %v2038_v56  ;;  %v2019_v56 = vld [vmem:[%s3387_s1 + $0x218] sm:$0xf0] }
  0xf5   : > { %v3090_v51 = vadd.f32 %v1158_v45, %v1110_v29  ;;  %v1111_v1 = vpop.f32.mrf.mxu1  ;;  %v1891_v45 = vld [vmem:[%s3387_s1 + $0x118] sm:$0xf0]  ;;  %v2022_v38 = vor.u32 %v2203_v49, %v2019_v56 }
  0xf6   : > { %v1112_v3 = vadd.f32 %v1111_v1, %v1063_v53  ;;  %v1894_v53 = vor.u32 %v2171_v44, %v1891_v45  ;;  %v2139_v1 = vld [vmem:[%s3387_s1 + $0xc] sm:$0xf] }
  0xf8   : > { %1528 = vmatpush.bf16.msra.mxu2 %v1894_v53  ;;  %1577 = vmatpush.bf16.msra.mxu3 %v2022_v38 }
  0xf9   : > { %v3105_v12 = vpop.f32.mrf.mxu3 }
  0xfa   : > { %v1065_v18 = vpop.f32.mrf.mxu0 }
  0xfb   : > { %v1066_v27 = vadd.f32 %v1065_v18, %v2911_v16  ;;  %v2017_v18 = vld [vmem:[%s3387_s1 + $0x208] sm:$0xf] }
  0xfc   : > { %v1160_v20 = vpop.f32.mrf.mxu2 }
  0xfd   : > { %v3107_v25 = vadd.f32 %v1160_v20, %v1112_v3  ;;  %1260 = vmatmul.bf16.gmra.mxu0 %v2802_v48  ;;  %v1114_v29 = vpop.f32.mrf.mxu1  ;;  %v1763_v3 = vld [vmem:[%s3387_s1 + $0x18] sm:$0xf0]  ;;  %v2205_v20 = vld [vmem:[%s3387_s1 + $0x214] sm:$0xf0] }
  0xfe   : > { %1407 = vmatmul.bf16.gmra.mxu3 %v2802_v48  ;;  %v1115_v31 = vadd.f32 %v1114_v29, %v1066_v27  ;;  %v1766_v4 = vor.u32 %v2139_v1, %v1763_v3  ;;  %v2018_v27 = vor.u32 %v2205_v20, %v2017_v18 }
 0x100   : > { %1309 = vmatmul.bf16.gmra.mxu1 %v2796_v46  ;;  %1430 = vmatpush.bf16.msra.mxu0 %v2018_v27 }
 0x101   : > { %1358 = vmatmul.bf16.gmra.mxu2 %v2751_v62  ;;  %v3114_v34 = vpop.f32.mrf.mxu3  ;;  %1479 = vmatpush.bf16.msra.mxu1 %v1766_v4 }
 0x102   : > { %v1067_v41 = vpop.f32.mrf.mxu0 }
 0x103   : > { %v1068_v63 = vadd.f32 %v1067_v41, %v2911_v16 }
 0x104   : > { %v1163_v36 = vpop.f32.mrf.mxu2 }
 0x105   : > { %v3128_v57 = vadd.f32 %v1163_v36, %v1115_v31  ;;  %v1116_v5 = vpop.f32.mrf.mxu1 }
 0x106   : > { %v1117_v7 = vadd.f32 %v1116_v5, %v1068_v63 }
 0x109   : > { %v3143_v29 = vpop.f32.mrf.mxu3 }
 0x10a   : > { %v1070_v31 = vpop.f32.mrf.mxu0 }
 0x10b   : > { %v1071_v45 = vadd.f32 %v1070_v31, %v2911_v16 }
 0x10c   : > { %v1165_v41 = vpop.f32.mrf.mxu2 }
 0x10d   : > { %v3145_v44 = vadd.f32 %v1165_v41, %v1117_v7  ;;  %1265 = vmatmul.bf16.gmra.mxu0 %v2846_v24  ;;  %v1119_v49 = vpop.f32.mrf.mxu1 }
 0x10e   : > { %1412 = vmatmul.bf16.gmra.mxu3 %v2846_v24  ;;  %v1120_v36 = vadd.f32 %v1119_v49, %v1071_v45 }
 0x110   : > { %1314 = vmatmul.bf16.gmra.mxu1 %v2842_v22 }
 0x111   : > { %1363 = vmatmul.bf16.gmra.mxu2 %v2799_v47  ;;  %v3152_v53 = vpop.f32.mrf.mxu3 }
 0x112   : > { %v1072_v56 = vpop.f32.mrf.mxu0 }
 0x113   : > { %v1073_v1 = vadd.f32 %v1072_v56, %v2911_v16 }
 0x114   : > { %v1168_v63 = vpop.f32.mrf.mxu2 }
 0x115   : > { %v3154_v38 = vadd.f32 %v1168_v63, %v1120_v36  ;;  %v1121_v3 = vpop.f32.mrf.mxu1 }
 0x116   : > { %v1122_v4 = vadd.f32 %v1121_v3, %v1073_v1  ;;  %v3174_v1 = vperm.slane %v2908_v9, 1 }
 0x119   : > { %v3157_v5 = vpop.f32.mrf.mxu3 }
 0x11a   : > { %v1075_v7 = vpop.f32.mrf.mxu0 }
 0x11b   : > { %v1076_v27 = vadd.f32 %v1075_v7, %v2911_v16  ;;  %v1188_v7 = vadd.f32 %v2924_v26, %v3174_v1  ;;  %v3186_v26 = vperm.slane %v2908_v9, 2  ;;  %v1193_v9 = vadd.f32 %v2962_v2, %v3174_v1 }
 0x11c   : > { %v1170_v18 = vpop.f32.mrf.mxu2 }
 0x11d   : > { %v3159_v20 = vadd.f32 %v1170_v18, %v1122_v4  ;;  %1270 = vmatmul.bf16.gmra.mxu0 %v2882_v61  ;;  %v1124_v31 = vpop.f32.mrf.mxu1 }
 0x11e   : > { %1417 = vmatmul.bf16.gmra.mxu3 %v2882_v61  ;;  %v1125_v41 = vadd.f32 %v1124_v31, %v1076_v27 }
 0x120   : > { %1319 = vmatmul.bf16.gmra.mxu1 %v2879_v59 }
 0x121   : > { %1368 = vmatmul.bf16.gmra.mxu2 %v2836_v15  ;;  %v3166_v45 = vpop.f32.mrf.mxu3 }
 0x122   : > { %v1077_v49 = vpop.f32.mrf.mxu0 }
 0x123   : > { %v1078_v63 = vadd.f32 %v1077_v49, %v2911_v16 }
 0x124   : > { %v1173_v36 = vpop.f32.mrf.mxu2 }
 0x125   : > { %v3170_v56 = vadd.f32 %v1173_v36, %v1125_v41  ;;  %v1126_v3 = vpop.f32.mrf.mxu1  ;;  %v1190_v36 = vadd.f32 %v2953_v55, %v3174_v1 }
 0x126   : > { %v1127_v4 = vadd.f32 %v1126_v3, %v1078_v63  ;;  %v2274_v3 = vld [vmem:[%s2543_s8] sm:$0xff]  }
 0x129   : > { %v3178_v18 = vpop.f32.mrf.mxu3 }
 0x12a   : > { %v1236_v27 = vpop.f32.mrf.mxu0 }
 0x12b   : > { %v1237_v41 = vadd.f32 %v1236_v27, %v1188_v7 }
 0x12c   : > { %v1175_v31 = vpop.f32.mrf.mxu2 }
 0x12d   : > { %v3180_v15 = vadd.f32 %v1175_v31, %v1127_v4  ;;  %1431 = vmatmul.bf16.vlgmr.msra.gmra.mxu0 %v2590_v11  ;;  %v1285_v16 = vpop.f32.mrf.mxu1 }
 0x12e   : > { %1578 = vmatmul.bf16.vlgmr.msra.gmra.mxu3 %v2590_v11  ;;  %v1286_v49 = vadd.f32 %v1285_v16, %v1237_v41 }
 0x12f   : > { %3394 = vst [vmem:[#allocation4_spill] sm:$0xff] %v3180_v15 }
 0x130   : > { %v1619_v63 = vpack.c.bf16 %v1286_v49, %v2938_v33  ;;  %1480 = vmatmul.bf16.vlgmr.msra.gmra.mxu1 %v2274_v3 }
 0x131   : > { %1529 = vmatmul.bf16.vlgmr.msra.gmra.mxu2 %v2595_v13  ;;  %v1383_v11 = vpop.f32.mrf.mxu3 }
 0x132   : > { %v1238_v4 = vpop.f32.mrf.mxu0  ;;  %1651 = vst [vmem:[%s3191_s18] sm:$0xff] %v1619_v63 }
 0x133   : > { %v1239_v27 = vadd.f32 %v1238_v4, %v1190_v36 }
 0x134   : > { %v1334_v13 = vpop.f32.mrf.mxu2 }
 0x135   : > { %v1335_v7 = vadd.f32 %v1334_v13, %v3186_v26  ;;  %v1287_v41 = vpop.f32.mrf.mxu1 }
 0x136   : > { %v1288_v16 = vadd.f32 %v1287_v41, %v1239_v27 }
 0x137   : > { %v3199_v31 = vadd.f32 %v1383_v11, %v1335_v7 }
 0x138   : > { %v1621_v55 = vpack.c.bf16 %v1288_v16, %v2955_v58  ;;  %v1195_v58 = vadd.f32 %v2991_v42, %v3174_v1 }
 0x139   : > { %v1385_v33 = vpop.f32.mrf.mxu3 }
 0x13a   : > { %v1241_v49 = vpop.f32.mrf.mxu0  ;;  %1653 = vst [vmem:[%s3191_s18 + $0x10] sm:$0xff] %v1621_v55 }
 0x13b   : > { %v1242_v63 = vadd.f32 %v1241_v49, %v1193_v9 }
 0x13c   : > { %v1336_v15 = vpop.f32.mrf.mxu2 }
 0x13d   : > { %v1337_v3 = vadd.f32 %v1336_v15, %v3186_v26  ;;  %1436 = vmatmul.bf16.gmra.mxu0 %v2628_v37  ;;  %v1290_v11 = vpop.f32.mrf.mxu1 }
 0x13e   : > { %1583 = vmatmul.bf16.gmra.mxu3 %v2628_v37  ;;  %v1291_v4 = vadd.f32 %v1290_v11, %v1242_v63 }
 0x13f   : > { %v3207_v36 = vadd.f32 %v1385_v33, %v1337_v3 }
 0x140   : > { %v1623_v2 = vpack.c.bf16 %v1291_v4, %v2976_v19  ;;  %1485 = vmatmul.bf16.gmra.mxu1 %v2566_v52  ;;  %v2275_v4 = vld [vmem:[%s2543_s8 + $0x18] sm:$0xff]  }
 0x141   : > { %1534 = vmatmul.bf16.gmra.mxu2 %v2634_v39  ;;  %v1388_v15 = vpop.f32.mrf.mxu3  ;;  %v1198_v39 = vadd.f32 %v3000_v50, %v3174_v1 }
 0x142   : > { %v1243_v9 = vpop.f32.mrf.mxu0  ;;  %1655 = vst [vmem:[%s3191_s18 + $0x20] sm:$0xff] %v1623_v2 }
 0x143   : > { %v1244_v27 = vadd.f32 %v1243_v9, %v1195_v58 }
 0x144   : > { %v1339_v13 = vpop.f32.mrf.mxu2 }
 0x145   : > { %v1340_v7 = vadd.f32 %v1339_v13, %v3186_v26  ;;  %v1292_v37 = vpop.f32.mrf.mxu1 }
 0x146   : > { %v1293_v16 = vadd.f32 %v1292_v37, %v1244_v27 }
 0x147   : > { %v3217_v41 = vadd.f32 %v1388_v15, %v1340_v7 }
 0x148   : > { %v1625_v19 = vpack.c.bf16 %v1293_v16, %v2993_v43  ;;  %v1200_v43 = vadd.f32 %v3029_v23, %v3174_v1 }
 0x149   : > { %v1390_v42 = vpop.f32.mrf.mxu3 }
 0x14a   : > { %v1246_v55 = vpop.f32.mrf.mxu0  ;;  %1657 = vst [vmem:[%s3191_s18 + $0x30] sm:$0xff] %v1625_v19 }
 0x14b   : > { %v1247_v49 = vadd.f32 %v1246_v55, %v1198_v39 }
 0x14c   : > { %v1341_v52 = vpop.f32.mrf.mxu2 }
 0x14d   : > { %v1342_v33 = vadd.f32 %v1341_v52, %v3186_v26  ;;  %1441 = vmatmul.bf16.gmra.mxu0 %v2674_v6  ;;  %v1295_v63 = vpop.f32.mrf.mxu1 }
 0x14e   : > { %1588 = vmatmul.bf16.gmra.mxu3 %v2674_v6  ;;  %v1296_v11 = vadd.f32 %v1295_v63, %v1247_v49 }
 0x14f   : > { %v3225_v3 = vadd.f32 %v1390_v42, %v1342_v33 }
 0x150   : > { %v1627_v50 = vpack.c.bf16 %v1296_v11, %v3014_v0  ;;  %1490 = vmatmul.bf16.gmra.mxu1 %v2275_v4 }
 0x151   : > { %1539 = vmatmul.bf16.gmra.mxu2 %v2678_v8  ;;  %v1393_v58 = vpop.f32.mrf.mxu3  ;;  %v1203_v8 = vadd.f32 %v3038_v32, %v3174_v1 }
 0x152   : > { %v1248_v2 = vpop.f32.mrf.mxu0  ;;  %1659 = vst [vmem:[%s3191_s18 + $0x40] sm:$0xff] %v1627_v50 }
 0x153   : > { %v1249_v13 = vadd.f32 %v1248_v2, %v1200_v43 }
 0x154   : > { %v1344_v15 = vpop.f32.mrf.mxu2 }
 0x155   : > { %v1345_v9 = vadd.f32 %v1344_v15, %v3186_v26  ;;  %v1297_v6 = vpop.f32.mrf.mxu1 }
 0x156   : > { %v1298_v27 = vadd.f32 %v1297_v6, %v1249_v13 }
 0x157   : > { %v3235_v7 = vadd.f32 %v1393_v58, %v1345_v9 }
 0x158   : > { %v1629_v23 = vpack.c.bf16 %v1298_v27, %v3031_v28  ;;  %v1205_v28 = vadd.f32 %v3067_v17, %v3174_v1  ;;  %v2276_v27 = vld [vmem:[%s2543_s8 + $0x30] sm:$0xff]  }
 0x159   : > { %v1395_v0 = vpop.f32.mrf.mxu3 }
 0x15a   : > { %v1251_v37 = vpop.f32.mrf.mxu0  ;;  %1661 = vst [vmem:[%s3191_s18 + $0x50] sm:$0xff] %v1629_v23 }
 0x15b   : > { %v1252_v19 = vadd.f32 %v1251_v37, %v1203_v8 }
 0x15c   : > { %v1346_v16 = vpop.f32.mrf.mxu2 }
 0x15d   : > { %v1347_v39 = vadd.f32 %v1346_v16, %v3186_v26  ;;  %1446 = vmatmul.bf16.gmra.mxu0 %v2712_v35  ;;  %v1300_v55 = vpop.f32.mrf.mxu1 }
 0x15e   : > { %1593 = vmatmul.bf16.gmra.mxu3 %v2712_v35  ;;  %v1301_v52 = vadd.f32 %v1300_v55, %v1252_v19 }
 0x15f   : > { %v3243_v42 = vadd.f32 %v1395_v0, %v1347_v39 }
 0x160   : > { %v1631_v32 = vpack.c.bf16 %v1301_v52, %v3052_v54  ;;  %1495 = vmatmul.bf16.gmra.mxu1 %v2667_v60 }
 0x161   : > { %1544 = vmatmul.bf16.gmra.mxu2 %v2718_v40  ;;  %v1398_v33 = vpop.f32.mrf.mxu3  ;;  %v1208_v40 = vadd.f32 %v3076_v30, %v3174_v1 }
 0x162   : > { %v1253_v49 = vpop.f32.mrf.mxu0  ;;  %1663 = vst [vmem:[%s3191_s18 + $0x60] sm:$0xff] %v1631_v32 }
 0x163   : > { %v1254_v43 = vadd.f32 %v1253_v49, %v1205_v28 }
 0x164   : > { %v1349_v63 = vpop.f32.mrf.mxu2 }
 0x165   : > { %v1350_v11 = vadd.f32 %v1349_v63, %v3186_v26  ;;  %v1302_v35 = vpop.f32.mrf.mxu1 }
 0x166   : > { %v1303_v4 = vadd.f32 %v1302_v35, %v1254_v43 }
 0x167   : > { %v3253_v50 = vadd.f32 %v1398_v33, %v1350_v11 }
 0x168   : > { %v1633_v54 = vpack.c.bf16 %v1303_v4, %v3069_v21  ;;  %v1210_v21 = vadd.f32 %v3105_v12, %v3174_v1 }
 0x169   : > { %v1400_v17 = vpop.f32.mrf.mxu3 }
 0x16a   : > { %v1256_v58 = vpop.f32.mrf.mxu0  ;;  %1665 = vst [vmem:[%s3191_s18 + $0x70] sm:$0xff] %v1633_v54 }
 0x16b   : > { %v1257_v15 = vadd.f32 %v1256_v58, %v1208_v40 }
 0x16c   : > { %v1351_v60 = vpop.f32.mrf.mxu2 }
 0x16d   : > { %v1352_v2 = vadd.f32 %v1351_v60, %v3186_v26  ;;  %1451 = vmatmul.bf16.gmra.mxu0 %v2758_v10  ;;  %v1305_v13 = vpop.f32.mrf.mxu1 }
 0x16e   : > { %1598 = vmatmul.bf16.gmra.mxu3 %v2758_v10  ;;  %v1306_v6 = vadd.f32 %v1305_v13, %v1257_v15 }
 0x16f   : > { %v3261_v9 = vadd.f32 %v1400_v17, %v1352_v2 }
 0x170   : > { %v1635_v30 = vpack.c.bf16 %v1306_v6, %v3090_v51  ;;  %1500 = vmatmul.bf16.gmra.mxu1 %v2276_v27 }
 0x171   : > { %1549 = vmatmul.bf16.gmra.mxu2 %v2762_v14  ;;  %v1403_v8 = vpop.f32.mrf.mxu3  ;;  %v1213_v14 = vadd.f32 %v3114_v34, %v3174_v1 }
 0x172   : > { %v1258_v23 = vpop.f32.mrf.mxu0  ;;  %1667 = vst [vmem:[%s3191_s18 + $0x80] sm:$0xff] %v1635_v30 }
 0x173   : > { %v1259_v16 = vadd.f32 %v1258_v23, %v1210_v21 }
 0x174   : > { %v1354_v0 = vpop.f32.mrf.mxu2 }
 0x175   : > { %v1355_v37 = vadd.f32 %v1354_v0, %v3186_v26  ;;  %v1307_v10 = vpop.f32.mrf.mxu1 }
 0x176   : > { %v1308_v19 = vadd.f32 %v1307_v10, %v1259_v16 }
 0x177   : > { %v3271_v39 = vadd.f32 %v1403_v8, %v1355_v37 }
 0x178   : > { %v1637_v12 = vpack.c.bf16 %v1308_v19, %v3107_v25  ;;  %v1215_v25 = vadd.f32 %v3143_v29, %v3174_v1 }
 0x179   : > { %v1405_v51 = vpop.f32.mrf.mxu3 }
 0x17a   : > { %v1261_v55 = vpop.f32.mrf.mxu0  ;;  %1669 = vst [vmem:[%s3191_s18 + $0x90] sm:$0xff] %v1637_v12 }
 0x17b   : > { %v1262_v32 = vadd.f32 %v1261_v55, %v1213_v14  ;;  %v3395_v55 = vld [vmem:[#allocation2_spill] sm:$0xff] }
 0x17c   : > { %v1356_v52 = vpop.f32.mrf.mxu2 }
 0x17d   : > { %v1357_v28 = vadd.f32 %v1356_v52, %v3186_v26  ;;  %1456 = vmatmul.bf16.gmra.mxu0 %v2796_v46  ;;  %v1310_v49 = vpop.f32.mrf.mxu1 }
 0x17e   : > { %1603 = vmatmul.bf16.gmra.mxu3 %v2796_v46  ;;  %v1311_v63 = vadd.f32 %v1310_v49, %v1262_v32 }
 0x17f   : > { %v3279_v33 = vadd.f32 %v1405_v51, %v1357_v28 }
 0x180   : > { %v1639_v34 = vpack.c.bf16 %v1311_v63, %v3128_v57  ;;  %1505 = vmatmul.bf16.gmra.mxu1 %v2751_v62 }
 0x181   : > { %1554 = vmatmul.bf16.gmra.mxu2 %v2802_v48  ;;  %v1408_v11 = vpop.f32.mrf.mxu3  ;;  %v1218_v48 = vadd.f32 %v3152_v53, %v3174_v1 }
 0x182   : > { %v1263_v43 = vpop.f32.mrf.mxu0  ;;  %1671 = vst [vmem:[%s3191_s18 + $0xa0] sm:$0xff] %v1639_v34 }
 0x183   : > { %v1264_v40 = vadd.f32 %v1263_v43, %v1215_v25 }
 0x184   : > { %v1359_v35 = vpop.f32.mrf.mxu2 }
 0x185   : > { %v1360_v4 = vadd.f32 %v1359_v35, %v3186_v26  ;;  %v1312_v46 = vpop.f32.mrf.mxu1  ;;  %v3397_v35 = vld [vmem:[#allocation3_spill] sm:$0xff] }
 0x186   : > { %v1313_v17 = vadd.f32 %v1312_v46, %v1264_v40 }
 0x187   : > { %v3289_v54 = vadd.f32 %v1408_v11, %v1360_v4  ;;  %v3331_v4 = vperm.slane %v3397_v35, 3 }
 0x188   : > { %v1641_v29 = vpack.c.bf16 %v1313_v17, %v3145_v44  ;;  %v1220_v44 = vadd.f32 %v3157_v5, %v3174_v1 }
 0x189   : > { %v1410_v57 = vpop.f32.mrf.mxu3 }
 0x18a   : > { %v1266_v58 = vpop.f32.mrf.mxu0  ;;  %1673 = vst [vmem:[%s3191_s18 + $0xb0] sm:$0xff] %v1641_v29 }
 0x18b   : > { %v1267_v2 = vadd.f32 %v1266_v58, %v1218_v48 }
 0x18c   : > { %v1361_v60 = vpop.f32.mrf.mxu2 }
 0x18d   : > { %v1362_v62 = vadd.f32 %v1361_v60, %v3186_v26  ;;  %1461 = vmatmul.bf16.gmra.mxu0 %v2842_v22  ;;  %v1315_v13 = vpop.f32.mrf.mxu1 }
 0x18e   : > { %1608 = vmatmul.bf16.gmra.mxu3 %v2842_v22  ;;  %v1316_v6 = vadd.f32 %v1315_v13, %v1267_v2 }
 0x18f   : > { %v3297_v15 = vadd.f32 %v1410_v57, %v1362_v62 }
 0x190   : > { %v1643_v53 = vpack.c.bf16 %v1316_v6, %v3154_v38  ;;  %1510 = vmatmul.bf16.gmra.mxu1 %v2799_v47 }
 0x191   : > { %1559 = vmatmul.bf16.gmra.mxu2 %v2846_v24  ;;  %v1413_v21 = vpop.f32.mrf.mxu3  ;;  %v1223_v24 = vadd.f32 %v3166_v45, %v3174_v1 }
 0x192   : > { %v1268_v30 = vpop.f32.mrf.mxu0  ;;  %1675 = vst [vmem:[%s3191_s18 + $0xc0] sm:$0xff] %v1643_v53 }
 0x193   : > { %v1269_v23 = vadd.f32 %v1268_v30, %v1220_v44 }
 0x194   : > { %v1364_v27 = vpop.f32.mrf.mxu2 }
 0x195   : > { %v1365_v8 = vadd.f32 %v1364_v27, %v3186_v26  ;;  %v1317_v22 = vpop.f32.mrf.mxu1 }
 0x196   : > { %v1318_v37 = vadd.f32 %v1317_v22, %v1269_v23 }
 0x197   : > { %v3307_v0 = vadd.f32 %v1413_v21, %v1365_v8 }
 0x198   : > { %v1645_v5 = vpack.c.bf16 %v1318_v37, %v3159_v20  ;;  %v1225_v20 = vadd.f32 %v3178_v18, %v3174_v1 }
 0x199   : > { %v1415_v38 = vpop.f32.mrf.mxu3 }
 0x19a   : > { %v1271_v16 = vpop.f32.mrf.mxu0  ;;  %1677 = vst [vmem:[%s3191_s18 + $0xd0] sm:$0xff] %v1645_v5 }
 0x19b   : > { %v1272_v19 = vadd.f32 %v1271_v16, %v1223_v24 }
 0x19c   : > { %v1366_v10 = vpop.f32.mrf.mxu2 }
 0x19d   : > { %v1367_v47 = vadd.f32 %v1366_v10, %v3186_v26  ;;  %1466 = vmatmul.bf16.gmra.mxu0 %v2879_v59  ;;  %v1320_v12 = vpop.f32.mrf.mxu1 }
 0x19e   : > { %1613 = vmatmul.bf16.gmra.mxu3 %v2879_v59  ;;  %v1321_v51 = vadd.f32 %v1320_v12, %v1272_v19 }
 0x19f   : > { %v3315_v14 = vadd.f32 %v1415_v38, %v1367_v47 }
 0x1a0   : > { %v1647_v45 = vpack.c.bf16 %v1321_v51, %v3170_v56  ;;  %1515 = vmatmul.bf16.gmra.mxu1 %v3395_v55 }
 0x1a1   : > { %1564 = vmatmul.bf16.gmra.mxu2 %v2882_v61  ;;  %v1418_v52 = vpop.f32.mrf.mxu3  ;;  %v3396_v61 = vld [vmem:[#allocation4_spill] sm:$0xff] }
 0x1a2   : > { %v1273_v28 = vpop.f32.mrf.mxu0  ;;  %1679 = vst [vmem:[%s3191_s18 + $0xe0] sm:$0xff] %v1647_v45 }
 0x1a3   : > { %v1274_v63 = vadd.f32 %v1273_v28, %v1225_v20 }
 0x1a4   : > { %v1369_v32 = vpop.f32.mrf.mxu2 }
 0x1a5   : > { %v1370_v49 = vadd.f32 %v1369_v32, %v3186_v26  ;;  %v1322_v59 = vpop.f32.mrf.mxu1 }
 0x1a6   : > { %v1323_v34 = vadd.f32 %v1322_v59, %v1274_v63 }
 0x1a7   : > { %v3325_v25 = vadd.f32 %v1418_v52, %v1370_v49 }
 0x1a8   : > { %v1649_v11 = vpack.c.bf16 %v1323_v34, %v3396_v61 }
 0x1a9   : > { %v1420_v43 = vpop.f32.mrf.mxu3 }
 0x1aa   : > { %v1432_v1 = vpop.f32.mrf.mxu0  ;;  %1681 = vst [vmem:[%s3191_s18 + $0xf0] sm:$0xff] %v1649_v11 }
 0x1ab   : > { %v1433_v60 = vadd.f32 %v1432_v1, %v3199_v31 }
 0x1ac   : > { %v1371_v18 = vpop.f32.mrf.mxu2 }
 0x1ad   : > { %v1372_v56 = vadd.f32 %v1371_v18, %v3186_v26  ;;  %v1481_v46 = vpop.f32.mrf.mxu1 }
 0x1ae   : > { %v1482_v17 = vadd.f32 %v1481_v46, %v3331_v4 }
 0x1af   : > { %v3333_v40 = vadd.f32 %v1420_v43, %v1372_v56 }
 0x1b1   : > { %v1579_v48 = vpop.f32.mrf.mxu3 }
 0x1b2   : > { %v1434_v29 = vpop.f32.mrf.mxu0 }
 0x1b3   : > { %v1435_v30 = vadd.f32 %v1434_v29, %v3207_v36 }
 0x1b4   : > { %v1530_v57 = vpop.f32.mrf.mxu2 }
 0x1b5   : > { %v1531_v58 = vadd.f32 %v1530_v57, %v1482_v17  ;;  %v1483_v2 = vpop.f32.mrf.mxu1 }
 0x1b6   : > { %v1484_v26 = vadd.f32 %v1483_v2, %v3331_v4 }
 0x1b7   : > { %v1580_v62 = vadd.f32 %v1579_v48, %v1531_v58 }
 0x1b9   : > { %v1620_v13 = vpack.c.bf16 %v1580_v62, %v1433_v60  ;;  %v1581_v6 = vpop.f32.mrf.mxu3 }
 0x1ba   : > { %v1437_v44 = vpop.f32.mrf.mxu0 }
 0x1bb   : > { %1652 = vst [vmem:[%s3191_s18 + $0x8] sm:$0xff] %v1620_v13  ;;  %v1438_v38 = vadd.f32 %v1437_v44, %v3217_v41 }
 0x1bc   : > { %v1532_v53 = vpop.f32.mrf.mxu2 }
 0x1bd   : > { %v1533_v21 = vadd.f32 %v1532_v53, %v1484_v26  ;;  %v1486_v8 = vpop.f32.mrf.mxu1 }
 0x1be   : > { %v1487_v22 = vadd.f32 %v1486_v8, %v3331_v4 }
 0x1bf   : > { %v1582_v27 = vadd.f32 %v1581_v6, %v1533_v21 }
 0x1c1   : > { %v1622_v23 = vpack.c.bf16 %v1582_v27, %v1435_v30  ;;  %v1584_v31 = vpop.f32.mrf.mxu3 }
 0x1c2   : > { %v1439_v37 = vpop.f32.mrf.mxu0 }
 0x1c3   : > { %1654 = vst [vmem:[%s3191_s18 + $0x18] sm:$0xff] %v1622_v23  ;;  %v1440_v45 = vadd.f32 %v1439_v37, %v3225_v3 }
 0x1c4   : > { %v1535_v24 = vpop.f32.mrf.mxu2 }
 0x1c5   : > { %v1536_v5 = vadd.f32 %v1535_v24, %v1487_v22  ;;  %v1488_v10 = vpop.f32.mrf.mxu1 }
 0x1c6   : > { %v1489_v19 = vadd.f32 %v1488_v10, %v3331_v4 }
 0x1c7   : > { %v1585_v16 = vadd.f32 %v1584_v31, %v1536_v5 }
 0x1c9   : > { %v1624_v47 = vpack.c.bf16 %v1585_v16, %v1438_v38  ;;  %v1586_v36 = vpop.f32.mrf.mxu3 }
 0x1ca   : > { %v1442_v12 = vpop.f32.mrf.mxu0 }
 0x1cb   : > { %1656 = vst [vmem:[%s3191_s18 + $0x28] sm:$0xff] %v1624_v47  ;;  %v1443_v34 = vadd.f32 %v1442_v12, %v3235_v7 }
 0x1cc   : > { %v1537_v51 = vpop.f32.mrf.mxu2 }
 0x1cd   : > { %v1538_v20 = vadd.f32 %v1537_v51, %v1489_v19  ;;  %v1491_v52 = vpop.f32.mrf.mxu1 }
 0x1ce   : > { %v1492_v32 = vadd.f32 %v1491_v52, %v3331_v4 }
 0x1cf   : > { %v1587_v55 = vadd.f32 %v1586_v36, %v1538_v20 }
 0x1d1   : > { %v1626_v28 = vpack.c.bf16 %v1587_v55, %v1440_v45  ;;  %v1589_v41 = vpop.f32.mrf.mxu3 }
 0x1d2   : > { %v1444_v49 = vpop.f32.mrf.mxu0 }
 0x1d3   : > { %1658 = vst [vmem:[%s3191_s18 + $0x38] sm:$0xff] %v1626_v28  ;;  %v1445_v46 = vadd.f32 %v1444_v49, %v3243_v42 }
 0x1d4   : > { %v1540_v63 = vpop.f32.mrf.mxu2 }
 0x1d5   : > { %v1541_v59 = vadd.f32 %v1540_v63, %v1492_v32  ;;  %v1493_v11 = vpop.f32.mrf.mxu1 }
 0x1d6   : > { %v1494_v1 = vadd.f32 %v1493_v11, %v3331_v4 }
 0x1d7   : > { %v1590_v61 = vadd.f32 %v1589_v41, %v1541_v59 }
 0x1d9   : > { %v1628_v43 = vpack.c.bf16 %v1590_v61, %v1443_v34  ;;  %v1591_v3 = vpop.f32.mrf.mxu3 }
 0x1da   : > { %v1447_v18 = vpop.f32.mrf.mxu0 }
 0x1db   : > { %1660 = vst [vmem:[%s3191_s18 + $0x48] sm:$0xff] %v1628_v43  ;;  %v1448_v2 = vadd.f32 %v1447_v18, %v3253_v50 }
 0x1dc   : > { %v1542_v56 = vpop.f32.mrf.mxu2 }
 0x1dd   : > { %v1543_v35 = vadd.f32 %v1542_v56, %v1494_v1  ;;  %v1496_v48 = vpop.f32.mrf.mxu1 }
 0x1de   : > { %v1497_v57 = vadd.f32 %v1496_v48, %v3331_v4 }
 0x1df   : > { %v1592_v17 = vadd.f32 %v1591_v3, %v1543_v35 }
 0x1e1   : > { %v1630_v29 = vpack.c.bf16 %v1592_v17, %v1445_v46  ;;  %v1594_v7 = vpop.f32.mrf.mxu3 }
 0x1e2   : > { %v1449_v58 = vpop.f32.mrf.mxu0 }
 0x1e3   : > { %1662 = vst [vmem:[%s3191_s18 + $0x58] sm:$0xff] %v1630_v29  ;;  %v1450_v27 = vadd.f32 %v1449_v58, %v3261_v9 }
 0x1e4   : > { %v1545_v60 = vpop.f32.mrf.mxu2 }
 0x1e5   : > { %v1546_v62 = vadd.f32 %v1545_v60, %v1497_v57  ;;  %v1498_v26 = vpop.f32.mrf.mxu1 }
 0x1e6   : > { %v1499_v44 = vadd.f32 %v1498_v26, %v3331_v4 }
 0x1e7   : > { %v1595_v13 = vadd.f32 %v1594_v7, %v1546_v62 }
 0x1e9   : > { %v1632_v6 = vpack.c.bf16 %v1595_v13, %v1448_v2  ;;  %v1596_v42 = vpop.f32.mrf.mxu3 }
 0x1ea   : > { %v1452_v53 = vpop.f32.mrf.mxu0 }
 0x1eb   : > { %1664 = vst [vmem:[%s3191_s18 + $0x68] sm:$0xff] %v1632_v6  ;;  %v1453_v38 = vadd.f32 %v1452_v53, %v3271_v39 }
 0x1ec   : > { %v1547_v21 = vpop.f32.mrf.mxu2 }
 0x1ed   : > { %v1548_v30 = vadd.f32 %v1547_v21, %v1499_v44  ;;  %v1501_v23 = vpop.f32.mrf.mxu1 }
 0x1ee   : > { %v1502_v31 = vadd.f32 %v1501_v23, %v3331_v4 }
 0x1ef   : > { %v1597_v8 = vadd.f32 %v1596_v42, %v1548_v30 }
 0x1f1   : > { %v1634_v22 = vpack.c.bf16 %v1597_v8, %v1450_v27  ;;  %v1599_v50 = vpop.f32.mrf.mxu3 }
 0x1f2   : > { %v1454_v37 = vpop.f32.mrf.mxu0 }
 0x1f3   : > { %1666 = vst [vmem:[%s3191_s18 + $0x78] sm:$0xff] %v1634_v22  ;;  %v1455_v20 = vadd.f32 %v1454_v37, %v3279_v33 }
 0x1f4   : > { %v1550_v24 = vpop.f32.mrf.mxu2 }
 0x1f5   : > { %v1551_v5 = vadd.f32 %v1550_v24, %v1502_v31  ;;  %v1503_v10 = vpop.f32.mrf.mxu1 }
 0x1f6   : > { %v1504_v19 = vadd.f32 %v1503_v10, %v3331_v4 }
 0x1f7   : > { %v1600_v16 = vadd.f32 %v1599_v50, %v1551_v5 }
 0x1f9   : > { %v1636_v47 = vpack.c.bf16 %v1600_v16, %v1453_v38  ;;  %v1601_v9 = vpop.f32.mrf.mxu3 }
 0x1fa   : > { %v1457_v36 = vpop.f32.mrf.mxu0 }
 0x1fb   : > { %1668 = vst [vmem:[%s3191_s18 + $0x88] sm:$0xff] %v1636_v47  ;;  %v1458_v63 = vadd.f32 %v1457_v36, %v3289_v54 }
 0x1fc   : > { %v1552_v12 = vpop.f32.mrf.mxu2 }
 0x1fd   : > { %v1553_v51 = vadd.f32 %v1552_v12, %v1504_v19  ;;  %v1506_v55 = vpop.f32.mrf.mxu1 }
 0x1fe   : > { %v1507_v28 = vadd.f32 %v1506_v55, %v3331_v4 }
 0x1ff   : > { %v1602_v45 = vadd.f32 %v1601_v9, %v1553_v51 }
 0x201   : > { %v1638_v52 = vpack.c.bf16 %v1602_v45, %v1455_v20  ;;  %v1604_v39 = vpop.f32.mrf.mxu3 }
 0x202   : > { %v1459_v41 = vpop.f32.mrf.mxu0 }
 0x203   : > { %1670 = vst [vmem:[%s3191_s18 + $0x98] sm:$0xff] %v1638_v52  ;;  %v1460_v18 = vadd.f32 %v1459_v41, %v3297_v15 }
 0x204   : > { %v1555_v32 = vpop.f32.mrf.mxu2 }
 0x205   : > { %v1556_v49 = vadd.f32 %v1555_v32, %v1507_v28  ;;  %v1508_v34 = vpop.f32.mrf.mxu1 }
 0x206   : > { %v1509_v11 = vadd.f32 %v1508_v34, %v3331_v4 }
 0x207   : > { %v1605_v59 = vadd.f32 %v1604_v39, %v1556_v49 }
 0x209   : > { %v1640_v61 = vpack.c.bf16 %v1605_v59, %v1458_v63  ;;  %v1606_v33 = vpop.f32.mrf.mxu3 }
 0x20a   : > { %v1462_v3 = vpop.f32.mrf.mxu0 }
 0x20b   : > { %1672 = vst [vmem:[%s3191_s18 + $0xa8] sm:$0xff] %v1640_v61  ;;  %v1463_v57 = vadd.f32 %v1462_v3, %v3307_v0 }
 0x20c   : > { %v1557_v43 = vpop.f32.mrf.mxu2 }
 0x20d   : > { %v1558_v1 = vadd.f32 %v1557_v43, %v1509_v11  ;;  %v1511_v35 = vpop.f32.mrf.mxu1 }
 0x20e   : > { %v1512_v17 = vadd.f32 %v1511_v35, %v3331_v4 }
 0x20f   : > { %v1607_v56 = vadd.f32 %v1606_v33, %v1558_v1 }
 0x211   : > { %v1642_v46 = vpack.c.bf16 %v1607_v56, %v1460_v18  ;;  %v1609_v54 = vpop.f32.mrf.mxu3 }
 0x212   : > { %v1464_v58 = vpop.f32.mrf.mxu0 }
 0x213   : > { %1674 = vst [vmem:[%s3191_s18 + $0xb8] sm:$0xff] %v1642_v46  ;;  %v1465_v6 = vadd.f32 %v1464_v58, %v3315_v14 }
 0x214   : > { %v1560_v48 = vpop.f32.mrf.mxu2 }
 0x215   : > { %v1561_v29 = vadd.f32 %v1560_v48, %v1512_v17  ;;  %v1513_v60 = vpop.f32.mrf.mxu1 }
 0x216   : > { %v1514_v2 = vadd.f32 %v1513_v60, %v3331_v4 }
 0x217   : > { %v1610_v7 = vadd.f32 %v1609_v54, %v1561_v29 }
 0x219   : > { %v1644_v62 = vpack.c.bf16 %v1610_v7, %v1463_v57  ;;  %v1611_v15 = vpop.f32.mrf.mxu3 }
 0x21a   : > { %v1467_v0 = vpop.f32.mrf.mxu0 }
 0x21b   : > { %1676 = vst [vmem:[%s3191_s18 + $0xc8] sm:$0xff] %v1644_v62  ;;  %v1468_v23 = vadd.f32 %v1467_v0, %v3325_v25 }
 0x21c   : > { %v1562_v13 = vpop.f32.mrf.mxu2 }
 0x21d   : > { %v1563_v26 = vadd.f32 %v1562_v13, %v1514_v2  ;;  %v1516_v42 = vpop.f32.mrf.mxu1 }
 0x21e   : > { %v1517_v21 = vadd.f32 %v1516_v42, %v3331_v4 }
 0x21f   : > { %v1612_v44 = vadd.f32 %v1611_v15, %v1563_v26 }
 0x221   : > { %v1646_v53 = vpack.c.bf16 %v1612_v44, %v1465_v6  ;;  %v1614_v27 = vpop.f32.mrf.mxu3 }
 0x222   : > { %v1469_v14 = vpop.f32.mrf.mxu0 }
 0x223   : > { %1678 = vst [vmem:[%s3191_s18 + $0xd8] sm:$0xff] %v1646_v53  ;;  %v1470_v16 = vadd.f32 %v1469_v14, %v3333_v40 }
 0x224   : > { %v1565_v30 = vpop.f32.mrf.mxu2 }
 0x225   : > { %v1566_v8 = vadd.f32 %v1565_v30, %v1517_v21  ;;  %v1518_v31 = vpop.f32.mrf.mxu1 }
 0x226   : > { %v1519_v37 = vadd.f32 %v1518_v31, %v3331_v4 }
 0x227   : > { %v1615_v22 = vadd.f32 %v1614_v27, %v1566_v8 }
 0x229   : > { %v1648_v50 = vpack.c.bf16 %v1615_v22, %v1468_v23  ;;  %v1616_v38 = vpop.f32.mrf.mxu3 }
 0x22b   : > { %1680 = vst [vmem:[%s3191_s18 + $0xe8] sm:$0xff] %v1648_v50 }
 0x22c   : > { %v1567_v24 = vpop.f32.mrf.mxu2 }
 0x22d   : > { %v1568_v5 = vadd.f32 %v1567_v24, %v1519_v37 }
 0x22f   : > { %v1617_v10 = vadd.f32 %v1616_v38, %v1568_v5 }
 0x231   : > { %v1650_v47 = vpack.c.bf16 %v1617_v10, %v1470_v16 }
 0x233   : > { %1682 = vst [vmem:[%s3191_s18 + $0xf8] sm:$0xff] %v1650_v47 }
 0x234 PF: > { %s13_s12 = sadd.s32 1, %s2295_s12  }
 0x235   : > { %p10_p5 = scmp.ge.s32.totalorder %s13_s12, 6  }
 0x237   :  { %12 = sbr.rel (!%p10_p5) target bundleno = 1 (0x1), region = 62 }

// kernel: bidirectional_propagation.54
= control target key start
LH: loop header
LB: loop body
LE: loop exit
PB: predicated region body
PF: predicated region fallthrough
CT: control target
= control target key end

     0   :  { %s792_s12 = smov 0   ;;  %s913_s0 = inlined_call_operand.vmem [shape: bf16[512,144], index: 0, kind: input, shape index: {}]   ;;  %s914_s1 = inlined_call_operand.vmem [shape: bf16[144,128], index: 1, kind: input, shape index: {}]   ;;  %s915_s2 = inlined_call_operand.vmem [shape: f32[1,128], index: 2, kind: input, shape index: {}]   ;;  %s916_s3 = inlined_call_operand.vmem [shape: bf16[512,128], index: 3, kind: output, shape index: {}]  }
   0x1 LB: > { %s553_s13 = sadd.s32 4294967295, %s770_s12   ;;  %p557_p0 = scmp.ge.s32.totalorder %s770_s12, 1  ;;  %s770_s12 = sphi %s792_s12, %s13_s12  }
   0x2   : > { %p139_p1 = scmp.lt.s32.totalorder %s770_s12, 5 }
   0x4   : > { %p140_p2 = pnand %p557_p0, %p139_p1 }
   0x5   : > { %s558_s18 = sshll.u32 (!%p140_p2), %s553_s13, 4 }
   0x6   : > { %143 = sbr.rel (%p140_p2) target bundleno = 238 (0xee), region = 32  ;;  %p165_p3 = scmp.lt.s32.totalorder (!%p140_p2), %s558_s18, 63 }
   0xb   : > { %v697_v0 = vld [vmem:[%s914_s1 + $0x38] sm:$0xff]  ;;  %v698_v1 = vld [vmem:[%s914_s1 + $0x40] sm:$0xff]  ;;  %v696_v2 = vld [vmem:[%s914_s1 + $0x30] sm:$0xff]  ;;  %s918_s18 = smov (!%p165_p3, %s558_s18), 63  ;;  %vm342_vm0 = vcmask 130048  }
   0xc   : > { %367 = vmatpush.bf16.msra.mxu0 %v697_v0  ;;  %746 = vmatpush.bf16.msra.mxu2 %v697_v0  ;;  %s673_s21 = sshll.u32 %s918_s18, 3  ;;  %v695_v3 = vld [vmem:[%s914_s1 + $0x28] sm:$0xff]  ;;  %v694_v7 = vld [vmem:[%s914_s1 + $0x20] sm:$0xff]  ;;  %v693_v11 = vld [vmem:[%s914_s1 + $0x18] sm:$0xff]  ;;  %s562_s13 = sshll.u32 %s918_s18, 2 }
   0xd   : > { %423 = vmatpush.bf16.msra.mxu1 %v698_v1  ;;  %754 = vmatpush.bf16.msra.mxu3 %v698_v1  ;;  %s815_s24 = scalar_lea.vmem %s913_s0, %s673_s21  ;;  %v692_v12 = vld [vmem:[%s914_s1 + $0x10] sm:$0xff]  ;;  %v691_v16 = vld [vmem:[%s914_s1 + $0x8] sm:$0xff]  ;;  %v690_v19 = vld [vmem:[%s914_s1] sm:$0xff]  ;;  %s886_s16 = scalar_lea.vmem %s916_s3, %s562_s13 }
   0xe   : > { %v674_v4 = vld [vmem:[%s815_s24 + $0x4] sm:$0xf]  ;;  %v567_v5 = vld [vmem:[%s815_s24 + $0x8] sm:$0xf0]  ;;  %v684_v8 = vld [vmem:[%s815_s24 + $0x54] sm:$0xf] }
   0xf   : > { %v570_v6 = vor.u32 %v674_v4, %v567_v5  ;;  %v607_v9 = vld [vmem:[%s815_s24 + $0x58] sm:$0xf0]  ;;  %v676_v13 = vld [vmem:[%s815_s24 + $0x14] sm:$0xf]  ;;  %v686_v17 = vld [vmem:[%s815_s24 + $0x64] sm:$0xf] }
  0x10   : > { %368 = vmatpush.bf16.msra.mxu0 %v696_v2  ;;  %747 = vmatpush.bf16.msra.mxu2 %v696_v2  ;;  %v610_v10 = vor.u32 %v684_v8, %v607_v9  ;;  %v575_v14 = vld [vmem:[%s815_s24 + $0x18] sm:$0xf0]  ;;  %v615_v18 = vld [vmem:[%s815_s24 + $0x68] sm:$0xf0]  ;;  %v565_v20 = vld [vmem:[%s815_s24] sm:$0xf] }
  0x11   : > { %663 = vmatmul.msk.bf16.vlgmr.msra.gmra.mxu1 %vm342_vm0, %v570_v6  ;;  %v578_v15 = vor.u32 %v676_v13, %v575_v14  ;;  %v675_v21 = vld [vmem:[%s815_s24 + $0x4] sm:$0xf0]  ;;  %v618_v22 = vor.u32 %v686_v17, %v615_v18  ;;  %v597_v23 = vld [vmem:[%s815_s24 + $0x40] sm:$0xf]  ;;  %v678_v27 = vld [vmem:[%s815_s24 + $0x24] sm:$0xf] }
  0x12   : > { %668 = vmatmul.msk.bf16.vlgmr.msra.gmra.mxu3 %vm342_vm0, %v610_v10  ;;  %v683_v24 = vld [vmem:[%s815_s24 + $0x44] sm:$0xf0]  ;;  %v566_v25 = vor.u32 %v675_v21, %v565_v20  ;;  %v583_v28 = vld [vmem:[%s815_s24 + $0x28] sm:$0xf0]  ;;  %v688_v30 = vld [vmem:[%s815_s24 + $0x74] sm:$0xf] }
  0x13   : > { %v598_v26 = vor.u32 %v683_v24, %v597_v23  ;;  %v586_v29 = vor.u32 %v678_v27, %v583_v28  ;;  %v623_v31 = vld [vmem:[%s815_s24 + $0x78] sm:$0xf0]  ;;  %v573_v32 = vld [vmem:[%s815_s24 + $0x10] sm:$0xf]  ;;  %v677_v33 = vld [vmem:[%s815_s24 + $0x14] sm:$0xf0] }
  0x14   : > { %369 = vmatpush.bf16.msra.mxu0 %v695_v3  ;;  %748 = vmatpush.bf16.msra.mxu2 %v695_v3  ;;  %v626_v34 = vor.u32 %v688_v30, %v623_v31  ;;  %v605_v35 = vld [vmem:[%s815_s24 + $0x50] sm:$0xf]  ;;  %v685_v36 = vld [vmem:[%s815_s24 + $0x54] sm:$0xf0]  ;;  %v574_v37 = vor.u32 %v677_v33, %v573_v32  ;;  %v680_v39 = vld [vmem:[%s815_s24 + $0x34] sm:$0xf] }
  0x15   : > { %v606_v38 = vor.u32 %v685_v36, %v605_v35  ;;  %v591_v40 = vld [vmem:[%s815_s24 + $0x38] sm:$0xf0]  ;;  %v581_v42 = vld [vmem:[%s815_s24 + $0x20] sm:$0xf]  ;;  %v679_v43 = vld [vmem:[%s815_s24 + $0x24] sm:$0xf0] }
  0x16   : > { %v594_v41 = vor.u32 %v680_v39, %v591_v40  ;;  %v613_v44 = vld [vmem:[%s815_s24 + $0x60] sm:$0xf]  ;;  %v687_v45 = vld [vmem:[%s815_s24 + $0x64] sm:$0xf0]  ;;  %v582_v46 = vor.u32 %v679_v43, %v581_v42  ;;  %v682_v48 = vld [vmem:[%s815_s24 + $0x44] sm:$0xf] }
  0x17   : > { %v614_v47 = vor.u32 %v687_v45, %v613_v44  ;;  %v599_v49 = vld [vmem:[%s815_s24 + $0x48] sm:$0xf0]  ;;  %v589_v51 = vld [vmem:[%s815_s24 + $0x30] sm:$0xf]  ;;  %v681_v52 = vld [vmem:[%s815_s24 + $0x34] sm:$0xf0] }
  0x18   : > { %370 = vmatpush.bf16.msra.mxu0 %v694_v7  ;;  %749 = vmatpush.bf16.msra.mxu2 %v694_v7  ;;  %v602_v50 = vor.u32 %v682_v48, %v599_v49  ;;  %v621_v53 = vld [vmem:[%s815_s24 + $0x70] sm:$0xf]  ;;  %v689_v54 = vld [vmem:[%s815_s24 + $0x74] sm:$0xf0]  ;;  %v590_v55 = vor.u32 %v681_v52, %v589_v51  ;;  %v878_v62 = vld [vmem:[%s915_s2] ss:$0 sm:$0xff] }
  0x19   : > { %v622_v56 = vor.u32 %v689_v54, %v621_v53 }
  0x1c   : > { %371 = vmatpush.bf16.msra.mxu0 %v693_v11  ;;  %750 = vmatpush.bf16.msra.mxu2 %v693_v11 }
  0x20   : > { %372 = vmatpush.bf16.msra.mxu0 %v692_v12  ;;  %751 = vmatpush.bf16.msra.mxu2 %v692_v12 }
  0x21   : > { %664 = vmatmul.msk.bf16.gmra.mxu1 %vm342_vm0, %v578_v15 }
  0x22   : > { %669 = vmatmul.msk.bf16.gmra.mxu3 %vm342_vm0, %v618_v22 }
  0x24   : > { %373 = vmatpush.bf16.msra.mxu0 %v691_v16  ;;  %752 = vmatpush.bf16.msra.mxu2 %v691_v16 }
  0x28   : > { %374 = vmatpush.bf16.msra.mxu0 %v690_v19  ;;  %753 = vmatpush.bf16.msra.mxu2 %v690_v19 }
  0x2b   : > { %375 = vmatmul.bf16.vlgmr.msra.gmra.mxu0 %v566_v25  ;;  %395 = vmatmul.bf16.vlgmr.msra.gmra.mxu2 %v598_v26 }
  0x31   : > { %665 = vmatmul.msk.bf16.gmra.mxu1 %vm342_vm0, %v586_v29 }
  0x32   : > { %670 = vmatmul.msk.bf16.gmra.mxu3 %vm342_vm0, %v626_v34 }
  0x3b   : > { %380 = vmatmul.bf16.gmra.mxu0 %v574_v37  ;;  %400 = vmatmul.bf16.gmra.mxu2 %v606_v38 }
  0x41   : > { %666 = vmatmul.msk.bf16.gmra.mxu1 %vm342_vm0, %v594_v41 }
  0x4b   : > { %385 = vmatmul.bf16.gmra.mxu0 %v582_v46  ;;  %405 = vmatmul.bf16.gmra.mxu2 %v614_v47 }
  0x51   : > { %667 = vmatmul.msk.bf16.gmra.mxu1 %vm342_vm0, %v602_v50 }
  0x5b   : > { %390 = vmatmul.bf16.gmra.mxu0 %v590_v55  ;;  %410 = vmatmul.bf16.gmra.mxu2 %v622_v56 }
  0x8e   : > { %v425_v57 = vpop.f32.mrf.mxu1 }
  0x95   : > { %v450_v8 = vpop.f32.mrf.mxu3 }
  0x96   : > { %v427_v58 = vpop.f32.mrf.mxu1 }
  0x9d   : > { %v452_v16 = vpop.f32.mrf.mxu3 }
  0x9e   : > { %v430_v59 = vpop.f32.mrf.mxu1 }
  0xa5   : > { %v455_v27 = vpop.f32.mrf.mxu3 }
  0xa6   : > { %v432_v61 = vpop.f32.mrf.mxu1 }
  0xa8   : > { %v376_v60 = vpop.f32.mrf.mxu0 }
  0xa9   : > { %v377_v63 = vadd.f32 %v878_v62, %v376_v60 }
  0xab   : > { %v426_v4 = vadd.f32 %v425_v57, %v377_v63 }
  0xad   : > { %v457_v37 = vpop.f32.mrf.mxu3 }
  0xae   : > { %v396_v0 = vpop.f32.mrf.mxu2  ;;  %v435_v3 = vpop.f32.mrf.mxu1 }
  0xaf   : > { %v397_v40 = vadd.f32 %v878_v62, %v396_v0 }
  0xb0   : > { %v378_v1 = vpop.f32.mrf.mxu0 }
  0xb1   : > { %v379_v2 = vadd.f32 %v878_v62, %v378_v1 }
  0xb3   : > { %v428_v5 = vadd.f32 %v427_v58, %v379_v2 }
  0xb5   : > { %v702_v6 = vpack.c.bf16 %v428_v5, %v426_v4  ;;  %v460_v52 = vpop.f32.mrf.mxu3 }
  0xb6   : > { %v398_v7 = vpop.f32.mrf.mxu2  ;;  %v437_v10 = vpop.f32.mrf.mxu1 }
  0xb7   : > { %703 = vst [vmem:[%s886_s16] sm:$0xff] %v702_v6   ;;  %v399_v41 = vadd.f32 %v878_v62, %v398_v7 }
  0xb8   : > { %v381_v9 = vpop.f32.mrf.mxu0 }
  0xb9   : > { %v382_v11 = vadd.f32 %v878_v62, %v381_v9 }
  0xbb   : > { %v431_v17 = vadd.f32 %v430_v59, %v382_v11 }
  0xbd   : > { %v462_v63 = vpop.f32.mrf.mxu3 }
  0xbe   : > { %v401_v12 = vpop.f32.mrf.mxu2  ;;  %v440_v15 = vpop.f32.mrf.mxu1 }
  0xbf   : > { %v402_v20 = vadd.f32 %v878_v62, %v401_v12 }
  0xc0   : > { %v383_v13 = vpop.f32.mrf.mxu0 }
  0xc1   : > { %v384_v14 = vadd.f32 %v878_v62, %v383_v13  ;;  %v451_v25 = vadd.f32 %v450_v8, %v402_v20 }
  0xc3   : > { %v433_v18 = vadd.f32 %v432_v61, %v384_v14 }
  0xc5   : > { %v707_v19 = vpack.c.bf16 %v433_v18, %v431_v17 }
  0xc6   : > { %v403_v21 = vpop.f32.mrf.mxu2  ;;  %v442_v24 = vpop.f32.mrf.mxu1 }
  0xc7   : > { %739 = vst [vmem:[%s886_s16 + $0x8] sm:$0xff] %v707_v19   ;;  %v404_v22 = vadd.f32 %v878_v62, %v403_v21 }
  0xc8   : > { %v386_v23 = vpop.f32.mrf.mxu0 }
  0xc9   : > { %v453_v26 = vadd.f32 %v452_v16, %v404_v22  ;;  %v387_v29 = vadd.f32 %v878_v62, %v386_v23 }
  0xcb   : > { %v727_v28 = vpack.c.bf16 %v453_v26, %v451_v25  ;;  %v436_v34 = vadd.f32 %v435_v3, %v387_v29 }
  0xcd   : > { %743 = vst [vmem:[%s886_s16 + $0x28] sm:$0xff] %v727_v28  }
  0xce   : > { %v406_v30 = vpop.f32.mrf.mxu2  ;;  %v445_v33 = vpop.f32.mrf.mxu1 }
  0xcf   : > { %v407_v38 = vadd.f32 %v878_v62, %v406_v30  ;;  %v446_v46 = vadd.f32 %v445_v33, %v397_v40 }
  0xd0   : > { %v388_v31 = vpop.f32.mrf.mxu0 }
  0xd1   : > { %v389_v32 = vadd.f32 %v878_v62, %v388_v31  ;;  %v456_v45 = vadd.f32 %v455_v27, %v407_v38 }
  0xd3   : > { %v438_v35 = vadd.f32 %v437_v10, %v389_v32 }
  0xd5   : > { %v712_v36 = vpack.c.bf16 %v438_v35, %v436_v34 }
  0xd6   : > { %v408_v39 = vpop.f32.mrf.mxu2  ;;  %v447_v44 = vpop.f32.mrf.mxu1 }
  0xd7   : > { %740 = vst [vmem:[%s886_s16 + $0x10] sm:$0xff] %v712_v36   ;;  %v409_v42 = vadd.f32 %v878_v62, %v408_v39  ;;  %v448_v48 = vadd.f32 %v447_v44, %v399_v41 }
  0xd8   : > { %v391_v43 = vpop.f32.mrf.mxu0 }
  0xd9   : > { %v458_v47 = vadd.f32 %v457_v37, %v409_v42  ;;  %v722_v50 = vpack.c.bf16 %v448_v48, %v446_v46  ;;  %v392_v51 = vadd.f32 %v878_v62, %v391_v43 }
  0xdb   : > { %v732_v49 = vpack.c.bf16 %v458_v47, %v456_v45  ;;  %742 = vst [vmem:[%s886_s16 + $0x20] sm:$0xff] %v722_v50   ;;  %v441_v56 = vadd.f32 %v440_v15, %v392_v51 }
  0xdd   : > { %744 = vst [vmem:[%s886_s16 + $0x30] sm:$0xff] %v732_v49  }
  0xde   : > { %v411_v53 = vpop.f32.mrf.mxu2 }
  0xdf   : > { %v412_v59 = vadd.f32 %v878_v62, %v411_v53 }
  0xe0   : > { %v393_v54 = vpop.f32.mrf.mxu0 }
  0xe1   : > { %v394_v55 = vadd.f32 %v878_v62, %v393_v54  ;;  %v461_v0 = vadd.f32 %v460_v52, %v412_v59 }
  0xe3   : > { %v443_v57 = vadd.f32 %v442_v24, %v394_v55 }
  0xe5   : > { %v717_v58 = vpack.c.bf16 %v443_v57, %v441_v56 }
  0xe6   : > { %v413_v60 = vpop.f32.mrf.mxu2 }
  0xe7   : > { %741 = vst [vmem:[%s886_s16 + $0x18] sm:$0xff] %v717_v58   ;;  %v414_v61 = vadd.f32 %v878_v62, %v413_v60 }
  0xe9   : > { %v463_v1 = vadd.f32 %v462_v63, %v414_v61 }
  0xeb   : > { %v737_v2 = vpack.c.bf16 %v463_v1, %v461_v0 }
  0xed   : > { %745 = vst [vmem:[%s886_s16 + $0x38] sm:$0xff] %v737_v2  }
  0xee PF: > { %s13_s12 = sadd.s32 1, %s770_s12  }
  0xef   : > { %p10_p4 = scmp.ge.s32.totalorder %s13_s12, 6  }
  0xf1   :  { %12 = sbr.rel (!%p10_p4) target bundleno = 1 (0x1), region = 62 }

// kernel: bidirectional_propagation.94
= control target key start
LH: loop header
LB: loop body
LE: loop exit
PB: predicated region body
PF: predicated region fallthrough
CT: control target
= control target key end

     0   :  { %s2875_s12 = smov 0   ;;  %s3576_s0 = inlined_call_operand.vmem [shape: bf16[128,18,128], index: 0, kind: input, shape index: {}]   ;;  %s3577_s1 = inlined_call_operand.vmem [shape: bf16[384,128], index: 1, kind: input, shape index: {}]   ;;  %s3578_s2 = inlined_call_operand.vmem [shape: f32[1,128], index: 2, kind: input, shape index: {}]   ;;  %s3579_s3 = inlined_call_operand.vmem [shape: bf16[2048,128], index: 3, kind: output, shape index: {}]  }
   0x1 LB: > { %s2314_s13 = sadd.s32 4294967295, %s2853_s12   ;;  %p2318_p0 = scmp.ge.s32.totalorder %s2853_s12, 1  ;;  %s2853_s12 = sphi %s2875_s12, %s13_s12  }
   0x2   : > { %p139_p1 = scmp.lt.s32.totalorder %s2853_s12, 5 }
   0x4   : > { %p140_p2 = pnand %p2318_p0, %p139_p1 }
   0x5   : > { %s2319_s20 = sshll.u32 (!%p140_p2), %s2314_s13, 5 }
   0x6   : > { %143 = sbr.rel (%p140_p2) target bundleno = 561 (0x231), region = 32  ;;  %p165_p3 = scmp.lt.s32.totalorder (!%p140_p2), %s2319_s20, 127 }
   0xb   : > { %v2428_v0 = vld [vmem:[%s3577_s1 + $0x38] sm:$0xff]  ;;  %v2427_v3 = vld [vmem:[%s3577_s1 + $0x30] sm:$0xff]  ;;  %s3581_s20 = smov (!%p165_p3, %s2319_s20), 127  ;;  %v2426_v6 = vld [vmem:[%s3577_s1 + $0x28] sm:$0xff]  ;;  %vm593_vm0 = vsmask.f32 7424 }
   0xc   : > { %v2889_v1 = vld [vmem:[%s3577_s1 + $0x78] sm:$0xff]  ;;  %1431 = vmatpush.bf16.msra.mxu0 %v2428_v0  ;;  %2763 = vmatpush.bf16.msra.mxu3 %v2428_v0  ;;  %v2906_v4 = vld [vmem:[%s3577_s1 + $0x70] sm:$0xff]  ;;  %s2787_s27 = smul.u32 12, %s3581_s20  ;;  %v2921_v7 = vld [vmem:[%s3577_s1 + $0x68] sm:$0xff]  ;;  %vm1106_vm1 = vcmask 1046528   ;;  %s2321_s20 = sshll.u32 %s2314_s13, 6 }
   0xd   : > { %v2894_v2 = vld [vmem:[%s3577_s1 + $0xb8] sm:$0xff]  ;;  %1600 = vmatpush.bf16.msra.mxu1 %v2889_v1  ;;  %v2911_v5 = vld [vmem:[%s3577_s1 + $0xb0] sm:$0xff]  ;;  %v2926_v8 = vld [vmem:[%s3577_s1 + $0xa8] sm:$0xff]  ;;  %p172_p4 = scmp.lt.s32.totalorder %s2321_s20, 255 }
   0xe   : > { %1769 = vmatpush.bf16.msra.mxu2 %v2894_v2  ;;  %s2931_s9 = scalar_lea.vmem %s3576_s0, %s2787_s27  ;;  %v2425_v9 = vld [vmem:[%s3577_s1 + $0x20] sm:$0xff]  ;;  %v2424_v13 = vld [vmem:[%s3577_s1 + $0x18] sm:$0xff]  ;;  %v2423_v18 = vld [vmem:[%s3577_s1 + $0x10] sm:$0xff] }
   0xf   : > { %v2941_v10 = vld [vmem:[%s3577_s1 + $0x60] sm:$0xff]  ;;  %v241_v12 = vld [vmem:[%s2931_s9 + $0x8] sm:$0x1]  ;;  %v2957_v14 = vld [vmem:[%s3577_s1 + $0x58] sm:$0xff]  ;;  %s3583_s20 = smov (!%p172_p4, %s2321_s20), 255 }
  0x10   : > { %1432 = vmatpush.bf16.msra.mxu0 %v2427_v3  ;;  %2764 = vmatpush.bf16.msra.mxu3 %v2427_v3  ;;  %v2946_v11 = vld [vmem:[%s3577_s1 + $0xa0] sm:$0xff]  ;;  %v2962_v15 = vld [vmem:[%s3577_s1 + $0x98] sm:$0xff]  ;;  %v529_v16 = vunpack.c.l.b16 %v241_v12  ;;  %v2973_v19 = vld [vmem:[%s3577_s1 + $0x50] sm:$0xff]  ;;  %s2322_s13 = sshll.u32 %s3583_s20, 2 }
  0x11   : > { %1601 = vmatpush.bf16.msra.mxu1 %v2906_v4  ;;  %v2446_v17 = vld [vmem:[%s2931_s9] sm:$0xff]   ;;  %v2978_v20 = vld [vmem:[%s3577_s1 + $0x90] sm:$0xff]  ;;  %v2422_v25 = vld [vmem:[%s3577_s1 + $0x8] sm:$0xff]  ;;  %s3177_s23 = scalar_lea.vmem %s3579_s3, %s2322_s13 }
  0x12   : > { %1770 = vmatpush.bf16.msra.mxu2 %v2911_v5  ;;  %v597_v21 = vshll.u32 %v2446_v17, 16  ;;  %v561_v22 = vpack.c.b16 %v529_v16, %v529_v16  ;;  %v2684_v23 = vld [vmem:[%s2931_s9] sm:$0xf0]  ;;  %v2685_v24 = vld [vmem:[%s2931_s9] sm:$0xe]  ;;  %v2990_v26 = vld [vmem:[%s3577_s1 + $0x48] sm:$0xff] }
  0x13   : > { %v2995_v27 = vld [vmem:[%s3577_s1 + $0x88] sm:$0xff]  ;;  %v595_v28 = vshrl.u32 %v2446_v17, 16  ;;  %v2686_v31 = vor.u32 %v2685_v24, %v2684_v23  ;;  %v2799_v33 = vld [vmem:[%s2931_s9 + $0xc] sm:$0xf0]  ;;  %v2421_v34 = vld [vmem:[%s3577_s1] sm:$0xff] }
  0x14   : > { %1433 = vmatpush.bf16.msra.mxu0 %v2426_v6  ;;  %2765 = vmatpush.bf16.msra.mxu3 %v2426_v6  ;;  %v599_v29 = vrot.slane %v597_v21, 1  ;;  %v602_v30 = vshll.u32 %v561_v22, 16  ;;  %v179_v32 = vld [vmem:[%s2931_s9 + $0xc] sm:$0xff]   ;;  %v3007_v35 = vld [vmem:[%s3577_s1 + $0x40] sm:$0xff]  ;;  %v1108_v40 = vrot.slane %v561_v22, 1  ;;  %v2669_v63 = vld [vmem:[%s2931_s9 + $0x18] sm:$0xff]  }
  0x15   : > { %1602 = vmatpush.bf16.msra.mxu1 %v2921_v7  ;;  %v3012_v36 = vld [vmem:[%s3577_s1 + $0x80] sm:$0xff]  ;;  %v1107_v39 = vrot.slane %v2686_v31, 1  ;;  %v242_v41 = vld [vmem:[%s2931_s9 + $0x14] sm:$0x1]  ;;  %v2800_v46 = vld [vmem:[%s2931_s9 + $0xc] sm:$0xe] }
  0x16   : > { %1771 = vmatpush.bf16.msra.mxu2 %v2926_v8  ;;  %v600_v37 = vor.u32 %v599_v29, %v595_v28  ;;  %v604_v38 = vrot.slane %v602_v30, 1  ;;  %v3016_v42 = vld [vmem:[%s2931_s9 + $0x120] sm:$0xff]   ;;  %v530_v45 = vunpack.c.l.b16 %v242_v41  ;;  %v609_v48 = vshll.u32 %v179_v32, 16  ;;  %v3027_v49 = vld [vmem:[%s2931_s9 + $0x12c] sm:$0xff]   ;;  %v2687_v3 = vld [vmem:[%s2931_s9 + $0x18] sm:$0xf0] }
  0x17   : > { %v1109_v44 = vsel %vm1106_vm1, %v1107_v39, %v1108_v40  ;;  %v3030_v50 = vld [vmem:[%s2931_s9 + $0x12c] sm:$0xf0]  ;;  %v607_v51 = vshrl.u32 %v179_v32, 16  ;;  %v2801_v54 = vor.u32 %v2800_v46, %v2799_v33  ;;  %v243_v59 = vld [vmem:[%s2931_s9 + $0x20] sm:$0x1]  ;;  %v621_v0 = vshll.u32 %v2669_v63, 16 }
  0x18   : > { %1434 = vmatpush.bf16.msra.mxu0 %v2425_v9  ;;  %2766 = vmatpush.bf16.msra.mxu3 %v2425_v9  ;;  %v605_v43 = vsel %vm593_vm0, %v600_v37, %v604_v38  ;;  %v562_v47 = vpack.c.b16 %v530_v45, %v530_v45  ;;  %v611_v52 = vrot.slane %v609_v48, 1  ;;  %v531_v60 = vunpack.c.l.b16 %v243_v59  ;;  %v183_v12 = vld [vmem:[%s2931_s9 + $0x24] sm:$0xff]   ;;  %v244_v21 = vld [vmem:[%s2931_s9 + $0x2c] sm:$0x1]  ;;  %v245_v39 = vld [vmem:[%s2931_s9 + $0x38] sm:$0x1] }
  0x19   : > { %1603 = vmatpush.bf16.msra.mxu1 %v2941_v10  ;;  %v1110_v57 = vrot.slane %v2801_v54, 1  ;;  %v619_v6 = vshrl.u32 %v2669_v63, 16  ;;  %v532_v24 = vunpack.c.l.b16 %v244_v21  ;;  %v633_v28 = vshll.u32 %v183_v12, 16  ;;  %v3058_v29 = vld [vmem:[%s2931_s9 + $0x144] sm:$0xff]   ;;  %v2691_v45 = vld [vmem:[%s2931_s9 + $0x30] sm:$0xe] }
  0x1a   : > { %1772 = vmatpush.bf16.msra.mxu2 %v2946_v11  ;;  %v614_v53 = vshll.u32 %v562_v47, 16  ;;  %v612_v55 = vor.u32 %v611_v52, %v607_v51  ;;  %v1111_v58 = vrot.slane %v562_v47, 1  ;;  %v631_v30 = vshrl.u32 %v183_v12, 16  ;;  %v2805_v52 = vld [vmem:[%s2931_s9 + $0x3c] sm:$0xf0] }
  0x1b   : > { %v635_v31 = vrot.slane %v633_v28, 1 }
  0x1c   : > { %1435 = vmatpush.bf16.msra.mxu0 %v2424_v13  ;;  %2767 = vmatpush.bf16.msra.mxu3 %v2424_v13  ;;  %v616_v56 = vrot.slane %v614_v53, 1  ;;  %v1112_v62 = vsel %vm1106_vm1, %v1110_v57, %v1111_v58  ;;  %v2802_v13 = vld [vmem:[%s2931_s9 + $0x24] sm:$0xf0]  ;;  %v3080_v57 = vld [vmem:[%s2931_s9 + $0x150] sm:$0xff]  }
  0x1d   : > { %1604 = vmatpush.bf16.msra.mxu1 %v2957_v14 }
  0x1e   : > { %1773 = vmatpush.bf16.msra.mxu2 %v2962_v15  ;;  %v617_v61 = vsel %vm593_vm0, %v612_v55, %v616_v56 }
  0x20   : > { %1436 = vmatpush.bf16.msra.mxu0 %v2423_v18  ;;  %2768 = vmatpush.bf16.msra.mxu3 %v2423_v18 }
  0x21   : > { %1605 = vmatpush.bf16.msra.mxu1 %v2973_v19 }
  0x22   : > { %1774 = vmatpush.bf16.msra.mxu2 %v2978_v20 }
  0x24   : > { %1437 = vmatpush.bf16.msra.mxu0 %v2422_v25  ;;  %2769 = vmatpush.bf16.msra.mxu3 %v2422_v25  ;;  %v2803_v25 = vld [vmem:[%s2931_s9 + $0x24] sm:$0xe] }
  0x25   : > { %1606 = vmatpush.bf16.msra.mxu1 %v2990_v26  ;;  %v2804_v33 = vor.u32 %v2803_v25, %v2802_v13 }
  0x26   : > { %1775 = vmatpush.bf16.msra.mxu2 %v2995_v27 }
  0x27   : > { %v1116_v37 = vrot.slane %v2804_v33, 1 }
  0x28   : > { %1438 = vmatpush.bf16.msra.mxu0 %v2421_v34  ;;  %2770 = vmatpush.bf16.msra.mxu3 %v2421_v34  ;;  %v636_v34 = vor.u32 %v635_v31, %v631_v30  ;;  %v191_v30 = vld [vmem:[%s2931_s9 + $0x54] sm:$0xff]  }
  0x29   : > { %1607 = vmatpush.bf16.msra.mxu1 %v3007_v35  ;;  %v2808_v31 = vld [vmem:[%s2931_s9 + $0x54] sm:$0xf0] }
  0x2a   : > { %1776 = vmatpush.bf16.msra.mxu2 %v3012_v36 }
  0x2b   : > { %1439 = vmatmul.bf16.vlgmr.msra.gmra.mxu0 %v2446_v17  ;;  %1559 = vmatmul.bf16.vlgmr.msra.gmra.mxu3 %v3016_v42 }
  0x2c   : > { %2771 = vmatpush.bf16.msrb.mxu3 %v2889_v1  ;;  %1608 = vmatmul.bf16.vlgmr.msra.gmra.mxu1 %v605_v43  ;;  %v563_v1 = vpack.c.b16 %v531_v60, %v531_v60  ;;  %v2670_v43 = vld [vmem:[%s2931_s9 + $0x30] sm:$0xff]  }
  0x2d   : > { %1777 = vmatmul.bf16.vlgmr.msra.gmra.mxu2 %v1109_v44  ;;  %v643_v46 = vshrl.u32 %v2670_v43, 16 }
  0x2e   : > { %v626_v9 = vshll.u32 %v563_v1, 16  ;;  %v1114_v18 = vrot.slane %v563_v1, 1 }
  0x30   : > { %2772 = vmatpush.bf16.msrb.mxu3 %v2906_v4  ;;  %v2688_v4 = vld [vmem:[%s2931_s9 + $0x18] sm:$0xe]  ;;  %v628_v16 = vrot.slane %v626_v9, 1 }
  0x34   : > { %2773 = vmatpush.bf16.msrb.mxu3 %v2921_v7  ;;  %v623_v7 = vrot.slane %v621_v0, 1 }
  0x38   : > { %2774 = vmatpush.bf16.msrb.mxu3 %v2941_v10  ;;  %v2689_v10 = vor.u32 %v2688_v4, %v2687_v3 }
  0x3a   : > { %v1113_v17 = vrot.slane %v2689_v10, 1 }
  0x3b   : > { %1444 = vmatmul.bf16.gmra.mxu0 %v179_v32  ;;  %1564 = vmatmul.bf16.gmra.mxu3 %v3027_v49 }
  0x3c   : > { %2775 = vmatpush.bf16.msrb.mxu3 %v2957_v14  ;;  %1613 = vmatmul.bf16.gmra.mxu1 %v617_v61  ;;  %v624_v14 = vor.u32 %v623_v7, %v619_v6  ;;  %v1115_v23 = vsel %vm1106_vm1, %v1113_v17, %v1114_v18  ;;  %v2806_v61 = vld [vmem:[%s2931_s9 + $0x3c] sm:$0xe]  ;;  %v2671_v17 = vld [vmem:[%s2931_s9 + $0x48] sm:$0xff]  }
  0x3d   : > { %1782 = vmatmul.bf16.gmra.mxu2 %v1112_v62  ;;  %v2807_v4 = vor.u32 %v2806_v61, %v2805_v52  ;;  %v669_v18 = vshll.u32 %v2671_v17, 16  ;;  %v885_v61 = vshll.u32 %v3016_v42, 16 }
  0x3e   : > { %v629_v22 = vsel %vm593_vm0, %v624_v14, %v628_v16 }
  0x3f   : > { %v1122_v9 = vrot.slane %v2807_v4, 1  ;;  %v671_v25 = vrot.slane %v669_v18, 1  ;;  %v883_v4 = vshrl.u32 %v3016_v42, 16  ;;  %v250_v42 = vld [vmem:[%s2931_s9 + $0x74] sm:$0x1] }
  0x40   : > { %2776 = vmatpush.bf16.msrb.mxu3 %v2973_v19  ;;  %v3050_v19 = vld [vmem:[%s2931_s9 + $0x138] sm:$0xff]  }
  0x44   : > { %2777 = vmatpush.bf16.msrb.mxu3 %v2990_v26  ;;  %v564_v26 = vpack.c.b16 %v532_v24, %v532_v24  ;;  %v667_v24 = vshrl.u32 %v2671_v17, 16 }
  0x46   : > { %v638_v32 = vshll.u32 %v564_v26, 16  ;;  %v1117_v38 = vrot.slane %v564_v26, 1 }
  0x48   : > { %2778 = vmatpush.bf16.msrb.mxu3 %v3007_v35  ;;  %v640_v35 = vrot.slane %v638_v32, 1  ;;  %v1118_v41 = vsel %vm1106_vm1, %v1116_v37, %v1117_v38  ;;  %v672_v32 = vor.u32 %v671_v25, %v667_v24  ;;  %v248_v37 = vld [vmem:[%s2931_s9 + $0x5c] sm:$0x1]  ;;  %v3103_v38 = vld [vmem:[%s2931_s9 + $0x168] sm:$0xff]   ;;  %v266_v25 = vld [vmem:[%s2931_s9 + $0x134] sm:$0x1] }
  0x4a   : > { %v641_v40 = vsel %vm593_vm0, %v636_v34, %v640_v35 }
  0x4b   : > { %1449 = vmatmul.bf16.gmra.mxu0 %v2669_v63  ;;  %1569 = vmatmul.bf16.gmra.mxu3 %v3050_v19  ;;  %v3087_v63 = vld [vmem:[%s2931_s9 + $0x15c] sm:$0xff]  }
  0x4c   : > { %2779 = vmatpush.bf16.msra.mxu3 %v2894_v2  ;;  %1618 = vmatmul.bf16.gmra.mxu1 %v629_v22  ;;  %v3061_v2 = vld [vmem:[%s2931_s9 + $0x144] sm:$0xf0]  ;;  %v2693_v22 = vld [vmem:[%s2931_s9 + $0x48] sm:$0xf0] }
  0x4d   : > { %1787 = vmatmul.bf16.gmra.mxu2 %v1115_v23  ;;  %v2694_v23 = vld [vmem:[%s2931_s9 + $0x48] sm:$0xe] }
  0x4e   : > { %v2695_v28 = vor.u32 %v2694_v23, %v2693_v22 }
  0x50   : > { %2780 = vmatpush.bf16.msra.mxu3 %v2911_v5  ;;  %v533_v5 = vunpack.c.l.b16 %v245_v39  ;;  %v1125_v34 = vrot.slane %v2695_v28, 1  ;;  %v536_v39 = vunpack.c.l.b16 %v248_v37  ;;  %v2812_v37 = vld [vmem:[%s2931_s9 + $0x6c] sm:$0xe] }
  0x52   : > { %v565_v44 = vpack.c.b16 %v533_v5, %v533_v5 }
  0x54   : > { %2781 = vmatpush.bf16.msra.mxu3 %v2926_v8  ;;  %v645_v8 = vshll.u32 %v2670_v43, 16  ;;  %v650_v48 = vshll.u32 %v565_v44, 16  ;;  %v1120_v56 = vrot.slane %v565_v44, 1  ;;  %v3110_v44 = vld [vmem:[%s2931_s9 + $0x174] sm:$0xff]  }
  0x56   : > { %v647_v47 = vrot.slane %v645_v8, 1  ;;  %v652_v54 = vrot.slane %v650_v48, 1  ;;  %v681_v8 = vshll.u32 %v191_v30, 16 }
  0x58   : > { %2782 = vmatpush.bf16.msra.mxu3 %v2946_v11  ;;  %v2690_v11 = vld [vmem:[%s2931_s9 + $0x30] sm:$0xf0]  ;;  %v648_v53 = vor.u32 %v647_v47, %v643_v46  ;;  %v679_v46 = vshrl.u32 %v191_v30, 16  ;;  %v683_v47 = vrot.slane %v681_v8, 1 }
  0x59   : > { %v2692_v51 = vor.u32 %v2691_v45, %v2690_v11  ;;  %v3113_v11 = vld [vmem:[%s2931_s9 + $0x174] sm:$0xf0] }
  0x5a   : > { %v653_v58 = vsel %vm593_vm0, %v648_v53, %v652_v54  ;;  %v249_v54 = vld [vmem:[%s2931_s9 + $0x68] sm:$0x1] }
  0x5b   : > { %1454 = vmatmul.bf16.gmra.mxu0 %v183_v12  ;;  %1574 = vmatmul.bf16.gmra.mxu3 %v3058_v29  ;;  %v1119_v55 = vrot.slane %v2692_v51, 1  ;;  %v247_v12 = vld [vmem:[%s2931_s9 + $0x50] sm:$0x1] }
  0x5c   : > { %2783 = vmatpush.bf16.msra.mxu3 %v2962_v15  ;;  %1623 = vmatmul.bf16.gmra.mxu1 %v641_v40  ;;  %v187_v15 = vld [vmem:[%s2931_s9 + $0x3c] sm:$0xff]   ;;  %v535_v13 = vunpack.c.l.b16 %v247_v12 }
  0x5d   : > { %1792 = vmatmul.bf16.gmra.mxu2 %v1118_v41  ;;  %v1121_v59 = vsel %vm1106_vm1, %v1119_v55, %v1120_v56  ;;  %v657_v62 = vshll.u32 %v187_v15, 16  ;;  %v655_v0 = vshrl.u32 %v187_v15, 16  ;;  %v2809_v41 = vld [vmem:[%s2931_s9 + $0x54] sm:$0xe]  ;;  %v265_v55 = vld [vmem:[%s2931_s9 + $0x128] sm:$0x1]  ;;  %v537_v56 = vunpack.c.l.b16 %v249_v54 }
  0x5e   : > { %v567_v21 = vpack.c.b16 %v535_v13, %v535_v13  ;;  %v2810_v48 = vor.u32 %v2809_v41, %v2808_v31  ;;  %v554_v31 = vunpack.c.l.b16 %v266_v25 }
  0x5f   : > { %v659_v1 = vrot.slane %v657_v62, 1  ;;  %v569_v62 = vpack.c.b16 %v537_v56, %v537_v56 }
  0x60   : > { %2784 = vmatpush.bf16.msra.mxu3 %v2978_v20  ;;  %v246_v20 = vld [vmem:[%s2931_s9 + $0x44] sm:$0x1]  ;;  %v674_v26 = vshll.u32 %v567_v21, 16  ;;  %v1126_v35 = vrot.slane %v567_v21, 1  ;;  %v1128_v52 = vrot.slane %v2810_v48, 1  ;;  %v895_v48 = vshrl.u32 %v3027_v49, 16 }
  0x61   : > { %v534_v60 = vunpack.c.l.b16 %v246_v20  ;;  %v660_v6 = vor.u32 %v659_v1, %v655_v0  ;;  %v553_v20 = vunpack.c.l.b16 %v265_v55  ;;  %v2696_v1 = vld [vmem:[%s2931_s9 + $0x60] sm:$0xf0]  ;;  %v1132_v24 = vrot.slane %v569_v62, 1 }
  0x62   : > { %v676_v33 = vrot.slane %v674_v26, 1  ;;  %v1127_v40 = vsel %vm1106_vm1, %v1125_v34, %v1126_v35  ;;  %v3137_v26 = vld [vmem:[%s3578_s2] ss:$0 sm:$0xff]  ;;  %v538_v35 = vunpack.c.l.b16 %v250_v42 }
  0x63   : > { %v3122_v0 = vpack.c.b16 %v553_v20, %v553_v20 }
  0x64   : > { %2785 = vmatpush.bf16.msra.mxu3 %v2995_v27  ;;  %v566_v27 = vpack.c.b16 %v534_v60, %v534_v60  ;;  %v677_v5 = vsel %vm593_vm0, %v672_v32, %v676_v33  ;;  %v2672_v60 = vld [vmem:[%s2931_s9 + $0x60] sm:$0xff]   ;;  %v570_v41 = vpack.c.b16 %v538_v35, %v538_v35  ;;  %v2699_v35 = vld [vmem:[%s2931_s9 + $0x78] sm:$0xf0] }
  0x65   : > { %v890_v12 = vshll.u32 %v3122_v0, 16 }
  0x66   : > { %v662_v3 = vshll.u32 %v566_v27, 16  ;;  %v1123_v10 = vrot.slane %v566_v27, 1  ;;  %v693_v27 = vshll.u32 %v2672_v60, 16  ;;  %v710_v55 = vshll.u32 %v570_v41, 16 }
  0x67   : > { %v892_v22 = vrot.slane %v890_v12, 1 }
  0x68   : > { %2786 = vmatpush.bf16.msra.mxu3 %v3012_v36  ;;  %v3090_v36 = vld [vmem:[%s2931_s9 + $0x15c] sm:$0xf0]  ;;  %v664_v7 = vrot.slane %v662_v3, 1  ;;  %v1124_v16 = vsel %vm1106_vm1, %v1122_v9, %v1123_v10  ;;  %v695_v9 = vrot.slane %v693_v27, 1  ;;  %v698_v10 = vshll.u32 %v569_v62, 16 }
  0x69   : > { %v2697_v3 = vld [vmem:[%s2931_s9 + $0x60] sm:$0xe]  ;;  %v267_v27 = vld [vmem:[%s2931_s9 + $0x140] sm:$0x1]  ;;  %v712_v62 = vrot.slane %v710_v55, 1 }
  0x6a   : > { %v665_v14 = vsel %vm593_vm0, %v660_v6, %v664_v7  ;;  %v887_v6 = vrot.slane %v885_v61, 1  ;;  %v691_v7 = vshrl.u32 %v2672_v60, 16  ;;  %v2698_v13 = vor.u32 %v2697_v3, %v2696_v1  ;;  %v251_v61 = vld [vmem:[%s2931_s9 + $0x80] sm:$0x1] }
  0x6b   : > { %1459 = vmatmul.bf16.gmra.mxu0 %v2670_v43  ;;  %1579 = vmatmul.bf16.gmra.mxu3 %v3080_v57  ;;  %v568_v43 = vpack.c.b16 %v536_v39, %v536_v39  ;;  %v700_v21 = vrot.slane %v698_v10, 1  ;;  %v1135_v3 = vrot.slane %v570_v41, 1  ;;  %v555_v10 = vunpack.c.l.b16 %v267_v27 }
  0x6c   : > { %1628 = vmatmul.bf16.gmra.mxu1 %v653_v58  ;;  %v696_v18 = vor.u32 %v695_v9, %v691_v7  ;;  %v1131_v23 = vrot.slane %v2698_v13, 1  ;;  %v539_v9 = vunpack.c.l.b16 %v251_v61 }
  0x6d   : > { %1797 = vmatmul.bf16.gmra.mxu2 %v1121_v59  ;;  %v686_v45 = vshll.u32 %v568_v43, 16  ;;  %v1129_v53 = vrot.slane %v568_v43, 1 }
  0x6e   : > { %v701_v33 = vsel %vm593_vm0, %v696_v18, %v700_v21  ;;  %v1133_v34 = vsel %vm1106_vm1, %v1131_v23, %v1132_v24  ;;  %v3164_v18 = vld [vmem:[%s2931_s9 + $0x78] sm:$0xff]   ;;  %v571_v42 = vpack.c.b16 %v539_v9, %v539_v9 }
  0x6f   : > { %v688_v51 = vrot.slane %v686_v45, 1  ;;  %v1130_v59 = vsel %vm1106_vm1, %v1128_v52, %v1129_v53  ;;  %v717_v25 = vshll.u32 %v3164_v18, 16  ;;  %v715_v41 = vshrl.u32 %v3164_v18, 16 }
  0x70   : > { %v1138_v27 = vrot.slane %v571_v42, 1 }
  0x7b   : > { %1464 = vmatmul.bf16.gmra.mxu0 %v187_v15  ;;  %1584 = vmatmul.bf16.gmra.mxu3 %v3087_v63  ;;  %v684_v15 = vor.u32 %v683_v47, %v679_v46 }
  0x7c   : > { %1633 = vmatmul.bf16.gmra.mxu1 %v665_v14  ;;  %v3129_v14 = vld [vmem:[%s2931_s9 + $0x6c] sm:$0xff]  }
  0x7d   : > { %1802 = vmatmul.bf16.gmra.mxu2 %v1124_v16  ;;  %v689_v58 = vsel %vm593_vm0, %v684_v15, %v688_v51  ;;  %v2811_v16 = vld [vmem:[%s2931_s9 + $0x6c] sm:$0xf0]  ;;  %v705_v43 = vshll.u32 %v3129_v14, 16  ;;  %v703_v53 = vshrl.u32 %v3129_v14, 16 }
  0x7e   : > { %v2813_v56 = vor.u32 %v2812_v37, %v2811_v16  ;;  %v2700_v37 = vld [vmem:[%s2931_s9 + $0x78] sm:$0xe] }
  0x7f   : > { %v707_v54 = vrot.slane %v705_v43, 1  ;;  %v719_v43 = vrot.slane %v717_v25, 1 }
  0x80   : > { %v1134_v1 = vrot.slane %v2813_v56, 1 }
  0x81   : > { %v720_v55 = vor.u32 %v719_v43, %v715_v41 }
  0x82   : > { %v1136_v23 = vsel %vm1106_vm1, %v1134_v1, %v1135_v3  ;;  %v252_v1 = vld [vmem:[%s2931_s9 + $0x8c] sm:$0x1] }
  0x8b   : > { %1469 = vmatmul.bf16.gmra.mxu0 %v2671_v17  ;;  %1589 = vmatmul.bf16.gmra.mxu3 %v3103_v38  ;;  %v888_v17 = vor.u32 %v887_v6, %v883_v4 }
  0x8c   : > { %1638 = vmatmul.bf16.gmra.mxu1 %v677_v5  ;;  %v3144_v5 = vpack.c.b16 %v554_v31, %v554_v31 }
  0x8d   : > { %1807 = vmatmul.bf16.gmra.mxu2 %v1127_v40  ;;  %v897_v40 = vshll.u32 %v3027_v49, 16  ;;  %v708_v49 = vor.u32 %v707_v54, %v703_v53  ;;  %v3190_v54 = vld [vmem:[%s2931_s9 + $0x84] sm:$0xff]  }
  0x8e   : > { %v902_v15 = vshll.u32 %v3144_v5, 16 }
  0x8f   : > { %v899_v51 = vrot.slane %v897_v40, 1 }
  0x9b   : > { %1474 = vmatmul.bf16.gmra.mxu0 %v191_v30  ;;  %1594 = vmatmul.bf16.gmra.mxu3 %v3110_v44  ;;  %v893_v30 = vsel %vm593_vm0, %v888_v17, %v892_v22  ;;  %v713_v22 = vsel %vm593_vm0, %v708_v49, %v712_v62 }
  0x9c   : > { %1643 = vmatmul.bf16.gmra.mxu1 %v689_v58 }
  0x9d   : > { %1812 = vmatmul.bf16.gmra.mxu2 %v1130_v59  ;;  %v900_v59 = vor.u32 %v899_v51, %v895_v48  ;;  %v722_v48 = vshll.u32 %v571_v42, 16 }
  0xa8   : > { %v1440_v28 = vpop.f32.mrf.mxu0 }
  0xa9   : > { %v1609_v32 = vpop.f32.mrf.mxu1  ;;  %v1441_v39 = vadd.f32 %v3137_v26, %v1440_v28  ;;  %v3171_v28 = vpack.c.b16 %v555_v10, %v555_v10 }
  0xab   : > { %1479 = vmatmul.bf16.gmra.mxu0 %v2672_v60  ;;  %1728 = vmatmul.bf16.vlgmr.msrb.gmra.mxu3 %v893_v30  ;;  %v1610_v46 = vadd.f32 %v1609_v32, %v1441_v39  ;;  %v904_v60 = vrot.slane %v902_v15, 1  ;;  %v909_v30 = vshll.u32 %v3050_v19, 16  ;;  %v907_v39 = vshrl.u32 %v3050_v19, 16  ;;  %v2814_v19 = vld [vmem:[%s2931_s9 + $0x84] sm:$0xf0] }
  0xac   : > { %1648 = vmatmul.bf16.gmra.mxu1 %v701_v33  ;;  %v914_v51 = vshll.u32 %v3171_v28, 16 }
  0xad   : > { %1817 = vmatmul.bf16.gmra.mxu2 %v1133_v34  ;;  %v905_v17 = vsel %vm593_vm0, %v900_v59, %v904_v60  ;;  %v268_v60 = vld [vmem:[%s2931_s9 + $0x14c] sm:$0x1] }
  0xae   : > { %v3148_v8 = vpop.f32.mrf.mxu3  ;;  %v916_v59 = vrot.slane %v914_v51, 1 }
  0xb0   : > { %v1778_v45 = vpop.f32.mrf.mxu2  ;;  %v1442_v47 = vpop.f32.mrf.mxu0 }
  0xb1   : > { %v1611_v52 = vpop.f32.mrf.mxu1  ;;  %v1443_v20 = vadd.f32 %v3137_v26, %v1442_v47  ;;  %v1779_v58 = vadd.f32 %v1778_v45, %v1610_v46  ;;  %v911_v45 = vrot.slane %v909_v30, 1 }
  0xb3   : > { %v1612_v4 = vadd.f32 %v1611_v52, %v1443_v20  ;;  %v2002_v12 = vmul.f32 0.2, %v1779_v58  ;;  %vm1938_vm2 = vcmp.ge.f32.partialorder %v1779_v58, 0.0  ;;  %v2701_v52 = vor.u32 %v2700_v37, %v2699_v35 }
  0xb4   : > { %v724_v20 = vrot.slane %v722_v48, 1 }
  0xb5   : > { %v2066_v31 = vsel %vm1938_vm2, %v1779_v58, %v2002_v12  ;;  %v912_v58 = vor.u32 %v911_v45, %v907_v39  ;;  %v1137_v61 = vrot.slane %v2701_v52, 1 }
  0xb6   : > { %v3160_v6 = vpop.f32.mrf.mxu3  ;;  %v725_v12 = vsel %vm593_vm0, %v720_v55, %v724_v20  ;;  %v269_v20 = vld [vmem:[%s2931_s9 + $0x158] sm:$0x1] }
  0xb8   : > { %v1780_v7 = vpop.f32.mrf.mxu2  ;;  %v1445_v16 = vpop.f32.mrf.mxu0 }
  0xb9   : > { %v1781_v13 = vadd.f32 %v1780_v7, %v1612_v4  ;;  %v1614_v21 = vpop.f32.mrf.mxu1  ;;  %v1446_v33 = vadd.f32 %v3137_v26, %v1445_v16  ;;  %v556_v4 = vunpack.c.l.b16 %v268_v60 }
  0xbb   : > { %vm1939_vm3 = vcmp.ge.f32.partialorder %v1781_v13, 0.0  ;;  %v2003_v24 = vmul.f32 0.2, %v1781_v13  ;;  %1484 = vmatmul.bf16.gmra.mxu0 %v3129_v14  ;;  %1733 = vmatmul.bf16.gmra.mxu3 %v905_v17  ;;  %v1615_v46 = vadd.f32 %v1614_v21, %v1446_v33  ;;  %v1139_v17 = vsel %vm1106_vm1, %v1137_v61, %v1138_v27 }
  0xbc   : > { %1653 = vmatmul.bf16.gmra.mxu1 %v713_v22  ;;  %v540_v21 = vunpack.c.l.b16 %v252_v1 }
  0xbd   : > { %v2067_v32 = vsel %vm1939_vm3, %v1781_v13, %v2003_v24  ;;  %1822 = vmatmul.bf16.gmra.mxu2 %v1136_v23  ;;  %v917_v13 = vsel %vm593_vm0, %v912_v58, %v916_v59  ;;  %v2815_v23 = vld [vmem:[%s2931_s9 + $0x84] sm:$0xe]  ;;  %v3202_v24 = vpack.c.b16 %v556_v4, %v556_v4 }
  0xbe   : > { %v2512_v14 = vpack.c.bf16 %v2067_v32, %v2066_v31  ;;  %v3180_v34 = vpop.f32.mrf.mxu3  ;;  %v921_v31 = vshll.u32 %v3058_v29, 16  ;;  %v572_v33 = vpack.c.b16 %v540_v21, %v540_v21  ;;  %v2816_v51 = vor.u32 %v2815_v23, %v2814_v19 }
  0xbf   : > { %v926_v43 = vshll.u32 %v3202_v24, 16  ;;  %v933_v21 = vshll.u32 %v3080_v57, 16 }
  0xc0   : > { %2513 = vst [vmem:[%s3177_s23] sm:$0xff] %v2512_v14   ;;  %v1783_v40 = vpop.f32.mrf.mxu2  ;;  %v1447_v47 = vpop.f32.mrf.mxu0  ;;  %v729_v14 = vshll.u32 %v3190_v54, 16  ;;  %v923_v41 = vrot.slane %v921_v31, 1  ;;  %v734_v48 = vshll.u32 %v572_v33, 16  ;;  %v1141_v60 = vrot.slane %v572_v33, 1 }
  0xc1   : > { %v1616_v15 = vpop.f32.mrf.mxu1  ;;  %v1448_v53 = vadd.f32 %v3137_v26, %v1447_v47  ;;  %v1784_v56 = vadd.f32 %v1783_v40, %v1615_v46  ;;  %v919_v40 = vshrl.u32 %v3058_v29, 16  ;;  %v727_v46 = vshrl.u32 %v3190_v54, 16 }
  0xc2   : > { %v731_v47 = vrot.slane %v729_v14, 1  ;;  %v928_v55 = vrot.slane %v926_v43, 1  ;;  %v736_v59 = vrot.slane %v734_v48, 1  ;;  %v1140_v29 = vrot.slane %v2816_v51, 1  ;;  %v2702_v14 = vld [vmem:[%s2931_s9 + $0x90] sm:$0xf0] }
  0xc3   : > { %v1617_v49 = vadd.f32 %v1616_v15, %v1448_v53  ;;  %v2004_v7 = vmul.f32 0.2, %v1784_v56  ;;  %vm1940_vm4 = vcmp.ge.f32.partialorder %v1784_v56, 0.0  ;;  %v924_v53 = vor.u32 %v923_v41, %v919_v40 }
  0xc4   : > { %v732_v58 = vor.u32 %v731_v47, %v727_v46 }
  0xc5   : > { %v2068_v25 = vsel %vm1940_vm4, %v1784_v56, %v2004_v7  ;;  %v253_v56 = vld [vmem:[%s2931_s9 + $0x98] sm:$0x1] }
  0xc6   : > { %v3194_v62 = vpop.f32.mrf.mxu3  ;;  %v541_v1 = vunpack.c.l.b16 %v253_v56 }
  0xc8   : > { %v1785_v3 = vpop.f32.mrf.mxu2  ;;  %v1450_v10 = vpop.f32.mrf.mxu0 }
  0xc9   : > { %v1786_v9 = vadd.f32 %v1785_v3, %v1617_v49  ;;  %v1619_v16 = vpop.f32.mrf.mxu1  ;;  %v1451_v30 = vadd.f32 %v3137_v26, %v1450_v10  ;;  %v557_v3 = vunpack.c.l.b16 %v269_v20 }
  0xcb   : > { %vm1941_vm5 = vcmp.ge.f32.partialorder %v1786_v9, 0.0  ;;  %v2005_v22 = vmul.f32 0.2, %v1786_v9  ;;  %1489 = vmatmul.bf16.gmra.mxu0 %v3164_v18  ;;  %1738 = vmatmul.bf16.gmra.mxu3 %v917_v13  ;;  %v1620_v37 = vadd.f32 %v1619_v16, %v1451_v30  ;;  %v1142_v13 = vsel %vm1106_vm1, %v1140_v29, %v1141_v60  ;;  %v2674_v16 = vld [vmem:[%s2931_s9 + $0x90] sm:$0xff]  }
  0xcc   : > { %1658 = vmatmul.bf16.gmra.mxu1 %v725_v12  ;;  %v737_v12 = vsel %vm593_vm0, %v732_v58, %v736_v59  ;;  %v3224_v23 = vpack.c.b16 %v557_v3, %v557_v3  ;;  %v741_v31 = vshll.u32 %v2674_v16, 16  ;;  %v739_v40 = vshrl.u32 %v2674_v16, 16  ;;  %v270_v59 = vld [vmem:[%s2931_s9 + $0x164] sm:$0x1] }
  0xcd   : > { %v2069_v42 = vsel %vm1941_vm5, %v1786_v9, %v2005_v22  ;;  %1827 = vmatmul.bf16.gmra.mxu2 %v1139_v17  ;;  %v929_v9 = vsel %vm593_vm0, %v924_v53, %v928_v55  ;;  %v573_v22 = vpack.c.b16 %v541_v1, %v541_v1  ;;  %v2817_v53 = vld [vmem:[%s2931_s9 + $0x9c] sm:$0xf0]  ;;  %v254_v1 = vld [vmem:[%s2931_s9 + $0xa4] sm:$0x1] }
  0xce   : > { %v2517_v32 = vpack.c.bf16 %v2069_v42, %v2068_v25  ;;  %v3207_v35 = vpop.f32.mrf.mxu3  ;;  %v938_v47 = vshll.u32 %v3224_v23, 16 }
  0xcf   : > { %v746_v46 = vshll.u32 %v573_v22, 16  ;;  %v1144_v60 = vrot.slane %v573_v22, 1 }
  0xd0   : > { %2732 = vst [vmem:[%s3177_s23 + $0x8] sm:$0xff] %v2517_v32   ;;  %v1788_v18 = vpop.f32.mrf.mxu2  ;;  %v1452_v39 = vpop.f32.mrf.mxu0  ;;  %v940_v58 = vrot.slane %v938_v47, 1 }
  0xd1   : > { %v1621_v45 = vpop.f32.mrf.mxu1  ;;  %v1453_v15 = vadd.f32 %v3137_v26, %v1452_v39  ;;  %v1789_v52 = vadd.f32 %v1788_v18, %v1620_v37  ;;  %v2703_v18 = vld [vmem:[%s2931_s9 + $0x90] sm:$0xe]  ;;  %v935_v37 = vrot.slane %v933_v21, 1  ;;  %v748_v20 = vrot.slane %v746_v46, 1 }
  0xd2   : > { %v2704_v51 = vor.u32 %v2703_v18, %v2702_v14  ;;  %v542_v21 = vunpack.c.l.b16 %v254_v1 }
  0xd3   : > { %v1622_v61 = vadd.f32 %v1621_v45, %v1453_v15  ;;  %v2006_v4 = vmul.f32 0.2, %v1789_v52  ;;  %vm1942_vm6 = vcmp.ge.f32.partialorder %v1789_v52, 0.0  ;;  %v743_v45 = vrot.slane %v741_v31, 1 }
  0xd4   : > { %v1143_v29 = vrot.slane %v2704_v51, 1 }
  0xd5   : > { %v2070_v25 = vsel %vm1942_vm6, %v1789_v52, %v2006_v4  ;;  %v3236_v52 = vld [vmem:[%s2931_s9 + $0x9c] sm:$0xff]   ;;  %v744_v56 = vor.u32 %v743_v45, %v739_v40  ;;  %v558_v4 = vunpack.c.l.b16 %v270_v59  ;;  %v255_v59 = vld [vmem:[%s2931_s9 + $0xb0] sm:$0x1] }
  0xd6   : > { %v3216_v27 = vpop.f32.mrf.mxu3 }
  0xd8   : > { %v1790_v49 = vpop.f32.mrf.mxu2  ;;  %v1455_v7 = vpop.f32.mrf.mxu0 }
  0xd9   : > { %v1791_v19 = vadd.f32 %v1790_v49, %v1622_v61  ;;  %v1624_v10 = vpop.f32.mrf.mxu1  ;;  %v1456_v30 = vadd.f32 %v3137_v26, %v1455_v7 }
  0xdb   : > { %vm1943_vm7 = vcmp.ge.f32.partialorder %v1791_v19, 0.0  ;;  %v2007_v17 = vmul.f32 0.2, %v1791_v19  ;;  %1494 = vmatmul.bf16.gmra.mxu0 %v3190_v54  ;;  %1743 = vmatmul.bf16.gmra.mxu3 %v929_v9  ;;  %v931_v54 = vshrl.u32 %v3080_v57, 16  ;;  %v1625_v41 = vadd.f32 %v1624_v10, %v1456_v30 }
  0xdc   : > { %1663 = vmatmul.bf16.gmra.mxu1 %v737_v12  ;;  %v749_v10 = vsel %vm593_vm0, %v744_v56, %v748_v20  ;;  %v945_v30 = vshll.u32 %v3087_v63, 16 }
  0xdd   : > { %v2071_v42 = vsel %vm1943_vm7, %v1791_v19, %v2007_v17  ;;  %1832 = vmatmul.bf16.gmra.mxu2 %v1142_v13  ;;  %v936_v57 = vor.u32 %v935_v37, %v931_v54  ;;  %v1145_v17 = vsel %vm1106_vm1, %v1143_v29, %v1144_v60  ;;  %v753_v54 = vshll.u32 %v3236_v52, 16  ;;  %v271_v29 = vld [vmem:[%s2931_s9 + $0x170] sm:$0x1] }
  0xde   : > { %v2522_v32 = vpack.c.bf16 %v2071_v42, %v2070_v25  ;;  %v3227_v33 = vpop.f32.mrf.mxu3  ;;  %v2818_v25 = vld [vmem:[%s2931_s9 + $0x9c] sm:$0xe]  ;;  %v3247_v42 = vpack.c.b16 %v558_v4, %v558_v4  ;;  %v574_v37 = vpack.c.b16 %v542_v21, %v542_v21  ;;  %v947_v45 = vrot.slane %v945_v30, 1 }
  0xdf   : > { %v941_v12 = vsel %vm593_vm0, %v936_v57, %v940_v58  ;;  %v755_v51 = vrot.slane %v753_v54, 1  ;;  %v2819_v57 = vor.u32 %v2818_v25, %v2817_v53  ;;  %v2675_v25 = vld [vmem:[%s2931_s9 + $0xa8] sm:$0xff]  }
  0xe0   : > { %2733 = vst [vmem:[%s3177_s23 + $0x10] sm:$0xff] %v2522_v32   ;;  %v1793_v39 = vpop.f32.mrf.mxu2  ;;  %v1457_v43 = vpop.f32.mrf.mxu0  ;;  %v950_v46 = vshll.u32 %v3247_v42, 16  ;;  %v1147_v1 = vrot.slane %v574_v37, 1 }
  0xe1   : > { %v1626_v48 = vpop.f32.mrf.mxu1  ;;  %v1458_v15 = vadd.f32 %v3137_v26, %v1457_v43  ;;  %v1794_v55 = vadd.f32 %v1793_v39, %v1625_v41  ;;  %v943_v43 = vshrl.u32 %v3087_v63, 16  ;;  %v1146_v63 = vrot.slane %v2819_v57, 1 }
  0xe2   : > { %v952_v58 = vrot.slane %v950_v46, 1 }
  0xe3   : > { %v1627_v61 = vadd.f32 %v1626_v48, %v1458_v15  ;;  %v2008_v19 = vmul.f32 0.2, %v1794_v55  ;;  %vm1944_vm8 = vcmp.ge.f32.partialorder %v1794_v55, 0.0  ;;  %v751_v48 = vshrl.u32 %v3236_v52, 16 }
  0xe4   : > { %v758_v15 = vshll.u32 %v574_v37, 16  ;;  %v948_v20 = vor.u32 %v947_v45, %v943_v43  ;;  %v2705_v43 = vld [vmem:[%s2931_s9 + $0xa8] sm:$0xf0]  ;;  %v2706_v45 = vld [vmem:[%s2931_s9 + $0xa8] sm:$0xe] }
  0xe5   : > { %v2072_v31 = vsel %vm1944_vm8, %v1794_v55, %v2008_v19  ;;  %v756_v60 = vor.u32 %v755_v51, %v751_v48  ;;  %v763_v48 = vshrl.u32 %v2675_v25, 16 }
  0xe6   : > { %v3240_v49 = vpop.f32.mrf.mxu3 }
  0xe8   : > { %v1795_v3 = vpop.f32.mrf.mxu2  ;;  %v1460_v9 = vpop.f32.mrf.mxu0 }
  0xe9   : > { %v1796_v7 = vadd.f32 %v1795_v3, %v1627_v61  ;;  %v1629_v13 = vpop.f32.mrf.mxu1  ;;  %v1461_v14 = vadd.f32 %v3137_v26, %v1460_v9  ;;  %v760_v61 = vrot.slane %v758_v15, 1  ;;  %v559_v9 = vunpack.c.l.b16 %v271_v29  ;;  %v3281_v29 = vld [vmem:[%s2931_s9 + $0xb4] sm:$0xff]  }
  0xeb   : > { %vm1945_vm9 = vcmp.ge.f32.partialorder %v1796_v7, 0.0  ;;  %v2009_v22 = vmul.f32 0.2, %v1796_v7  ;;  %1499 = vmatmul.bf16.gmra.mxu0 %v2674_v16  ;;  %1748 = vmatmul.bf16.gmra.mxu3 %v941_v12  ;;  %v1630_v40 = vadd.f32 %v1629_v13, %v1461_v14  ;;  %v953_v13 = vsel %vm593_vm0, %v948_v20, %v952_v58 }
  0xec   : > { %1668 = vmatmul.bf16.gmra.mxu1 %v749_v10  ;;  %v761_v21 = vsel %vm593_vm0, %v756_v60, %v760_v61  ;;  %v3269_v14 = vpack.c.b16 %v559_v9, %v559_v9  ;;  %v2707_v58 = vor.u32 %v2706_v45, %v2705_v43  ;;  %v2820_v60 = vld [vmem:[%s2931_s9 + $0xb4] sm:$0xf0]  ;;  %v969_v45 = vshll.u32 %v3110_v44, 16 }
  0xed   : > { %v2073_v32 = vsel %vm1945_vm9, %v1796_v7, %v2009_v22  ;;  %1837 = vmatmul.bf16.gmra.mxu2 %v1145_v17  ;;  %v543_v7 = vunpack.c.l.b16 %v255_v59  ;;  %v1148_v22 = vsel %vm1106_vm1, %v1146_v63, %v1147_v1 }
  0xee   : > { %v2527_v18 = vpack.c.bf16 %v2073_v32, %v2072_v31  ;;  %v3252_v39 = vpop.f32.mrf.mxu3  ;;  %v957_v31 = vshll.u32 %v3103_v38, 16 }
  0xef   : > { %v575_v32 = vpack.c.b16 %v543_v7, %v543_v7  ;;  %v1149_v7 = vrot.slane %v2707_v58, 1  ;;  %v971_v58 = vrot.slane %v969_v45, 1 }
  0xf0   : > { %2734 = vst [vmem:[%s3177_s23 + $0x18] sm:$0xff] %v2527_v18   ;;  %v1798_v16 = vpop.f32.mrf.mxu2  ;;  %v1462_v41 = vpop.f32.mrf.mxu0  ;;  %v959_v46 = vrot.slane %v957_v31, 1 }
  0xf1   : > { %v1631_v47 = vpop.f32.mrf.mxu1  ;;  %v1463_v55 = vadd.f32 %v3137_v26, %v1462_v41  ;;  %v1799_v56 = vadd.f32 %v1798_v16, %v1630_v40  ;;  %v765_v16 = vshll.u32 %v2675_v25, 16  ;;  %v1150_v9 = vrot.slane %v575_v32, 1 }
  0xf3   : > { %v1632_v3 = vadd.f32 %v1631_v47, %v1463_v55  ;;  %v2010_v10 = vmul.f32 0.2, %v1799_v56  ;;  %vm1946_vm10 = vcmp.ge.f32.partialorder %v1799_v56, 0.0  ;;  %v767_v57 = vrot.slane %v765_v16, 1 }
  0xf4   : > { %v770_v55 = vshll.u32 %v575_v32, 16 }
  0xf5   : > { %v2074_v18 = vsel %vm1946_vm10, %v1799_v56, %v2010_v10  ;;  %v962_v56 = vshll.u32 %v3269_v14, 16  ;;  %v768_v63 = vor.u32 %v767_v57, %v763_v48 }
  0xf6   : > { %v3261_v4 = vpop.f32.mrf.mxu3  ;;  %v772_v1 = vrot.slane %v770_v55, 1 }
  0xf8   : > { %v1800_v19 = vpop.f32.mrf.mxu2  ;;  %v1465_v12 = vpop.f32.mrf.mxu0  ;;  %v773_v31 = vsel %vm593_vm0, %v768_v63, %v772_v1 }
  0xf9   : > { %v1801_v53 = vadd.f32 %v1800_v19, %v1632_v3  ;;  %v1634_v17 = vpop.f32.mrf.mxu1  ;;  %v1466_v37 = vadd.f32 %v3137_v26, %v1465_v12  ;;  %v964_v3 = vrot.slane %v962_v56, 1  ;;  %v272_v19 = vld [vmem:[%s2931_s9 + $0x17c] sm:$0x1] }
  0xfa   : > { %v256_v12 = vld [vmem:[%s2931_s9 + $0xbc] sm:$0x1] }
  0xfb   : > { %vm1947_vm11 = vcmp.ge.f32.partialorder %v1801_v53, 0.0  ;;  %v2011_v30 = vmul.f32 0.2, %v1801_v53  ;;  %1504 = vmatmul.bf16.gmra.mxu0 %v3236_v52  ;;  %1753 = vmatmul.bf16.gmra.mxu3 %v953_v13  ;;  %v955_v52 = vshrl.u32 %v3103_v38, 16  ;;  %v1635_v51 = vadd.f32 %v1634_v17, %v1466_v37 }
  0xfc   : > { %1673 = vmatmul.bf16.gmra.mxu1 %v761_v21  ;;  %v560_v17 = vunpack.c.l.b16 %v272_v19  ;;  %v1151_v37 = vsel %vm1106_vm1, %v1149_v7, %v1150_v9  ;;  %v544_v16 = vunpack.c.l.b16 %v256_v12  ;;  %v257_v12 = vld [vmem:[%s2931_s9 + $0xc8] sm:$0x1] }
  0xfd   : > { %v2075_v54 = vsel %vm1947_vm11, %v1801_v53, %v2011_v30  ;;  %1842 = vmatmul.bf16.gmra.mxu2 %v1148_v22  ;;  %v960_v38 = vor.u32 %v959_v46, %v955_v52 }
  0xfe   : > { %v2532_v40 = vpack.c.bf16 %v2075_v54, %v2074_v18  ;;  %v3272_v41 = vpop.f32.mrf.mxu3  ;;  %v3292_v43 = vpack.c.b16 %v560_v17, %v560_v17 }
  0xff   : > { %v965_v18 = vsel %vm593_vm0, %v960_v38, %v964_v3 }
 0x100   : > { %2735 = vst [vmem:[%s3177_s23 + $0x20] sm:$0xff] %v2532_v40   ;;  %v1803_v47 = vpop.f32.mrf.mxu2  ;;  %v1467_v15 = vpop.f32.mrf.mxu0  ;;  %v2821_v40 = vld [vmem:[%s2931_s9 + $0xb4] sm:$0xe] }
 0x101   : > { %v1636_v20 = vpop.f32.mrf.mxu1  ;;  %v1468_v59 = vadd.f32 %v3137_v26, %v1467_v15  ;;  %v1804_v61 = vadd.f32 %v1803_v47, %v1635_v51  ;;  %v777_v51 = vshll.u32 %v3281_v29, 16  ;;  %v576_v15 = vpack.c.b16 %v544_v16, %v544_v16 }
 0x102   : > { %v2822_v3 = vor.u32 %v2821_v40, %v2820_v60 }
 0x103   : > { %v1637_v10 = vadd.f32 %v1636_v20, %v1468_v59  ;;  %v2012_v21 = vmul.f32 0.2, %v1804_v61  ;;  %vm1948_vm12 = vcmp.ge.f32.partialorder %v1804_v61, 0.0  ;;  %v967_v20 = vshrl.u32 %v3110_v44, 16 }
 0x104   : > { %v974_v59 = vshll.u32 %v3292_v43, 16  ;;  %v779_v63 = vrot.slane %v777_v51, 1  ;;  %v782_v1 = vshll.u32 %v576_v15, 16  ;;  %v1153_v44 = vrot.slane %v576_v15, 1 }
 0x105   : > { %v2076_v52 = vsel %vm1948_vm12, %v1804_v61, %v2012_v21  ;;  %v775_v61 = vshrl.u32 %v3281_v29, 16  ;;  %v972_v9 = vor.u32 %v971_v58, %v967_v20  ;;  %v1152_v21 = vrot.slane %v2822_v3, 1  ;;  %v2721_v20 = vld [vmem:[%s2931_s9 + $0x120] sm:$0xe] }
 0x106   : > { %v3285_v53 = vpop.f32.mrf.mxu3  ;;  %v784_v17 = vrot.slane %v782_v1, 1 }
 0x108   : > { %v1805_v13 = vpop.f32.mrf.mxu2  ;;  %v1470_v30 = vpop.f32.mrf.mxu0 }
 0x109   : > { %v1806_v22 = vadd.f32 %v1805_v13, %v1637_v10  ;;  %v1639_v54 = vpop.f32.mrf.mxu1  ;;  %v1471_v47 = vadd.f32 %v3137_v26, %v1470_v30  ;;  %v976_v10 = vrot.slane %v974_v59, 1  ;;  %v780_v13 = vor.u32 %v779_v63, %v775_v61  ;;  %v2708_v59 = vld [vmem:[%s2931_s9 + $0xc0] sm:$0xf0] }
 0x10b   : > { %vm1949_vm13 = vcmp.ge.f32.partialorder %v1806_v22, 0.0  ;;  %v2013_v32 = vmul.f32 0.2, %v1806_v22  ;;  %1509 = vmatmul.bf16.gmra.mxu0 %v2675_v25  ;;  %1758 = vmatmul.bf16.gmra.mxu3 %v965_v18  ;;  %v1640_v55 = vadd.f32 %v1639_v54, %v1471_v47  ;;  %v545_v18 = vunpack.c.l.b16 %v257_v12 }
 0x10c   : > { %1678 = vmatmul.bf16.gmra.mxu1 %v773_v31  ;;  %v977_v60 = vsel %vm593_vm0, %v972_v9, %v976_v10  ;;  %v785_v45 = vsel %vm593_vm0, %v780_v13, %v784_v17  ;;  %v3322_v13 = vld [vmem:[%s2931_s9 + $0xcc] sm:$0xff]  }
 0x10d   : > { %v2077_v46 = vsel %vm1949_vm13, %v1806_v22, %v2013_v32  ;;  %1847 = vmatmul.bf16.gmra.mxu2 %v1151_v37  ;;  %v2676_v32 = vld [vmem:[%s2931_s9 + $0xc0] sm:$0xff]   ;;  %v2826_v17 = vld [vmem:[%s2931_s9 + $0xcc] sm:$0xf0] }
 0x10e   : > { %v2537_v48 = vpack.c.bf16 %v2077_v46, %v2076_v52  ;;  %v3297_v57 = vpop.f32.mrf.mxu3  ;;  %v1154_v52 = vsel %vm1106_vm1, %v1152_v21, %v1153_v44  ;;  %v789_v47 = vshll.u32 %v2676_v32, 16  ;;  %v787_v61 = vshrl.u32 %v2676_v32, 16 }
 0x110   : > { %2736 = vst [vmem:[%s3177_s23 + $0x28] sm:$0xff] %v2537_v48   ;;  %v1808_v25 = vpop.f32.mrf.mxu2  ;;  %v1472_v56 = vpop.f32.mrf.mxu0  ;;  %v577_v48 = vpack.c.b16 %v545_v18, %v545_v18  ;;  %v791_v63 = vrot.slane %v789_v47, 1  ;;  %v1180_v18 = vrot.slane %v3122_v0, 1 }
 0x111   : > { %v1641_v38 = vpop.f32.mrf.mxu1  ;;  %v1473_v19 = vadd.f32 %v3137_v26, %v1472_v56  ;;  %v1809_v7 = vadd.f32 %v1808_v25, %v1640_v55  ;;  %v2720_v56 = vld [vmem:[%s2931_s9 + $0x120] sm:$0xf0] }
 0x112   : > { %v792_v21 = vor.u32 %v791_v63, %v787_v61 }
 0x113   : > { %v1642_v22 = vadd.f32 %v1641_v38, %v1473_v19  ;;  %v2014_v54 = vmul.f32 0.2, %v1809_v7  ;;  %vm1950_vm14 = vcmp.ge.f32.partialorder %v1809_v7, 0.0  ;;  %v2709_v38 = vld [vmem:[%s2931_s9 + $0xc0] sm:$0xe]  ;;  %v794_v19 = vshll.u32 %v577_v48, 16 }
 0x114   : > { %v2710_v10 = vor.u32 %v2709_v38, %v2708_v59  ;;  %v1561_v59 = vadd.f32 %v3137_v26, %v3148_v8 }
 0x115   : > { %v2078_v51 = vsel %vm1950_vm14, %v1809_v7, %v2014_v54  ;;  %v2722_v7 = vor.u32 %v2721_v20, %v2720_v56  ;;  %v2824_v56 = vld [vmem:[%s2931_s9 + $0x12c] sm:$0xe] }
 0x116   : > { %v3305_v30 = vpop.f32.mrf.mxu3  ;;  %v1155_v54 = vrot.slane %v2710_v10, 1  ;;  %v2827_v20 = vld [vmem:[%s2931_s9 + $0xcc] sm:$0xe] }
 0x118   : > { %v1810_v31 = vpop.f32.mrf.mxu2  ;;  %v1475_v16 = vpop.f32.mrf.mxu0 }
 0x119   : > { %v1811_v37 = vadd.f32 %v1810_v31, %v1642_v22  ;;  %v1644_v40 = vpop.f32.mrf.mxu1  ;;  %v1476_v25 = vadd.f32 %v3137_v26, %v1475_v16  ;;  %v796_v22 = vrot.slane %v794_v19, 1  ;;  %v1179_v31 = vrot.slane %v2722_v7, 1 }
 0x11b   : > { %vm1951_vm15 = vcmp.ge.f32.partialorder %v1811_v37, 0.0  ;;  %v2015_v46 = vmul.f32 0.2, %v1811_v37  ;;  %1514 = vmatmul.bf16.gmra.mxu0 %v3281_v29  ;;  %1763 = vmatmul.bf16.gmra.mxu3 %v977_v60  ;;  %v1645_v1 = vadd.f32 %v1644_v40, %v1476_v25  ;;  %v258_v40 = vld [vmem:[%s2931_s9 + $0xd4] sm:$0x1] }
 0x11c   : > { %1683 = vmatmul.bf16.gmra.mxu1 %v785_v45 }
 0x11d   : > { %v2079_v15 = vsel %vm1951_vm15, %v1811_v37, %v2015_v46  ;;  %1852 = vmatmul.bf16.gmra.mxu2 %v1154_v52  ;;  %v1156_v37 = vrot.slane %v577_v48, 1 }
 0x11e   : > { %v2542_v55 = vpack.c.bf16 %v2079_v15, %v2078_v51  ;;  %v3315_v58 = vpop.f32.mrf.mxu3  ;;  %v797_v51 = vsel %vm593_vm0, %v792_v21, %v796_v22  ;;  %v1181_v15 = vsel %vm1106_vm1, %v1179_v31, %v1180_v18  ;;  %v799_v21 = vshrl.u32 %v3322_v13, 16 }
 0x11f   : > { %v1157_v0 = vsel %vm1106_vm1, %v1155_v54, %v1156_v37  ;;  %v2828_v31 = vor.u32 %v2827_v20, %v2826_v17  ;;  %v1563_v54 = vadd.f32 %v3137_v26, %v3160_v6  ;;  %v3352_v20 = vld [vmem:[%s2931_s9 + $0xd8] sm:$0xff]  }
 0x120   : > { %2737 = vst [vmem:[%s3177_s23 + $0x30] sm:$0xff] %v2542_v55   ;;  %v1813_v29 = vpop.f32.mrf.mxu2  ;;  %v1477_v3 = vpop.f32.mrf.mxu0  ;;  %v546_v55 = vunpack.c.l.b16 %v258_v40  ;;  %v1183_v40 = vrot.slane %v3144_v5, 1 }
 0x121   : > { %v1646_v9 = vpop.f32.mrf.mxu1  ;;  %v1478_v12 = vadd.f32 %v3137_v26, %v1477_v3  ;;  %v1814_v44 = vadd.f32 %v1813_v29, %v1645_v1  ;;  %v801_v1 = vshll.u32 %v3322_v13, 16 }
 0x122   : > { %v578_v3 = vpack.c.b16 %v546_v55, %v546_v55 }
 0x123   : > { %v1647_v16 = vadd.f32 %v1646_v9, %v1478_v12  ;;  %v2016_v52 = vmul.f32 0.2, %v1814_v44  ;;  %vm1952_vm2 = vcmp.ge.f32.partialorder %v1814_v44, 0.0 }
 0x124   : > { %v806_v22 = vshll.u32 %v578_v3, 16 }
 0x125   : > { %v2080_v38 = vsel %vm1952_vm2, %v1814_v44, %v2016_v52  ;;  %v803_v44 = vrot.slane %v801_v1, 1 }
 0x126   : > { %v3326_v60 = vpop.f32.mrf.mxu3 }
 0x127   : > { %v804_v52 = vor.u32 %v803_v44, %v799_v21  ;;  %v2712_v21 = vld [vmem:[%s2931_s9 + $0xd8] sm:$0xe] }
 0x128   : > { %v1815_v45 = vpop.f32.mrf.mxu2  ;;  %v1480_v47 = vpop.f32.mrf.mxu0 }
 0x129   : > { %v1816_v46 = vadd.f32 %v1815_v45, %v1647_v16  ;;  %v1649_v25 = vpop.f32.mrf.mxu1  ;;  %v1481_v61 = vadd.f32 %v3137_v26, %v1480_v47  ;;  %v259_v45 = vld [vmem:[%s2931_s9 + $0xe0] sm:$0x1]  ;;  %v1159_v47 = vrot.slane %v578_v3, 1 }
 0x12b   : > { %vm1953_vm3 = vcmp.ge.f32.partialorder %v1816_v46, 0.0  ;;  %v2017_v48 = vmul.f32 0.2, %v1816_v46  ;;  %1519 = vmatmul.bf16.gmra.mxu0 %v2676_v32  ;;  %1897 = vmatmul.bf16.vlgmr.msra.gmra.mxu3 %v1181_v15  ;;  %v1650_v10 = vadd.f32 %v1649_v25, %v1481_v61  ;;  %v2825_v32 = vor.u32 %v2824_v56, %v3030_v50 }
 0x12c   : > { %1688 = vmatmul.bf16.gmra.mxu1 %v797_v51  ;;  %v1158_v50 = vrot.slane %v2828_v31, 1  ;;  %v813_v61 = vshll.u32 %v3352_v20, 16  ;;  %v811_v31 = vshrl.u32 %v3352_v20, 16 }
 0x12d   : > { %v2081_v29 = vsel %vm1953_vm3, %v1816_v46, %v2017_v48  ;;  %1857 = vmatmul.bf16.gmra.mxu2 %v1157_v0  ;;  %v1182_v16 = vrot.slane %v2825_v32, 1  ;;  %v808_v46 = vrot.slane %v806_v22, 1  ;;  %v547_v0 = vunpack.c.l.b16 %v259_v45  ;;  %v2724_v32 = vld [vmem:[%s2931_s9 + $0x138] sm:$0xe]  ;;  %v3372_v45 = vld [vmem:[%s3578_s2] ss:$0 sm:$0xff] }
 0x12e   : > { %v2547_v63 = vpack.c.bf16 %v2081_v29, %v2080_v38  ;;  %v1729_v19 = vpop.f32.mrf.mxu3  ;;  %v1160_v38 = vsel %vm1106_vm1, %v1158_v50, %v1159_v47  ;;  %v2832_v50 = vld [vmem:[%s2931_s9 + $0xe4] sm:$0xf0]  ;;  %v1568_v47 = vadd.f32 %v3372_v45, %v3194_v62 }
 0x12f   : > { %v3339_v7 = vadd.f32 %v1729_v19, %v1561_v59  ;;  %v1184_v6 = vsel %vm1106_vm1, %v1182_v16, %v1183_v40  ;;  %v809_v59 = vsel %vm593_vm0, %v804_v52, %v808_v46  ;;  %v3376_v46 = vld [vmem:[%s2931_s9 + $0xe4] sm:$0xff]  }
 0x130   : > { %2738 = vst [vmem:[%s3177_s23 + $0x38] sm:$0xff] %v2547_v63   ;;  %v1818_v9 = vpop.f32.mrf.mxu2  ;;  %v1482_v8 = vpop.f32.mrf.mxu0  ;;  %v579_v63 = vpack.c.b16 %v547_v0, %v547_v0 }
 0x131   : > { %v1651_v12 = vpop.f32.mrf.mxu1  ;;  %v1483_v18 = vadd.f32 %v3137_v26, %v1482_v8  ;;  %v1819_v37 = vadd.f32 %v1818_v9, %v1650_v10  ;;  %v1566_v9 = vadd.f32 %v3137_v26, %v3180_v34  ;;  %v2723_v8 = vld [vmem:[%s2931_s9 + $0x138] sm:$0xf0] }
 0x132   : > { %v818_v16 = vshll.u32 %v579_v63, 16  ;;  %v2725_v40 = vor.u32 %v2724_v32, %v2723_v8  ;;  %v2833_v32 = vld [vmem:[%s2931_s9 + $0xe4] sm:$0xe] }
 0x133   : > { %v1652_v51 = vadd.f32 %v1651_v12, %v1483_v18  ;;  %v2018_v55 = vmul.f32 0.2, %v1819_v37  ;;  %vm1954_vm4 = vcmp.ge.f32.partialorder %v1819_v37, 0.0  ;;  %v815_v18 = vrot.slane %v813_v61, 1 }
 0x134   : > { %v1185_v0 = vrot.slane %v2725_v40, 1 }
 0x135   : > { %v2082_v1 = vsel %vm1954_vm4, %v1819_v37, %v2018_v55  ;;  %v1186_v55 = vrot.slane %v3171_v28, 1 }
 0x136   : > { %v1731_v15 = vpop.f32.mrf.mxu3 }
 0x137   : > { %v3348_v25 = vadd.f32 %v1731_v15, %v1563_v54 }
 0x138   : > { %v1820_v17 = vpop.f32.mrf.mxu2  ;;  %v1485_v48 = vpop.f32.mrf.mxu0 }
 0x139   : > { %v1821_v56 = vadd.f32 %v1820_v17, %v1652_v51  ;;  %v1654_v5 = vpop.f32.mrf.mxu1  ;;  %v1486_v19 = vadd.f32 %v3137_v26, %v1485_v48  ;;  %v816_v51 = vor.u32 %v815_v18, %v811_v31  ;;  %v820_v17 = vrot.slane %v818_v16, 1 }
 0x13a   : > { %v1162_v48 = vrot.slane %v579_v63, 1  ;;  %v2830_v63 = vld [vmem:[%s2931_s9 + $0x144] sm:$0xe]  ;;  %v825_v18 = vshll.u32 %v3376_v46, 16 }
 0x13b   : > { %vm1955_vm5 = vcmp.ge.f32.partialorder %v1821_v56, 0.0  ;;  %v2019_v29 = vmul.f32 0.2, %v1821_v56  ;;  %1524 = vmatmul.bf16.gmra.mxu0 %v3322_v13  ;;  %1902 = vmatmul.bf16.gmra.mxu3 %v1184_v6  ;;  %v2711_v13 = vld [vmem:[%s2931_s9 + $0xd8] sm:$0xf0]  ;;  %v1655_v54 = vadd.f32 %v1654_v5, %v1486_v19  ;;  %v821_v62 = vsel %vm593_vm0, %v816_v51, %v820_v17 }
 0x13c   : > { %1693 = vmatmul.bf16.gmra.mxu1 %v809_v59  ;;  %v2713_v34 = vor.u32 %v2712_v21, %v2711_v13  ;;  %v260_v59 = vld [vmem:[%s2931_s9 + $0xec] sm:$0x1]  ;;  %v1187_v19 = vsel %vm1106_vm1, %v1185_v0, %v1186_v55  ;;  %v1573_v0 = vadd.f32 %v3372_v45, %v3216_v27 }
 0x13d   : > { %v2083_v3 = vsel %vm1955_vm5, %v1821_v56, %v2019_v29  ;;  %1862 = vmatmul.bf16.gmra.mxu2 %v1160_v38 }
 0x13e   : > { %v2552_v10 = vpack.c.bf16 %v2083_v3, %v2082_v1  ;;  %v1734_v12 = vpop.f32.mrf.mxu3  ;;  %v1161_v56 = vrot.slane %v2713_v34, 1 }
 0x13f   : > { %v3366_v44 = vadd.f32 %v1734_v12, %v1566_v9  ;;  %v1571_v12 = vadd.f32 %v3372_v45, %v3207_v35 }
 0x140   : > { %2739 = vst [vmem:[%s3177_s23 + $0x40] sm:$0xff] %v2552_v10   ;;  %v1823_v22 = vpop.f32.mrf.mxu2  ;;  %v1487_v37 = vpop.f32.mrf.mxu0  ;;  %v1163_v28 = vsel %vm1106_vm1, %v1161_v56, %v1162_v48  ;;  %v548_v10 = vunpack.c.l.b16 %v260_v59  ;;  %v1189_v48 = vrot.slane %v3202_v24, 1 }
 0x141   : > { %v1656_v26 = vpop.f32.mrf.mxu1  ;;  %v1488_v52 = vadd.f32 %v3372_v45, %v1487_v37  ;;  %v1824_v15 = vadd.f32 %v1823_v22, %v1655_v54 }
 0x142   : > { %v580_v54 = vpack.c.b16 %v548_v10, %v548_v10  ;;  %v3409_v10 = vld [vmem:[%s2931_s9 + $0xf0] sm:$0xff]  }
 0x143   : > { %v1657_v6 = vadd.f32 %v1656_v26, %v1488_v52  ;;  %v2020_v61 = vmul.f32 0.2, %v1824_v15  ;;  %vm1956_vm6 = vcmp.ge.f32.partialorder %v1824_v15, 0.0  ;;  %v823_v52 = vshrl.u32 %v3376_v46, 16 }
 0x144   : > { %v830_v51 = vshll.u32 %v580_v54, 16 }
 0x145   : > { %v2084_v13 = vsel %vm1956_vm6, %v1824_v15, %v2020_v61  ;;  %v2834_v15 = vor.u32 %v2833_v32, %v2832_v50 }
 0x146   : > { %v1736_v5 = vpop.f32.mrf.mxu3  ;;  %v832_v59 = vrot.slane %v830_v51, 1 }
 0x147   : > { %v3383_v38 = vadd.f32 %v1736_v5, %v1568_v47  ;;  %v827_v47 = vrot.slane %v825_v18, 1  ;;  %v1576_v18 = vadd.f32 %v3372_v45, %v3227_v33 }
 0x148   : > { %v1825_v29 = vpop.f32.mrf.mxu2  ;;  %v1490_v3 = vpop.f32.mrf.mxu0 }
 0x149   : > { %v1826_v1 = vadd.f32 %v1825_v29, %v1657_v6  ;;  %v1659_v9 = vpop.f32.mrf.mxu1  ;;  %v1491_v22 = vadd.f32 %v3372_v45, %v1490_v3  ;;  %v261_v6 = vld [vmem:[%s2931_s9 + $0xf8] sm:$0x1]  ;;  %v828_v5 = vor.u32 %v827_v47, %v823_v52  ;;  %v1165_v29 = vrot.slane %v580_v54, 1 }
 0x14a   : > { %v835_v52 = vshrl.u32 %v3409_v10, 16 }
 0x14b   : > { %vm1957_vm7 = vcmp.ge.f32.partialorder %v1826_v1, 0.0  ;;  %v2021_v8 = vmul.f32 0.2, %v1826_v1  ;;  %1529 = vmatmul.bf16.gmra.mxu0 %v3352_v20  ;;  %1907 = vmatmul.bf16.gmra.mxu3 %v1187_v19  ;;  %v1660_v35 = vadd.f32 %v1659_v9, %v1491_v22  ;;  %v2831_v20 = vor.u32 %v2830_v63, %v3061_v2 }
 0x14c   : > { %1698 = vmatmul.bf16.gmra.mxu1 %v821_v62  ;;  %v1164_v2 = vrot.slane %v2834_v15, 1  ;;  %v549_v62 = vunpack.c.l.b16 %v261_v6  ;;  %v833_v63 = vsel %vm593_vm0, %v828_v5, %v832_v59  ;;  %v2838_v6 = vld [vmem:[%s2931_s9 + $0xfc] sm:$0xf0]  ;;  %v1578_v5 = vadd.f32 %v3372_v45, %v3240_v49 }
 0x14d   : > { %v2085_v21 = vsel %vm1957_vm7, %v1826_v1, %v2021_v8  ;;  %1867 = vmatmul.bf16.gmra.mxu2 %v1163_v28  ;;  %v1188_v56 = vrot.slane %v2831_v20, 1 }
 0x14e   : > { %v2557_v31 = vpack.c.bf16 %v2085_v21, %v2084_v13  ;;  %v1739_v37 = vpop.f32.mrf.mxu3  ;;  %v1166_v8 = vsel %vm1106_vm1, %v1164_v2, %v1165_v29  ;;  %v581_v13 = vpack.c.b16 %v549_v62, %v549_v62 }
 0x14f   : > { %v3396_v16 = vadd.f32 %v1739_v37, %v1571_v12  ;;  %v1190_v27 = vsel %vm1106_vm1, %v1188_v56, %v1189_v48  ;;  %v837_v12 = vshll.u32 %v3409_v10, 16  ;;  %v2726_v37 = vld [vmem:[%s2931_s9 + $0x150] sm:$0xf0]  ;;  %v3428_v48 = vld [vmem:[%s2931_s9 + $0xfc] sm:$0xff]  }
 0x150   : > { %2740 = vst [vmem:[%s3177_s23 + $0x48] sm:$0xff] %v2557_v31   ;;  %v1828_v40 = vpop.f32.mrf.mxu2  ;;  %v1492_v26 = vpop.f32.mrf.mxu0  ;;  %v1168_v62 = vrot.slane %v581_v13, 1 }
 0x151   : > { %v1661_v34 = vpop.f32.mrf.mxu1  ;;  %v1493_v17 = vadd.f32 %v3372_v45, %v1492_v26  ;;  %v1829_v55 = vadd.f32 %v1828_v40, %v1660_v35  ;;  %v2727_v40 = vld [vmem:[%s2931_s9 + $0x150] sm:$0xe]  ;;  %v839_v47 = vrot.slane %v837_v12, 1 }
 0x152   : > { %v2715_v26 = vld [vmem:[%s2931_s9 + $0xf0] sm:$0xe] }
 0x153   : > { %v1662_v61 = vadd.f32 %v1661_v34, %v1493_v17  ;;  %v2022_v19 = vmul.f32 0.2, %v1829_v55  ;;  %vm1958_vm8 = vcmp.ge.f32.partialorder %v1829_v55, 0.0  ;;  %v842_v17 = vshll.u32 %v581_v13, 16  ;;  %v2836_v13 = vld [vmem:[%s2931_s9 + $0x15c] sm:$0xe] }
 0x154   : > { %v840_v59 = vor.u32 %v839_v47, %v835_v52 }
 0x155   : > { %v2086_v21 = vsel %vm1958_vm8, %v1829_v55, %v2022_v19  ;;  %v844_v29 = vrot.slane %v842_v17, 1 }
 0x156   : > { %v1741_v1 = vpop.f32.mrf.mxu3 }
 0x157   : > { %v3405_v3 = vadd.f32 %v1741_v1, %v1573_v0  ;;  %v2728_v0 = vor.u32 %v2727_v40, %v2726_v37  ;;  %v1192_v1 = vrot.slane %v3224_v23, 1  ;;  %v845_v49 = vsel %vm593_vm0, %v840_v59, %v844_v29 }
 0x158   : > { %v1830_v50 = vpop.f32.mrf.mxu2  ;;  %v1495_v28 = vpop.f32.mrf.mxu0  ;;  %v1583_v59 = vadd.f32 %v3372_v45, %v3261_v4 }
 0x159   : > { %v1831_v9 = vadd.f32 %v1830_v50, %v1662_v61  ;;  %v1664_v24 = vpop.f32.mrf.mxu1  ;;  %v1496_v31 = vadd.f32 %v3372_v45, %v1495_v28  ;;  %v1191_v61 = vrot.slane %v2728_v0, 1  ;;  %v262_v28 = vld [vmem:[%s2931_s9 + $0x104] sm:$0x1]  ;;  %v847_v0 = vshrl.u32 %v3428_v48, 16 }
 0x15b   : > { %vm1959_vm9 = vcmp.ge.f32.partialorder %v1831_v9, 0.0  ;;  %v2023_v32 = vmul.f32 0.2, %v1831_v9  ;;  %1534 = vmatmul.bf16.gmra.mxu0 %v3376_v46  ;;  %1912 = vmatmul.bf16.gmra.mxu3 %v1190_v27  ;;  %v2714_v46 = vld [vmem:[%s2931_s9 + $0xf0] sm:$0xf0]  ;;  %v1665_v51 = vadd.f32 %v1664_v24, %v1496_v31  ;;  %v1193_v12 = vsel %vm1106_vm1, %v1191_v61, %v1192_v1 }
 0x15c   : > { %1703 = vmatmul.bf16.gmra.mxu1 %v833_v63  ;;  %v2716_v55 = vor.u32 %v2715_v26, %v2714_v46  ;;  %v849_v26 = vshll.u32 %v3428_v48, 16  ;;  %v1195_v61 = vrot.slane %v3247_v42, 1  ;;  %v263_v1 = vld [vmem:[%s2931_s9 + $0x110] sm:$0x1] }
 0x15d   : > { %v2087_v22 = vsel %vm1959_vm9, %v1831_v9, %v2023_v32  ;;  %1872 = vmatmul.bf16.gmra.mxu2 %v1166_v8 }
 0x15e   : > { %v2562_v54 = vpack.c.bf16 %v2087_v22, %v2086_v21  ;;  %v1744_v35 = vpop.f32.mrf.mxu3  ;;  %v1167_v50 = vrot.slane %v2716_v55, 1  ;;  %v550_v22 = vunpack.c.l.b16 %v262_v28 }
 0x15f   : > { %v3423_v20 = vadd.f32 %v1744_v35, %v1576_v18  ;;  %v2839_v18 = vld [vmem:[%s2931_s9 + $0xfc] sm:$0xe] }
 0x160   : > { %2741 = vst [vmem:[%s3177_s23 + $0x50] sm:$0xff] %v2562_v54   ;;  %v1833_v34 = vpop.f32.mrf.mxu2  ;;  %v1497_v15 = vpop.f32.mrf.mxu0  ;;  %v1169_v23 = vsel %vm1106_vm1, %v1167_v50, %v1168_v62  ;;  %v1581_v54 = vadd.f32 %v3372_v45, %v3252_v39 }
 0x161   : > { %v1666_v33 = vpop.f32.mrf.mxu1  ;;  %v1498_v56 = vadd.f32 %v3372_v45, %v1497_v15  ;;  %v1834_v2 = vadd.f32 %v1833_v34, %v1665_v51  ;;  %v582_v34 = vpack.c.b16 %v550_v22, %v550_v22 }
 0x163   : > { %v1667_v19 = vadd.f32 %v1666_v33, %v1498_v56  ;;  %v2024_v63 = vmul.f32 0.2, %v1834_v2  ;;  %vm1960_vm10 = vcmp.ge.f32.partialorder %v1834_v2, 0.0  ;;  %v851_v33 = vrot.slane %v849_v26, 1  ;;  %v2730_v26 = vld [vmem:[%s2931_s9 + $0x168] sm:$0xe] }
 0x164   : > { %v854_v55 = vshll.u32 %v582_v34, 16  ;;  %v2840_v56 = vor.u32 %v2839_v18, %v2838_v6 }
 0x165   : > { %v2088_v37 = vsel %vm1960_vm10, %v1834_v2, %v2024_v63  ;;  %v852_v50 = vor.u32 %v851_v33, %v847_v0  ;;  %v551_v63 = vunpack.c.l.b16 %v263_v1 }
 0x166   : > { %v1746_v9 = vpop.f32.mrf.mxu3  ;;  %v856_v62 = vrot.slane %v854_v55, 1 }
 0x167   : > { %v3435_v27 = vadd.f32 %v1746_v9, %v1578_v5 }
 0x168   : > { %v1835_v24 = vpop.f32.mrf.mxu2  ;;  %v1500_v32 = vpop.f32.mrf.mxu0 }
 0x169   : > { %v1836_v8 = vadd.f32 %v1835_v24, %v1667_v19  ;;  %v1669_v21 = vpop.f32.mrf.mxu1  ;;  %v1501_v35 = vadd.f32 %v3372_v45, %v1500_v32  ;;  %v1171_v19 = vrot.slane %v582_v34, 1 }
 0x16b   : > { %vm1961_vm11 = vcmp.ge.f32.partialorder %v1836_v8, 0.0  ;;  %v2025_v31 = vmul.f32 0.2, %v1836_v8  ;;  %1539 = vmatmul.bf16.gmra.mxu0 %v3409_v10  ;;  %1917 = vmatmul.bf16.gmra.mxu3 %v1193_v12  ;;  %v1670_v39 = vadd.f32 %v1669_v21, %v1501_v35  ;;  %v2837_v10 = vor.u32 %v2836_v13, %v3090_v36  ;;  %v3461_v12 = vld [vmem:[%s2931_s9 + $0x108] sm:$0xff]  }
 0x16c   : > { %1708 = vmatmul.bf16.gmra.mxu1 %v845_v49  ;;  %v1170_v36 = vrot.slane %v2840_v56, 1  ;;  %v857_v21 = vsel %vm593_vm0, %v852_v50, %v856_v62  ;;  %v861_v13 = vshll.u32 %v3461_v12, 16 }
 0x16d   : > { %v2089_v40 = vsel %vm1961_vm11, %v1836_v8, %v2025_v31  ;;  %1877 = vmatmul.bf16.gmra.mxu2 %v1169_v23  ;;  %v1194_v29 = vrot.slane %v2837_v10, 1  ;;  %v583_v31 = vpack.c.b16 %v551_v63, %v551_v63  ;;  %v264_v63 = vld [vmem:[%s2931_s9 + $0x11c] sm:$0x1] }
 0x16e   : > { %v2567_v46 = vpack.c.bf16 %v2089_v40, %v2088_v37  ;;  %v1749_v52 = vpop.f32.mrf.mxu3  ;;  %v1172_v23 = vsel %vm1106_vm1, %v1170_v36, %v1171_v19  ;;  %v1586_v40 = vadd.f32 %v3372_v45, %v3272_v41  ;;  %v863_v10 = vrot.slane %v861_v13, 1  ;;  %v2842_v13 = vld [vmem:[%s2931_s9 + $0x174] sm:$0xe] }
 0x16f   : > { %v3448_v47 = vadd.f32 %v1749_v52, %v1581_v54  ;;  %v1196_v4 = vsel %vm1106_vm1, %v1194_v29, %v1195_v61  ;;  %v2718_v52 = vld [vmem:[%s2931_s9 + $0x108] sm:$0xe]  ;;  %v866_v33 = vshll.u32 %v583_v31, 16  ;;  %v1588_v29 = vadd.f32 %v3372_v45, %v3285_v53 }
 0x170   : > { %2742 = vst [vmem:[%s3177_s23 + $0x58] sm:$0xff] %v2567_v46   ;;  %v1838_v51 = vpop.f32.mrf.mxu2  ;;  %v1502_v15 = vpop.f32.mrf.mxu0  ;;  %v2729_v46 = vld [vmem:[%s2931_s9 + $0x168] sm:$0xf0]  ;;  %v1198_v36 = vrot.slane %v3269_v14, 1 }
 0x171   : > { %v1671_v17 = vpop.f32.mrf.mxu1  ;;  %v1503_v5 = vadd.f32 %v3372_v45, %v1502_v15  ;;  %v1839_v2 = vadd.f32 %v1838_v51, %v1670_v39  ;;  %v859_v15 = vshrl.u32 %v3461_v12, 16  ;;  %v2731_v55 = vor.u32 %v2730_v26, %v2729_v46 }
 0x172   : > { %v868_v50 = vrot.slane %v866_v33, 1 }
 0x173   : > { %v1672_v9 = vadd.f32 %v1671_v17, %v1503_v5  ;;  %v2026_v8 = vmul.f32 0.2, %v1839_v2  ;;  %vm1962_vm12 = vcmp.ge.f32.partialorder %v1839_v2, 0.0  ;;  %v864_v61 = vor.u32 %v863_v10, %v859_v15 }
 0x174   : > { %v1197_v62 = vrot.slane %v2731_v55, 1 }
 0x175   : > { %v2090_v18 = vsel %vm1962_vm12, %v1839_v2, %v2026_v8  ;;  %v2844_v2 = vld [vmem:[%s2931_s9 + $0x114] sm:$0xf0]  ;;  %v869_v53 = vsel %vm593_vm0, %v864_v61, %v868_v50  ;;  %v1201_v61 = vrot.slane %v3292_v43, 1 }
 0x176   : > { %v1751_v28 = vpop.f32.mrf.mxu3 }
 0x177   : > { %v3457_v24 = vadd.f32 %v1751_v28, %v1583_v59  ;;  %v3480_v59 = vld [vmem:[%s2931_s9 + $0x114] sm:$0xff]  }
 0x178   : > { %v1840_v6 = vpop.f32.mrf.mxu2  ;;  %v1505_v49 = vpop.f32.mrf.mxu0  ;;  %v873_v26 = vshll.u32 %v3480_v59, 16 }
 0x179   : > { %v1841_v32 = vadd.f32 %v1840_v6, %v1672_v9  ;;  %v1674_v42 = vpop.f32.mrf.mxu1  ;;  %v1506_v37 = vadd.f32 %v3372_v45, %v1505_v49  ;;  %v1174_v9 = vrot.slane %v583_v31, 1 }
 0x17b   : > { %vm1963_vm13 = vcmp.ge.f32.partialorder %v1841_v32, 0.0  ;;  %v2027_v22 = vmul.f32 0.2, %v1841_v32  ;;  %1544 = vmatmul.bf16.gmra.mxu0 %v3428_v48  ;;  %1922 = vmatmul.bf16.gmra.mxu3 %v1196_v4  ;;  %v2717_v48 = vld [vmem:[%s2931_s9 + $0x108] sm:$0xf0]  ;;  %v1675_v17 = vadd.f32 %v1674_v42, %v1506_v37 }
 0x17c   : > { %1713 = vmatmul.bf16.gmra.mxu1 %v857_v21  ;;  %v2719_v56 = vor.u32 %v2718_v52, %v2717_v48  ;;  %v1199_v21 = vsel %vm1106_vm1, %v1197_v62, %v1198_v36 }
 0x17d   : > { %v2091_v54 = vsel %vm1963_vm13, %v1841_v32, %v2027_v22  ;;  %1882 = vmatmul.bf16.gmra.mxu2 %v1172_v23  ;;  %v552_v22 = vunpack.c.l.b16 %v264_v63 }
 0x17e   : > { %v2572_v35 = vpack.c.bf16 %v2091_v54, %v2090_v18  ;;  %v1754_v34 = vpop.f32.mrf.mxu3  ;;  %v1173_v19 = vrot.slane %v2719_v56, 1  ;;  %v2845_v18 = vld [vmem:[%s2931_s9 + $0x114] sm:$0xe]  ;;  %v1591_v54 = vadd.f32 %v3372_v45, %v3297_v57  ;;  %v1593_v56 = vadd.f32 %v3372_v45, %v3305_v30 }
 0x17f   : > { %v3475_v51 = vadd.f32 %v1754_v34, %v1586_v40  ;;  %v584_v34 = vpack.c.b16 %v552_v22, %v552_v22  ;;  %v2846_v55 = vor.u32 %v2845_v18, %v2844_v2 }
 0x180   : > { %2743 = vst [vmem:[%s3177_s23 + $0x60] sm:$0xff] %v2572_v35   ;;  %v1843_v39 = vpop.f32.mrf.mxu2  ;;  %v1507_v0 = vpop.f32.mrf.mxu0  ;;  %v1175_v14 = vsel %vm1106_vm1, %v1173_v19, %v1174_v9 }
 0x181   : > { %v1676_v41 = vpop.f32.mrf.mxu1  ;;  %v1508_v5 = vadd.f32 %v3372_v45, %v1507_v0  ;;  %v1844_v1 = vadd.f32 %v1843_v39, %v1675_v17  ;;  %v871_v17 = vshrl.u32 %v3480_v59, 16  ;;  %v875_v0 = vrot.slane %v873_v26, 1 }
 0x182   : > { %v878_v33 = vshll.u32 %v584_v34, 16  ;;  %v1176_v62 = vrot.slane %v2846_v55, 1  ;;  %v1177_v36 = vrot.slane %v584_v34, 1 }
 0x183   : > { %v1677_v28 = vadd.f32 %v1676_v41, %v1508_v5  ;;  %v2028_v49 = vmul.f32 0.2, %v1844_v1  ;;  %vm1964_vm14 = vcmp.ge.f32.partialorder %v1844_v1, 0.0 }
 0x184   : > { %v880_v50 = vrot.slane %v878_v33, 1  ;;  %v1178_v43 = vsel %vm1106_vm1, %v1176_v62, %v1177_v36 }
 0x185   : > { %v2092_v37 = vsel %vm1964_vm14, %v1844_v1, %v2028_v49  ;;  %v876_v1 = vor.u32 %v875_v0, %v871_v17 }
 0x186   : > { %v1756_v6 = vpop.f32.mrf.mxu3 }
 0x187   : > { %v3487_v8 = vadd.f32 %v1756_v6, %v1588_v29  ;;  %v881_v49 = vsel %vm593_vm0, %v876_v1, %v880_v50 }
 0x188   : > { %v1845_v32 = vpop.f32.mrf.mxu2  ;;  %v1510_v42 = vpop.f32.mrf.mxu0 }
 0x189   : > { %v1846_v4 = vadd.f32 %v1845_v32, %v1677_v28  ;;  %v1679_v23 = vpop.f32.mrf.mxu1  ;;  %v1511_v35 = vadd.f32 %v3372_v45, %v1510_v42 }
 0x18b   : > { %vm1965_vm15 = vcmp.ge.f32.partialorder %v1846_v4, 0.0  ;;  %v2029_v31 = vmul.f32 0.2, %v1846_v4  ;;  %1549 = vmatmul.bf16.gmra.mxu0 %v3461_v12  ;;  %1927 = vmatmul.bf16.gmra.mxu3 %v1199_v21  ;;  %v1680_v15 = vadd.f32 %v1679_v23, %v1511_v35  ;;  %v2843_v12 = vor.u32 %v2842_v13, %v3113_v11 }
 0x18c   : > { %1718 = vmatmul.bf16.gmra.mxu1 %v869_v53  ;;  %v1596_v23 = vadd.f32 %v3372_v45, %v3315_v58  ;;  %v1598_v35 = vadd.f32 %v3372_v45, %v3326_v60 }
 0x18d   : > { %v2093_v40 = vsel %vm1965_vm15, %v1846_v4, %v2029_v31  ;;  %1887 = vmatmul.bf16.gmra.mxu2 %v1175_v14  ;;  %v1200_v29 = vrot.slane %v2843_v12, 1 }
 0x18e   : > { %v2577_v46 = vpack.c.bf16 %v2093_v40, %v2092_v37  ;;  %v1759_v48 = vpop.f32.mrf.mxu3 }
 0x18f   : > { %v3500_v52 = vadd.f32 %v1759_v48, %v1591_v54  ;;  %v1202_v32 = vsel %vm1106_vm1, %v1200_v29, %v1201_v61 }
 0x190   : > { %2744 = vst [vmem:[%s3177_s23 + $0x68] sm:$0xff] %v2577_v46   ;;  %v1848_v39 = vpop.f32.mrf.mxu2  ;;  %v1512_v57 = vpop.f32.mrf.mxu0 }
 0x191   : > { %v1681_v10 = vpop.f32.mrf.mxu1  ;;  %v1513_v41 = vadd.f32 %v3372_v45, %v1512_v57  ;;  %v1849_v5 = vadd.f32 %v1848_v39, %v1680_v15 }
 0x193   : > { %v1682_v11 = vadd.f32 %v1681_v10, %v1513_v41  ;;  %v2030_v6 = vmul.f32 0.2, %v1849_v5  ;;  %vm1966_vm2 = vcmp.ge.f32.partialorder %v1849_v5, 0.0 }
 0x195   : > { %v2094_v42 = vsel %vm1966_vm2, %v1849_v5, %v2030_v6 }
 0x196   : > { %v1761_v19 = vpop.f32.mrf.mxu3 }
 0x197   : > { %v3508_v9 = vadd.f32 %v1761_v19, %v1593_v56 }
 0x198   : > { %v1850_v28 = vpop.f32.mrf.mxu2  ;;  %v1515_v63 = vpop.f32.mrf.mxu0 }
 0x199   : > { %v1851_v2 = vadd.f32 %v1850_v28, %v1682_v11  ;;  %v1684_v30 = vpop.f32.mrf.mxu1  ;;  %v1516_v21 = vadd.f32 %v3372_v45, %v1515_v63 }
 0x19b   : > { %vm1967_vm3 = vcmp.ge.f32.partialorder %v1851_v2, 0.0  ;;  %v2031_v4 = vmul.f32 0.2, %v1851_v2  ;;  %1554 = vmatmul.bf16.gmra.mxu0 %v3480_v59  ;;  %1932 = vmatmul.bf16.gmra.mxu3 %v1202_v32  ;;  %v1685_v18 = vadd.f32 %v1684_v30, %v1516_v21 }
 0x19c   : > { %1723 = vmatmul.bf16.gmra.mxu1 %v881_v49 }
 0x19d   : > { %v2095_v53 = vsel %vm1967_vm3, %v1851_v2, %v2031_v4  ;;  %1892 = vmatmul.bf16.gmra.mxu2 %v1178_v43 }
 0x19e   : > { %v2582_v14 = vpack.c.bf16 %v2095_v53, %v2094_v42  ;;  %v1764_v22 = vpop.f32.mrf.mxu3 }
 0x19f   : > { %v3518_v13 = vadd.f32 %v1764_v22, %v1596_v23 }
 0x1a0   : > { %2745 = vst [vmem:[%s3177_s23 + $0x70] sm:$0xff] %v2582_v14   ;;  %v1853_v31 = vpop.f32.mrf.mxu2  ;;  %v1517_v54 = vpop.f32.mrf.mxu0 }
 0x1a1   : > { %v1686_v37 = vpop.f32.mrf.mxu1  ;;  %v1518_v59 = vadd.f32 %v3372_v45, %v1517_v54  ;;  %v1854_v40 = vadd.f32 %v1853_v31, %v1685_v18 }
 0x1a3   : > { %v1687_v46 = vadd.f32 %v1686_v37, %v1518_v59  ;;  %v2032_v48 = vmul.f32 0.2, %v1854_v40  ;;  %vm1968_vm0 = vcmp.ge.f32.partialorder %v1854_v40, 0.0 }
 0x1a5   : > { %v2096_v10 = vsel %vm1968_vm0, %v1854_v40, %v2032_v48 }
 0x1a6   : > { %v1766_v26 = vpop.f32.mrf.mxu3 }
 0x1a7   : > { %v3523_v34 = vadd.f32 %v1766_v26, %v1598_v35 }
 0x1a8   : > { %v1855_v58 = vpop.f32.mrf.mxu2  ;;  %v1520_v15 = vpop.f32.mrf.mxu0 }
 0x1a9   : > { %v1856_v39 = vadd.f32 %v1855_v58, %v1687_v46  ;;  %v1689_v57 = vpop.f32.mrf.mxu1  ;;  %v1521_v0 = vadd.f32 %v3372_v45, %v1520_v15 }
 0x1ab   : > { %vm1969_vm1 = vcmp.ge.f32.partialorder %v1856_v39, 0.0  ;;  %v2033_v12 = vmul.f32 0.2, %v1856_v39  ;;  %v1690_v41 = vadd.f32 %v1689_v57, %v1521_v0 }
 0x1ad   : > { %v2097_v17 = vsel %vm1969_vm1, %v1856_v39, %v2033_v12 }
 0x1ae   : > { %v2587_v33 = vpack.c.bf16 %v2097_v17, %v2096_v10  ;;  %v1898_v55 = vpop.f32.mrf.mxu3 }
 0x1af   : > { %v1899_v61 = vadd.f32 %v1898_v55, %v3339_v7 }
 0x1b0   : > { %2746 = vst [vmem:[%s3177_s23 + $0x78] sm:$0xff] %v2587_v33   ;;  %v1858_v60 = vpop.f32.mrf.mxu2  ;;  %v1522_v56 = vpop.f32.mrf.mxu0 }
 0x1b1   : > { %v1691_v5 = vpop.f32.mrf.mxu1  ;;  %v1523_v29 = vadd.f32 %v3372_v45, %v1522_v56  ;;  %v1859_v1 = vadd.f32 %v1858_v60, %v1690_v41  ;;  %v2050_v36 = vmul.f32 0.2, %v1899_v61  ;;  %vm1986_vm4 = vcmp.ge.f32.partialorder %v1899_v61, 0.0 }
 0x1b3   : > { %v1692_v50 = vadd.f32 %v1691_v5, %v1523_v29  ;;  %v2034_v28 = vmul.f32 0.2, %v1859_v1  ;;  %vm1970_vm5 = vcmp.ge.f32.partialorder %v1859_v1, 0.0  ;;  %v2114_v7 = vsel %vm1986_vm4, %v1899_v61, %v2050_v36 }
 0x1b5   : > { %v2098_v43 = vsel %vm1970_vm5, %v1859_v1, %v2034_v28 }
 0x1b6   : > { %v1900_v62 = vpop.f32.mrf.mxu3 }
 0x1b7   : > { %v1901_v19 = vadd.f32 %v1900_v62, %v3348_v25 }
 0x1b8   : > { %v1860_v11 = vpop.f32.mrf.mxu2  ;;  %v1525_v2 = vpop.f32.mrf.mxu0 }
 0x1b9   : > { %v1861_v6 = vadd.f32 %v1860_v11, %v1692_v50  ;;  %vm1987_vm6 = vcmp.ge.f32.partialorder %v1901_v19, 0.0  ;;  %v2051_v63 = vmul.f32 0.2, %v1901_v19  ;;  %v1694_v32 = vpop.f32.mrf.mxu1  ;;  %v1526_v53 = vadd.f32 %v3372_v45, %v1525_v2 }
 0x1bb   : > { %vm1971_vm7 = vcmp.ge.f32.partialorder %v1861_v6, 0.0  ;;  %v2035_v30 = vmul.f32 0.2, %v1861_v6  ;;  %v2115_v49 = vsel %vm1987_vm6, %v1901_v19, %v2051_v63  ;;  %v1695_v14 = vadd.f32 %v1694_v32, %v1526_v53 }
 0x1bc   : > { %v2632_v42 = vpack.c.bf16 %v2115_v49, %v2114_v7 }
 0x1bd   : > { %v2099_v4 = vsel %vm1971_vm7, %v1861_v6, %v2035_v30 }
 0x1be   : > { %v2592_v25 = vpack.c.bf16 %v2099_v4, %v2098_v43  ;;  %2755 = vst [vmem:[%s3177_s23 + $0xc0] sm:$0xff] %v2632_v42   ;;  %v1903_v21 = vpop.f32.mrf.mxu3 }
 0x1bf   : > { %v1904_v54 = vadd.f32 %v1903_v21, %v3366_v44 }
 0x1c0   : > { %2747 = vst [vmem:[%s3177_s23 + $0x80] sm:$0xff] %v2592_v25   ;;  %v1863_v23 = vpop.f32.mrf.mxu2  ;;  %v1527_v22 = vpop.f32.mrf.mxu0 }
 0x1c1   : > { %v1696_v31 = vpop.f32.mrf.mxu1  ;;  %v1528_v18 = vadd.f32 %v3372_v45, %v1527_v22  ;;  %v1864_v37 = vadd.f32 %v1863_v23, %v1695_v14  ;;  %v2052_v35 = vmul.f32 0.2, %v1904_v54  ;;  %vm1988_vm8 = vcmp.ge.f32.partialorder %v1904_v54, 0.0 }
 0x1c3   : > { %v1697_v59 = vadd.f32 %v1696_v31, %v1528_v18  ;;  %v2036_v58 = vmul.f32 0.2, %v1864_v37  ;;  %vm1972_vm9 = vcmp.ge.f32.partialorder %v1864_v37, 0.0  ;;  %v2116_v44 = vsel %vm1988_vm8, %v1904_v54, %v2052_v35 }
 0x1c5   : > { %v2100_v17 = vsel %vm1972_vm9, %v1864_v37, %v2036_v58 }
 0x1c6   : > { %v1905_v40 = vpop.f32.mrf.mxu3 }
 0x1c7   : > { %v1906_v26 = vadd.f32 %v1905_v40, %v3383_v38 }
 0x1c8   : > { %v1865_v46 = vpop.f32.mrf.mxu2  ;;  %v1530_v39 = vpop.f32.mrf.mxu0 }
 0x1c9   : > { %v1866_v48 = vadd.f32 %v1865_v46, %v1697_v59  ;;  %vm1989_vm10 = vcmp.ge.f32.partialorder %v1906_v26, 0.0  ;;  %v2053_v15 = vmul.f32 0.2, %v1906_v26  ;;  %v1699_v57 = vpop.f32.mrf.mxu1  ;;  %v1531_v55 = vadd.f32 %v3372_v45, %v1530_v39 }
 0x1cb   : > { %vm1973_vm11 = vcmp.ge.f32.partialorder %v1866_v48, 0.0  ;;  %v2037_v12 = vmul.f32 0.2, %v1866_v48  ;;  %v2117_v10 = vsel %vm1989_vm10, %v1906_v26, %v2053_v15  ;;  %v1700_v56 = vadd.f32 %v1699_v57, %v1531_v55 }
 0x1cc   : > { %v2637_v33 = vpack.c.bf16 %v2117_v10, %v2116_v44 }
 0x1cd   : > { %v2101_v0 = vsel %vm1973_vm11, %v1866_v48, %v2037_v12 }
 0x1ce   : > { %v2597_v38 = vpack.c.bf16 %v2101_v0, %v2100_v17  ;;  %2756 = vst [vmem:[%s3177_s23 + $0xc8] sm:$0xff] %v2637_v33   ;;  %v1908_v60 = vpop.f32.mrf.mxu3 }
 0x1cf   : > { %v1909_v1 = vadd.f32 %v1908_v60, %v3396_v16 }
 0x1d0   : > { %2748 = vst [vmem:[%s3177_s23 + $0x88] sm:$0xff] %v2597_v38   ;;  %v1868_v41 = vpop.f32.mrf.mxu2  ;;  %v1532_v5 = vpop.f32.mrf.mxu0 }
 0x1d1   : > { %v1701_v29 = vpop.f32.mrf.mxu1  ;;  %v1533_v61 = vadd.f32 %v3372_v45, %v1532_v5  ;;  %v1869_v50 = vadd.f32 %v1868_v41, %v1700_v56  ;;  %v2054_v11 = vmul.f32 0.2, %v1909_v1  ;;  %vm1990_vm12 = vcmp.ge.f32.partialorder %v1909_v1, 0.0 }
 0x1d3   : > { %v1702_v62 = vadd.f32 %v1701_v29, %v1533_v61  ;;  %v2038_v6 = vmul.f32 0.2, %v1869_v50  ;;  %vm1974_vm13 = vcmp.ge.f32.partialorder %v1869_v50, 0.0  ;;  %v2118_v16 = vsel %vm1990_vm12, %v1909_v1, %v2054_v11 }
 0x1d5   : > { %v2102_v43 = vsel %vm1974_vm13, %v1869_v50, %v2038_v6 }
 0x1d6   : > { %v1910_v36 = vpop.f32.mrf.mxu3 }
 0x1d7   : > { %v1911_v28 = vadd.f32 %v1910_v36, %v3405_v3 }
 0x1d8   : > { %v1870_v19 = vpop.f32.mrf.mxu2  ;;  %v1535_v63 = vpop.f32.mrf.mxu0 }
 0x1d9   : > { %v1871_v2 = vadd.f32 %v1870_v19, %v1702_v62  ;;  %vm1991_vm14 = vcmp.ge.f32.partialorder %v1911_v28, 0.0  ;;  %v2055_v32 = vmul.f32 0.2, %v1911_v28  ;;  %v1704_v30 = vpop.f32.mrf.mxu1  ;;  %v1536_v53 = vadd.f32 %v3372_v45, %v1535_v63 }
 0x1db   : > { %vm1975_vm15 = vcmp.ge.f32.partialorder %v1871_v2, 0.0  ;;  %v2039_v7 = vmul.f32 0.2, %v1871_v2  ;;  %v2119_v49 = vsel %vm1991_vm14, %v1911_v28, %v2055_v32  ;;  %v1705_v23 = vadd.f32 %v1704_v30, %v1536_v53 }
 0x1dc   : > { %v2642_v42 = vpack.c.bf16 %v2119_v49, %v2118_v16 }
 0x1dd   : > { %v2103_v4 = vsel %vm1975_vm15, %v1871_v2, %v2039_v7 }
 0x1de   : > { %v2602_v3 = vpack.c.bf16 %v2103_v4, %v2102_v43  ;;  %2757 = vst [vmem:[%s3177_s23 + $0xd0] sm:$0xff] %v2642_v42   ;;  %v1913_v25 = vpop.f32.mrf.mxu3 }
 0x1df   : > { %v1914_v18 = vadd.f32 %v1913_v25, %v3423_v20 }
 0x1e0   : > { %2749 = vst [vmem:[%s3177_s23 + $0x90] sm:$0xff] %v2602_v3   ;;  %v1873_v21 = vpop.f32.mrf.mxu2  ;;  %v1537_v14 = vpop.f32.mrf.mxu0 }
 0x1e1   : > { %v1706_v22 = vpop.f32.mrf.mxu1  ;;  %v1538_v31 = vadd.f32 %v3372_v45, %v1537_v14  ;;  %v1874_v54 = vadd.f32 %v1873_v21, %v1705_v23  ;;  %v2056_v40 = vmul.f32 0.2, %v1914_v18  ;;  %vm1992_vm2 = vcmp.ge.f32.partialorder %v1914_v18, 0.0 }
 0x1e3   : > { %v1707_v37 = vadd.f32 %v1706_v22, %v1538_v31  ;;  %v2040_v26 = vmul.f32 0.2, %v1874_v54  ;;  %vm1976_vm3 = vcmp.ge.f32.partialorder %v1874_v54, 0.0  ;;  %v2120_v20 = vsel %vm1992_vm2, %v1914_v18, %v2056_v40 }
 0x1e5   : > { %v2104_v44 = vsel %vm1976_vm3, %v1874_v54, %v2040_v26 }
 0x1e6   : > { %v1915_v59 = vpop.f32.mrf.mxu3 }
 0x1e7   : > { %v1916_v46 = vadd.f32 %v1915_v59, %v3435_v27 }
 0x1e8   : > { %v1875_v35 = vpop.f32.mrf.mxu2  ;;  %v1540_v48 = vpop.f32.mrf.mxu0 }
 0x1e9   : > { %v1876_v58 = vadd.f32 %v1875_v35, %v1707_v37  ;;  %vm1993_vm0 = vcmp.ge.f32.partialorder %v1916_v46, 0.0  ;;  %v2057_v39 = vmul.f32 0.2, %v1916_v46  ;;  %v1709_v15 = vpop.f32.mrf.mxu1  ;;  %v1541_v0 = vadd.f32 %v3372_v45, %v1540_v48 }
 0x1eb   : > { %vm1977_vm1 = vcmp.ge.f32.partialorder %v1876_v58, 0.0  ;;  %v2041_v57 = vmul.f32 0.2, %v1876_v58  ;;  %v2121_v12 = vsel %vm1993_vm0, %v1916_v46, %v2057_v39  ;;  %v1710_v38 = vadd.f32 %v1709_v15, %v1541_v0 }
 0x1ec   : > { %v2647_v17 = vpack.c.bf16 %v2121_v12, %v2120_v20 }
 0x1ed   : > { %v2105_v10 = vsel %vm1977_vm1, %v1876_v58, %v2041_v57 }
 0x1ee   : > { %v2607_v27 = vpack.c.bf16 %v2105_v10, %v2104_v44  ;;  %2758 = vst [vmem:[%s3177_s23 + $0xd8] sm:$0xff] %v2647_v17   ;;  %v1918_v33 = vpop.f32.mrf.mxu3 }
 0x1ef   : > { %v1919_v5 = vadd.f32 %v1918_v33, %v3448_v47 }
 0x1f0   : > { %2750 = vst [vmem:[%s3177_s23 + $0x98] sm:$0xff] %v2607_v27   ;;  %v1878_v55 = vpop.f32.mrf.mxu2  ;;  %v1542_v60 = vpop.f32.mrf.mxu0 }
 0x1f1   : > { %v1711_v41 = vpop.f32.mrf.mxu1  ;;  %v1543_v56 = vadd.f32 %v3372_v45, %v1542_v60  ;;  %v1879_v29 = vadd.f32 %v1878_v55, %v1710_v38  ;;  %v2058_v50 = vmul.f32 0.2, %v1919_v5  ;;  %vm1994_vm4 = vcmp.ge.f32.partialorder %v1919_v5, 0.0 }
 0x1f3   : > { %v1712_v61 = vadd.f32 %v1711_v41, %v1543_v56  ;;  %v2042_v11 = vmul.f32 0.2, %v1879_v29  ;;  %vm1978_vm5 = vcmp.ge.f32.partialorder %v1879_v29, 0.0  ;;  %v2122_v47 = vsel %vm1994_vm4, %v1919_v5, %v2058_v50 }
 0x1f5   : > { %v2106_v30 = vsel %vm1978_vm5, %v1879_v29, %v2042_v11 }
 0x1f6   : > { %v1920_v1 = vpop.f32.mrf.mxu3 }
 0x1f7   : > { %v1921_v36 = vadd.f32 %v1920_v1, %v3457_v24 }
 0x1f8   : > { %v1880_v62 = vpop.f32.mrf.mxu2  ;;  %v1545_v28 = vpop.f32.mrf.mxu0 }
 0x1f9   : > { %v1881_v19 = vadd.f32 %v1880_v62, %v1712_v61  ;;  %vm1995_vm6 = vcmp.ge.f32.partialorder %v1921_v36, 0.0  ;;  %v2059_v6 = vmul.f32 0.2, %v1921_v36  ;;  %v1714_v2 = vpop.f32.mrf.mxu1  ;;  %v1546_v49 = vadd.f32 %v3372_v45, %v1545_v28 }
 0x1fb   : > { %vm1979_vm7 = vcmp.ge.f32.partialorder %v1881_v19, 0.0  ;;  %v2043_v63 = vmul.f32 0.2, %v1881_v19  ;;  %v2123_v32 = vsel %vm1995_vm6, %v1921_v36, %v2059_v6  ;;  %v1715_v42 = vadd.f32 %v1714_v2, %v1546_v49 }
 0x1fc   : > { %v2652_v16 = vpack.c.bf16 %v2123_v32, %v2122_v47 }
 0x1fd   : > { %v2107_v7 = vsel %vm1979_vm7, %v1881_v19, %v2043_v63 }
 0x1fe   : > { %v2612_v24 = vpack.c.bf16 %v2107_v7, %v2106_v30  ;;  %2759 = vst [vmem:[%s3177_s23 + $0xe0] sm:$0xff] %v2652_v16   ;;  %v1923_v43 = vpop.f32.mrf.mxu3 }
 0x1ff   : > { %v1924_v21 = vadd.f32 %v1923_v43, %v3475_v51 }
 0x200   : > { %2751 = vst [vmem:[%s3177_s23 + $0xa0] sm:$0xff] %v2612_v24   ;;  %v1883_v4 = vpop.f32.mrf.mxu2  ;;  %v1547_v53 = vpop.f32.mrf.mxu0 }
 0x201   : > { %v1716_v3 = vpop.f32.mrf.mxu1  ;;  %v1548_v25 = vadd.f32 %v3372_v45, %v1547_v53  ;;  %v1884_v23 = vadd.f32 %v1883_v4, %v1715_v42  ;;  %v2060_v31 = vmul.f32 0.2, %v1924_v21  ;;  %vm1996_vm8 = vcmp.ge.f32.partialorder %v1924_v21, 0.0 }
 0x203   : > { %v1717_v14 = vadd.f32 %v1716_v3, %v1548_v25  ;;  %v2044_v37 = vmul.f32 0.2, %v1884_v23  ;;  %vm1980_vm9 = vcmp.ge.f32.partialorder %v1884_v23, 0.0  ;;  %v2124_v51 = vsel %vm1996_vm8, %v1924_v21, %v2060_v31 }
 0x205   : > { %v2108_v58 = vsel %vm1980_vm9, %v1884_v23, %v2044_v37 }
 0x206   : > { %v1925_v22 = vpop.f32.mrf.mxu3 }
 0x207   : > { %v1926_v54 = vadd.f32 %v1925_v22, %v3487_v8  ;;  %v2798_v8 = vld [vmem:[%s3578_s2] ss:$0 sm:$0xff] }
 0x208   : > { %v1885_v18 = vpop.f32.mrf.mxu2  ;;  %v1550_v40 = vpop.f32.mrf.mxu0 }
 0x209   : > { %v1886_v59 = vadd.f32 %v1885_v18, %v1717_v14  ;;  %vm1997_vm10 = vcmp.ge.f32.partialorder %v1926_v54, 0.0  ;;  %v2061_v35 = vmul.f32 0.2, %v1926_v54  ;;  %v1719_v46 = vpop.f32.mrf.mxu1  ;;  %v1551_v15 = vadd.f32 %v2798_v8, %v1550_v40 }
 0x20b   : > { %vm1981_vm11 = vcmp.ge.f32.partialorder %v1886_v59, 0.0  ;;  %v2045_v45 = vmul.f32 0.2, %v1886_v59  ;;  %v2125_v26 = vsel %vm1997_vm10, %v1926_v54, %v2061_v35  ;;  %v1720_v44 = vadd.f32 %v1719_v46, %v1551_v15 }
 0x20c   : > { %v2657_v39 = vpack.c.bf16 %v2125_v26, %v2124_v51 }
 0x20d   : > { %v2109_v48 = vsel %vm1981_vm11, %v1886_v59, %v2045_v45 }
 0x20e   : > { %v2617_v57 = vpack.c.bf16 %v2109_v48, %v2108_v58  ;;  %2760 = vst [vmem:[%s3177_s23 + $0xe8] sm:$0xff] %v2657_v39   ;;  %v1928_v20 = vpop.f32.mrf.mxu3 }
 0x20f   : > { %v1929_v27 = vadd.f32 %v1928_v20, %v3500_v52 }
 0x210   : > { %2752 = vst [vmem:[%s3177_s23 + $0xa8] sm:$0xff] %v2617_v57   ;;  %v1888_v12 = vpop.f32.mrf.mxu2  ;;  %v1552_v10 = vpop.f32.mrf.mxu0 }
 0x211   : > { %v1721_v17 = vpop.f32.mrf.mxu1  ;;  %v1553_v0 = vadd.f32 %v2798_v8, %v1552_v10  ;;  %v1889_v33 = vadd.f32 %v1888_v12, %v1720_v44  ;;  %v2062_v60 = vmul.f32 0.2, %v1929_v27  ;;  %vm1998_vm12 = vcmp.ge.f32.partialorder %v1929_v27, 0.0 }
 0x213   : > { %v1722_v55 = vadd.f32 %v1721_v17, %v1553_v0  ;;  %v2046_v5 = vmul.f32 0.2, %v1889_v33  ;;  %vm1982_vm13 = vcmp.ge.f32.partialorder %v1889_v33, 0.0  ;;  %v2126_v62 = vsel %vm1998_vm12, %v1929_v27, %v2062_v60 }
 0x215   : > { %v2110_v11 = vsel %vm1982_vm13, %v1889_v33, %v2046_v5 }
 0x216   : > { %v1930_v38 = vpop.f32.mrf.mxu3 }
 0x217   : > { %v1931_v56 = vadd.f32 %v1930_v38, %v3508_v9 }
 0x218   : > { %v1890_v41 = vpop.f32.mrf.mxu2  ;;  %v1555_v61 = vpop.f32.mrf.mxu0 }
 0x219   : > { %v1891_v29 = vadd.f32 %v1890_v41, %v1722_v55  ;;  %vm1999_vm14 = vcmp.ge.f32.partialorder %v1931_v56, 0.0  ;;  %v2063_v1 = vmul.f32 0.2, %v1931_v56  ;;  %v1724_v36 = vpop.f32.mrf.mxu1  ;;  %v1556_v6 = vadd.f32 %v2798_v8, %v1555_v61 }
 0x21b   : > { %vm1983_vm15 = vcmp.ge.f32.partialorder %v1891_v29, 0.0  ;;  %v2047_v50 = vmul.f32 0.2, %v1891_v29  ;;  %v2127_v52 = vsel %vm1999_vm14, %v1931_v56, %v2063_v1  ;;  %v1725_v47 = vadd.f32 %v1724_v36, %v1556_v6 }
 0x21c   : > { %v2662_v28 = vpack.c.bf16 %v2127_v52, %v2126_v62 }
 0x21d   : > { %v2111_v19 = vsel %vm1983_vm15, %v1891_v29, %v2047_v50 }
 0x21e   : > { %v2622_v2 = vpack.c.bf16 %v2111_v19, %v2110_v11  ;;  %2761 = vst [vmem:[%s3177_s23 + $0xf0] sm:$0xff] %v2662_v28   ;;  %v1933_v9 = vpop.f32.mrf.mxu3 }
 0x21f   : > { %v1934_v7 = vadd.f32 %v1933_v9, %v3518_v13 }
 0x220   : > { %2753 = vst [vmem:[%s3177_s23 + $0xb0] sm:$0xff] %v2622_v2   ;;  %v1893_v63 = vpop.f32.mrf.mxu2  ;;  %v1557_v32 = vpop.f32.mrf.mxu0 }
 0x221   : > { %v1558_v30 = vadd.f32 %v2798_v8, %v1557_v32  ;;  %v1894_v16 = vadd.f32 %v1893_v63, %v1725_v47  ;;  %v1726_v49 = vpop.f32.mrf.mxu1  ;;  %v2064_v4 = vmul.f32 0.2, %v1934_v7  ;;  %vm2000_vm2 = vcmp.ge.f32.partialorder %v1934_v7, 0.0 }
 0x223   : > { %v1727_v24 = vadd.f32 %v1726_v49, %v1558_v30  ;;  %v2048_v3 = vmul.f32 0.2, %v1894_v16  ;;  %vm1984_vm3 = vcmp.ge.f32.partialorder %v1894_v16, 0.0  ;;  %v2128_v14 = vsel %vm2000_vm2, %v1934_v7, %v2064_v4 }
 0x225   : > { %v2112_v22 = vsel %vm1984_vm3, %v1894_v16, %v2048_v3 }
 0x226   : > { %v1935_v43 = vpop.f32.mrf.mxu3 }
 0x227   : > { %v1936_v53 = vadd.f32 %v1935_v43, %v3523_v34 }
 0x228   : > { %v1895_v42 = vpop.f32.mrf.mxu2 }
 0x229   : > { %v1896_v25 = vadd.f32 %v1895_v42, %v1727_v24  ;;  %vm2001_vm0 = vcmp.ge.f32.partialorder %v1936_v53, 0.0  ;;  %v2065_v21 = vmul.f32 0.2, %v1936_v53 }
 0x22b   : > { %vm1985_vm1 = vcmp.ge.f32.partialorder %v1896_v25, 0.0  ;;  %v2049_v23 = vmul.f32 0.2, %v1896_v25  ;;  %v2129_v13 = vsel %vm2001_vm0, %v1936_v53, %v2065_v21 }
 0x22c   : > { %v2667_v18 = vpack.c.bf16 %v2129_v13, %v2128_v14 }
 0x22d   : > { %v2113_v31 = vsel %vm1985_vm1, %v1896_v25, %v2049_v23 }
 0x22e   : > { %v2627_v54 = vpack.c.bf16 %v2113_v31, %v2112_v22  ;;  %2762 = vst [vmem:[%s3177_s23 + $0xf8] sm:$0xff] %v2667_v18  }
 0x230   : > { %2754 = vst [vmem:[%s3177_s23 + $0xb8] sm:$0xff] %v2627_v54  }
 0x231 PF: > { %s13_s12 = sadd.s32 1, %s2853_s12  }
 0x232   : > { %p10_p5 = scmp.ge.s32.totalorder %s13_s12, 6  }
 0x234   :  { %12 = sbr.rel (!%p10_p5) target bundleno = 1 (0x1), region = 62 }

// kernel: bidirectional_propagation.95
= control target key start
LH: loop header
LB: loop body
LE: loop exit
PB: predicated region body
PF: predicated region fallthrough
CT: control target
= control target key end

     0   :  { %s3101_s15 = smov 0   ;;  %s3824_s0 = inlined_call_operand.vmem [shape: bf16[128,18,128], index: 0, kind: input, shape index: {}]   ;;  %s3825_s1 = inlined_call_operand.vmem [shape: bf16[384,128], index: 1, kind: input, shape index: {}]   ;;  %s3826_s2 = inlined_call_operand.vmem [shape: f32[1,128], index: 2, kind: input, shape index: {}]   ;;  %s3827_s3 = inlined_call_operand.vmem [shape: bf16[2048,128], index: 3, kind: input, shape index: {}]   ;;  %s3828_s4 = inlined_call_operand.vmem [shape: bf16[2048,128], index: 4, kind: output, shape index: {}]  }
   0x1 LB: > { %s2375_s16 = sadd.s32 4294967295, %s3074_s15   ;;  %p2379_p0 = scmp.ge.s32.totalorder %s3074_s15, 1  ;;  %s3074_s15 = sphi %s3101_s15, %s14_s15  }
   0x2   : > { %p175_p1 = scmp.lt.s32.totalorder %s3074_s15, 5 }
   0x4   : > { %p176_p2 = pnand %p2379_p0, %p175_p1 }
   0x5   : > { %s2380_s23 = sshll.u32 (!%p176_p2), %s2375_s16, 5 }
   0x6   : > { %179 = sbr.rel (%p176_p2) target bundleno = 560 (0x230), region = 36  ;;  %p208_p3 = scmp.lt.s32.totalorder (!%p176_p2), %s2380_s23, 127 }
   0xb   : > { %v2491_v0 = vld [vmem:[%s3825_s1 + $0x38] sm:$0xff]  ;;  %v2490_v3 = vld [vmem:[%s3825_s1 + $0x30] sm:$0xff]  ;;  %s3830_s23 = smov (!%p208_p3, %s2380_s23), 127  ;;  %v2489_v6 = vld [vmem:[%s3825_s1 + $0x28] sm:$0xff]  ;;  %vm642_vm0 = vsmask.f32 7424 }
   0xc   : > { %v3115_v1 = vld [vmem:[%s3825_s1 + $0x78] sm:$0xff]  ;;  %1480 = vmatpush.bf16.msra.mxu0 %v2491_v0  ;;  %2985 = vmatpush.bf16.msra.mxu3 %v2491_v0  ;;  %v3132_v4 = vld [vmem:[%s3825_s1 + $0x70] sm:$0xff]  ;;  %s3009_s30 = smul.u32 12, %s3830_s23  ;;  %v3147_v7 = vld [vmem:[%s3825_s1 + $0x68] sm:$0xff]  ;;  %vm1155_vm1 = vcmask 1046528   ;;  %s2382_s23 = sshll.u32 %s2375_s16, 6 }
   0xd   : > { %v3120_v2 = vld [vmem:[%s3825_s1 + $0xb8] sm:$0xff]  ;;  %1649 = vmatpush.bf16.msra.mxu1 %v3115_v1  ;;  %v3137_v5 = vld [vmem:[%s3825_s1 + $0xb0] sm:$0xff]  ;;  %v3152_v8 = vld [vmem:[%s3825_s1 + $0xa8] sm:$0xff]  ;;  %p215_p4 = scmp.lt.s32.totalorder %s2382_s23, 255 }
   0xe   : > { %1818 = vmatpush.bf16.msra.mxu2 %v3120_v2  ;;  %s3157_s13 = scalar_lea.vmem %s3824_s0, %s3009_s30  ;;  %v2488_v9 = vld [vmem:[%s3825_s1 + $0x20] sm:$0xff]  ;;  %v2487_v13 = vld [vmem:[%s3825_s1 + $0x18] sm:$0xff]  ;;  %v2486_v18 = vld [vmem:[%s3825_s1 + $0x10] sm:$0xff] }
   0xf   : > { %v3167_v10 = vld [vmem:[%s3825_s1 + $0x60] sm:$0xff]  ;;  %v290_v12 = vld [vmem:[%s3157_s13 + $0x8] sm:$0x1]  ;;  %v3183_v14 = vld [vmem:[%s3825_s1 + $0x58] sm:$0xff]  ;;  %s3832_s23 = smov (!%p215_p4, %s2382_s23), 255 }
  0x10   : > { %1481 = vmatpush.bf16.msra.mxu0 %v2490_v3  ;;  %2986 = vmatpush.bf16.msra.mxu3 %v2490_v3  ;;  %v3172_v11 = vld [vmem:[%s3825_s1 + $0xa0] sm:$0xff]  ;;  %v3188_v15 = vld [vmem:[%s3825_s1 + $0x98] sm:$0xff]  ;;  %v578_v16 = vunpack.c.l.b16 %v290_v12  ;;  %v3199_v19 = vld [vmem:[%s3825_s1 + $0x50] sm:$0xff]  ;;  %s2383_s25 = sshll.u32 %s3832_s23, 2 }
  0x11   : > { %1650 = vmatpush.bf16.msra.mxu1 %v3132_v4  ;;  %v2509_v17 = vld [vmem:[%s3157_s13] sm:$0xff]   ;;  %v3204_v20 = vld [vmem:[%s3825_s1 + $0x90] sm:$0xff]  ;;  %v2485_v25 = vld [vmem:[%s3825_s1 + $0x8] sm:$0xff]  ;;  %s3386_s28 = scalar_lea.vmem %s3827_s3, %s2383_s25  ;;  %s3407_s5 = scalar_lea.vmem %s3828_s4, %s2383_s25 }
  0x12   : > { %1819 = vmatpush.bf16.msra.mxu2 %v3137_v5  ;;  %v646_v21 = vshll.u32 %v2509_v17, 16  ;;  %v610_v22 = vpack.c.b16 %v578_v16, %v578_v16  ;;  %v2875_v23 = vld [vmem:[%s3157_s13] sm:$0xf0]  ;;  %v2876_v24 = vld [vmem:[%s3157_s13] sm:$0xe]  ;;  %v3216_v26 = vld [vmem:[%s3825_s1 + $0x48] sm:$0xff] }
  0x13   : > { %v3221_v27 = vld [vmem:[%s3825_s1 + $0x88] sm:$0xff]  ;;  %v644_v28 = vshrl.u32 %v2509_v17, 16  ;;  %v2877_v31 = vor.u32 %v2876_v24, %v2875_v23  ;;  %v3020_v33 = vld [vmem:[%s3157_s13 + $0xc] sm:$0xf0]  ;;  %v2484_v34 = vld [vmem:[%s3825_s1] sm:$0xff] }
  0x14   : > { %1482 = vmatpush.bf16.msra.mxu0 %v2489_v6  ;;  %2987 = vmatpush.bf16.msra.mxu3 %v2489_v6  ;;  %v648_v29 = vrot.slane %v646_v21, 1  ;;  %v651_v30 = vshll.u32 %v610_v22, 16  ;;  %v228_v32 = vld [vmem:[%s3157_s13 + $0xc] sm:$0xff]   ;;  %v3233_v35 = vld [vmem:[%s3825_s1 + $0x40] sm:$0xff]  ;;  %v1157_v40 = vrot.slane %v610_v22, 1  ;;  %v2860_v63 = vld [vmem:[%s3157_s13 + $0x18] sm:$0xff]  }
  0x15   : > { %1651 = vmatpush.bf16.msra.mxu1 %v3147_v7  ;;  %v3238_v36 = vld [vmem:[%s3825_s1 + $0x80] sm:$0xff]  ;;  %v1156_v39 = vrot.slane %v2877_v31, 1  ;;  %v291_v41 = vld [vmem:[%s3157_s13 + $0x14] sm:$0x1]  ;;  %v3021_v46 = vld [vmem:[%s3157_s13 + $0xc] sm:$0xe] }
  0x16   : > { %1820 = vmatpush.bf16.msra.mxu2 %v3152_v8  ;;  %v649_v37 = vor.u32 %v648_v29, %v644_v28  ;;  %v653_v38 = vrot.slane %v651_v30, 1  ;;  %v3242_v42 = vld [vmem:[%s3157_s13 + $0x120] sm:$0xff]   ;;  %v579_v45 = vunpack.c.l.b16 %v291_v41  ;;  %v658_v48 = vshll.u32 %v228_v32, 16  ;;  %v3253_v49 = vld [vmem:[%s3157_s13 + $0x12c] sm:$0xff]   ;;  %v2878_v3 = vld [vmem:[%s3157_s13 + $0x18] sm:$0xf0] }
  0x17   : > { %v1158_v44 = vsel %vm1155_vm1, %v1156_v39, %v1157_v40  ;;  %v3256_v50 = vld [vmem:[%s3157_s13 + $0x12c] sm:$0xf0]  ;;  %v656_v51 = vshrl.u32 %v228_v32, 16  ;;  %v3022_v54 = vor.u32 %v3021_v46, %v3020_v33  ;;  %v292_v59 = vld [vmem:[%s3157_s13 + $0x20] sm:$0x1]  ;;  %v670_v0 = vshll.u32 %v2860_v63, 16 }
  0x18   : > { %1483 = vmatpush.bf16.msra.mxu0 %v2488_v9  ;;  %2988 = vmatpush.bf16.msra.mxu3 %v2488_v9  ;;  %v654_v43 = vsel %vm642_vm0, %v649_v37, %v653_v38  ;;  %v611_v47 = vpack.c.b16 %v579_v45, %v579_v45  ;;  %v660_v52 = vrot.slane %v658_v48, 1  ;;  %v580_v60 = vunpack.c.l.b16 %v292_v59  ;;  %v232_v12 = vld [vmem:[%s3157_s13 + $0x24] sm:$0xff]   ;;  %v293_v21 = vld [vmem:[%s3157_s13 + $0x2c] sm:$0x1]  ;;  %v294_v39 = vld [vmem:[%s3157_s13 + $0x38] sm:$0x1] }
  0x19   : > { %1652 = vmatpush.bf16.msra.mxu1 %v3167_v10  ;;  %v1159_v57 = vrot.slane %v3022_v54, 1  ;;  %v668_v6 = vshrl.u32 %v2860_v63, 16  ;;  %v581_v24 = vunpack.c.l.b16 %v293_v21  ;;  %v682_v28 = vshll.u32 %v232_v12, 16  ;;  %v3284_v29 = vld [vmem:[%s3157_s13 + $0x144] sm:$0xff]   ;;  %v2882_v45 = vld [vmem:[%s3157_s13 + $0x30] sm:$0xe] }
  0x1a   : > { %1821 = vmatpush.bf16.msra.mxu2 %v3172_v11  ;;  %v663_v53 = vshll.u32 %v611_v47, 16  ;;  %v661_v55 = vor.u32 %v660_v52, %v656_v51  ;;  %v1160_v58 = vrot.slane %v611_v47, 1  ;;  %v680_v30 = vshrl.u32 %v232_v12, 16  ;;  %v3026_v52 = vld [vmem:[%s3157_s13 + $0x3c] sm:$0xf0] }
  0x1b   : > { %v684_v31 = vrot.slane %v682_v28, 1 }
  0x1c   : > { %1484 = vmatpush.bf16.msra.mxu0 %v2487_v13  ;;  %2989 = vmatpush.bf16.msra.mxu3 %v2487_v13  ;;  %v665_v56 = vrot.slane %v663_v53, 1  ;;  %v1161_v62 = vsel %vm1155_vm1, %v1159_v57, %v1160_v58  ;;  %v3023_v13 = vld [vmem:[%s3157_s13 + $0x24] sm:$0xf0]  ;;  %v3306_v57 = vld [vmem:[%s3157_s13 + $0x150] sm:$0xff]  }
  0x1d   : > { %1653 = vmatpush.bf16.msra.mxu1 %v3183_v14 }
  0x1e   : > { %1822 = vmatpush.bf16.msra.mxu2 %v3188_v15  ;;  %v666_v61 = vsel %vm642_vm0, %v661_v55, %v665_v56 }
  0x20   : > { %1485 = vmatpush.bf16.msra.mxu0 %v2486_v18  ;;  %2990 = vmatpush.bf16.msra.mxu3 %v2486_v18 }
  0x21   : > { %1654 = vmatpush.bf16.msra.mxu1 %v3199_v19 }
  0x22   : > { %1823 = vmatpush.bf16.msra.mxu2 %v3204_v20 }
  0x24   : > { %1486 = vmatpush.bf16.msra.mxu0 %v2485_v25  ;;  %2991 = vmatpush.bf16.msra.mxu3 %v2485_v25  ;;  %v3024_v25 = vld [vmem:[%s3157_s13 + $0x24] sm:$0xe] }
  0x25   : > { %1655 = vmatpush.bf16.msra.mxu1 %v3216_v26  ;;  %v3025_v33 = vor.u32 %v3024_v25, %v3023_v13 }
  0x26   : > { %1824 = vmatpush.bf16.msra.mxu2 %v3221_v27 }
  0x27   : > { %v1165_v37 = vrot.slane %v3025_v33, 1 }
  0x28   : > { %1487 = vmatpush.bf16.msra.mxu0 %v2484_v34  ;;  %2992 = vmatpush.bf16.msra.mxu3 %v2484_v34  ;;  %v685_v34 = vor.u32 %v684_v31, %v680_v30  ;;  %v240_v30 = vld [vmem:[%s3157_s13 + $0x54] sm:$0xff]  }
  0x29   : > { %1656 = vmatpush.bf16.msra.mxu1 %v3233_v35  ;;  %v3029_v31 = vld [vmem:[%s3157_s13 + $0x54] sm:$0xf0] }
  0x2a   : > { %1825 = vmatpush.bf16.msra.mxu2 %v3238_v36 }
  0x2b   : > { %1488 = vmatmul.bf16.vlgmr.msra.gmra.mxu0 %v2509_v17  ;;  %1608 = vmatmul.bf16.vlgmr.msra.gmra.mxu3 %v3242_v42 }
  0x2c   : > { %2993 = vmatpush.bf16.msrb.mxu3 %v3115_v1  ;;  %1657 = vmatmul.bf16.vlgmr.msra.gmra.mxu1 %v654_v43  ;;  %v612_v1 = vpack.c.b16 %v580_v60, %v580_v60  ;;  %v2861_v43 = vld [vmem:[%s3157_s13 + $0x30] sm:$0xff]  }
  0x2d   : > { %1826 = vmatmul.bf16.vlgmr.msra.gmra.mxu2 %v1158_v44  ;;  %v692_v46 = vshrl.u32 %v2861_v43, 16 }
  0x2e   : > { %v675_v9 = vshll.u32 %v612_v1, 16  ;;  %v1163_v18 = vrot.slane %v612_v1, 1 }
  0x30   : > { %2994 = vmatpush.bf16.msrb.mxu3 %v3132_v4  ;;  %v2879_v4 = vld [vmem:[%s3157_s13 + $0x18] sm:$0xe]  ;;  %v677_v16 = vrot.slane %v675_v9, 1 }
  0x34   : > { %2995 = vmatpush.bf16.msrb.mxu3 %v3147_v7  ;;  %v672_v7 = vrot.slane %v670_v0, 1 }
  0x38   : > { %2996 = vmatpush.bf16.msrb.mxu3 %v3167_v10  ;;  %v2880_v10 = vor.u32 %v2879_v4, %v2878_v3 }
  0x3a   : > { %v1162_v17 = vrot.slane %v2880_v10, 1 }
  0x3b   : > { %1493 = vmatmul.bf16.gmra.mxu0 %v228_v32  ;;  %1613 = vmatmul.bf16.gmra.mxu3 %v3253_v49 }
  0x3c   : > { %2997 = vmatpush.bf16.msrb.mxu3 %v3183_v14  ;;  %1662 = vmatmul.bf16.gmra.mxu1 %v666_v61  ;;  %v673_v14 = vor.u32 %v672_v7, %v668_v6  ;;  %v1164_v23 = vsel %vm1155_vm1, %v1162_v17, %v1163_v18  ;;  %v3027_v61 = vld [vmem:[%s3157_s13 + $0x3c] sm:$0xe]  ;;  %v2862_v17 = vld [vmem:[%s3157_s13 + $0x48] sm:$0xff]  }
  0x3d   : > { %1831 = vmatmul.bf16.gmra.mxu2 %v1161_v62  ;;  %v3028_v4 = vor.u32 %v3027_v61, %v3026_v52  ;;  %v718_v18 = vshll.u32 %v2862_v17, 16  ;;  %v934_v61 = vshll.u32 %v3242_v42, 16 }
  0x3e   : > { %v678_v22 = vsel %vm642_vm0, %v673_v14, %v677_v16 }
  0x3f   : > { %v1171_v9 = vrot.slane %v3028_v4, 1  ;;  %v720_v25 = vrot.slane %v718_v18, 1  ;;  %v932_v4 = vshrl.u32 %v3242_v42, 16 }
  0x40   : > { %2998 = vmatpush.bf16.msrb.mxu3 %v3199_v19  ;;  %v3276_v19 = vld [vmem:[%s3157_s13 + $0x138] sm:$0xff]  }
  0x44   : > { %2999 = vmatpush.bf16.msrb.mxu3 %v3216_v26  ;;  %v613_v26 = vpack.c.b16 %v581_v24, %v581_v24  ;;  %v716_v24 = vshrl.u32 %v2862_v17, 16 }
  0x46   : > { %v687_v32 = vshll.u32 %v613_v26, 16  ;;  %v1166_v38 = vrot.slane %v613_v26, 1 }
  0x48   : > { %3000 = vmatpush.bf16.msrb.mxu3 %v3233_v35  ;;  %v689_v35 = vrot.slane %v687_v32, 1  ;;  %v1167_v41 = vsel %vm1155_vm1, %v1165_v37, %v1166_v38  ;;  %v721_v32 = vor.u32 %v720_v25, %v716_v24  ;;  %v297_v37 = vld [vmem:[%s3157_s13 + $0x5c] sm:$0x1]  ;;  %v3329_v38 = vld [vmem:[%s3157_s13 + $0x168] sm:$0xff]   ;;  %v299_v24 = vld [vmem:[%s3157_s13 + $0x74] sm:$0x1] }
  0x49   : > { %v315_v25 = vld [vmem:[%s3157_s13 + $0x134] sm:$0x1] }
  0x4a   : > { %v690_v40 = vsel %vm642_vm0, %v685_v34, %v689_v35 }
  0x4b   : > { %1498 = vmatmul.bf16.gmra.mxu0 %v2860_v63  ;;  %1618 = vmatmul.bf16.gmra.mxu3 %v3276_v19  ;;  %v3313_v63 = vld [vmem:[%s3157_s13 + $0x15c] sm:$0xff]  }
  0x4c   : > { %3001 = vmatpush.bf16.msra.mxu3 %v3120_v2  ;;  %1667 = vmatmul.bf16.gmra.mxu1 %v678_v22  ;;  %v3287_v2 = vld [vmem:[%s3157_s13 + $0x144] sm:$0xf0]  ;;  %v2884_v22 = vld [vmem:[%s3157_s13 + $0x48] sm:$0xf0] }
  0x4d   : > { %1836 = vmatmul.bf16.gmra.mxu2 %v1164_v23  ;;  %v2885_v23 = vld [vmem:[%s3157_s13 + $0x48] sm:$0xe] }
  0x4e   : > { %v2886_v28 = vor.u32 %v2885_v23, %v2884_v22 }
  0x50   : > { %3002 = vmatpush.bf16.msra.mxu3 %v3137_v5  ;;  %v582_v5 = vunpack.c.l.b16 %v294_v39  ;;  %v1174_v34 = vrot.slane %v2886_v28, 1  ;;  %v585_v39 = vunpack.c.l.b16 %v297_v37  ;;  %v3033_v37 = vld [vmem:[%s3157_s13 + $0x6c] sm:$0xe] }
  0x52   : > { %v614_v44 = vpack.c.b16 %v582_v5, %v582_v5 }
  0x54   : > { %3003 = vmatpush.bf16.msra.mxu3 %v3152_v8  ;;  %v694_v8 = vshll.u32 %v2861_v43, 16  ;;  %v699_v48 = vshll.u32 %v614_v44, 16  ;;  %v1169_v56 = vrot.slane %v614_v44, 1  ;;  %v3336_v44 = vld [vmem:[%s3157_s13 + $0x174] sm:$0xff]  }
  0x56   : > { %v696_v47 = vrot.slane %v694_v8, 1  ;;  %v701_v54 = vrot.slane %v699_v48, 1  ;;  %v730_v8 = vshll.u32 %v240_v30, 16 }
  0x58   : > { %3004 = vmatpush.bf16.msra.mxu3 %v3172_v11  ;;  %v2881_v11 = vld [vmem:[%s3157_s13 + $0x30] sm:$0xf0]  ;;  %v697_v53 = vor.u32 %v696_v47, %v692_v46  ;;  %v728_v46 = vshrl.u32 %v240_v30, 16  ;;  %v732_v47 = vrot.slane %v730_v8, 1 }
  0x59   : > { %v2883_v51 = vor.u32 %v2882_v45, %v2881_v11  ;;  %v3339_v11 = vld [vmem:[%s3157_s13 + $0x174] sm:$0xf0] }
  0x5a   : > { %v702_v58 = vsel %vm642_vm0, %v697_v53, %v701_v54  ;;  %v298_v54 = vld [vmem:[%s3157_s13 + $0x68] sm:$0x1] }
  0x5b   : > { %1503 = vmatmul.bf16.gmra.mxu0 %v232_v12  ;;  %1623 = vmatmul.bf16.gmra.mxu3 %v3284_v29  ;;  %v1168_v55 = vrot.slane %v2883_v51, 1  ;;  %v296_v12 = vld [vmem:[%s3157_s13 + $0x50] sm:$0x1] }
  0x5c   : > { %3005 = vmatpush.bf16.msra.mxu3 %v3188_v15  ;;  %1672 = vmatmul.bf16.gmra.mxu1 %v690_v40  ;;  %v236_v15 = vld [vmem:[%s3157_s13 + $0x3c] sm:$0xff]   ;;  %v584_v13 = vunpack.c.l.b16 %v296_v12 }
  0x5d   : > { %1841 = vmatmul.bf16.gmra.mxu2 %v1167_v41  ;;  %v1170_v59 = vsel %vm1155_vm1, %v1168_v55, %v1169_v56  ;;  %v706_v62 = vshll.u32 %v236_v15, 16  ;;  %v704_v0 = vshrl.u32 %v236_v15, 16  ;;  %v3030_v41 = vld [vmem:[%s3157_s13 + $0x54] sm:$0xe]  ;;  %v314_v55 = vld [vmem:[%s3157_s13 + $0x128] sm:$0x1]  ;;  %v586_v56 = vunpack.c.l.b16 %v298_v54 }
  0x5e   : > { %v616_v21 = vpack.c.b16 %v584_v13, %v584_v13  ;;  %v3031_v48 = vor.u32 %v3030_v41, %v3029_v31  ;;  %v603_v31 = vunpack.c.l.b16 %v315_v25 }
  0x5f   : > { %v708_v1 = vrot.slane %v706_v62, 1  ;;  %v618_v62 = vpack.c.b16 %v586_v56, %v586_v56 }
  0x60   : > { %3006 = vmatpush.bf16.msra.mxu3 %v3204_v20  ;;  %v295_v20 = vld [vmem:[%s3157_s13 + $0x44] sm:$0x1]  ;;  %v723_v26 = vshll.u32 %v616_v21, 16  ;;  %v1175_v35 = vrot.slane %v616_v21, 1  ;;  %v1177_v52 = vrot.slane %v3031_v48, 1  ;;  %v944_v48 = vshrl.u32 %v3253_v49, 16 }
  0x61   : > { %v583_v60 = vunpack.c.l.b16 %v295_v20  ;;  %v709_v6 = vor.u32 %v708_v1, %v704_v0  ;;  %v602_v20 = vunpack.c.l.b16 %v314_v55  ;;  %v2887_v1 = vld [vmem:[%s3157_s13 + $0x60] sm:$0xf0]  ;;  %v1181_v23 = vrot.slane %v618_v62, 1 }
  0x62   : > { %v725_v33 = vrot.slane %v723_v26, 1  ;;  %v1176_v40 = vsel %vm1155_vm1, %v1174_v34, %v1175_v35  ;;  %v3370_v35 = vld [vmem:[%s3826_s2] ss:$0 sm:$0xff] }
  0x63   : > { %v3348_v0 = vpack.c.b16 %v602_v20, %v602_v20 }
  0x64   : > { %3007 = vmatpush.bf16.msra.mxu3 %v3221_v27  ;;  %v615_v27 = vpack.c.b16 %v583_v60, %v583_v60  ;;  %v726_v5 = vsel %vm642_vm0, %v721_v32, %v725_v33  ;;  %v2863_v60 = vld [vmem:[%s3157_s13 + $0x60] sm:$0xff]  }
  0x65   : > { %v939_v12 = vshll.u32 %v3348_v0, 16 }
  0x66   : > { %v711_v3 = vshll.u32 %v615_v27, 16  ;;  %v1172_v10 = vrot.slane %v615_v27, 1  ;;  %v742_v27 = vshll.u32 %v2863_v60, 16 }
  0x67   : > { %v941_v22 = vrot.slane %v939_v12, 1 }
  0x68   : > { %3008 = vmatpush.bf16.msra.mxu3 %v3238_v36  ;;  %v3316_v36 = vld [vmem:[%s3157_s13 + $0x15c] sm:$0xf0]  ;;  %v713_v7 = vrot.slane %v711_v3, 1  ;;  %v1173_v16 = vsel %vm1155_vm1, %v1171_v9, %v1172_v10  ;;  %v744_v9 = vrot.slane %v742_v27, 1  ;;  %v747_v10 = vshll.u32 %v618_v62, 16 }
  0x69   : > { %v2888_v3 = vld [vmem:[%s3157_s13 + $0x60] sm:$0xe] }
  0x6a   : > { %v714_v14 = vsel %vm642_vm0, %v709_v6, %v713_v7  ;;  %v936_v6 = vrot.slane %v934_v61, 1  ;;  %v740_v7 = vshrl.u32 %v2863_v60, 16  ;;  %v2889_v13 = vor.u32 %v2888_v3, %v2887_v1  ;;  %v300_v1 = vld [vmem:[%s3157_s13 + $0x80] sm:$0x1] }
  0x6b   : > { %1508 = vmatmul.bf16.gmra.mxu0 %v2861_v43  ;;  %1628 = vmatmul.bf16.gmra.mxu3 %v3306_v57  ;;  %v617_v43 = vpack.c.b16 %v585_v39, %v585_v39  ;;  %v749_v21 = vrot.slane %v747_v10, 1  ;;  %v316_v3 = vld [vmem:[%s3157_s13 + $0x140] sm:$0x1] }
  0x6c   : > { %1677 = vmatmul.bf16.gmra.mxu1 %v702_v58  ;;  %v745_v18 = vor.u32 %v744_v9, %v740_v7  ;;  %v1180_v42 = vrot.slane %v2889_v13, 1 }
  0x6d   : > { %1846 = vmatmul.bf16.gmra.mxu2 %v1170_v59  ;;  %v735_v45 = vshll.u32 %v617_v43, 16  ;;  %v1178_v53 = vrot.slane %v617_v43, 1 }
  0x6e   : > { %v750_v33 = vsel %vm642_vm0, %v745_v18, %v749_v21  ;;  %v1182_v34 = vsel %vm1155_vm1, %v1180_v42, %v1181_v23  ;;  %v588_v18 = vunpack.c.l.b16 %v300_v1  ;;  %v604_v21 = vunpack.c.l.b16 %v316_v3 }
  0x6f   : > { %v737_v51 = vrot.slane %v735_v45, 1  ;;  %v1179_v59 = vsel %vm1155_vm1, %v1177_v52, %v1178_v53 }
  0x7b   : > { %1513 = vmatmul.bf16.gmra.mxu0 %v236_v15  ;;  %1633 = vmatmul.bf16.gmra.mxu3 %v3313_v63  ;;  %v733_v15 = vor.u32 %v732_v47, %v728_v46 }
  0x7c   : > { %1682 = vmatmul.bf16.gmra.mxu1 %v714_v14  ;;  %v3357_v14 = vld [vmem:[%s3157_s13 + $0x6c] sm:$0xff]  }
  0x7d   : > { %1851 = vmatmul.bf16.gmra.mxu2 %v1173_v16  ;;  %v738_v58 = vsel %vm642_vm0, %v733_v15, %v737_v51  ;;  %v3032_v16 = vld [vmem:[%s3157_s13 + $0x6c] sm:$0xf0]  ;;  %v754_v41 = vshll.u32 %v3357_v14, 16  ;;  %v752_v53 = vshrl.u32 %v3357_v14, 16 }
  0x7e   : > { %v3034_v55 = vor.u32 %v3033_v37, %v3032_v16 }
  0x7f   : > { %v756_v54 = vrot.slane %v754_v41, 1 }
  0x80   : > { %v1183_v62 = vrot.slane %v3034_v55, 1  ;;  %v3422_v55 = vld [vmem:[%s3157_s13 + $0x84] sm:$0xff]  }
  0x81   : > { %v757_v27 = vor.u32 %v756_v54, %v752_v53 }
  0x8b   : > { %1518 = vmatmul.bf16.gmra.mxu0 %v2862_v17  ;;  %1638 = vmatmul.bf16.gmra.mxu3 %v3329_v38  ;;  %v937_v17 = vor.u32 %v936_v6, %v932_v4 }
  0x8c   : > { %1687 = vmatmul.bf16.gmra.mxu1 %v726_v5  ;;  %v3373_v5 = vpack.c.b16 %v603_v31, %v603_v31 }
  0x8d   : > { %1856 = vmatmul.bf16.gmra.mxu2 %v1176_v40  ;;  %v942_v28 = vsel %vm642_vm0, %v937_v17, %v941_v22  ;;  %v946_v40 = vshll.u32 %v3253_v49, 16 }
  0x8e   : > { %v951_v15 = vshll.u32 %v3373_v5, 16 }
  0x8f   : > { %v948_v51 = vrot.slane %v946_v40, 1  ;;  %v2891_v40 = vld [vmem:[%s3157_s13 + $0x78] sm:$0xe] }
  0x90   : > { %v953_v61 = vrot.slane %v951_v15, 1 }
  0x9b   : > { %1523 = vmatmul.bf16.gmra.mxu0 %v240_v30  ;;  %1643 = vmatmul.bf16.gmra.mxu3 %v3336_v44  ;;  %v587_v30 = vunpack.c.l.b16 %v299_v24  ;;  %v2864_v24 = vld [vmem:[%s3157_s13 + $0x78] sm:$0xff]  }
  0x9c   : > { %1692 = vmatmul.bf16.gmra.mxu1 %v738_v58  ;;  %v2573_v58 = vld [vmem:[%s3386_s28] sm:$0xff]   ;;  %v766_v31 = vshll.u32 %v2864_v24, 16 }
  0x9d   : > { %1861 = vmatmul.bf16.gmra.mxu2 %v1179_v59  ;;  %v619_v39 = vpack.c.b16 %v587_v30, %v587_v30  ;;  %v2574_v6 = vunpack.c.l.bf16 %v2573_v58  ;;  %v2575_v10 = vunpack.c.h.bf16 %v2573_v58 }
  0x9f   : > { %v759_v47 = vshll.u32 %v619_v39, 16  ;;  %v1184_v49 = vrot.slane %v619_v39, 1  ;;  %v2890_v39 = vld [vmem:[%s3157_s13 + $0x78] sm:$0xf0] }
  0xa1   : > { %v761_v59 = vrot.slane %v759_v47, 1  ;;  %v1185_v23 = vsel %vm1155_vm1, %v1183_v62, %v1184_v49  ;;  %v768_v47 = vrot.slane %v766_v31, 1  ;;  %v301_v62 = vld [vmem:[%s3157_s13 + $0x8c] sm:$0x1] }
  0xa2   : > { %v317_v49 = vld [vmem:[%s3157_s13 + $0x14c] sm:$0x1] }
  0xa3   : > { %v762_v42 = vsel %vm642_vm0, %v757_v27, %v761_v59 }
  0xa8   : > { %v1489_v26 = vpop.f32.mrf.mxu0 }
  0xa9   : > { %v1658_v32 = vpop.f32.mrf.mxu1  ;;  %v1490_v43 = vadd.f32 %v3370_v35, %v1489_v26 }
  0xab   : > { %1528 = vmatmul.bf16.gmra.mxu0 %v2863_v60  ;;  %1777 = vmatmul.bf16.vlgmr.msrb.gmra.mxu3 %v942_v28  ;;  %v1659_v56 = vadd.f32 %v1658_v32, %v1490_v43  ;;  %v949_v60 = vor.u32 %v948_v51, %v944_v48  ;;  %v958_v28 = vshll.u32 %v3276_v19, 16  ;;  %v620_v32 = vpack.c.b16 %v588_v18, %v588_v18 }
  0xac   : > { %1697 = vmatmul.bf16.gmra.mxu1 %v750_v33  ;;  %v3410_v33 = vpack.c.b16 %v604_v21, %v604_v21  ;;  %v605_v18 = vunpack.c.l.b16 %v317_v49 }
  0xad   : > { %1866 = vmatmul.bf16.gmra.mxu2 %v1182_v34  ;;  %v954_v17 = vsel %vm642_vm0, %v949_v60, %v953_v61  ;;  %v960_v41 = vrot.slane %v958_v28, 1  ;;  %v771_v48 = vshll.u32 %v620_v32, 16  ;;  %v1187_v27 = vrot.slane %v620_v32, 1 }
  0xae   : > { %v3379_v8 = vpop.f32.mrf.mxu3  ;;  %v963_v51 = vshll.u32 %v3410_v33, 16  ;;  %v3434_v31 = vpack.c.b16 %v605_v18, %v605_v18  ;;  %v970_v32 = vshll.u32 %v3284_v29, 16 }
  0xaf   : > { %v773_v58 = vrot.slane %v771_v48, 1  ;;  %v776_v48 = vshrl.u32 %v3422_v55, 16 }
  0xb0   : > { %v1827_v45 = vpop.f32.mrf.mxu2  ;;  %v1491_v46 = vpop.f32.mrf.mxu0  ;;  %v965_v60 = vrot.slane %v963_v51, 1 }
  0xb1   : > { %v1660_v52 = vpop.f32.mrf.mxu1  ;;  %v1492_v20 = vadd.f32 %v3370_v35, %v1491_v46  ;;  %v1828_v4 = vadd.f32 %v1827_v45, %v1659_v56  ;;  %v764_v46 = vshrl.u32 %v2864_v24, 16  ;;  %v3035_v56 = vld [vmem:[%s3157_s13 + $0x84] sm:$0xf0] }
  0xb3   : > { %v1661_v7 = vadd.f32 %v1660_v52, %v1492_v20  ;;  %v2115_v25 = vadd.f32 %v2574_v6, %v1828_v4  ;;  %v2892_v52 = vor.u32 %v2891_v40, %v2890_v39  ;;  %v2923_v20 = vld [vmem:[%s3386_s28 + $0x8] sm:$0xff]  }
  0xb4   : > { %v2578_v3 = vunpack.c.l.bf16 %v2923_v20 }
  0xb5   : > { %v1186_v61 = vrot.slane %v2892_v52, 1 }
  0xb6   : > { %v3395_v9 = vpop.f32.mrf.mxu3 }
  0xb8   : > { %v1829_v12 = vpop.f32.mrf.mxu2  ;;  %v1494_v16 = vpop.f32.mrf.mxu0 }
  0xb9   : > { %v1830_v13 = vadd.f32 %v1829_v12, %v1661_v7  ;;  %v1663_v22 = vpop.f32.mrf.mxu1  ;;  %v1495_v34 = vadd.f32 %v3370_v35, %v1494_v16  ;;  %v2579_v7 = vunpack.c.h.bf16 %v2923_v20 }
  0xbb   : > { %v2116_v26 = vadd.f32 %v2575_v10, %v1830_v13  ;;  %1533 = vmatmul.bf16.gmra.mxu0 %v3357_v14  ;;  %1782 = vmatmul.bf16.gmra.mxu3 %v954_v17  ;;  %v956_v14 = vshrl.u32 %v3276_v19, 16  ;;  %v1664_v53 = vadd.f32 %v1663_v22, %v1495_v34  ;;  %v769_v19 = vor.u32 %v768_v47, %v764_v46 }
  0xbc   : > { %1702 = vmatmul.bf16.gmra.mxu1 %v762_v42  ;;  %v589_v17 = vunpack.c.l.b16 %v301_v62  ;;  %v1188_v42 = vsel %vm1155_vm1, %v1186_v61, %v1187_v27  ;;  %v778_v34 = vshll.u32 %v3422_v55, 16  ;;  %v975_v46 = vshll.u32 %v3434_v31, 16  ;;  %v302_v61 = vld [vmem:[%s3157_s13 + $0x98] sm:$0x1] }
  0xbd   : > { %v2703_v30 = vpack.c.bf16 %v2116_v26, %v2115_v25  ;;  %1871 = vmatmul.bf16.gmra.mxu2 %v1185_v23  ;;  %v961_v59 = vor.u32 %v960_v41, %v956_v14  ;;  %v774_v22 = vsel %vm642_vm0, %v769_v19, %v773_v58  ;;  %v3036_v26 = vld [vmem:[%s3157_s13 + $0x84] sm:$0xe]  ;;  %v318_v27 = vld [vmem:[%s3157_s13 + $0x158] sm:$0x1] }
  0xbe   : > { %v3414_v37 = vpop.f32.mrf.mxu3  ;;  %v780_v51 = vrot.slane %v778_v34, 1  ;;  %v977_v58 = vrot.slane %v975_v46, 1 }
  0xbf   : > { %2704 = vst [vmem:[%s3407_s5] sm:$0xff] %v2703_v30   ;;  %v966_v16 = vsel %vm642_vm0, %v961_v59, %v965_v60  ;;  %v621_v30 = vpack.c.b16 %v589_v17, %v589_v17 }
  0xc0   : > { %v1832_v43 = vpop.f32.mrf.mxu2  ;;  %v1496_v45 = vpop.f32.mrf.mxu0  ;;  %v781_v59 = vor.u32 %v780_v51, %v776_v48 }
  0xc1   : > { %v1665_v15 = vpop.f32.mrf.mxu1  ;;  %v1497_v54 = vadd.f32 %v3370_v35, %v1496_v45  ;;  %v1833_v1 = vadd.f32 %v1832_v43, %v1664_v53  ;;  %v968_v43 = vshrl.u32 %v3284_v29, 16  ;;  %v972_v45 = vrot.slane %v970_v32, 1 }
  0xc2   : > { %v1190_v29 = vrot.slane %v621_v30, 1 }
  0xc3   : > { %v1666_v4 = vadd.f32 %v1665_v15, %v1497_v54  ;;  %v2117_v23 = vadd.f32 %v2578_v3, %v1833_v1  ;;  %v3037_v15 = vor.u32 %v3036_v26, %v3035_v56  ;;  %v2924_v54 = vld [vmem:[%s3386_s28 + $0x10] sm:$0xff]   ;;  %v973_v19 = vor.u32 %v972_v45, %v968_v43 }
  0xc4   : > { %v2582_v49 = vunpack.c.l.bf16 %v2924_v54 }
  0xc5   : > { %v1189_v60 = vrot.slane %v3037_v15, 1 }
  0xc6   : > { %v3428_v6 = vpop.f32.mrf.mxu3 }
  0xc8   : > { %v1834_v10 = vpop.f32.mrf.mxu2  ;;  %v1499_v13 = vpop.f32.mrf.mxu0 }
  0xc9   : > { %v1835_v12 = vadd.f32 %v1834_v10, %v1666_v4  ;;  %v1668_v21 = vpop.f32.mrf.mxu1  ;;  %v1500_v39 = vadd.f32 %v3370_v35, %v1499_v13  ;;  %v2583_v4 = vunpack.c.h.bf16 %v2924_v54  ;;  %v590_v13 = vunpack.c.l.b16 %v302_v61 }
  0xcb   : > { %v2118_v25 = vadd.f32 %v2579_v7, %v1835_v12  ;;  %1538 = vmatmul.bf16.gmra.mxu0 %v2864_v24  ;;  %1787 = vmatmul.bf16.gmra.mxu3 %v966_v16  ;;  %v783_v24 = vshll.u32 %v621_v30, 16  ;;  %v1669_v52 = vadd.f32 %v1668_v21, %v1500_v39  ;;  %v978_v12 = vsel %vm642_vm0, %v973_v19, %v977_v58  ;;  %v3038_v19 = vld [vmem:[%s3157_s13 + $0x9c] sm:$0xf0]  ;;  %v2925_v58 = vld [vmem:[%s3386_s28 + $0x18] sm:$0xff]  }
  0xcc   : > { %1707 = vmatmul.bf16.gmra.mxu1 %v774_v22  ;;  %v606_v16 = vunpack.c.l.b16 %v318_v27  ;;  %v1191_v21 = vsel %vm1155_vm1, %v1189_v60, %v1190_v29  ;;  %v2865_v22 = vld [vmem:[%s3157_s13 + $0x90] sm:$0xff]   ;;  %v622_v30 = vpack.c.b16 %v590_v13, %v590_v13 }
  0xcd   : > { %v2708_v28 = vpack.c.bf16 %v2118_v25, %v2117_v23  ;;  %1876 = vmatmul.bf16.gmra.mxu2 %v1188_v42  ;;  %v785_v20 = vrot.slane %v783_v24, 1  ;;  %v982_v25 = vshll.u32 %v3306_v57, 16  ;;  %v788_v46 = vshrl.u32 %v2865_v22, 16 }
  0xce   : > { %v3440_v40 = vpop.f32.mrf.mxu3  ;;  %v3457_v32 = vpack.c.b16 %v606_v16, %v606_v16  ;;  %v795_v48 = vshll.u32 %v622_v30, 16  ;;  %v1193_v27 = vrot.slane %v622_v30, 1  ;;  %v3039_v30 = vld [vmem:[%s3157_s13 + $0x9c] sm:$0xe] }
  0xcf   : > { %2954 = vst [vmem:[%s3407_s5 + $0x8] sm:$0xff] %v2708_v28   ;;  %v786_v18 = vsel %vm642_vm0, %v781_v59, %v785_v20  ;;  %v790_v28 = vshll.u32 %v2865_v22, 16  ;;  %v984_v24 = vrot.slane %v982_v25, 1  ;;  %v3469_v20 = vld [vmem:[%s3157_s13 + $0x9c] sm:$0xff]  }
  0xd0   : > { %v1837_v14 = vpop.f32.mrf.mxu2  ;;  %v1501_v41 = vpop.f32.mrf.mxu0  ;;  %v987_v51 = vshll.u32 %v3457_v32, 16  ;;  %v797_v60 = vrot.slane %v795_v48, 1  ;;  %v992_v48 = vshrl.u32 %v3313_v63, 16 }
  0xd1   : > { %v1670_v47 = vpop.f32.mrf.mxu1  ;;  %v1502_v53 = vadd.f32 %v3370_v35, %v1501_v41  ;;  %v1838_v62 = vadd.f32 %v1837_v14, %v1669_v52  ;;  %v2893_v14 = vld [vmem:[%s3157_s13 + $0x90] sm:$0xf0]  ;;  %v2894_v41 = vld [vmem:[%s3157_s13 + $0x90] sm:$0xe] }
  0xd2   : > { %v2895_v52 = vor.u32 %v2894_v41, %v2893_v14  ;;  %v989_v29 = vrot.slane %v987_v51, 1 }
  0xd3   : > { %v1671_v1 = vadd.f32 %v1670_v47, %v1502_v53  ;;  %v2119_v42 = vadd.f32 %v2582_v49, %v1838_v62  ;;  %v792_v47 = vrot.slane %v790_v28, 1  ;;  %v303_v62 = vld [vmem:[%s3157_s13 + $0xa4] sm:$0x1] }
  0xd4   : > { %v1192_v61 = vrot.slane %v2895_v52, 1  ;;  %v319_v49 = vld [vmem:[%s3157_s13 + $0x164] sm:$0x1] }
  0xd5   : > { %v793_v59 = vor.u32 %v792_v47, %v788_v46 }
  0xd6   : > { %v3449_v3 = vpop.f32.mrf.mxu3  ;;  %v1194_v25 = vsel %vm1155_vm1, %v1192_v61, %v1193_v27 }
  0xd8   : > { %v1839_v56 = vpop.f32.mrf.mxu2  ;;  %v1504_v10 = vpop.f32.mrf.mxu0 }
  0xd9   : > { %v1840_v7 = vadd.f32 %v1839_v56, %v1671_v1  ;;  %v1673_v17 = vpop.f32.mrf.mxu1  ;;  %v1505_v34 = vadd.f32 %v3370_v35, %v1504_v10  ;;  %v2587_v10 = vunpack.c.h.bf16 %v2925_v58 }
  0xdb   : > { %v2120_v23 = vadd.f32 %v2583_v4, %v1840_v7  ;;  %1543 = vmatmul.bf16.gmra.mxu0 %v3422_v55  ;;  %1792 = vmatmul.bf16.gmra.mxu3 %v978_v12  ;;  %v980_v55 = vshrl.u32 %v3306_v57, 16  ;;  %v1674_v53 = vadd.f32 %v1673_v17, %v1505_v34  ;;  %v2586_v4 = vunpack.c.l.bf16 %v2925_v58 }
  0xdc   : > { %1712 = vmatmul.bf16.gmra.mxu1 %v786_v18  ;;  %v591_v18 = vunpack.c.l.b16 %v303_v62  ;;  %v994_v34 = vshll.u32 %v3313_v63, 16  ;;  %v3040_v58 = vor.u32 %v3039_v30, %v3038_v19  ;;  %v2866_v30 = vld [vmem:[%s3157_s13 + $0xa8] sm:$0xff]  }
  0xdd   : > { %v2713_v26 = vpack.c.bf16 %v2120_v23, %v2119_v42  ;;  %1881 = vmatmul.bf16.gmra.mxu2 %v1191_v21  ;;  %v985_v57 = vor.u32 %v984_v24, %v980_v55  ;;  %v607_v21 = vunpack.c.l.b16 %v319_v49  ;;  %v798_v23 = vsel %vm642_vm0, %v793_v59, %v797_v60  ;;  %v2926_v60 = vld [vmem:[%s3386_s28 + $0x20] sm:$0xff]  }
  0xde   : > { %v3461_v39 = vpop.f32.mrf.mxu3  ;;  %v623_v41 = vpack.c.b16 %v591_v18, %v591_v18  ;;  %v802_v24 = vshll.u32 %v3469_v20, 16  ;;  %v996_v51 = vrot.slane %v994_v34, 1  ;;  %v1195_v49 = vrot.slane %v3040_v58, 1 }
  0xdf   : > { %2955 = vst [vmem:[%s3407_s5 + $0x10] sm:$0xff] %v2713_v26   ;;  %v990_v17 = vsel %vm642_vm0, %v985_v57, %v989_v29  ;;  %v3482_v55 = vpack.c.b16 %v607_v21, %v607_v21  ;;  %v812_v58 = vshrl.u32 %v2866_v30, 16 }
  0xe0   : > { %v1842_v43 = vpop.f32.mrf.mxu2  ;;  %v1506_v45 = vpop.f32.mrf.mxu0  ;;  %v997_v61 = vor.u32 %v996_v51, %v992_v48  ;;  %v1196_v63 = vrot.slane %v623_v41, 1  ;;  %v2896_v51 = vld [vmem:[%s3157_s13 + $0xa8] sm:$0xf0] }
  0xe1   : > { %v1675_v15 = vpop.f32.mrf.mxu1  ;;  %v1507_v54 = vadd.f32 %v3370_v35, %v1506_v45  ;;  %v1843_v1 = vadd.f32 %v1842_v43, %v1674_v53  ;;  %v800_v53 = vshrl.u32 %v3469_v20, 16 }
  0xe3   : > { %v1676_v56 = vadd.f32 %v1675_v15, %v1507_v54  ;;  %v2121_v26 = vadd.f32 %v2586_v4, %v1843_v1  ;;  %v999_v15 = vshll.u32 %v3482_v55, 16  ;;  %v804_v54 = vrot.slane %v802_v24, 1  ;;  %v304_v1 = vld [vmem:[%s3157_s13 + $0xb0] sm:$0x1] }
  0xe4   : > { %v320_v4 = vld [vmem:[%s3157_s13 + $0x170] sm:$0x1] }
  0xe5   : > { %v1001_v27 = vrot.slane %v999_v15, 1  ;;  %v805_v62 = vor.u32 %v804_v54, %v800_v53  ;;  %v2897_v15 = vld [vmem:[%s3157_s13 + $0xa8] sm:$0xe] }
  0xe6   : > { %v3475_v7 = vpop.f32.mrf.mxu3 }
  0xe7   : > { %v1002_v21 = vsel %vm642_vm0, %v997_v61, %v1001_v27  ;;  %v2898_v61 = vor.u32 %v2897_v15, %v2896_v51 }
  0xe8   : > { %v1844_v12 = vpop.f32.mrf.mxu2  ;;  %v1509_v16 = vpop.f32.mrf.mxu0 }
  0xe9   : > { %v1845_v13 = vadd.f32 %v1844_v12, %v1676_v56  ;;  %v1678_v42 = vpop.f32.mrf.mxu1  ;;  %v1510_v43 = vadd.f32 %v3370_v35, %v1509_v16  ;;  %v2591_v16 = vunpack.c.h.bf16 %v2926_v60 }
  0xeb   : > { %v2122_v28 = vadd.f32 %v2587_v10, %v1845_v13  ;;  %1548 = vmatmul.bf16.gmra.mxu0 %v2865_v22  ;;  %1797 = vmatmul.bf16.gmra.mxu3 %v990_v17  ;;  %v807_v22 = vshll.u32 %v623_v41, 16  ;;  %v1679_v57 = vadd.f32 %v1678_v42, %v1510_v43  ;;  %v2590_v10 = vunpack.c.l.bf16 %v2926_v60 }
  0xec   : > { %1717 = vmatmul.bf16.gmra.mxu1 %v798_v23  ;;  %v592_v42 = vunpack.c.l.b16 %v304_v1  ;;  %v608_v23 = vunpack.c.l.b16 %v320_v4  ;;  %v1006_v41 = vshll.u32 %v3329_v38, 16  ;;  %v814_v43 = vshll.u32 %v2866_v30, 16  ;;  %v2927_v1 = vld [vmem:[%s3386_s28 + $0x28] sm:$0xff]  }
  0xed   : > { %v2718_v14 = vpack.c.bf16 %v2122_v28, %v2121_v26  ;;  %1886 = vmatmul.bf16.gmra.mxu2 %v1194_v25  ;;  %v809_v29 = vrot.slane %v807_v22, 1  ;;  %v1197_v28 = vsel %vm1155_vm1, %v1195_v49, %v1196_v63  ;;  %v3516_v49 = vld [vmem:[%s3157_s13 + $0xb4] sm:$0xff]  }
  0xee   : > { %v3487_v45 = vpop.f32.mrf.mxu3  ;;  %v3041_v63 = vld [vmem:[%s3157_s13 + $0xb4] sm:$0xf0] }
  0xef   : > { %2956 = vst [vmem:[%s3407_s5 + $0x18] sm:$0xff] %v2718_v14   ;;  %v810_v26 = vsel %vm642_vm0, %v805_v62, %v809_v29 }
  0xf0   : > { %v1847_v46 = vpop.f32.mrf.mxu2  ;;  %v1511_v47 = vpop.f32.mrf.mxu0 }
  0xf1   : > { %v1680_v52 = vpop.f32.mrf.mxu1  ;;  %v1512_v59 = vadd.f32 %v3370_v35, %v1511_v47  ;;  %v1848_v56 = vadd.f32 %v1847_v46, %v1679_v57  ;;  %v624_v46 = vpack.c.b16 %v592_v42, %v592_v42  ;;  %v3504_v47 = vpack.c.b16 %v608_v23, %v608_v23 }
  0xf2   : > { %v816_v57 = vrot.slane %v814_v43, 1  ;;  %v2595_v23 = vunpack.c.h.bf16 %v2927_v1 }
  0xf3   : > { %v1681_v12 = vadd.f32 %v1680_v52, %v1512_v59  ;;  %v2123_v34 = vadd.f32 %v2590_v10, %v1848_v56  ;;  %v1008_v52 = vrot.slane %v1006_v41, 1  ;;  %v819_v59 = vshll.u32 %v624_v46, 16 }
  0xf4   : > { %v1011_v60 = vshll.u32 %v3504_v47, 16  ;;  %v817_v4 = vor.u32 %v816_v57, %v812_v58  ;;  %v826_v58 = vshll.u32 %v3516_v49, 16 }
  0xf5   : > { %v821_v56 = vrot.slane %v819_v59, 1 }
  0xf6   : > { %v3496_v13 = vpop.f32.mrf.mxu3  ;;  %v1013_v10 = vrot.slane %v1011_v60, 1 }
  0xf7   : > { %v822_v43 = vsel %vm642_vm0, %v817_v4, %v821_v56  ;;  %v828_v4 = vrot.slane %v826_v58, 1 }
  0xf8   : > { %v1849_v19 = vpop.f32.mrf.mxu2  ;;  %v1514_v18 = vpop.f32.mrf.mxu0 }
  0xf9   : > { %v1850_v17 = vadd.f32 %v1849_v19, %v1681_v12  ;;  %v1683_v25 = vpop.f32.mrf.mxu1  ;;  %v1515_v22 = vadd.f32 %v3370_v35, %v1514_v18  ;;  %v1198_v12 = vrot.slane %v2898_v61, 1  ;;  %v321_v19 = vld [vmem:[%s3157_s13 + $0x17c] sm:$0x1]  ;;  %v2594_v18 = vunpack.c.l.bf16 %v2927_v1 }
  0xfa   : > { %v609_v41 = vunpack.c.l.b16 %v321_v19  ;;  %v2928_v19 = vld [vmem:[%s3386_s28 + $0x30] sm:$0xff]  }
  0xfb   : > { %v2124_v14 = vadd.f32 %v2591_v16, %v1850_v17  ;;  %1553 = vmatmul.bf16.gmra.mxu0 %v3469_v20  ;;  %1802 = vmatmul.bf16.gmra.mxu3 %v1002_v21  ;;  %v1004_v20 = vshrl.u32 %v3329_v38, 16  ;;  %v1684_v27 = vadd.f32 %v1683_v25, %v1515_v22  ;;  %v1199_v16 = vrot.slane %v624_v46, 1  ;;  %v305_v25 = vld [vmem:[%s3157_s13 + $0xbc] sm:$0x1] }
  0xfc   : > { %1722 = vmatmul.bf16.gmra.mxu1 %v810_v26  ;;  %v593_v22 = vunpack.c.l.b16 %v305_v25 }
  0xfd   : > { %v2723_v24 = vpack.c.bf16 %v2124_v14, %v2123_v34  ;;  %1891 = vmatmul.bf16.gmra.mxu2 %v1197_v28  ;;  %v1009_v38 = vor.u32 %v1008_v52, %v1004_v20  ;;  %v1200_v46 = vsel %vm1155_vm1, %v1198_v12, %v1199_v16  ;;  %v3042_v20 = vld [vmem:[%s3157_s13 + $0xb4] sm:$0xe]  ;;  %v1018_v52 = vshll.u32 %v3336_v44, 16 }
  0xfe   : > { %v3508_v48 = vpop.f32.mrf.mxu3  ;;  %v625_v57 = vpack.c.b16 %v593_v22, %v593_v22 }
  0xff   : > { %2957 = vst [vmem:[%s3407_s5 + $0x20] sm:$0xff] %v2723_v24   ;;  %v1014_v14 = vsel %vm642_vm0, %v1009_v38, %v1013_v10  ;;  %v824_v38 = vshrl.u32 %v3516_v49, 16  ;;  %v3043_v10 = vor.u32 %v3042_v20, %v3041_v63 }
 0x100   : > { %v1852_v53 = vpop.f32.mrf.mxu2  ;;  %v1516_v54 = vpop.f32.mrf.mxu0  ;;  %v831_v56 = vshll.u32 %v625_v57, 16 }
 0x101   : > { %v1685_v29 = vpop.f32.mrf.mxu1  ;;  %v1517_v62 = vadd.f32 %v3370_v35, %v1516_v54  ;;  %v1853_v17 = vadd.f32 %v1852_v53, %v1684_v27  ;;  %v3529_v54 = vpack.c.b16 %v609_v41, %v609_v41  ;;  %v1020_v27 = vrot.slane %v1018_v52, 1 }
 0x102   : > { %v1201_v25 = vrot.slane %v3043_v10, 1 }
 0x103   : > { %v1686_v21 = vadd.f32 %v1685_v29, %v1517_v62  ;;  %v2125_v51 = vadd.f32 %v2594_v18, %v1853_v17  ;;  %v1023_v62 = vshll.u32 %v3529_v54, 16 }
 0x105   : > { %v1025_v18 = vrot.slane %v1023_v62, 1 }
 0x106   : > { %v3521_v42 = vpop.f32.mrf.mxu3 }
 0x108   : > { %v1854_v26 = vpop.f32.mrf.mxu2  ;;  %v1519_v34 = vpop.f32.mrf.mxu0 }
 0x109   : > { %v1855_v28 = vadd.f32 %v1854_v26, %v1686_v21  ;;  %v1688_v24 = vpop.f32.mrf.mxu1  ;;  %v1520_v59 = vadd.f32 %v3370_v35, %v1519_v34  ;;  %v829_v21 = vor.u32 %v828_v4, %v824_v38  ;;  %v306_v26 = vld [vmem:[%s3157_s13 + $0xc8] sm:$0x1]  ;;  %v2598_v34 = vunpack.c.l.bf16 %v2928_v19  ;;  %v2899_v38 = vld [vmem:[%s3157_s13 + $0xc0] sm:$0xf0]  ;;  %v2900_v4 = vld [vmem:[%s3157_s13 + $0xc0] sm:$0xe] }
 0x10b   : > { %v2126_v15 = vadd.f32 %v2595_v23, %v1855_v28  ;;  %1558 = vmatmul.bf16.gmra.mxu0 %v2866_v30  ;;  %1807 = vmatmul.bf16.gmra.mxu3 %v1014_v14  ;;  %v1016_v30 = vshrl.u32 %v3336_v44, 16  ;;  %v1689_v12 = vadd.f32 %v1688_v24, %v1520_v59  ;;  %v833_v23 = vrot.slane %v831_v56, 1 }
 0x10c   : > { %1727 = vmatmul.bf16.gmra.mxu1 %v822_v43  ;;  %v1202_v44 = vrot.slane %v625_v57, 1  ;;  %v2599_v43 = vunpack.c.h.bf16 %v2928_v19 }
 0x10d   : > { %v2728_v53 = vpack.c.bf16 %v2126_v15, %v2125_v51  ;;  %1896 = vmatmul.bf16.gmra.mxu2 %v1200_v46  ;;  %v1021_v17 = vor.u32 %v1020_v27, %v1016_v30  ;;  %v594_v51 = vunpack.c.l.b16 %v306_v26  ;;  %v834_v20 = vsel %vm642_vm0, %v829_v21, %v833_v23  ;;  %v2911_v30 = vld [vmem:[%s3157_s13 + $0x120] sm:$0xf0]  ;;  %v2912_v27 = vld [vmem:[%s3157_s13 + $0x120] sm:$0xe]  ;;  %v2929_v26 = vld [vmem:[%s3386_s28 + $0x38] sm:$0xff]  }
 0x10e   : > { %v3534_v60 = vpop.f32.mrf.mxu3  ;;  %v1203_v52 = vsel %vm1155_vm1, %v1201_v25, %v1202_v44  ;;  %v2913_v19 = vor.u32 %v2912_v27, %v2911_v30  ;;  %v3559_v25 = vld [vmem:[%s3157_s13 + $0xcc] sm:$0xff]  }
 0x10f   : > { %2958 = vst [vmem:[%s3407_s5 + $0x28] sm:$0xff] %v2728_v53   ;;  %v1026_v22 = vsel %vm642_vm0, %v1021_v17, %v1025_v18  ;;  %v2867_v53 = vld [vmem:[%s3157_s13 + $0xc0] sm:$0xff]   ;;  %v2901_v18 = vor.u32 %v2900_v4, %v2899_v38  ;;  %v3047_v44 = vld [vmem:[%s3157_s13 + $0xcc] sm:$0xf0] }
 0x110   : > { %v1857_v29 = vpop.f32.mrf.mxu2  ;;  %v1521_v61 = vpop.f32.mrf.mxu0  ;;  %v836_v10 = vshrl.u32 %v2867_v53, 16 }
 0x111   : > { %v1690_v1 = vpop.f32.mrf.mxu1  ;;  %v1522_v16 = vadd.f32 %v3370_v35, %v1521_v61  ;;  %v1858_v28 = vadd.f32 %v1857_v29, %v1689_v12  ;;  %v838_v29 = vshll.u32 %v2867_v53, 16  ;;  %v626_v61 = vpack.c.b16 %v594_v51, %v594_v51 }
 0x113   : > { %v1691_v14 = vadd.f32 %v1690_v1, %v1522_v16  ;;  %v2127_v58 = vadd.f32 %v2598_v34, %v1858_v28  ;;  %v840_v12 = vrot.slane %v838_v29, 1  ;;  %v843_v16 = vshll.u32 %v626_v61, 16 }
 0x115   : > { %v841_v28 = vor.u32 %v840_v12, %v836_v10  ;;  %v845_v34 = vrot.slane %v843_v16, 1  ;;  %v1610_v10 = vadd.f32 %v3370_v35, %v3379_v8  ;;  %v850_v12 = vshll.u32 %v3559_v25, 16 }
 0x116   : > { %v3542_v41 = vpop.f32.mrf.mxu3 }
 0x118   : > { %v1859_v46 = vpop.f32.mrf.mxu2  ;;  %v1524_v24 = vpop.f32.mrf.mxu0 }
 0x119   : > { %v1860_v63 = vadd.f32 %v1859_v46, %v1691_v14  ;;  %v1693_v15 = vpop.f32.mrf.mxu1  ;;  %v1525_v62 = vadd.f32 %v3370_v35, %v1524_v24  ;;  %v1228_v14 = vrot.slane %v2913_v19, 1  ;;  %v1204_v46 = vrot.slane %v2901_v18, 1 }
 0x11b   : > { %v2128_v57 = vadd.f32 %v2599_v43, %v1860_v63  ;;  %1563 = vmatmul.bf16.gmra.mxu0 %v3516_v49  ;;  %1812 = vmatmul.bf16.gmra.mxu3 %v1026_v22  ;;  %v1694_v21 = vadd.f32 %v1693_v15, %v1525_v62  ;;  %v1229_v43 = vrot.slane %v3348_v0, 1  ;;  %v1205_v63 = vrot.slane %v626_v61, 1  ;;  %v3045_v62 = vld [vmem:[%s3157_s13 + $0x12c] sm:$0xe] }
 0x11c   : > { %1732 = vmatmul.bf16.gmra.mxu1 %v834_v20  ;;  %v2602_v22 = vunpack.c.l.bf16 %v2929_v26  ;;  %v2603_v20 = vunpack.c.h.bf16 %v2929_v26  ;;  %v846_v0 = vsel %vm642_vm0, %v841_v28, %v845_v34  ;;  %v848_v28 = vshrl.u32 %v3559_v25, 16 }
 0x11d   : > { %v2733_v59 = vpack.c.bf16 %v2128_v57, %v2127_v58  ;;  %1901 = vmatmul.bf16.gmra.mxu2 %v1203_v52  ;;  %v307_v52 = vld [vmem:[%s3157_s13 + $0xd4] sm:$0x1]  ;;  %v1230_v29 = vsel %vm1155_vm1, %v1228_v14, %v1229_v43  ;;  %v1206_v27 = vsel %vm1155_vm1, %v1204_v46, %v1205_v63  ;;  %v852_v34 = vrot.slane %v850_v12, 1  ;;  %v2930_v63 = vld [vmem:[%s3386_s28 + $0x40] sm:$0xff]  }
 0x11e   : > { %v3553_v1 = vpop.f32.mrf.mxu3  ;;  %v595_v61 = vunpack.c.l.b16 %v307_v52 }
 0x11f   : > { %2959 = vst [vmem:[%s3407_s5 + $0x30] sm:$0xff] %v2733_v59  }
 0x120   : > { %v1862_v56 = vpop.f32.mrf.mxu2  ;;  %v1526_v49 = vpop.f32.mrf.mxu0  ;;  %v627_v16 = vpack.c.b16 %v595_v61, %v595_v61 }
 0x121   : > { %v1695_v17 = vpop.f32.mrf.mxu1  ;;  %v1527_v23 = vadd.f32 %v3370_v35, %v1526_v49  ;;  %v1863_v24 = vadd.f32 %v1862_v56, %v1694_v21  ;;  %v3048_v56 = vld [vmem:[%s3157_s13 + $0xcc] sm:$0xe] }
 0x122   : > { %v855_v8 = vshll.u32 %v627_v16, 16  ;;  %v3049_v14 = vor.u32 %v3048_v56, %v3047_v44 }
 0x123   : > { %v1696_v51 = vadd.f32 %v1695_v17, %v1527_v23  ;;  %v2129_v38 = vadd.f32 %v2602_v22, %v1863_v24  ;;  %v1612_v24 = vadd.f32 %v3370_v35, %v3395_v9 }
 0x124   : > { %v857_v52 = vrot.slane %v855_v8, 1  ;;  %v2902_v8 = vld [vmem:[%s3157_s13 + $0xd8] sm:$0xf0] }
 0x126   : > { %v3564_v15 = vpop.f32.mrf.mxu3 }
 0x128   : > { %v1864_v58 = vpop.f32.mrf.mxu2  ;;  %v1529_v59 = vpop.f32.mrf.mxu0 }
 0x129   : > { %v1865_v57 = vadd.f32 %v1864_v58, %v1696_v51  ;;  %v1698_v30 = vpop.f32.mrf.mxu1  ;;  %v1530_v19 = vadd.f32 %v3370_v35, %v1529_v59  ;;  %v1232_v51 = vrot.slane %v3373_v5, 1  ;;  %v1208_v58 = vrot.slane %v627_v16, 1 }
 0x12b   : > { %v2130_v4 = vadd.f32 %v2603_v20, %v1865_v57  ;;  %1568 = vmatmul.bf16.gmra.mxu0 %v2867_v53  ;;  %1946 = vmatmul.bf16.vlgmr.msra.gmra.mxu3 %v1230_v29  ;;  %v3046_v53 = vor.u32 %v3045_v62, %v3256_v50  ;;  %v1699_v43 = vadd.f32 %v1698_v30, %v1530_v19  ;;  %v1207_v50 = vrot.slane %v3049_v14, 1  ;;  %v308_v57 = vld [vmem:[%s3157_s13 + $0xe0] sm:$0x1] }
 0x12c   : > { %1737 = vmatmul.bf16.gmra.mxu1 %v846_v0  ;;  %v853_v20 = vor.u32 %v852_v34, %v848_v28  ;;  %v2606_v29 = vunpack.c.l.bf16 %v2930_v63  ;;  %v2607_v30 = vunpack.c.h.bf16 %v2930_v63  ;;  %v596_v5 = vunpack.c.l.b16 %v308_v57  ;;  %v3053_v57 = vld [vmem:[%s3157_s13 + $0xe4] sm:$0xf0] }
 0x12d   : > { %v2738_v49 = vpack.c.bf16 %v2130_v4, %v2129_v38  ;;  %1906 = vmatmul.bf16.gmra.mxu2 %v1206_v27  ;;  %v1231_v22 = vrot.slane %v3046_v53, 1  ;;  %v2914_v53 = vld [vmem:[%s3157_s13 + $0x138] sm:$0xf0] }
 0x12e   : > { %v1778_v17 = vpop.f32.mrf.mxu3  ;;  %v858_v56 = vsel %vm642_vm0, %v853_v20, %v857_v52 }
 0x12f   : > { %2960 = vst [vmem:[%s3407_s5 + $0x38] sm:$0xff] %v2738_v49   ;;  %v3577_v18 = vadd.f32 %v1778_v17, %v1610_v10  ;;  %v1233_v9 = vsel %vm1155_vm1, %v1231_v22, %v1232_v51  ;;  %v1209_v49 = vsel %vm1155_vm1, %v1207_v50, %v1208_v58  ;;  %v2868_v10 = vld [vmem:[%s3157_s13 + $0xd8] sm:$0xff]   ;;  %v3606_v58 = vld [vmem:[%s3157_s13 + $0xe4] sm:$0xff]  }
 0x130   : > { %v1867_v21 = vpop.f32.mrf.mxu2  ;;  %v1531_v23 = vpop.f32.mrf.mxu0  ;;  %v862_v17 = vshll.u32 %v2868_v10, 16  ;;  %v860_v63 = vshrl.u32 %v2868_v10, 16 }
 0x131   : > { %v1700_v26 = vpop.f32.mrf.mxu1  ;;  %v1532_v46 = vadd.f32 %v3370_v35, %v1531_v23  ;;  %v1868_v59 = vadd.f32 %v1867_v21, %v1699_v43  ;;  %v628_v21 = vpack.c.b16 %v596_v5, %v596_v5  ;;  %v1615_v23 = vadd.f32 %v3370_v35, %v3414_v37 }
 0x133   : > { %v1701_v0 = vadd.f32 %v1700_v26, %v1532_v46  ;;  %v2131_v12 = vadd.f32 %v2606_v29, %v1868_v59  ;;  %v2915_v26 = vld [vmem:[%s3157_s13 + $0x138] sm:$0xe]  ;;  %v867_v22 = vshll.u32 %v628_v21, 16  ;;  %v1617_v59 = vadd.f32 %v3370_v35, %v3428_v6  ;;  %v2931_v29 = vld [vmem:[%s3386_s28 + $0x48] sm:$0xff]  }
 0x134   : > { %v2916_v51 = vor.u32 %v2915_v26, %v2914_v53  ;;  %v2610_v5 = vunpack.c.l.bf16 %v2931_v29  ;;  %v3051_v26 = vld [vmem:[%s3157_s13 + $0x144] sm:$0xe] }
 0x136   : > { %v1780_v44 = vpop.f32.mrf.mxu3 }
 0x137   : > { %v3587_v27 = vadd.f32 %v1780_v44, %v1612_v24  ;;  %v864_v24 = vrot.slane %v862_v17, 1  ;;  %v869_v44 = vrot.slane %v867_v22, 1 }
 0x138   : > { %v1869_v61 = vpop.f32.mrf.mxu2  ;;  %v1534_v38 = vpop.f32.mrf.mxu0 }
 0x139   : > { %v1870_v62 = vadd.f32 %v1869_v61, %v1701_v0  ;;  %v1703_v4 = vpop.f32.mrf.mxu1  ;;  %v1535_v28 = vadd.f32 %v3370_v35, %v1534_v38  ;;  %v865_v0 = vor.u32 %v864_v24, %v860_v63  ;;  %v1235_v61 = vrot.slane %v3410_v33, 1 }
 0x13a   : > { %v1211_v38 = vrot.slane %v628_v21, 1  ;;  %v874_v63 = vshll.u32 %v3606_v58, 16 }
 0x13b   : > { %v2132_v16 = vadd.f32 %v2607_v30, %v1870_v62  ;;  %1573 = vmatmul.bf16.gmra.mxu0 %v3559_v25  ;;  %1951 = vmatmul.bf16.gmra.mxu3 %v1233_v9  ;;  %v2903_v25 = vld [vmem:[%s3157_s13 + $0xd8] sm:$0xe]  ;;  %v1704_v52 = vadd.f32 %v1703_v4, %v1535_v28  ;;  %v1234_v30 = vrot.slane %v2916_v51, 1  ;;  %v870_v33 = vsel %vm642_vm0, %v865_v0, %v869_v44 }
 0x13c   : > { %1742 = vmatmul.bf16.gmra.mxu1 %v858_v56  ;;  %v2904_v20 = vor.u32 %v2903_v25, %v2902_v8  ;;  %v3054_v8 = vld [vmem:[%s3157_s13 + $0xe4] sm:$0xe] }
 0x13d   : > { %v2743_v19 = vpack.c.bf16 %v2132_v16, %v2131_v12  ;;  %1911 = vmatmul.bf16.gmra.mxu2 %v1209_v49  ;;  %v2611_v49 = vunpack.c.h.bf16 %v2931_v29  ;;  %v309_v12 = vld [vmem:[%s3157_s13 + $0xec] sm:$0x1]  ;;  %v1236_v17 = vsel %vm1155_vm1, %v1234_v30, %v1235_v61  ;;  %v876_v29 = vrot.slane %v874_v63, 1  ;;  %v2932_v61 = vld [vmem:[%s3386_s28 + $0x50] sm:$0xff]  }
 0x13e   : > { %v1783_v34 = vpop.f32.mrf.mxu3  ;;  %v1210_v62 = vrot.slane %v2904_v20, 1  ;;  %v597_v53 = vunpack.c.l.b16 %v309_v12  ;;  %v3055_v0 = vor.u32 %v3054_v8, %v3053_v57 }
 0x13f   : > { %2961 = vst [vmem:[%s3407_s5 + $0x40] sm:$0xff] %v2743_v19   ;;  %v3602_v14 = vadd.f32 %v1783_v34, %v1615_v23 }
 0x140   : > { %v1872_v43 = vpop.f32.mrf.mxu2  ;;  %v1536_v46 = vpop.f32.mrf.mxu0  ;;  %v1212_v21 = vsel %vm1155_vm1, %v1210_v62, %v1211_v38  ;;  %v629_v24 = vpack.c.b16 %v597_v53, %v597_v53 }
 0x141   : > { %v1705_v37 = vpop.f32.mrf.mxu1  ;;  %v1537_v50 = vadd.f32 %v3370_v35, %v1536_v46  ;;  %v1873_v9 = vadd.f32 %v1872_v43, %v1704_v52  ;;  %v3624_v43 = vld [vmem:[%s3826_s2] ss:$0 sm:$0xff]  ;;  %v3052_v52 = vor.u32 %v3051_v26, %v3287_v2  ;;  %v1213_v2 = vrot.slane %v3055_v0, 1 }
 0x142   : > { %v1620_v46 = vadd.f32 %v3624_v43, %v3440_v40  ;;  %v879_v40 = vshll.u32 %v629_v24, 16  ;;  %v1622_v62 = vadd.f32 %v3624_v43, %v3449_v3 }
 0x143   : > { %v1706_v4 = vadd.f32 %v1705_v37, %v1537_v50  ;;  %v2133_v28 = vadd.f32 %v2610_v5, %v1873_v9  ;;  %v1237_v38 = vrot.slane %v3052_v52, 1  ;;  %v1238_v9 = vrot.slane %v3434_v31, 1 }
 0x145   : > { %v1239_v3 = vsel %vm1155_vm1, %v1237_v38, %v1238_v9 }
 0x146   : > { %v1785_v56 = vpop.f32.mrf.mxu3 }
 0x147   : > { %v3614_v16 = vadd.f32 %v1785_v56, %v1617_v59  ;;  %v872_v59 = vshrl.u32 %v3606_v58, 16  ;;  %v1214_v56 = vrot.slane %v629_v24, 1 }
 0x148   : > { %v1874_v19 = vpop.f32.mrf.mxu2  ;;  %v1539_v6 = vpop.f32.mrf.mxu0 }
 0x149   : > { %v1875_v35 = vadd.f32 %v1874_v19, %v1706_v4  ;;  %v1708_v23 = vpop.f32.mrf.mxu1  ;;  %v1540_v22 = vadd.f32 %v3624_v43, %v1539_v6  ;;  %v877_v5 = vor.u32 %v876_v29, %v872_v59  ;;  %v881_v4 = vrot.slane %v879_v40, 1 }
 0x14a   : > { %v2614_v19 = vunpack.c.l.bf16 %v2932_v61  ;;  %v2615_v6 = vunpack.c.h.bf16 %v2932_v61 }
 0x14b   : > { %v2134_v34 = vadd.f32 %v2611_v49, %v1875_v35  ;;  %1578 = vmatmul.bf16.gmra.mxu0 %v2868_v10  ;;  %1956 = vmatmul.bf16.gmra.mxu3 %v1236_v17  ;;  %v1709_v44 = vadd.f32 %v1708_v23, %v1540_v22  ;;  %v310_v49 = vld [vmem:[%s3157_s13 + $0xf8] sm:$0x1]  ;;  %v882_v26 = vsel %vm642_vm0, %v877_v5, %v881_v4  ;;  %v3660_v5 = vld [vmem:[%s3157_s13 + $0xfc] sm:$0xff]  }
 0x14c   : > { %1747 = vmatmul.bf16.gmra.mxu1 %v870_v33  ;;  %v598_v31 = vunpack.c.l.b16 %v310_v49  ;;  %v1625_v22 = vadd.f32 %v3624_v43, %v3461_v39  ;;  %v3059_v4 = vld [vmem:[%s3157_s13 + $0xfc] sm:$0xf0] }
 0x14d   : > { %v2748_v25 = vpack.c.bf16 %v2134_v34, %v2133_v28  ;;  %1916 = vmatmul.bf16.gmra.mxu2 %v1212_v21  ;;  %v1215_v28 = vsel %vm1155_vm1, %v1213_v2, %v1214_v56  ;;  %v2869_v34 = vld [vmem:[%s3157_s13 + $0xf0] sm:$0xff]   ;;  %v1627_v2 = vadd.f32 %v3624_v43, %v3475_v7  ;;  %v2933_v56 = vld [vmem:[%s3386_s28 + $0x58] sm:$0xff]  }
 0x14e   : > { %v1788_v10 = vpop.f32.mrf.mxu3  ;;  %v886_v63 = vshll.u32 %v2869_v34, 16  ;;  %v630_v24 = vpack.c.b16 %v598_v31, %v598_v31  ;;  %v884_v0 = vshrl.u32 %v2869_v34, 16  ;;  %v2619_v31 = vunpack.c.h.bf16 %v2933_v56 }
 0x14f   : > { %2962 = vst [vmem:[%s3407_s5 + $0x48] sm:$0xff] %v2748_v25   ;;  %v3631_v51 = vadd.f32 %v1788_v10, %v1620_v46  ;;  %v2917_v10 = vld [vmem:[%s3157_s13 + $0x150] sm:$0xf0] }
 0x150   : > { %v1877_v37 = vpop.f32.mrf.mxu2  ;;  %v1541_v20 = vpop.f32.mrf.mxu0 }
 0x151   : > { %v1710_v50 = vpop.f32.mrf.mxu1  ;;  %v1542_v30 = vadd.f32 %v3624_v43, %v1541_v20  ;;  %v1878_v12 = vadd.f32 %v1877_v37, %v1709_v44  ;;  %v2918_v37 = vld [vmem:[%s3157_s13 + $0x150] sm:$0xe]  ;;  %v888_v44 = vrot.slane %v886_v63, 1 }
 0x152   : > { %v2919_v61 = vor.u32 %v2918_v37, %v2917_v10 }
 0x153   : > { %v1711_v35 = vadd.f32 %v1710_v50, %v1542_v30  ;;  %v2135_v8 = vadd.f32 %v2614_v19, %v1878_v12  ;;  %v2905_v50 = vld [vmem:[%s3157_s13 + $0xf0] sm:$0xf0]  ;;  %v891_v30 = vshll.u32 %v630_v24, 16  ;;  %v889_v49 = vor.u32 %v888_v44, %v884_v0 }
 0x154   : > { %v1240_v19 = vrot.slane %v2919_v61, 1 }
 0x155   : > { %v893_v12 = vrot.slane %v891_v30, 1 }
 0x156   : > { %v1790_v57 = vpop.f32.mrf.mxu3 }
 0x157   : > { %v3641_v17 = vadd.f32 %v1790_v57, %v1622_v62 }
 0x158   : > { %v1879_v23 = vpop.f32.mrf.mxu2  ;;  %v1544_v21 = vpop.f32.mrf.mxu0 }
 0x159   : > { %v1880_v33 = vadd.f32 %v1879_v23, %v1711_v35  ;;  %v1713_v53 = vpop.f32.mrf.mxu1  ;;  %v1545_v20 = vadd.f32 %v3624_v43, %v1544_v21  ;;  %v1241_v35 = vrot.slane %v3457_v32, 1  ;;  %v894_v32 = vsel %vm642_vm0, %v889_v49, %v893_v12  ;;  %v2934_v49 = vld [vmem:[%s3386_s28 + $0x60] sm:$0xff]  }
 0x15a   : > { %v1632_v12 = vadd.f32 %v3624_v43, %v3496_v13 }
 0x15b   : > { %v2136_v25 = vadd.f32 %v2615_v6, %v1880_v33  ;;  %1583 = vmatmul.bf16.gmra.mxu0 %v3606_v58  ;;  %1961 = vmatmul.bf16.gmra.mxu3 %v1239_v3  ;;  %v2906_v58 = vld [vmem:[%s3157_s13 + $0xf0] sm:$0xe]  ;;  %v1714_v38 = vadd.f32 %v1713_v53, %v1545_v20  ;;  %v1217_v6 = vrot.slane %v630_v24, 1  ;;  %v2618_v33 = vunpack.c.l.bf16 %v2933_v56  ;;  %v311_v53 = vld [vmem:[%s3157_s13 + $0x104] sm:$0x1] }
 0x15c   : > { %1752 = vmatmul.bf16.gmra.mxu1 %v882_v26  ;;  %v2907_v62 = vor.u32 %v2906_v58, %v2905_v50  ;;  %v599_v24 = vunpack.c.l.b16 %v311_v53  ;;  %v3060_v20 = vld [vmem:[%s3157_s13 + $0xfc] sm:$0xe]  ;;  %v1630_v50 = vadd.f32 %v3624_v43, %v3487_v45  ;;  %v898_v58 = vshll.u32 %v3660_v5, 16 }
 0x15d   : > { %v2753_v46 = vpack.c.bf16 %v2136_v25, %v2135_v8  ;;  %1921 = vmatmul.bf16.gmra.mxu2 %v1215_v28  ;;  %v1242_v25 = vsel %vm1155_vm1, %v1240_v19, %v1241_v35  ;;  %v1244_v35 = vrot.slane %v3482_v55, 1  ;;  %v2623_v53 = vunpack.c.h.bf16 %v2934_v49 }
 0x15e   : > { %v1793_v52 = vpop.f32.mrf.mxu3  ;;  %v1216_v57 = vrot.slane %v2907_v62, 1  ;;  %v896_v62 = vshrl.u32 %v3660_v5, 16 }
 0x15f   : > { %2963 = vst [vmem:[%s3407_s5 + $0x50] sm:$0xff] %v2753_v46   ;;  %v3656_v59 = vadd.f32 %v1793_v52, %v1625_v22  ;;  %v3057_v22 = vld [vmem:[%s3157_s13 + $0x15c] sm:$0xe] }
 0x160   : > { %v1882_v29 = vpop.f32.mrf.mxu2  ;;  %v1546_v40 = vpop.f32.mrf.mxu0  ;;  %v1218_v63 = vsel %vm1155_vm1, %v1216_v57, %v1217_v6 }
 0x161   : > { %v1715_v39 = vpop.f32.mrf.mxu1  ;;  %v1547_v9 = vadd.f32 %v3624_v43, %v1546_v40  ;;  %v1883_v23 = vadd.f32 %v1882_v29, %v1714_v38  ;;  %v631_v29 = vpack.c.b16 %v599_v24, %v599_v24  ;;  %v900_v38 = vrot.slane %v898_v58, 1  ;;  %v2870_v24 = vld [vmem:[%s3157_s13 + $0x108] sm:$0xff]  }
 0x162   : > { %v2920_v58 = vld [vmem:[%s3157_s13 + $0x168] sm:$0xf0] }
 0x163   : > { %v1716_v21 = vadd.f32 %v1715_v39, %v1547_v9  ;;  %v2137_v10 = vadd.f32 %v2618_v33, %v1883_v23  ;;  %v903_v45 = vshll.u32 %v631_v29, 16  ;;  %v3061_v9 = vor.u32 %v3060_v20, %v3059_v4  ;;  %v312_v33 = vld [vmem:[%s3157_s13 + $0x110] sm:$0x1] }
 0x164   : > { %v901_v57 = vor.u32 %v900_v38, %v896_v62  ;;  %v1220_v23 = vrot.slane %v631_v29, 1  ;;  %v600_v55 = vunpack.c.l.b16 %v312_v33  ;;  %v910_v20 = vshll.u32 %v2870_v24, 16  ;;  %v2921_v29 = vld [vmem:[%s3157_s13 + $0x168] sm:$0xe] }
 0x165   : > { %v905_v6 = vrot.slane %v903_v45, 1  ;;  %v908_v62 = vshrl.u32 %v2870_v24, 16  ;;  %v1247_v33 = vrot.slane %v3504_v47, 1 }
 0x166   : > { %v1795_v3 = vpop.f32.mrf.mxu3  ;;  %v912_v38 = vrot.slane %v910_v20, 1 }
 0x167   : > { %v3668_v26 = vadd.f32 %v1795_v3, %v1627_v2  ;;  %v2622_v3 = vunpack.c.l.bf16 %v2934_v49 }
 0x168   : > { %v1884_v28 = vpop.f32.mrf.mxu2  ;;  %v1549_v8 = vpop.f32.mrf.mxu0 }
 0x169   : > { %v1885_v7 = vadd.f32 %v1884_v28, %v1716_v21  ;;  %v1718_v46 = vpop.f32.mrf.mxu1  ;;  %v1550_v40 = vadd.f32 %v3624_v43, %v1549_v8 }
 0x16b   : > { %v2138_v37 = vadd.f32 %v2619_v31, %v1885_v7  ;;  %1588 = vmatmul.bf16.gmra.mxu0 %v2869_v34  ;;  %1966 = vmatmul.bf16.gmra.mxu3 %v1242_v25  ;;  %v3058_v34 = vor.u32 %v3057_v22, %v3316_v36  ;;  %v1719_v2 = vadd.f32 %v1718_v46, %v1550_v40  ;;  %v1219_v36 = vrot.slane %v3061_v9, 1 }
 0x16c   : > { %1757 = vmatmul.bf16.gmra.mxu1 %v894_v32  ;;  %v906_v32 = vsel %vm642_vm0, %v901_v57, %v905_v6  ;;  %v2922_v9 = vor.u32 %v2921_v29, %v2920_v58  ;;  %v2935_v57 = vld [vmem:[%s3386_s28 + $0x68] sm:$0xff]   ;;  %v913_v6 = vor.u32 %v912_v38, %v908_v62  ;;  %v1640_v29 = vadd.f32 %v3624_v43, %v3534_v60 }
 0x16d   : > { %v2758_v52 = vpack.c.bf16 %v2138_v37, %v2137_v10  ;;  %1926 = vmatmul.bf16.gmra.mxu2 %v1218_v63  ;;  %v1243_v19 = vrot.slane %v3058_v34, 1  ;;  %v1221_v63 = vsel %vm1155_vm1, %v1219_v36, %v1220_v23 }
 0x16e   : > { %v1798_v0 = vpop.f32.mrf.mxu3  ;;  %v1246_v23 = vrot.slane %v2922_v9, 1 }
 0x16f   : > { %2964 = vst [vmem:[%s3407_s5 + $0x58] sm:$0xff] %v2758_v52   ;;  %v3680_v44 = vadd.f32 %v1798_v0, %v1630_v50  ;;  %v1245_v13 = vsel %vm1155_vm1, %v1243_v19, %v1244_v35  ;;  %v632_v52 = vpack.c.b16 %v600_v55, %v600_v55  ;;  %v1635_v50 = vadd.f32 %v3624_v43, %v3508_v48  ;;  %v3065_v19 = vld [vmem:[%s3157_s13 + $0x114] sm:$0xf0] }
 0x170   : > { %v1887_v30 = vpop.f32.mrf.mxu2  ;;  %v1551_v61 = vpop.f32.mrf.mxu0  ;;  %v1637_v35 = vadd.f32 %v3624_v43, %v3521_v42 }
 0x171   : > { %v1720_v39 = vpop.f32.mrf.mxu1  ;;  %v1552_v56 = vadd.f32 %v3624_v43, %v1551_v61  ;;  %v1888_v21 = vadd.f32 %v1887_v30, %v1719_v2  ;;  %v2908_v30 = vld [vmem:[%s3157_s13 + $0x108] sm:$0xf0]  ;;  %v915_v45 = vshll.u32 %v632_v52, 16 }
 0x173   : > { %v1721_v31 = vadd.f32 %v1720_v39, %v1552_v56  ;;  %v2139_v22 = vadd.f32 %v2622_v3, %v1888_v21  ;;  %v917_v36 = vrot.slane %v915_v45, 1  ;;  %v1223_v3 = vrot.slane %v632_v52, 1 }
 0x175   : > { %v918_v47 = vsel %vm642_vm0, %v913_v6, %v917_v36  ;;  %v1250_v6 = vrot.slane %v3529_v54, 1 }
 0x176   : > { %v1800_v4 = vpop.f32.mrf.mxu3 }
 0x177   : > { %v3690_v28 = vadd.f32 %v1800_v4, %v1632_v12  ;;  %v3709_v12 = vld [vmem:[%s3157_s13 + $0x114] sm:$0xff]   ;;  %v2626_v4 = vunpack.c.l.bf16 %v2935_v57 }
 0x178   : > { %v1889_v7 = vpop.f32.mrf.mxu2  ;;  %v1554_v25 = vpop.f32.mrf.mxu0  ;;  %v920_v45 = vshrl.u32 %v3709_v12, 16 }
 0x179   : > { %v1890_v8 = vadd.f32 %v1889_v7, %v1721_v31  ;;  %v1723_v46 = vpop.f32.mrf.mxu1  ;;  %v1555_v40 = vadd.f32 %v3624_v43, %v1554_v25  ;;  %v313_v25 = vld [vmem:[%s3157_s13 + $0x11c] sm:$0x1] }
 0x17b   : > { %v2140_v10 = vadd.f32 %v2623_v53, %v1890_v8  ;;  %1593 = vmatmul.bf16.gmra.mxu0 %v3660_v5  ;;  %1971 = vmatmul.bf16.gmra.mxu3 %v1245_v13  ;;  %v2909_v5 = vld [vmem:[%s3157_s13 + $0x108] sm:$0xe]  ;;  %v1724_v56 = vadd.f32 %v1723_v46, %v1555_v40  ;;  %v2627_v8 = vunpack.c.h.bf16 %v2935_v57  ;;  %v922_v40 = vshll.u32 %v3709_v12, 16 }
 0x17c   : > { %1762 = vmatmul.bf16.gmra.mxu1 %v906_v32  ;;  %v2910_v2 = vor.u32 %v2909_v5, %v2908_v30  ;;  %v1248_v32 = vsel %vm1155_vm1, %v1246_v23, %v1247_v33 }
 0x17d   : > { %v2763_v37 = vpack.c.bf16 %v2140_v10, %v2139_v22  ;;  %1931 = vmatmul.bf16.gmra.mxu2 %v1221_v63  ;;  %v601_v10 = vunpack.c.l.b16 %v313_v25  ;;  %v924_v9 = vrot.slane %v922_v40, 1  ;;  %v1647_v40 = vadd.f32 %v3624_v43, %v3564_v15 }
 0x17e   : > { %v1803_v0 = vpop.f32.mrf.mxu3  ;;  %v1222_v21 = vrot.slane %v2910_v2, 1 }
 0x17f   : > { %2965 = vst [vmem:[%s3407_s5 + $0x60] sm:$0xff] %v2763_v37   ;;  %v3705_v61 = vadd.f32 %v1803_v0, %v1635_v50  ;;  %v3063_v37 = vld [vmem:[%s3157_s13 + $0x174] sm:$0xe]  ;;  %v633_v0 = vpack.c.b16 %v601_v10, %v601_v10  ;;  %v925_v36 = vor.u32 %v924_v9, %v920_v45 }
 0x180   : > { %v1892_v34 = vpop.f32.mrf.mxu2  ;;  %v1556_v39 = vpop.f32.mrf.mxu0  ;;  %v1224_v22 = vsel %vm1155_vm1, %v1222_v21, %v1223_v3  ;;  %v3066_v50 = vld [vmem:[%s3157_s13 + $0x114] sm:$0xe] }
 0x181   : > { %v1725_v48 = vpop.f32.mrf.mxu1  ;;  %v1557_v49 = vadd.f32 %v3624_v43, %v1556_v39  ;;  %v1893_v31 = vadd.f32 %v1892_v34, %v1724_v56  ;;  %v3067_v60 = vor.u32 %v3066_v50, %v3065_v19 }
 0x183   : > { %v1726_v53 = vadd.f32 %v1725_v48, %v1557_v49  ;;  %v2141_v20 = vadd.f32 %v2626_v4, %v1893_v31  ;;  %v927_v48 = vshll.u32 %v633_v0, 16  ;;  %v2936_v49 = vld [vmem:[%s3386_s28 + $0x70] sm:$0xff]   ;;  %v1225_v33 = vrot.slane %v3067_v60, 1 }
 0x184   : > { %v2630_v3 = vunpack.c.l.bf16 %v2936_v49 }
 0x185   : > { %v929_v23 = vrot.slane %v927_v48, 1 }
 0x186   : > { %v1805_v7 = vpop.f32.mrf.mxu3 }
 0x187   : > { %v3717_v13 = vadd.f32 %v1805_v7, %v1637_v35  ;;  %v1642_v35 = vadd.f32 %v3624_v43, %v3542_v41  ;;  %v930_v54 = vsel %vm642_vm0, %v925_v36, %v929_v23  ;;  %v2946_v36 = vld [vmem:[%s3386_s28 + $0xc0] sm:$0xff]  }
 0x188   : > { %v1894_v55 = vpop.f32.mrf.mxu2  ;;  %v1559_v46 = vpop.f32.mrf.mxu0 }
 0x189   : > { %v1895_v42 = vadd.f32 %v1894_v55, %v1726_v53  ;;  %v1728_v63 = vpop.f32.mrf.mxu1  ;;  %v1560_v30 = vadd.f32 %v3624_v43, %v1559_v46  ;;  %v2631_v53 = vunpack.c.h.bf16 %v2936_v49 }
 0x18b   : > { %v2142_v52 = vadd.f32 %v2627_v8, %v1895_v42  ;;  %1598 = vmatmul.bf16.gmra.mxu0 %v2870_v24  ;;  %1976 = vmatmul.bf16.gmra.mxu3 %v1248_v32  ;;  %v3064_v24 = vor.u32 %v3063_v37, %v3339_v11  ;;  %v1729_v2 = vadd.f32 %v1728_v63, %v1560_v30  ;;  %v1226_v11 = vrot.slane %v633_v0, 1 }
 0x18c   : > { %1767 = vmatmul.bf16.gmra.mxu1 %v918_v47  ;;  %v1645_v47 = vadd.f32 %v3624_v43, %v3553_v1 }
 0x18d   : > { %v2768_v58 = vpack.c.bf16 %v2142_v52, %v2141_v20  ;;  %1936 = vmatmul.bf16.gmra.mxu2 %v1224_v22  ;;  %v1249_v57 = vrot.slane %v3064_v24, 1  ;;  %v1227_v42 = vsel %vm1155_vm1, %v1225_v33, %v1226_v11  ;;  %v2938_v33 = vld [vmem:[%s3386_s28 + $0x80] sm:$0xff]  }
 0x18e   : > { %v1808_v5 = vpop.f32.mrf.mxu3 }
 0x18f   : > { %2966 = vst [vmem:[%s3407_s5 + $0x68] sm:$0xff] %v2768_v58   ;;  %v3729_v34 = vadd.f32 %v1808_v5, %v1640_v29  ;;  %v1251_v41 = vsel %vm1155_vm1, %v1249_v57, %v1250_v6 }
 0x190   : > { %v1897_v39 = vpop.f32.mrf.mxu2  ;;  %v1561_v62 = vpop.f32.mrf.mxu0 }
 0x191   : > { %v1730_v38 = vpop.f32.mrf.mxu1  ;;  %v1562_v56 = vadd.f32 %v3624_v43, %v1561_v62  ;;  %v1898_v21 = vadd.f32 %v1897_v39, %v1729_v2 }
 0x193   : > { %v1731_v31 = vadd.f32 %v1730_v38, %v1562_v56  ;;  %v2143_v46 = vadd.f32 %v2630_v3, %v1898_v21  ;;  %v2670_v21 = vunpack.c.l.bf16 %v2946_v36  ;;  %v2671_v3 = vunpack.c.h.bf16 %v2946_v36 }
 0x196   : > { %v1810_v4 = vpop.f32.mrf.mxu3 }
 0x197   : > { %v3738_v19 = vadd.f32 %v1810_v4, %v1642_v35  ;;  %v2638_v4 = vunpack.c.l.bf16 %v2938_v33 }
 0x198   : > { %v1899_v7 = vpop.f32.mrf.mxu2  ;;  %v1564_v25 = vpop.f32.mrf.mxu0 }
 0x199   : > { %v1900_v8 = vadd.f32 %v1899_v7, %v1731_v31  ;;  %v1733_v55 = vpop.f32.mrf.mxu1  ;;  %v1565_v22 = vadd.f32 %v3624_v43, %v1564_v25  ;;  %v2639_v7 = vunpack.c.h.bf16 %v2938_v33 }
 0x19b   : > { %v2144_v32 = vadd.f32 %v2631_v53, %v1900_v8  ;;  %1603 = vmatmul.bf16.gmra.mxu0 %v3709_v12  ;;  %1981 = vmatmul.bf16.gmra.mxu3 %v1251_v41  ;;  %v1734_v58 = vadd.f32 %v1733_v55, %v1565_v22  ;;  %v2937_v12 = vld [vmem:[%s3386_s28 + $0x78] sm:$0xff]  }
 0x19c   : > { %1772 = vmatmul.bf16.gmra.mxu1 %v930_v54  ;;  %v2634_v30 = vunpack.c.l.bf16 %v2937_v12  ;;  %v2635_v39 = vunpack.c.h.bf16 %v2937_v12 }
 0x19d   : > { %v2773_v63 = vpack.c.bf16 %v2144_v32, %v2143_v46  ;;  %1941 = vmatmul.bf16.gmra.mxu2 %v1227_v42 }
 0x19e   : > { %v1813_v10 = vpop.f32.mrf.mxu3 }
 0x19f   : > { %2967 = vst [vmem:[%s3407_s5 + $0x70] sm:$0xff] %v2773_v63   ;;  %v3748_v37 = vadd.f32 %v1813_v10, %v1645_v47 }
 0x1a0   : > { %v1902_v20 = vpop.f32.mrf.mxu2  ;;  %v1566_v52 = vpop.f32.mrf.mxu0 }
 0x1a1   : > { %v1735_v50 = vpop.f32.mrf.mxu1  ;;  %v1567_v29 = vadd.f32 %v3624_v43, %v1566_v52  ;;  %v1903_v0 = vadd.f32 %v1902_v20, %v1734_v58 }
 0x1a3   : > { %v1736_v1 = vadd.f32 %v1735_v50, %v1567_v29  ;;  %v2145_v48 = vadd.f32 %v2634_v30, %v1903_v0  ;;  %v2947_v29 = vld [vmem:[%s3386_s28 + $0xc8] sm:$0xff]  }
 0x1a4   : > { %v2674_v30 = vunpack.c.l.bf16 %v2947_v29 }
 0x1a6   : > { %v1815_v5 = vpop.f32.mrf.mxu3 }
 0x1a7   : > { %v3754_v62 = vadd.f32 %v1815_v5, %v1647_v40  ;;  %v2939_v40 = vld [vmem:[%s3386_s28 + $0x88] sm:$0xff]  }
 0x1a8   : > { %v1904_v24 = vpop.f32.mrf.mxu2  ;;  %v1569_v45 = vpop.f32.mrf.mxu0 }
 0x1a9   : > { %v1905_v38 = vadd.f32 %v1904_v24, %v1736_v1  ;;  %v1738_v9 = vpop.f32.mrf.mxu1  ;;  %v1570_v56 = vadd.f32 %v3624_v43, %v1569_v45  ;;  %v2675_v1 = vunpack.c.h.bf16 %v2947_v29 }
 0x1ab   : > { %v2146_v60 = vadd.f32 %v2635_v39, %v1905_v38  ;;  %v1739_v6 = vadd.f32 %v1738_v9, %v1570_v56  ;;  %v2642_v39 = vunpack.c.l.bf16 %v2939_v40  ;;  %v2643_v38 = vunpack.c.h.bf16 %v2939_v40 }
 0x1ad   : > { %v2778_v2 = vpack.c.bf16 %v2146_v60, %v2145_v48 }
 0x1ae   : > { %v1947_v15 = vpop.f32.mrf.mxu3 }
 0x1af   : > { %2968 = vst [vmem:[%s3407_s5 + $0x78] sm:$0xff] %v2778_v2   ;;  %v1948_v11 = vadd.f32 %v1947_v15, %v3577_v18 }
 0x1b0   : > { %v1907_v49 = vpop.f32.mrf.mxu2  ;;  %v1571_v35 = vpop.f32.mrf.mxu0 }
 0x1b1   : > { %v1740_v57 = vpop.f32.mrf.mxu1  ;;  %v1572_v23 = vadd.f32 %v3624_v43, %v1571_v35  ;;  %v1908_v31 = vadd.f32 %v1907_v49, %v1739_v6  ;;  %v2163_v42 = vadd.f32 %v2670_v21, %v1948_v11 }
 0x1b3   : > { %v1741_v53 = vadd.f32 %v1740_v57, %v1572_v23  ;;  %v2147_v18 = vadd.f32 %v2638_v4, %v1908_v31  ;;  %v2940_v4 = vld [vmem:[%s3386_s28 + $0x90] sm:$0xff]  }
 0x1b6   : > { %v1949_v8 = vpop.f32.mrf.mxu3 }
 0x1b7   : > { %v1950_v41 = vadd.f32 %v1949_v8, %v3587_v27 }
 0x1b8   : > { %v1909_v25 = vpop.f32.mrf.mxu2  ;;  %v1574_v54 = vpop.f32.mrf.mxu0 }
 0x1b9   : > { %v1910_v55 = vadd.f32 %v1909_v25, %v1741_v53  ;;  %v2164_v46 = vadd.f32 %v2671_v3, %v1950_v41  ;;  %v1743_v32 = vpop.f32.mrf.mxu1  ;;  %v1575_v10 = vadd.f32 %v3624_v43, %v1574_v54  ;;  %v2948_v3 = vld [vmem:[%s3386_s28 + $0xd0] sm:$0xff]   ;;  %v2646_v41 = vunpack.c.l.bf16 %v2940_v4 }
 0x1ba   : > { %v2679_v8 = vunpack.c.h.bf16 %v2948_v3  ;;  %v2647_v54 = vunpack.c.h.bf16 %v2940_v4 }
 0x1bb   : > { %v2148_v63 = vadd.f32 %v2639_v7, %v1910_v55  ;;  %v2823_v47 = vpack.c.bf16 %v2164_v46, %v2163_v42  ;;  %v1744_v27 = vadd.f32 %v1743_v32, %v1575_v10  ;;  %v2678_v7 = vunpack.c.l.bf16 %v2948_v3 }
 0x1bd   : > { %v2783_v22 = vpack.c.bf16 %v2148_v63, %v2147_v18  ;;  %2977 = vst [vmem:[%s3407_s5 + $0xc0] sm:$0xff] %v2823_v47  }
 0x1be   : > { %v1952_v20 = vpop.f32.mrf.mxu3 }
 0x1bf   : > { %2969 = vst [vmem:[%s3407_s5 + $0x80] sm:$0xff] %v2783_v22   ;;  %v1953_v0 = vadd.f32 %v1952_v20, %v3602_v14 }
 0x1c0   : > { %v1912_v52 = vpop.f32.mrf.mxu2  ;;  %v1576_v50 = vpop.f32.mrf.mxu0 }
 0x1c1   : > { %v1745_v58 = vpop.f32.mrf.mxu1  ;;  %v1577_v12 = vadd.f32 %v3624_v43, %v1576_v50  ;;  %v1913_v5 = vadd.f32 %v1912_v52, %v1744_v27  ;;  %v2165_v56 = vadd.f32 %v2674_v30, %v1953_v0  ;;  %v2949_v0 = vld [vmem:[%s3386_s28 + $0xd8] sm:$0xff]  }
 0x1c3   : > { %v1746_v24 = vadd.f32 %v1745_v58, %v1577_v12  ;;  %v2149_v14 = vadd.f32 %v2642_v39, %v1913_v5  ;;  %v2682_v39 = vunpack.c.l.bf16 %v2949_v0 }
 0x1c6   : > { %v1954_v45 = vpop.f32.mrf.mxu3 }
 0x1c7   : > { %v1955_v48 = vadd.f32 %v1954_v45, %v3614_v16 }
 0x1c8   : > { %v1914_v9 = vpop.f32.mrf.mxu2  ;;  %v1579_v2 = vpop.f32.mrf.mxu0 }
 0x1c9   : > { %v1915_v60 = vadd.f32 %v1914_v9, %v1746_v24  ;;  %v2166_v15 = vadd.f32 %v2675_v1, %v1955_v48  ;;  %v1748_v49 = vpop.f32.mrf.mxu1  ;;  %v1580_v36 = vadd.f32 %v3624_v43, %v1579_v2  ;;  %v2941_v1 = vld [vmem:[%s3386_s28 + $0x98] sm:$0xff]   ;;  %v2683_v24 = vunpack.c.h.bf16 %v2949_v0 }
 0x1ca   : > { %v2650_v45 = vunpack.c.l.bf16 %v2941_v1  ;;  %v2651_v48 = vunpack.c.h.bf16 %v2941_v1 }
 0x1cb   : > { %v2150_v35 = vadd.f32 %v2643_v38, %v1915_v60  ;;  %v2828_v57 = vpack.c.bf16 %v2166_v15, %v2165_v56  ;;  %v1749_v16 = vadd.f32 %v1748_v49, %v1580_v36 }
 0x1cd   : > { %v2788_v6 = vpack.c.bf16 %v2150_v35, %v2149_v14  ;;  %2978 = vst [vmem:[%s3407_s5 + $0xc8] sm:$0xff] %v2828_v57  }
 0x1ce   : > { %v1957_v23 = vpop.f32.mrf.mxu3 }
 0x1cf   : > { %2970 = vst [vmem:[%s3407_s5 + $0x88] sm:$0xff] %v2788_v6   ;;  %v1958_v53 = vadd.f32 %v1957_v23, %v3631_v51 }
 0x1d0   : > { %v1917_v33 = vpop.f32.mrf.mxu2  ;;  %v1581_v11 = vpop.f32.mrf.mxu0 }
 0x1d1   : > { %v1750_v21 = vpop.f32.mrf.mxu1  ;;  %v1582_v31 = vadd.f32 %v3624_v43, %v1581_v11  ;;  %v1918_v25 = vadd.f32 %v1917_v33, %v1749_v16  ;;  %v2167_v47 = vadd.f32 %v2678_v7, %v1958_v53  ;;  %v2942_v53 = vld [vmem:[%s3386_s28 + $0xa0] sm:$0xff]  }
 0x1d3   : > { %v1751_v55 = vadd.f32 %v1750_v21, %v1582_v31  ;;  %v2151_v51 = vadd.f32 %v2646_v41, %v1918_v25  ;;  %v2950_v31 = vld [vmem:[%s3386_s28 + $0xe0] sm:$0xff]  }
 0x1d4   : > { %v2687_v25 = vunpack.c.h.bf16 %v2950_v31 }
 0x1d6   : > { %v1959_v42 = vpop.f32.mrf.mxu3 }
 0x1d7   : > { %v1960_v32 = vadd.f32 %v1959_v42, %v3641_v17  ;;  %v2655_v42 = vunpack.c.h.bf16 %v2942_v53 }
 0x1d8   : > { %v1919_v46 = vpop.f32.mrf.mxu2  ;;  %v1584_v63 = vpop.f32.mrf.mxu0 }
 0x1d9   : > { %v1920_v18 = vadd.f32 %v1919_v46, %v1751_v55  ;;  %v2168_v22 = vadd.f32 %v2679_v8, %v1960_v32  ;;  %v1753_v10 = vpop.f32.mrf.mxu1  ;;  %v1585_v58 = vadd.f32 %v3624_v43, %v1584_v63  ;;  %v2686_v8 = vunpack.c.l.bf16 %v2950_v31 }
 0x1da   : > { %v2654_v55 = vunpack.c.l.bf16 %v2942_v53 }
 0x1db   : > { %v2152_v20 = vadd.f32 %v2647_v54, %v1920_v18  ;;  %v2833_v52 = vpack.c.bf16 %v2168_v22, %v2167_v47  ;;  %v1754_v17 = vadd.f32 %v1753_v10, %v1585_v58 }
 0x1dd   : > { %v2793_v50 = vpack.c.bf16 %v2152_v20, %v2151_v51  ;;  %2979 = vst [vmem:[%s3407_s5 + $0xd0] sm:$0xff] %v2833_v52  }
 0x1de   : > { %v1962_v27 = vpop.f32.mrf.mxu3 }
 0x1df   : > { %2971 = vst [vmem:[%s3407_s5 + $0x90] sm:$0xff] %v2793_v50   ;;  %v1963_v5 = vadd.f32 %v1962_v27, %v3656_v59 }
 0x1e0   : > { %v1922_v29 = vpop.f32.mrf.mxu2  ;;  %v1586_v12 = vpop.f32.mrf.mxu0 }
 0x1e1   : > { %v1755_v40 = vpop.f32.mrf.mxu1  ;;  %v1587_v30 = vadd.f32 %v3624_v43, %v1586_v12  ;;  %v1923_v38 = vadd.f32 %v1922_v29, %v1754_v17  ;;  %v2169_v14 = vadd.f32 %v2682_v39, %v1963_v5  ;;  %v2951_v17 = vld [vmem:[%s3386_s28 + $0xe8] sm:$0xff]  }
 0x1e2   : > { %v2690_v5 = vunpack.c.l.bf16 %v2951_v17  ;;  %v2691_v39 = vunpack.c.h.bf16 %v2951_v17 }
 0x1e3   : > { %v1756_v9 = vadd.f32 %v1755_v40, %v1587_v30  ;;  %v2153_v59 = vadd.f32 %v2650_v45, %v1923_v38  ;;  %v2943_v30 = vld [vmem:[%s3386_s28 + $0xa8] sm:$0xff]  }
 0x1e4   : > { %v2658_v38 = vunpack.c.l.bf16 %v2943_v30 }
 0x1e6   : > { %v1964_v60 = vpop.f32.mrf.mxu3 }
 0x1e7   : > { %v1965_v56 = vadd.f32 %v1964_v60, %v3668_v26 }
 0x1e8   : > { %v1924_v2 = vpop.f32.mrf.mxu2  ;;  %v1589_v49 = vpop.f32.mrf.mxu0 }
 0x1e9   : > { %v1925_v15 = vadd.f32 %v1924_v2, %v1756_v9  ;;  %v2170_v35 = vadd.f32 %v2683_v24, %v1965_v56  ;;  %v1758_v57 = vpop.f32.mrf.mxu1  ;;  %v1590_v33 = vadd.f32 %v3624_v43, %v1589_v49  ;;  %v2659_v9 = vunpack.c.h.bf16 %v2943_v30 }
 0x1eb   : > { %v2154_v6 = vadd.f32 %v2651_v48, %v1925_v15  ;;  %v2838_v36 = vpack.c.bf16 %v2170_v35, %v2169_v14  ;;  %v1759_v26 = vadd.f32 %v1758_v57, %v1590_v33 }
 0x1ed   : > { %v2798_v23 = vpack.c.bf16 %v2154_v6, %v2153_v59  ;;  %2980 = vst [vmem:[%s3407_s5 + $0xd8] sm:$0xff] %v2838_v36  }
 0x1ee   : > { %v1967_v11 = vpop.f32.mrf.mxu3 }
 0x1ef   : > { %2972 = vst [vmem:[%s3407_s5 + $0x98] sm:$0xff] %v2798_v23   ;;  %v1968_v7 = vadd.f32 %v1967_v11, %v3680_v44 }
 0x1f0   : > { %v1927_v21 = vpop.f32.mrf.mxu2  ;;  %v1591_v16 = vpop.f32.mrf.mxu0 }
 0x1f1   : > { %v1760_v3 = vpop.f32.mrf.mxu1  ;;  %v1592_v4 = vadd.f32 %v3624_v43, %v1591_v16  ;;  %v1928_v41 = vadd.f32 %v1927_v21, %v1759_v26  ;;  %v2171_v22 = vadd.f32 %v2686_v8, %v1968_v7  ;;  %v2952_v16 = vld [vmem:[%s3386_s28 + $0xf0] sm:$0xff]  }
 0x1f2   : > { %v2944_v26 = vld [vmem:[%s3386_s28 + $0xb0] sm:$0xff]   ;;  %v2695_v53 = vunpack.c.h.bf16 %v2952_v16 }
 0x1f3   : > { %v1761_v54 = vadd.f32 %v1760_v3, %v1592_v4  ;;  %v2155_v44 = vadd.f32 %v2654_v55, %v1928_v41  ;;  %v2694_v4 = vunpack.c.l.bf16 %v2952_v16  ;;  %v2662_v8 = vunpack.c.l.bf16 %v2944_v26 }
 0x1f4   : > { %v2663_v41 = vunpack.c.h.bf16 %v2944_v26 }
 0x1f6   : > { %v1969_v46 = vpop.f32.mrf.mxu3 }
 0x1f7   : > { %v1970_v18 = vadd.f32 %v1969_v46, %v3690_v28 }
 0x1f8   : > { %v1929_v32 = vpop.f32.mrf.mxu2  ;;  %v1594_v47 = vpop.f32.mrf.mxu0 }
 0x1f9   : > { %v1930_v63 = vadd.f32 %v1929_v32, %v1761_v54  ;;  %v2172_v10 = vadd.f32 %v2687_v25, %v1970_v18  ;;  %v1763_v51 = vpop.f32.mrf.mxu1  ;;  %v1595_v58 = vadd.f32 %v3624_v43, %v1594_v47 }
 0x1fb   : > { %v2156_v20 = vadd.f32 %v2655_v42, %v1930_v63  ;;  %v2843_v52 = vpack.c.bf16 %v2172_v10, %v2171_v22  ;;  %v1764_v28 = vadd.f32 %v1763_v51, %v1595_v58 }
 0x1fd   : > { %v2803_v50 = vpack.c.bf16 %v2156_v20, %v2155_v44  ;;  %2981 = vst [vmem:[%s3407_s5 + $0xe0] sm:$0xff] %v2843_v52  }
 0x1fe   : > { %v1972_v27 = vpop.f32.mrf.mxu3 }
 0x1ff   : > { %2973 = vst [vmem:[%s3407_s5 + $0xa0] sm:$0xff] %v2803_v50   ;;  %v1973_v1 = vadd.f32 %v1972_v27, %v3705_v61 }
 0x200   : > { %v1932_v29 = vpop.f32.mrf.mxu2  ;;  %v1596_v12 = vpop.f32.mrf.mxu0 }
 0x201   : > { %v1765_v40 = vpop.f32.mrf.mxu1  ;;  %v1597_v0 = vadd.f32 %v3624_v43, %v1596_v12  ;;  %v1933_v24 = vadd.f32 %v1932_v29, %v1764_v28  ;;  %v2173_v49 = vadd.f32 %v2690_v5, %v1973_v1  ;;  %v2945_v29 = vld [vmem:[%s3386_s28 + $0xb8] sm:$0xff]  }
 0x202   : > { %v2666_v30 = vunpack.c.l.bf16 %v2945_v29  ;;  %v2667_v5 = vunpack.c.h.bf16 %v2945_v29 }
 0x203   : > { %v1766_v45 = vadd.f32 %v1765_v40, %v1597_v0  ;;  %v2157_v61 = vadd.f32 %v2658_v38, %v1933_v24 }
 0x206   : > { %v1974_v48 = vpop.f32.mrf.mxu3 }
 0x207   : > { %v1975_v2 = vadd.f32 %v1974_v48, %v3717_v13 }
 0x208   : > { %v1934_v60 = vpop.f32.mrf.mxu2  ;;  %v1599_v15 = vpop.f32.mrf.mxu0 }
 0x209   : > { %v1935_v56 = vadd.f32 %v1934_v60, %v1766_v45  ;;  %v2174_v14 = vadd.f32 %v2691_v39, %v1975_v2  ;;  %v1768_v35 = vpop.f32.mrf.mxu1  ;;  %v1600_v36 = vadd.f32 %v3624_v43, %v1599_v15 }
 0x20b   : > { %v2158_v57 = vadd.f32 %v2659_v9, %v1935_v56  ;;  %v2848_v59 = vpack.c.bf16 %v2174_v14, %v2173_v49  ;;  %v1769_v13 = vadd.f32 %v1768_v35, %v1600_v36 }
 0x20d   : > { %v2808_v6 = vpack.c.bf16 %v2158_v57, %v2157_v61  ;;  %2982 = vst [vmem:[%s3407_s5 + $0xe8] sm:$0xff] %v2848_v59  }
 0x20e   : > { %v1977_v23 = vpop.f32.mrf.mxu3 }
 0x20f   : > { %2974 = vst [vmem:[%s3407_s5 + $0xa8] sm:$0xff] %v2808_v6   ;;  %v1978_v31 = vadd.f32 %v1977_v23, %v3729_v34 }
 0x210   : > { %v1937_v33 = vpop.f32.mrf.mxu2  ;;  %v1601_v11 = vpop.f32.mrf.mxu0 }
 0x211   : > { %v1770_v21 = vpop.f32.mrf.mxu1  ;;  %v1602_v3 = vadd.f32 %v3624_v43, %v1601_v11  ;;  %v1938_v7 = vadd.f32 %v1937_v33, %v1769_v13  ;;  %v2175_v18 = vadd.f32 %v2694_v4, %v1978_v31 }
 0x213   : > { %v1771_v25 = vadd.f32 %v1770_v21, %v1602_v3  ;;  %v2159_v47 = vadd.f32 %v2662_v8, %v1938_v7 }
 0x216   : > { %v1979_v55 = vpop.f32.mrf.mxu3 }
 0x217   : > { %v1980_v42 = vadd.f32 %v1979_v55, %v3738_v19  ;;  %v2953_v19 = vld [vmem:[%s3386_s28 + $0xf8] sm:$0xff]  }
 0x218   : > { %v1939_v54 = vpop.f32.mrf.mxu2  ;;  %v1604_v32 = vpop.f32.mrf.mxu0  ;;  %v2698_v40 = vunpack.c.l.bf16 %v2953_v19  ;;  %v2699_v17 = vunpack.c.h.bf16 %v2953_v19 }
 0x219   : > { %v1940_v46 = vadd.f32 %v1939_v54, %v1771_v25  ;;  %v2176_v63 = vadd.f32 %v2695_v53, %v1980_v42  ;;  %v1773_v10 = vpop.f32.mrf.mxu1  ;;  %v1605_v44 = vadd.f32 %v3624_v43, %v1604_v32 }
 0x21b   : > { %v2160_v34 = vadd.f32 %v2663_v41, %v1940_v46  ;;  %v2853_v22 = vpack.c.bf16 %v2176_v63, %v2175_v18  ;;  %v1774_v58 = vadd.f32 %v1773_v10, %v1605_v44 }
 0x21d   : > { %v2813_v51 = vpack.c.bf16 %v2160_v34, %v2159_v47  ;;  %2983 = vst [vmem:[%s3407_s5 + $0xf0] sm:$0xff] %v2853_v22  }
 0x21e   : > { %v1982_v20 = vpop.f32.mrf.mxu3 }
 0x21f   : > { %2975 = vst [vmem:[%s3407_s5 + $0xb0] sm:$0xff] %v2813_v51   ;;  %v1983_v12 = vadd.f32 %v1982_v20, %v3748_v37 }
 0x220   : > { %v1942_v52 = vpop.f32.mrf.mxu2  ;;  %v1606_v50 = vpop.f32.mrf.mxu0 }
 0x221   : > { %v1607_v27 = vadd.f32 %v3624_v43, %v1606_v50  ;;  %v1775_v28 = vpop.f32.mrf.mxu1  ;;  %v1943_v0 = vadd.f32 %v1942_v52, %v1774_v58  ;;  %v2177_v9 = vadd.f32 %v2698_v40, %v1983_v12 }
 0x223   : > { %v1776_v1 = vadd.f32 %v1775_v28, %v1607_v27  ;;  %v2161_v43 = vadd.f32 %v2666_v30, %v1943_v0 }
 0x226   : > { %v1984_v39 = vpop.f32.mrf.mxu3 }
 0x227   : > { %v1985_v38 = vadd.f32 %v1984_v39, %v3754_v62 }
 0x228   : > { %v1944_v24 = vpop.f32.mrf.mxu2 }
 0x229   : > { %v1945_v45 = vadd.f32 %v1944_v24, %v1776_v1  ;;  %v2178_v48 = vadd.f32 %v2699_v17, %v1985_v38 }
 0x22b   : > { %v2162_v60 = vadd.f32 %v2667_v5, %v1945_v45  ;;  %v2858_v2 = vpack.c.bf16 %v2178_v48, %v2177_v9 }
 0x22d   : > { %v2818_v37 = vpack.c.bf16 %v2162_v60, %v2161_v43  ;;  %2984 = vst [vmem:[%s3407_s5 + $0xf8] sm:$0xff] %v2858_v2  }
 0x22f   : > { %2976 = vst [vmem:[%s3407_s5 + $0xb8] sm:$0xff] %v2818_v37  }
 0x230 PF: > { %s14_s15 = sadd.s32 1, %s3074_s15  }
 0x231   : > { %p11_p5 = scmp.ge.s32.totalorder %s14_s15, 6  }
 0x233   :  { %13 = sbr.rel (!%p11_p5) target bundleno = 1 (0x1), region = 69 }

</bundles_post_ra>
